<compile_context>
chip_gen: v7x
topology: tpu7x:2x2x1
jax: 0.10.0
libtpu: 0.0.40
codegen_flags: <defaults>
</compile_context>

<pallas_src>
from functools import partial

import jax
import jax.numpy as jnp
from jax.experimental import pallas as pl
from jax.experimental.pallas import tpu as pltpu


# ----------------------------------------------------------------------------- helpers

def _round_up(x, m):
    return ((x + m - 1) // m) * m


def _largest_divisor_tile(dim, quantum, target):
    """Largest multiple of `quantum` <= target that divides `dim` (dim % quantum == 0)."""
    t = min((target // quantum) * quantum, dim)
    while t > quantum:
        if dim % t == 0:
            return t
        t -= quantum
    return quantum


# ----------------------------------------------------------------------------- matmul kernels

def _mm_single_kernel(a_ref, w_ref, b_ref, *rest, relu, has_residual):
    # Whole problem in VMEM: a (Mp,Kp) bf16, w (Kp,Np) bf16, b (1,Np) f32,
    # [r (Mp,Np) bf16], o (Mp,Np) bf16.  No grid, no scratch.
    if has_residual:
        r_ref, o_ref = rest
    else:
        (o_ref,) = rest
        r_ref = None
    out = jnp.dot(a_ref[...], w_ref[...], preferred_element_type=jnp.float32)
    out = out + b_ref[...]
    if has_residual:
        out = out + r_ref[...].astype(jnp.float32)
    if relu:
        out = jnp.maximum(out, 0.0)
    o_ref[...] = out.astype(o_ref.dtype)


def _mm_tiled_kernel(a_ref, w_ref, b_ref, *rest, relu, has_residual):
    # a (tm,tk) bf16, w (tk,tn) bf16, b (1,tn) f32, [r (tm,tn) bf16],
    # o (tm,tn) bf16, acc (tm,tn) f32 scratch.
    if has_residual:
        r_ref, o_ref, acc_ref = rest
    else:
        r_ref = None
        o_ref, acc_ref = rest

    k = pl.program_id(2)

    @pl.when(k == 0)
    def _():
        acc_ref[...] = jnp.zeros_like(acc_ref)

    acc_ref[...] += jnp.dot(a_ref[...], w_ref[...],
                            preferred_element_type=jnp.float32)

    @pl.when(k == pl.num_programs(2) - 1)
    def _():
        out = acc_ref[...] + b_ref[...]
        if has_residual:
            out = out + r_ref[...].astype(jnp.float32)
        if relu:
            out = jnp.maximum(out, 0.0)
        o_ref[...] = out.astype(o_ref.dtype)


def fused_matmul(a, w_p, b_p, n_out, residual=None, relu=False,
                 out_dtype=jnp.bfloat16,
                 tm_target=256, tn_target=512, tk_target=1024,
                 single_step_vmem_budget=10 * 1024 * 1024):
    """out = act(a @ w_p + b_p [+ residual]) in `out_dtype` (default bf16).

    a:        (M, K) activation patches (cast to bf16; fuses with the producer).
    w_p:      (Kp, Np) bf16 weight, BN-folded and 128-padded at prep time.
    b_p:      (1, Np) f32 bias, padded at prep time.
    residual: (M, n_out) or None; added in f32 before ReLU.
    Returns (M, n_out) with padding sliced off.
    """
    M, K = a.shape
    Kp, Np = w_p.shape
    has_residual = residual is not None

    a = a.astype(jnp.bfloat16)
    res = residual.astype(jnp.bfloat16) if has_residual else None

    # ---- single-invocation fast path (tiny-M deep layers, whole GEMM in VMEM) ----
    Mp = _round_up(M, 16)                      # bf16 packs (16,128) per vreg
    est = (Mp * Kp + Kp * Np) * 2 + Np * 4 + Mp * Np * 6
    if has_residual:
        est += Mp * Np * 2
    if est <= single_step_vmem_budget:
        a_p = jnp.pad(a, ((0, Mp - M), (0, Kp - K)))
        inputs = [a_p, w_p, b_p]
        if has_residual:
            inputs.append(jnp.pad(res, ((0, Mp - M), (0, Np - n_out))))
        vmem = pl.BlockSpec(memory_space=pltpu.MemorySpace.VMEM)
        out = pl.pallas_call(
            partial(_mm_single_kernel, relu=relu, has_residual=has_residual),
            out_shape=jax.ShapeDtypeStruct((Mp, Np), out_dtype),
            in_specs=[vmem] * len(inputs),
            out_specs=vmem,
        )(*inputs)
        return out[:M, :n_out]

    # ---- general (M, N, K)-gridded path ----
    if Mp <= tm_target:
        tm = Mp
    else:
        Mp = _round_up(M, tm_target)
        tm = tm_target
    tk = _largest_divisor_tile(Kp, 128, tk_target)
    tn = _largest_divisor_tile(Np, 128, tn_target)

    a_p = jnp.pad(a, ((0, Mp - M), (0, Kp - K)))
    inputs = [a_p, w_p, b_p]
    in_specs = [
        pl.BlockSpec((tm, tk), lambda i, j, k: (i, k)),
        pl.BlockSpec((tk, tn), lambda i, j, k: (k, j)),
        pl.BlockSpec((1, tn), lambda i, j, k: (0, j)),
    ]
    if has_residual:
        inputs.append(jnp.pad(res, ((0, Mp - M), (0, Np - n_out))))
        in_specs.append(pl.BlockSpec((tm, tn), lambda i, j, k: (i, j)))

    out = pl.pallas_call(
        partial(_mm_tiled_kernel, relu=relu, has_residual=has_residual),
        out_shape=jax.ShapeDtypeStruct((Mp, Np), out_dtype),
        grid_spec=pltpu.PrefetchScalarGridSpec(
            num_scalar_prefetch=0,
            grid=(Mp // tm, Np // tn, Kp // tk),
            in_specs=in_specs,
            out_specs=pl.BlockSpec((tm, tn), lambda i, j, k: (i, j)),
            scratch_shapes=[pltpu.VMEM((tm, tn), jnp.float32)],
        ),
        compiler_params=pltpu.CompilerParams(
            dimension_semantics=("parallel", "parallel", "arbitrary"),
            vmem_limit_bytes=32 * 1024 * 1024),
    )(*inputs)
    return out[:M, :n_out]


# ----------------------------------------------------------------------------- fused avgpool + FC kernel

def _pool_fc_kernel(x_ref, w_ref, b_ref, o_ref, *, inv_hw):
    # x (tb, HW, C) bf16, w (C, Ncp) bf16, b (1, Ncp) f32 -> o (tb, Ncp) f32.
    pooled = jnp.sum(x_ref[...].astype(jnp.float32), axis=1) * inv_hw
    o_ref[...] = (jnp.dot(pooled.astype(jnp.bfloat16), w_ref[...],
                          preferred_element_type=jnp.float32) + b_ref[...])


def pool_fc(x, fc_w_p, fc_b_p, n_classes):
    # x: (N, HW, C) bf16; fc_w_p: (C, Ncp) bf16 (prep-time padded); fc_b_p: (1, Ncp) f32.
    N, HW, C = x.shape
    Ncp = fc_w_p.shape[1]
    Nb = _round_up(N, 8)
    tb = min(Nb, 128)
    while Nb % tb:
        tb -= 8
    x_p = jnp.pad(x.astype(jnp.bfloat16), ((0, Nb - N), (0, 0), (0, 0)))
    out = pl.pallas_call(
        partial(_pool_fc_kernel, inv_hw=1.0 / float(HW)),
        out_shape=jax.ShapeDtypeStruct((Nb, Ncp), jnp.float32),
        grid=(Nb // tb,),
        in_specs=[pl.BlockSpec((tb, HW, C), lambda i: (i, 0, 0)),
                  pl.BlockSpec((C, Ncp), lambda i: (0, 0)),
                  pl.BlockSpec((1, Ncp), lambda i: (0, 0))],
        out_specs=pl.BlockSpec((tb, Ncp), lambda i: (i, 0)),
    )(x_p, fc_w_p, fc_b_p)
    return out[:N, :n_classes]


# ----------------------------------------------------------------------------- glue (im2col, maxpool)

def im2col(x, kh, kw, stride, padding):
    # x: NHWC bf16 -> (N*Ho*Wo, kh*kw*C) bf16 patches, plus output spatial shape.
    # Patches stay bf16 end-to-end (no f32 blow-up in HBM).
    # TODO(synk): a direct-conv Pallas kernel (tap axis as an extra "arbitrary" grid
    #             dim with shifted/strided windows) would remove the remaining
    #             kh*kw x bf16 patch expansion entirely.
    N, H, W, C = x.shape
    xp = jnp.pad(x, ((0, 0), (padding, padding), (padding, padding), (0, 0)))
    Ho = (H + 2 * padding - kh) // stride + 1
    Wo = (W + 2 * padding - kw) // stride + 1
    cols = []
    for i in range(kh):
        for j in range(kw):
            cols.append(xp[:, i:i + stride * Ho:stride, j:j + stride * Wo:stride, :])
    patches = jnp.stack(cols, axis=3)                     # (N, Ho, Wo, kh*kw, C)
    return patches.reshape(N * Ho * Wo, kh * kw * C), (N, Ho, Wo)


def conv_bn_act(x, cp, stride, padding, relu, residual=None):
    # x: NHWC bf16; cp: prepped conv params (BN folded, padded, bf16 weight).
    kh, kw, cout = cp['kh'], cp['kw'], cp['cout']
    a, (N, Ho, Wo) = im2col(x, kh, kw, stride, padding)
    res2d = residual.reshape(N * Ho * Wo, cout) if residual is not None else None
    out = fused_matmul(a, cp['w'], cp['b'], cout, residual=res2d, relu=relu)
    return out.reshape(N, Ho, Wo, cout)


def maxpool2d(x, k=3, stride=2, padding=1):
    # Running max over the k*k strided windows (XLA fuses; no patch tensor).
    N, H, W, C = x.shape
    neg = jnp.finfo(x.dtype).min
    xp = jnp.pad(x, ((0, 0), (padding, padding), (padding, padding), (0, 0)),
                 constant_values=neg)
    Ho = (H + 2 * padding - k) // stride + 1
    Wo = (W + 2 * padding - k) // stride + 1
    out = None
    for i in range(k):
        for j in range(k):
            win = xp[:, i:i + stride * Ho:stride, j:j + stride * Wo:stride, :]
            out = win if out is None else jnp.maximum(out, win)
    return out


# ----------------------------------------------------------------------------- parameters

def init_conv(key, kh, kw, cin, cout):
    # kaiming_normal_(mode='fan_out', nonlinearity='relu'): std = sqrt(2 / (cout*kh*kw))
    std = (2.0 / (cout * kh * kw)) ** 0.5
    return jax.random.normal(key, (kh, kw, cin, cout), jnp.float32) * std


def init_bn(c):
    return dict(gamma=jnp.ones((c,), jnp.float32), beta=jnp.zeros((c,), jnp.float32),
                mean=jnp.zeros((c,), jnp.float32), var=jnp.ones((c,), jnp.float32))


def init_basic_block(key, cin, cout, stride):
    k1, k2, k3 = jax.random.split(key, 3)
    p = dict(
        conv1=dict(w=init_conv(k1, 3, 3, cin, cout), **init_bn(cout)),
        conv2=dict(w=init_conv(k2, 3, 3, cout, cout), **init_bn(cout)),
    )
    if stride != 1 or cin != cout:
        p['down'] = dict(w=init_conv(k3, 1, 1, cin, cout), **init_bn(cout))
    return p


def init_resnet_params(key, num_classes=10):
    keys = jax.random.split(key, 8)
    params = dict(
        stem=dict(w=init_conv(keys[0], 7, 7, 3, 64), **init_bn(64)),
        layer1=init_basic_block(keys[1], 64, 64, stride=1),
        layer2=init_basic_block(keys[2], 64, 128, stride=2),
        layer3=init_basic_block(keys[3], 128, 256, stride=2),
        layer4=init_basic_block(keys[4], 256, 512, stride=2),
    )
    # nn.Linear default init: U(-1/sqrt(in), 1/sqrt(in))
    bound = 1.0 / (512.0 ** 0.5)
    params['fc_w'] = jax.random.uniform(keys[5], (512, num_classes), jnp.float32,
                                        minval=-bound, maxval=bound)
    params['fc_b'] = jax.random.uniform(keys[6], (num_classes,), jnp.float32,
                                        minval=-bound, maxval=bound)
    return params


def prepare_params(params, eps=1e-5):
    """One-time prep: fold BN into conv weights, reshape to (K, N), pad K/N to
    multiples of 128, cast weights to bf16, biases to f32. Pad/cast the FC too."""
    def prep_conv(p):
        kh, kw, cin, cout = p['w'].shape
        scale = p['gamma'] * jax.lax.rsqrt(p['var'] + eps)          # (cout,)
        w_mat = (p['w'] * scale).reshape(kh * kw * cin, cout)
        bias = p['beta'] - p['mean'] * scale
        K = kh * kw * cin
        Kp, Np = _round_up(K, 128), _round_up(cout, 128)
        return dict(
            w=jnp.pad(w_mat, ((0, Kp - K), (0, Np - cout))).astype(jnp.bfloat16),
            b=jnp.pad(bias, (0, Np - cout)).reshape(1, Np).astype(jnp.float32),
            kh=kh, kw=kw, cin=cin, cout=cout)

    def prep_block(bp):
        out = dict(conv1=prep_conv(bp['conv1']), conv2=prep_conv(bp['conv2']))
        if 'down' in bp:
            out['down'] = prep_conv(bp['down'])
        return out

    ncls = params['fc_w'].shape[1]
    Ncp = _round_up(ncls, 128)
    return dict(
        stem=prep_conv(params['stem']),
        layer1=prep_block(params['layer1']),
        layer2=prep_block(params['layer2']),
        layer3=prep_block(params['layer3']),
        layer4=prep_block(params['layer4']),
        fc_w=jnp.pad(params['fc_w'], ((0, 0), (0, Ncp - ncls))).astype(jnp.bfloat16),
        fc_b=jnp.pad(params['fc_b'], (0, Ncp - ncls)).reshape(1, Ncp).astype(jnp.float32),
        num_classes=ncls,
    )


# ----------------------------------------------------------------------------- model forward

def basic_block_fwd(x, p, stride):
    out = conv_bn_act(x, p['conv1'], stride=stride, padding=1, relu=True)
    if 'down' in p:
        identity = conv_bn_act(x, p['down'], stride=stride, padding=0, relu=False)
    else:
        identity = x
    # conv2 + bn2 + residual-add + relu fused into one matmul epilogue
    return conv_bn_act(out, p['conv2'], stride=1, padding=1, relu=True,
                       residual=identity)


def resnet_forward(x_nchw, params):
    # NCHW (PyTorch) -> NHWC, bf16 activation stream end-to-end.
    x = jnp.transpose(x_nchw, (0, 2, 3, 1)).astype(jnp.bfloat16)
    x = conv_bn_act(x, params['stem'], stride=2, padding=3, relu=True)   # conv1+bn1+relu1
    x = maxpool2d(x, k=3, stride=2, padding=1)                           # maxpool
    x = basic_block_fwd(x, params['layer1'], stride=1)
    x = basic_block_fwd(x, params['layer2'], stride=2)
    x = basic_block_fwd(x, params['layer3'], stride=2)
    x = basic_block_fwd(x, params['layer4'], stride=2)
    N, H, W, C = x.shape
    return pool_fc(x.reshape(N, H * W, C), params['fc_w'], params['fc_b'],
                   params['num_classes'])


# ----------------------------------------------------------------------------- main

if __name__ == "__main__":
    key = jax.random.PRNGKey(0)
    k_x, k_p = jax.random.split(key)
    # input matching the module's stem (3 input channels), small spatial size
    x = jax.random.normal(k_x, (2, 3, 16, 16), jnp.float32)
    params = init_resnet_params(k_p, num_classes=10)
    prepped = prepare_params(params)        # one-time BN-fold / pad / bf16 cast

    run = jax.jit(partial(resnet_forward, params=prepped))
    logits = jax.block_until_ready(run(x))

    assert logits.shape == (2, 10), logits.shape
    assert bool(jnp.all(jnp.isfinite(logits)))
    print("KERNEL_OK")
</pallas_src>

<mosaic_0001>
module attributes {stable_mosaic.version = 11 : i64} {
  func.func @_mm_single_kernel(%arg0: memref<128x256xbf16, #tpu.memory_space<vmem>>, %arg1: memref<256x128xbf16, #tpu.memory_space<vmem>>, %arg2: memref<1x128xf32, #tpu.memory_space<vmem>>, %arg3: memref<128x128xbf16, #tpu.memory_space<vmem>>) attributes {dimension_semantics = [], scalar_prefetch = 0 : i64, scratch_operands = 0 : i64, tpu.core_type = #tpu.core_type<tc>} {
    %c0 = arith.constant 0 : index
    %c0_0 = arith.constant 0 : index
    %0 = vector.load %arg0[%c0, %c0_0] : memref<128x256xbf16, #tpu.memory_space<vmem>>, vector<128x256xbf16>
    %c0_1 = arith.constant 0 : index
    %c0_2 = arith.constant 0 : index
    %1 = vector.load %arg1[%c0_1, %c0_2] : memref<256x128xbf16, #tpu.memory_space<vmem>>, vector<256x128xbf16>
    %cst = arith.constant dense<0.000000e+00> : vector<128x128xf32>
    %2 = tpu.matmul %0, %1, %cst {dimension_numbers = #tpu.dot_dimension_numbers<[1], [0], [0], [1], [0, 0, 1, 1], [], []>} : vector<128x256xbf16>, vector<256x128xbf16>, vector<128x128xf32> -> vector<128x128xf32>
    %c0_3 = arith.constant 0 : index
    %c0_4 = arith.constant 0 : index
    %3 = vector.load %arg2[%c0_3, %c0_4] : memref<1x128xf32, #tpu.memory_space<vmem>>, vector<1x128xf32>
    %4 = vector.broadcast %3 : vector<1x128xf32> to vector<128x128xf32>
    %5 = arith.addf %2, %4 : vector<128x128xf32>
    %cst_5 = arith.constant 0.000000e+00 : f32
    %6 = vector.broadcast %cst_5 : f32 to vector<128x128xf32>
    %7 = arith.maximumf %5, %6 : vector<128x128xf32>
    %8 = arith.truncf %7 : vector<128x128xf32> to vector<128x128xbf16>
    %c0_6 = arith.constant 0 : index
    %c0_7 = arith.constant 0 : index
    %9 = vector.load %arg3[%c0_6, %c0_7] : memref<128x128xbf16, #tpu.memory_space<vmem>>, vector<128x128xbf16>
    tpu.vector_store %arg3[%c0_6, %c0_7], %8 {strides = array<i32>} : memref<128x128xbf16, #tpu.memory_space<vmem>>, vector<128x128xbf16>,
    return
  }
}

module attributes {stable_mosaic.version = 11 : i64} {
  func.func @_mm_single_kernel(%arg0: memref<32x640xbf16, #tpu.memory_space<vmem>>, %arg1: memref<640x128xbf16, #tpu.memory_space<vmem>>, %arg2: memref<1x128xf32, #tpu.memory_space<vmem>>, %arg3: memref<32x128xbf16, #tpu.memory_space<vmem>>) attributes {dimension_semantics = [], scalar_prefetch = 0 : i64, scratch_operands = 0 : i64, tpu.core_type = #tpu.core_type<tc>} {
    %c0 = arith.constant 0 : index
    %c0_0 = arith.constant 0 : index
    %0 = vector.load %arg0[%c0, %c0_0] : memref<32x640xbf16, #tpu.memory_space<vmem>>, vector<32x640xbf16>
    %c0_1 = arith.constant 0 : index
    %c0_2 = arith.constant 0 : index
    %1 = vector.load %arg1[%c0_1, %c0_2] : memref<640x128xbf16, #tpu.memory_space<vmem>>, vector<640x128xbf16>
    %cst = arith.constant dense<0.000000e+00> : vector<32x128xf32>
    %2 = tpu.matmul %0, %1, %cst {dimension_numbers = #tpu.dot_dimension_numbers<[1], [0], [0], [1], [0, 0, 1, 1], [], []>} : vector<32x640xbf16>, vector<640x128xbf16>, vector<32x128xf32> -> vector<32x128xf32>
    %c0_3 = arith.constant 0 : index
    %c0_4 = arith.constant 0 : index
    %3 = vector.load %arg2[%c0_3, %c0_4] : memref<1x128xf32, #tpu.memory_space<vmem>>, vector<1x128xf32>
    %4 = vector.broadcast %3 : vector<1x128xf32> to vector<32x128xf32>
    %5 = arith.addf %2, %4 : vector<32x128xf32>
    %cst_5 = arith.constant 0.000000e+00 : f32
    %6 = vector.broadcast %cst_5 : f32 to vector<32x128xf32>
    %7 = arith.maximumf %5, %6 : vector<32x128xf32>
    %8 = arith.truncf %7 : vector<32x128xf32> to vector<32x128xbf16>
    %c0_6 = arith.constant 0 : index
    %c0_7 = arith.constant 0 : index
    %9 = vector.load %arg3[%c0_6, %c0_7] : memref<32x128xbf16, #tpu.memory_space<vmem>>, vector<32x128xbf16>
    tpu.vector_store %arg3[%c0_6, %c0_7], %8 {strides = array<i32>} : memref<32x128xbf16, #tpu.memory_space<vmem>>, vector<32x128xbf16>,
    return
  }
}

module attributes {stable_mosaic.version = 11 : i64} {
  func.func @_mm_single_kernel(%arg0: memref<32x640xbf16, #tpu.memory_space<vmem>>, %arg1: memref<640x128xbf16, #tpu.memory_space<vmem>>, %arg2: memref<1x128xf32, #tpu.memory_space<vmem>>, %arg3: memref<32x128xbf16, #tpu.memory_space<vmem>>, %arg4: memref<32x128xbf16, #tpu.memory_space<vmem>>) attributes {dimension_semantics = [], scalar_prefetch = 0 : i64, scratch_operands = 0 : i64, tpu.core_type = #tpu.core_type<tc>} {
    %c0 = arith.constant 0 : index
    %c0_0 = arith.constant 0 : index
    %0 = vector.load %arg0[%c0, %c0_0] : memref<32x640xbf16, #tpu.memory_space<vmem>>, vector<32x640xbf16>
    %c0_1 = arith.constant 0 : index
    %c0_2 = arith.constant 0 : index
    %1 = vector.load %arg1[%c0_1, %c0_2] : memref<640x128xbf16, #tpu.memory_space<vmem>>, vector<640x128xbf16>
    %cst = arith.constant dense<0.000000e+00> : vector<32x128xf32>
    %2 = tpu.matmul %0, %1, %cst {dimension_numbers = #tpu.dot_dimension_numbers<[1], [0], [0], [1], [0, 0, 1, 1], [], []>} : vector<32x640xbf16>, vector<640x128xbf16>, vector<32x128xf32> -> vector<32x128xf32>
    %c0_3 = arith.constant 0 : index
    %c0_4 = arith.constant 0 : index
    %3 = vector.load %arg2[%c0_3, %c0_4] : memref<1x128xf32, #tpu.memory_space<vmem>>, vector<1x128xf32>
    %4 = vector.broadcast %3 : vector<1x128xf32> to vector<32x128xf32>
    %5 = arith.addf %2, %4 : vector<32x128xf32>
    %c0_5 = arith.constant 0 : index
    %c0_6 = arith.constant 0 : index
    %6 = vector.load %arg3[%c0_5, %c0_6] : memref<32x128xbf16, #tpu.memory_space<vmem>>, vector<32x128xbf16>
    %7 = arith.extf %6 : vector<32x128xbf16> to vector<32x128xf32>
    %8 = arith.addf %5, %7 : vector<32x128xf32>
    %cst_7 = arith.constant 0.000000e+00 : f32
    %9 = vector.broadcast %cst_7 : f32 to vector<32x128xf32>
    %10 = arith.maximumf %8, %9 : vector<32x128xf32>
    %11 = arith.truncf %10 : vector<32x128xf32> to vector<32x128xbf16>
    %c0_8 = arith.constant 0 : index
    %c0_9 = arith.constant 0 : index
    %12 = vector.load %arg4[%c0_8, %c0_9] : memref<32x128xbf16, #tpu.memory_space<vmem>>, vector<32x128xbf16>
    tpu.vector_store %arg4[%c0_8, %c0_9], %11 {strides = array<i32>} : memref<32x128xbf16, #tpu.memory_space<vmem>>, vector<32x128xbf16>,
    return
  }
}

module attributes {stable_mosaic.version = 11 : i64} {
  func.func @_mm_single_kernel(%arg0: memref<16x128xbf16, #tpu.memory_space<vmem>>, %arg1: memref<128x128xbf16, #tpu.memory_space<vmem>>, %arg2: memref<1x128xf32, #tpu.memory_space<vmem>>, %arg3: memref<16x128xbf16, #tpu.memory_space<vmem>>) attributes {dimension_semantics = [], scalar_prefetch = 0 : i64, scratch_operands = 0 : i64, tpu.core_type = #tpu.core_type<tc>} {
    %c0 = arith.constant 0 : index
    %c0_0 = arith.constant 0 : index
    %0 = vector.load %arg0[%c0, %c0_0] : memref<16x128xbf16, #tpu.memory_space<vmem>>, vector<16x128xbf16>
    %c0_1 = arith.constant 0 : index
    %c0_2 = arith.constant 0 : index
    %1 = vector.load %arg1[%c0_1, %c0_2] : memref<128x128xbf16, #tpu.memory_space<vmem>>, vector<128x128xbf16>
    %cst = arith.constant dense<0.000000e+00> : vector<16x128xf32>
    %2 = tpu.matmul %0, %1, %cst {dimension_numbers = #tpu.dot_dimension_numbers<[1], [0], [0], [1], [0, 0, 1, 1], [], []>} : vector<16x128xbf16>, vector<128x128xbf16>, vector<16x128xf32> -> vector<16x128xf32>
    %c0_3 = arith.constant 0 : index
    %c0_4 = arith.constant 0 : index
    %3 = vector.load %arg2[%c0_3, %c0_4] : memref<1x128xf32, #tpu.memory_space<vmem>>, vector<1x128xf32>
    %4 = vector.broadcast %3 : vector<1x128xf32> to vector<16x128xf32>
    %5 = arith.addf %2, %4 : vector<16x128xf32>
    %6 = arith.truncf %5 : vector<16x128xf32> to vector<16x128xbf16>
    %c0_5 = arith.constant 0 : index
    %c0_6 = arith.constant 0 : index
    %7 = vector.load %arg3[%c0_5, %c0_6] : memref<16x128xbf16, #tpu.memory_space<vmem>>, vector<16x128xbf16>
    tpu.vector_store %arg3[%c0_5, %c0_6], %6 {strides = array<i32>} : memref<16x128xbf16, #tpu.memory_space<vmem>>, vector<16x128xbf16>,
    return
  }
}

module attributes {stable_mosaic.version = 11 : i64} {
  func.func @_mm_single_kernel(%arg0: memref<16x640xbf16, #tpu.memory_space<vmem>>, %arg1: memref<640x128xbf16, #tpu.memory_space<vmem>>, %arg2: memref<1x128xf32, #tpu.memory_space<vmem>>, %arg3: memref<16x128xbf16, #tpu.memory_space<vmem>>) attributes {dimension_semantics = [], scalar_prefetch = 0 : i64, scratch_operands = 0 : i64, tpu.core_type = #tpu.core_type<tc>} {
    %c0 = arith.constant 0 : index
    %c0_0 = arith.constant 0 : index
    %0 = vector.load %arg0[%c0, %c0_0] : memref<16x640xbf16, #tpu.memory_space<vmem>>, vector<16x640xbf16>
    %c0_1 = arith.constant 0 : index
    %c0_2 = arith.constant 0 : index
    %1 = vector.load %arg1[%c0_1, %c0_2] : memref<640x128xbf16, #tpu.memory_space<vmem>>, vector<640x128xbf16>
    %cst = arith.constant dense<0.000000e+00> : vector<16x128xf32>
    %2 = tpu.matmul %0, %1, %cst {dimension_numbers = #tpu.dot_dimension_numbers<[1], [0], [0], [1], [0, 0, 1, 1], [], []>} : vector<16x640xbf16>, vector<640x128xbf16>, vector<16x128xf32> -> vector<16x128xf32>
    %c0_3 = arith.constant 0 : index
    %c0_4 = arith.constant 0 : index
    %3 = vector.load %arg2[%c0_3, %c0_4] : memref<1x128xf32, #tpu.memory_space<vmem>>, vector<1x128xf32>
    %4 = vector.broadcast %3 : vector<1x128xf32> to vector<16x128xf32>
    %5 = arith.addf %2, %4 : vector<16x128xf32>
    %cst_5 = arith.constant 0.000000e+00 : f32
    %6 = vector.broadcast %cst_5 : f32 to vector<16x128xf32>
    %7 = arith.maximumf %5, %6 : vector<16x128xf32>
    %8 = arith.truncf %7 : vector<16x128xf32> to vector<16x128xbf16>
    %c0_6 = arith.constant 0 : index
    %c0_7 = arith.constant 0 : index
    %9 = vector.load %arg3[%c0_6, %c0_7] : memref<16x128xbf16, #tpu.memory_space<vmem>>, vector<16x128xbf16>
    tpu.vector_store %arg3[%c0_6, %c0_7], %8 {strides = array<i32>} : memref<16x128xbf16, #tpu.memory_space<vmem>>, vector<16x128xbf16>,
    return
  }
}

module attributes {stable_mosaic.version = 11 : i64} {
  func.func @_mm_single_kernel(%arg0: memref<16x1152xbf16, #tpu.memory_space<vmem>>, %arg1: memref<1152x128xbf16, #tpu.memory_space<vmem>>, %arg2: memref<1x128xf32, #tpu.memory_space<vmem>>, %arg3: memref<16x128xbf16, #tpu.memory_space<vmem>>, %arg4: memref<16x128xbf16, #tpu.memory_space<vmem>>) attributes {dimension_semantics = [], scalar_prefetch = 0 : i64, scratch_operands = 0 : i64, tpu.core_type = #tpu.core_type<tc>} {
    %c0 = arith.constant 0 : index
    %c0_0 = arith.constant 0 : index
    %0 = vector.load %arg0[%c0, %c0_0] : memref<16x1152xbf16, #tpu.memory_space<vmem>>, vector<16x1152xbf16>
    %c0_1 = arith.constant 0 : index
    %c0_2 = arith.constant 0 : index
    %1 = vector.load %arg1[%c0_1, %c0_2] : memref<1152x128xbf16, #tpu.memory_space<vmem>>, vector<1152x128xbf16>
    %cst = arith.constant dense<0.000000e+00> : vector<16x128xf32>
    %2 = tpu.matmul %0, %1, %cst {dimension_numbers = #tpu.dot_dimension_numbers<[1], [0], [0], [1], [0, 0, 1, 1], [], []>} : vector<16x1152xbf16>, vector<1152x128xbf16>, vector<16x128xf32> -> vector<16x128xf32>
    %c0_3 = arith.constant 0 : index
    %c0_4 = arith.constant 0 : index
    %3 = vector.load %arg2[%c0_3, %c0_4] : memref<1x128xf32, #tpu.memory_space<vmem>>, vector<1x128xf32>
    %4 = vector.broadcast %3 : vector<1x128xf32> to vector<16x128xf32>
    %5 = arith.addf %2, %4 : vector<16x128xf32>
    %c0_5 = arith.constant 0 : index
    %c0_6 = arith.constant 0 : index
    %6 = vector.load %arg3[%c0_5, %c0_6] : memref<16x128xbf16, #tpu.memory_space<vmem>>, vector<16x128xbf16>
    %7 = arith.extf %6 : vector<16x128xbf16> to vector<16x128xf32>
    %8 = arith.addf %5, %7 : vector<16x128xf32>
    %cst_7 = arith.constant 0.000000e+00 : f32
    %9 = vector.broadcast %cst_7 : f32 to vector<16x128xf32>
    %10 = arith.maximumf %8, %9 : vector<16x128xf32>
    %11 = arith.truncf %10 : vector<16x128xf32> to vector<16x128xbf16>
    %c0_8 = arith.constant 0 : index
    %c0_9 = arith.constant 0 : index
    %12 = vector.load %arg4[%c0_8, %c0_9] : memref<16x128xbf16, #tpu.memory_space<vmem>>, vector<16x128xbf16>
    tpu.vector_store %arg4[%c0_8, %c0_9], %11 {strides = array<i32>} : memref<16x128xbf16, #tpu.memory_space<vmem>>, vector<16x128xbf16>,
    return
  }
}

module attributes {stable_mosaic.version = 11 : i64} {
  func.func @_mm_single_kernel(%arg0: memref<16x128xbf16, #tpu.memory_space<vmem>>, %arg1: memref<128x256xbf16, #tpu.memory_space<vmem>>, %arg2: memref<1x256xf32, #tpu.memory_space<vmem>>, %arg3: memref<16x256xbf16, #tpu.memory_space<vmem>>) attributes {dimension_semantics = [], scalar_prefetch = 0 : i64, scratch_operands = 0 : i64, tpu.core_type = #tpu.core_type<tc>} {
    %c0 = arith.constant 0 : index
    %c0_0 = arith.constant 0 : index
    %0 = vector.load %arg0[%c0, %c0_0] : memref<16x128xbf16, #tpu.memory_space<vmem>>, vector<16x128xbf16>
    %c0_1 = arith.constant 0 : index
    %c0_2 = arith.constant 0 : index
    %1 = vector.load %arg1[%c0_1, %c0_2] : memref<128x256xbf16, #tpu.memory_space<vmem>>, vector<128x256xbf16>
    %cst = arith.constant dense<0.000000e+00> : vector<16x256xf32>
    %2 = tpu.matmul %0, %1, %cst {dimension_numbers = #tpu.dot_dimension_numbers<[1], [0], [0], [1], [0, 0, 1, 1], [], []>} : vector<16x128xbf16>, vector<128x256xbf16>, vector<16x256xf32> -> vector<16x256xf32>
    %c0_3 = arith.constant 0 : index
    %c0_4 = arith.constant 0 : index
    %3 = vector.load %arg2[%c0_3, %c0_4] : memref<1x256xf32, #tpu.memory_space<vmem>>, vector<1x256xf32>
    %4 = vector.broadcast %3 : vector<1x256xf32> to vector<16x256xf32>
    %5 = arith.addf %2, %4 : vector<16x256xf32>
    %6 = arith.truncf %5 : vector<16x256xf32> to vector<16x256xbf16>
    %c0_5 = arith.constant 0 : index
    %c0_6 = arith.constant 0 : index
    %7 = vector.load %arg3[%c0_5, %c0_6] : memref<16x256xbf16, #tpu.memory_space<vmem>>, vector<16x256xbf16>
    tpu.vector_store %arg3[%c0_5, %c0_6], %6 {strides = array<i32>} : memref<16x256xbf16, #tpu.memory_space<vmem>>, vector<16x256xbf16>,
    return
  }
}

module attributes {stable_mosaic.version = 11 : i64} {
  func.func @_mm_single_kernel(%arg0: memref<16x1152xbf16, #tpu.memory_space<vmem>>, %arg1: memref<1152x256xbf16, #tpu.memory_space<vmem>>, %arg2: memref<1x256xf32, #tpu.memory_space<vmem>>, %arg3: memref<16x256xbf16, #tpu.memory_space<vmem>>) attributes {dimension_semantics = [], scalar_prefetch = 0 : i64, scratch_operands = 0 : i64, tpu.core_type = #tpu.core_type<tc>} {
    %c0 = arith.constant 0 : index
    %c0_0 = arith.constant 0 : index
    %0 = vector.load %arg0[%c0, %c0_0] : memref<16x1152xbf16, #tpu.memory_space<vmem>>, vector<16x1152xbf16>
    %c0_1 = arith.constant 0 : index
    %c0_2 = arith.constant 0 : index
    %1 = vector.load %arg1[%c0_1, %c0_2] : memref<1152x256xbf16, #tpu.memory_space<vmem>>, vector<1152x256xbf16>
    %cst = arith.constant dense<0.000000e+00> : vector<16x256xf32>
    %2 = tpu.matmul %0, %1, %cst {dimension_numbers = #tpu.dot_dimension_numbers<[1], [0], [0], [1], [0, 0, 1, 1], [], []>} : vector<16x1152xbf16>, vector<1152x256xbf16>, vector<16x256xf32> -> vector<16x256xf32>
    %c0_3 = arith.constant 0 : index
    %c0_4 = arith.constant 0 : index
    %3 = vector.load %arg2[%c0_3, %c0_4] : memref<1x256xf32, #tpu.memory_space<vmem>>, vector<1x256xf32>
    %4 = vector.broadcast %3 : vector<1x256xf32> to vector<16x256xf32>
    %5 = arith.addf %2, %4 : vector<16x256xf32>
    %cst_5 = arith.constant 0.000000e+00 : f32
    %6 = vector.broadcast %cst_5 : f32 to vector<16x256xf32>
    %7 = arith.maximumf %5, %6 : vector<16x256xf32>
    %8 = arith.truncf %7 : vector<16x256xf32> to vector<16x256xbf16>
    %c0_6 = arith.constant 0 : index
    %c0_7 = arith.constant 0 : index
    %9 = vector.load %arg3[%c0_6, %c0_7] : memref<16x256xbf16, #tpu.memory_space<vmem>>, vector<16x256xbf16>
    tpu.vector_store %arg3[%c0_6, %c0_7], %8 {strides = array<i32>} : memref<16x256xbf16, #tpu.memory_space<vmem>>, vector<16x256xbf16>,
    return
  }
}

module attributes {stable_mosaic.version = 11 : i64} {
  func.func @_mm_single_kernel(%arg0: memref<16x2304xbf16, #tpu.memory_space<vmem>>, %arg1: memref<2304x256xbf16, #tpu.memory_space<vmem>>, %arg2: memref<1x256xf32, #tpu.memory_space<vmem>>, %arg3: memref<16x256xbf16, #tpu.memory_space<vmem>>, %arg4: memref<16x256xbf16, #tpu.memory_space<vmem>>) attributes {dimension_semantics = [], scalar_prefetch = 0 : i64, scratch_operands = 0 : i64, tpu.core_type = #tpu.core_type<tc>} {
    %c0 = arith.constant 0 : index
    %c0_0 = arith.constant 0 : index
    %0 = vector.load %arg0[%c0, %c0_0] : memref<16x2304xbf16, #tpu.memory_space<vmem>>, vector<16x2304xbf16>
    %c0_1 = arith.constant 0 : index
    %c0_2 = arith.constant 0 : index
    %1 = vector.load %arg1[%c0_1, %c0_2] : memref<2304x256xbf16, #tpu.memory_space<vmem>>, vector<2304x256xbf16>
    %cst = arith.constant dense<0.000000e+00> : vector<16x256xf32>
    %2 = tpu.matmul %0, %1, %cst {dimension_numbers = #tpu.dot_dimension_numbers<[1], [0], [0], [1], [0, 0, 1, 1], [], []>} : vector<16x2304xbf16>, vector<2304x256xbf16>, vector<16x256xf32> -> vector<16x256xf32>
    %c0_3 = arith.constant 0 : index
    %c0_4 = arith.constant 0 : index
    %3 = vector.load %arg2[%c0_3, %c0_4] : memref<1x256xf32, #tpu.memory_space<vmem>>, vector<1x256xf32>
    %4 = vector.broadcast %3 : vector<1x256xf32> to vector<16x256xf32>
    %5 = arith.addf %2, %4 : vector<16x256xf32>
    %c0_5 = arith.constant 0 : index
    %c0_6 = arith.constant 0 : index
    %6 = vector.load %arg3[%c0_5, %c0_6] : memref<16x256xbf16, #tpu.memory_space<vmem>>, vector<16x256xbf16>
    %7 = arith.extf %6 : vector<16x256xbf16> to vector<16x256xf32>
    %8 = arith.addf %5, %7 : vector<16x256xf32>
    %cst_7 = arith.constant 0.000000e+00 : f32
    %9 = vector.broadcast %cst_7 : f32 to vector<16x256xf32>
    %10 = arith.maximumf %8, %9 : vector<16x256xf32>
    %11 = arith.truncf %10 : vector<16x256xf32> to vector<16x256xbf16>
    %c0_8 = arith.constant 0 : index
    %c0_9 = arith.constant 0 : index
    %12 = vector.load %arg4[%c0_8, %c0_9] : memref<16x256xbf16, #tpu.memory_space<vmem>>, vector<16x256xbf16>
    tpu.vector_store %arg4[%c0_8, %c0_9], %11 {strides = array<i32>} : memref<16x256xbf16, #tpu.memory_space<vmem>>, vector<16x256xbf16>,
    return
  }
}

module attributes {stable_mosaic.version = 11 : i64} {
  func.func @_mm_single_kernel(%arg0: memref<16x256xbf16, #tpu.memory_space<vmem>>, %arg1: memref<256x512xbf16, #tpu.memory_space<vmem>>, %arg2: memref<1x512xf32, #tpu.memory_space<vmem>>, %arg3: memref<16x512xbf16, #tpu.memory_space<vmem>>) attributes {dimension_semantics = [], scalar_prefetch = 0 : i64, scratch_operands = 0 : i64, tpu.core_type = #tpu.core_type<tc>} {
    %c0 = arith.constant 0 : index
    %c0_0 = arith.constant 0 : index
    %0 = vector.load %arg0[%c0, %c0_0] : memref<16x256xbf16, #tpu.memory_space<vmem>>, vector<16x256xbf16>
    %c0_1 = arith.constant 0 : index
    %c0_2 = arith.constant 0 : index
    %1 = vector.load %arg1[%c0_1, %c0_2] : memref<256x512xbf16, #tpu.memory_space<vmem>>, vector<256x512xbf16>
    %cst = arith.constant dense<0.000000e+00> : vector<16x512xf32>
    %2 = tpu.matmul %0, %1, %cst {dimension_numbers = #tpu.dot_dimension_numbers<[1], [0], [0], [1], [0, 0, 1, 1], [], []>} : vector<16x256xbf16>, vector<256x512xbf16>, vector<16x512xf32> -> vector<16x512xf32>
    %c0_3 = arith.constant 0 : index
    %c0_4 = arith.constant 0 : index
    %3 = vector.load %arg2[%c0_3, %c0_4] : memref<1x512xf32, #tpu.memory_space<vmem>>, vector<1x512xf32>
    %4 = vector.broadcast %3 : vector<1x512xf32> to vector<16x512xf32>
    %5 = arith.addf %2, %4 : vector<16x512xf32>
    %6 = arith.truncf %5 : vector<16x512xf32> to vector<16x512xbf16>
    %c0_5 = arith.constant 0 : index
    %c0_6 = arith.constant 0 : index
    %7 = vector.load %arg3[%c0_5, %c0_6] : memref<16x512xbf16, #tpu.memory_space<vmem>>, vector<16x512xbf16>
    tpu.vector_store %arg3[%c0_5, %c0_6], %6 {strides = array<i32>} : memref<16x512xbf16, #tpu.memory_space<vmem>>, vector<16x512xbf16>,
    return
  }
}

module attributes {stable_mosaic.version = 11 : i64} {
  func.func @_mm_single_kernel(%arg0: memref<16x2304xbf16, #tpu.memory_space<vmem>>, %arg1: memref<2304x512xbf16, #tpu.memory_space<vmem>>, %arg2: memref<1x512xf32, #tpu.memory_space<vmem>>, %arg3: memref<16x512xbf16, #tpu.memory_space<vmem>>) attributes {dimension_semantics = [], scalar_prefetch = 0 : i64, scratch_operands = 0 : i64, tpu.core_type = #tpu.core_type<tc>} {
    %c0 = arith.constant 0 : index
    %c0_0 = arith.constant 0 : index
    %0 = vector.load %arg0[%c0, %c0_0] : memref<16x2304xbf16, #tpu.memory_space<vmem>>, vector<16x2304xbf16>
    %c0_1 = arith.constant 0 : index
    %c0_2 = arith.constant 0 : index
    %1 = vector.load %arg1[%c0_1, %c0_2] : memref<2304x512xbf16, #tpu.memory_space<vmem>>, vector<2304x512xbf16>
    %cst = arith.constant dense<0.000000e+00> : vector<16x512xf32>
    %2 = tpu.matmul %0, %1, %cst {dimension_numbers = #tpu.dot_dimension_numbers<[1], [0], [0], [1], [0, 0, 1, 1], [], []>} : vector<16x2304xbf16>, vector<2304x512xbf16>, vector<16x512xf32> -> vector<16x512xf32>
    %c0_3 = arith.constant 0 : index
    %c0_4 = arith.constant 0 : index
    %3 = vector.load %arg2[%c0_3, %c0_4] : memref<1x512xf32, #tpu.memory_space<vmem>>, vector<1x512xf32>
    %4 = vector.broadcast %3 : vector<1x512xf32> to vector<16x512xf32>
    %5 = arith.addf %2, %4 : vector<16x512xf32>
    %cst_5 = arith.constant 0.000000e+00 : f32
    %6 = vector.broadcast %cst_5 : f32 to vector<16x512xf32>
    %7 = arith.maximumf %5, %6 : vector<16x512xf32>
    %8 = arith.truncf %7 : vector<16x512xf32> to vector<16x512xbf16>
    %c0_6 = arith.constant 0 : index
    %c0_7 = arith.constant 0 : index
    %9 = vector.load %arg3[%c0_6, %c0_7] : memref<16x512xbf16, #tpu.memory_space<vmem>>, vector<16x512xbf16>
    tpu.vector_store %arg3[%c0_6, %c0_7], %8 {strides = array<i32>} : memref<16x512xbf16, #tpu.memory_space<vmem>>, vector<16x512xbf16>,
    return
  }
}

module attributes {stable_mosaic.version = 11 : i64} {
  func.func @_mm_single_kernel(%arg0: memref<16x4608xbf16, #tpu.memory_space<vmem>>, %arg1: memref<4608x512xbf16, #tpu.memory_space<vmem>>, %arg2: memref<1x512xf32, #tpu.memory_space<vmem>>, %arg3: memref<16x512xbf16, #tpu.memory_space<vmem>>, %arg4: memref<16x512xbf16, #tpu.memory_space<vmem>>) attributes {dimension_semantics = [], scalar_prefetch = 0 : i64, scratch_operands = 0 : i64, tpu.core_type = #tpu.core_type<tc>} {
    %c0 = arith.constant 0 : index
    %c0_0 = arith.constant 0 : index
    %0 = vector.load %arg0[%c0, %c0_0] : memref<16x4608xbf16, #tpu.memory_space<vmem>>, vector<16x4608xbf16>
    %c0_1 = arith.constant 0 : index
    %c0_2 = arith.constant 0 : index
    %1 = vector.load %arg1[%c0_1, %c0_2] : memref<4608x512xbf16, #tpu.memory_space<vmem>>, vector<4608x512xbf16>
    %cst = arith.constant dense<0.000000e+00> : vector<16x512xf32>
    %2 = tpu.matmul %0, %1, %cst {dimension_numbers = #tpu.dot_dimension_numbers<[1], [0], [0], [1], [0, 0, 1, 1], [], []>} : vector<16x4608xbf16>, vector<4608x512xbf16>, vector<16x512xf32> -> vector<16x512xf32>
    %c0_3 = arith.constant 0 : index
    %c0_4 = arith.constant 0 : index
    %3 = vector.load %arg2[%c0_3, %c0_4] : memref<1x512xf32, #tpu.memory_space<vmem>>, vector<1x512xf32>
    %4 = vector.broadcast %3 : vector<1x512xf32> to vector<16x512xf32>
    %5 = arith.addf %2, %4 : vector<16x512xf32>
    %c0_5 = arith.constant 0 : index
    %c0_6 = arith.constant 0 : index
    %6 = vector.load %arg3[%c0_5, %c0_6] : memref<16x512xbf16, #tpu.memory_space<vmem>>, vector<16x512xbf16>
    %7 = arith.extf %6 : vector<16x512xbf16> to vector<16x512xf32>
    %8 = arith.addf %5, %7 : vector<16x512xf32>
    %cst_7 = arith.constant 0.000000e+00 : f32
    %9 = vector.broadcast %cst_7 : f32 to vector<16x512xf32>
    %10 = arith.maximumf %8, %9 : vector<16x512xf32>
    %11 = arith.truncf %10 : vector<16x512xf32> to vector<16x512xbf16>
    %c0_8 = arith.constant 0 : index
    %c0_9 = arith.constant 0 : index
    %12 = vector.load %arg4[%c0_8, %c0_9] : memref<16x512xbf16, #tpu.memory_space<vmem>>, vector<16x512xbf16>
    tpu.vector_store %arg4[%c0_8, %c0_9], %11 {strides = array<i32>} : memref<16x512xbf16, #tpu.memory_space<vmem>>, vector<16x512xbf16>,
    return
  }
}

module attributes {stable_mosaic.version = 11 : i64} {
  func.func @_pool_fc_kernel(%arg0: i32, %arg1: memref<8x1x512xbf16, #tpu.memory_space<vmem>>, %arg2: memref<512x128xbf16, #tpu.memory_space<vmem>>, %arg3: memref<1x128xf32, #tpu.memory_space<vmem>>, %arg4: memref<8x128xf32, #tpu.memory_space<vmem>>) attributes {dimension_semantics = [#tpu.dimension_semantics<arbitrary>], iteration_bounds = array<i64: 1>, scalar_prefetch = 0 : i64, scratch_operands = 0 : i64, tpu.core_type = #tpu.core_type<tc>, window_params = [{transform_indices = @transform_0, window_bounds = array<i64: 8, 1, 512>}, {pipeline_mode = #tpu.pipeline_mode<synchronous>, transform_indices = @transform_1, window_bounds = array<i64: 512, 128>}, {pipeline_mode = #tpu.pipeline_mode<synchronous>, transform_indices = @transform_2, window_bounds = array<i64: 1, 128>}, {transform_indices = @transform_3, window_bounds = array<i64: 8, 128>}]} {
    %c0 = arith.constant 0 : index
    %c0_0 = arith.constant 0 : index
    %c0_1 = arith.constant 0 : index
    %0 = vector.load %arg1[%c0, %c0_0, %c0_1] : memref<8x1x512xbf16, #tpu.memory_space<vmem>>, vector<8x1x512xbf16>
    %1 = arith.extf %0 : vector<8x1x512xbf16> to vector<8x1x512xf32>
    %cst = arith.constant dense<0.000000e+00> : vector<8x512xf32>
    %2 = vector.multi_reduction <add>, %1, %cst [1] : vector<8x1x512xf32> to vector<8x512xf32>
    %cst_2 = arith.constant 1.000000e+00 : f32
    %3 = vector.broadcast %cst_2 : f32 to vector<8x512xf32>
    %4 = arith.mulf %2, %3 : vector<8x512xf32>
    %5 = arith.truncf %4 : vector<8x512xf32> to vector<8x512xbf16>
    %c0_3 = arith.constant 0 : index
    %c0_4 = arith.constant 0 : index
    %6 = vector.load %arg2[%c0_3, %c0_4] : memref<512x128xbf16, #tpu.memory_space<vmem>>, vector<512x128xbf16>
    %cst_5 = arith.constant dense<0.000000e+00> : vector<8x128xf32>
    %7 = tpu.matmul %5, %6, %cst_5 {dimension_numbers = #tpu.dot_dimension_numbers<[1], [0], [0], [1], [0, 0, 1, 1], [], []>} : vector<8x512xbf16>, vector<512x128xbf16>, vector<8x128xf32> -> vector<8x128xf32>
    %c0_6 = arith.constant 0 : index
    %c0_7 = arith.constant 0 : index
    %8 = vector.load %arg3[%c0_6, %c0_7] : memref<1x128xf32, #tpu.memory_space<vmem>>, vector<1x128xf32>
    %9 = vector.broadcast %8 : vector<1x128xf32> to vector<8x128xf32>
    %10 = arith.addf %7, %9 : vector<8x128xf32>
    %c0_8 = arith.constant 0 : index
    %c0_9 = arith.constant 0 : index
    %11 = vector.load %arg4[%c0_8, %c0_9] : memref<8x128xf32, #tpu.memory_space<vmem>>, vector<8x128xf32>
    tpu.vector_store %arg4[%c0_8, %c0_9], %10 {strides = array<i32>} : memref<8x128xf32, #tpu.memory_space<vmem>>, vector<8x128xf32>,
    return
  }
  func.func @transform_0(%arg0: i32) -> (i32, i32, i32) {
    %c0_i32 = arith.constant 0 : i32
    %c0_i32_0 = arith.constant 0 : i32
    %c0_i32_1 = arith.constant 0 : i32
    return %arg0, %c0_i32, %c0_i32_0 : i32, i32, i32
  }
  func.func @transform_1(%arg0: i32) -> (i32, i32) {
    %c0_i32 = arith.constant 0 : i32
    %c0_i32_0 = arith.constant 0 : i32
    %c0_i32_1 = arith.constant 0 : i32
    return %c0_i32, %c0_i32_0 : i32, i32
  }
  func.func @transform_2(%arg0: i32) -> (i32, i32) {
    %c0_i32 = arith.constant 0 : i32
    %c0_i32_0 = arith.constant 0 : i32
    %c0_i32_1 = arith.constant 0 : i32
    return %c0_i32, %c0_i32_0 : i32, i32
  }
  func.func @transform_3(%arg0: i32) -> (i32, i32) {
    %c0_i32 = arith.constant 0 : i32
    %c0_i32_0 = arith.constant 0 : i32
    return %arg0, %c0_i32 : i32, i32
  }
}

</mosaic_0001>

<bundles_post_ra>
// kernel: resnet_forward.13
= control target key start
LH: loop header
LB: loop body
LE: loop exit
PB: predicated region body
PF: predicated region fallthrough
CT: control target
= control target key end

     0   :  { %s836_s1 = inlined_call_operand.vmem [shape: bf16[256,128], index: 1, kind: input, shape index: {}]   ;;  %s837_s0 = inlined_call_operand.vmem [shape: bf16[128,256], index: 0, kind: input, shape index: {}]   ;;  %s838_s2 = inlined_call_operand.vmem [shape: f32[1,128], index: 2, kind: input, shape index: {}]   ;;  %s839_s3 = inlined_call_operand.vmem [shape: bf16[128,128], index: 3, kind: output, shape index: {}]  }
   0x1   :  { %v635_v0 = vld [vmem:[%s836_s1 + $0x40] sm:$0xff]   ;;  %v637_v2 = vld [vmem:[%s836_s1 + $0x48] sm:$0xff]   ;;  %v639_v4 = vld [vmem:[%s836_s1 + $0x50] sm:$0xff]  }
   0x2   :  { %v636_v1 = vld [vmem:[%s836_s1] sm:$0xff]   ;;  %555 = vmatprep.subr.bf16.mxu0 %v635_v0  ;;  %619 = vmatprep.subr.bf16.mxu1 %v635_v0  ;;  %v638_v3 = vld [vmem:[%s836_s1 + $0x8] sm:$0xff]   ;;  %v640_v5 = vld [vmem:[%s836_s1 + $0x10] sm:$0xff]  }
   0x3   :  { %556 = vmatpush3.bf16.msra.mxu0 %v636_v1  ;;  %627 = vmatpush3.bf16.msra.mxu1 %v636_v1  ;;  %v641_v6 = vld [vmem:[%s836_s1 + $0x58] sm:$0xff]   ;;  %v643_v8 = vld [vmem:[%s836_s1 + $0x60] sm:$0xff]   ;;  %v645_v10 = vld [vmem:[%s836_s1 + $0x68] sm:$0xff]  }
   0x4   :  { %557 = vmatprep.subr.bf16.mxu0 %v637_v2  ;;  %620 = vmatprep.subr.bf16.mxu1 %v637_v2  ;;  %v642_v7 = vld [vmem:[%s836_s1 + $0x18] sm:$0xff]   ;;  %v644_v9 = vld [vmem:[%s836_s1 + $0x20] sm:$0xff]   ;;  %v646_v13 = vld [vmem:[%s836_s1 + $0x28] sm:$0xff]  }
   0x5   :  { %v653_v11 = vld [vmem:[%s837_s0 + $0x4] ss:$8 sps:$4 sm:$0xff]   ;;  %v647_v14 = vld [vmem:[%s836_s1 + $0x70] sm:$0xff]   ;;  %v649_v16 = vld [vmem:[%s836_s1 + $0x78] sm:$0xff]  }
   0x6   :  { %v656_v12 = vld [vmem:[%s837_s0 + $0x44] ss:$8 sps:$4 sm:$0xff]   ;;  %278 = vmatprep.mubr.bf16.mxu0 %v653_v11  ;;  %v648_v15 = vld [vmem:[%s836_s1 + $0x30] sm:$0xff]   ;;  %v650_v17 = vld [vmem:[%s836_s1 + $0x38] sm:$0xff]  }
   0x7   :  { %558 = vmatpush3.bf16.msra.mxu0 %v638_v3  ;;  %628 = vmatpush3.bf16.msra.mxu1 %v638_v3  ;;  %v651_v18 = vld [vmem:[%s837_s0] ss:$8 sps:$4 sm:$0xff]   ;;  %v657_v20 = vld [vmem:[%s837_s0 + $0x14] ss:$8 sps:$4 sm:$0xff]   ;;  %v661_v22 = vld [vmem:[%s837_s0 + $0x10] ss:$8 sps:$4 sm:$0xff]  }
   0x8   :  { %559 = vmatprep.subr.bf16.mxu0 %v639_v4  ;;  %621 = vmatprep.subr.bf16.mxu1 %v639_v4  ;;  %v654_v19 = vld [vmem:[%s837_s0 + $0x40] ss:$8 sps:$4 sm:$0xff]   ;;  %v659_v21 = vld [vmem:[%s837_s0 + $0x54] ss:$8 sps:$4 sm:$0xff]   ;;  %v662_v23 = vld [vmem:[%s837_s0 + $0x50] ss:$8 sps:$4 sm:$0xff]  }
   0x9   :  { %310 = vmatprep.mubr.bf16.mxu1 %v656_v12  ;;  %v663_v24 = vld [vmem:[%s837_s0 + $0x24] ss:$8 sps:$4 sm:$0xff]   ;;  %v667_v26 = vld [vmem:[%s837_s0 + $0x20] ss:$8 sps:$4 sm:$0xff]   ;;  %v669_v28 = vld [vmem:[%s837_s0 + $0x34] ss:$8 sps:$4 sm:$0xff]  }
   0xa   :  { %v665_v25 = vld [vmem:[%s837_s0 + $0x64] ss:$8 sps:$4 sm:$0xff]   ;;  %v668_v27 = vld [vmem:[%s837_s0 + $0x60] ss:$8 sps:$4 sm:$0xff]   ;;  %v671_v29 = vld [vmem:[%s837_s0 + $0x74] ss:$8 sps:$4 sm:$0xff]  }
   0xb   :  { %560 = vmatpush3.bf16.msra.mxu0 %v640_v5  ;;  %629 = vmatpush3.bf16.msra.mxu1 %v640_v5  ;;  %v673_v30 = vld [vmem:[%s837_s0 + $0x30] ss:$8 sps:$4 sm:$0xff]   ;;  %v794_v34 = vld [vmem:[%s838_s2] ss:$0 sm:$0xff] }
   0xc   :  { %561 = vmatprep.subr.bf16.mxu0 %v641_v6  ;;  %622 = vmatprep.subr.bf16.mxu1 %v641_v6  ;;  %v674_v31 = vld [vmem:[%s837_s0 + $0x70] ss:$8 sps:$4 sm:$0xff]  }
   0xf   :  { %562 = vmatpush3.bf16.msra.mxu0 %v642_v7  ;;  %630 = vmatpush3.bf16.msra.mxu1 %v642_v7 }
  0x10   :  { %563 = vmatprep.subr.bf16.mxu0 %v643_v8  ;;  %623 = vmatprep.subr.bf16.mxu1 %v643_v8 }
  0x13   :  { %564 = vmatpush3.bf16.msra.mxu0 %v644_v9  ;;  %631 = vmatpush3.bf16.msra.mxu1 %v644_v9 }
  0x14   :  { %565 = vmatprep.subr.bf16.mxu0 %v645_v10  ;;  %624 = vmatprep.subr.bf16.mxu1 %v645_v10 }
  0x17   :  { %566 = vmatpush3.bf16.msra.mxu0 %v646_v13  ;;  %632 = vmatpush3.bf16.msra.mxu1 %v646_v13 }
  0x18   :  { %567 = vmatprep.subr.bf16.mxu0 %v647_v14  ;;  %625 = vmatprep.subr.bf16.mxu1 %v647_v14 }
  0x1b   :  { %568 = vmatpush3.bf16.msra.mxu0 %v648_v15  ;;  %633 = vmatpush3.bf16.msra.mxu1 %v648_v15 }
  0x1c   :  { %569 = vmatprep.subr.bf16.mxu0 %v649_v16  ;;  %626 = vmatprep.subr.bf16.mxu1 %v649_v16 }
  0x1f   :  { %570 = vmatpush3.bf16.msra.mxu0 %v650_v17  ;;  %634 = vmatpush3.bf16.msra.mxu1 %v650_v17 }
  0x22   :  { %279 = vmatmul.mubr.bf16.vlgmr.msra.gmra.mrb[0].mxu0 %v651_v18  ;;  %311 = vmatmul.mubr.bf16.vlgmr.msra.gmra.mrb[0].mxu1 %v654_v19 }
  0x23   :  { %286 = vmatprep.mubr.bf16.mxu0 %v657_v20  ;;  %318 = vmatprep.mubr.bf16.mxu1 %v659_v21 }
  0x2a   :  { %287 = vmatmul.mubr.bf16.gmra.mrb[4].mxu0 %v661_v22  ;;  %319 = vmatmul.mubr.bf16.gmra.mrb[4].mxu1 %v662_v23 }
  0x2b   :  { %294 = vmatprep.mubr.bf16.mxu0 %v663_v24  ;;  %326 = vmatprep.mubr.bf16.mxu1 %v665_v25 }
  0x32   :  { %295 = vmatmul.mubr.bf16.gmra.mrb[8].mxu0 %v667_v26  ;;  %327 = vmatmul.mubr.bf16.gmra.mrb[8].mxu1 %v668_v27 }
  0x33   :  { %302 = vmatprep.mubr.bf16.mxu0 %v669_v28  ;;  %334 = vmatprep.mubr.bf16.mxu1 %v671_v29 }
  0x3a   :  { %303 = vmatmul.mubr.bf16.gmra.mrb[12].mxu0 %v673_v30  ;;  %335 = vmatmul.mubr.bf16.gmra.mrb[12].mxu1 %v674_v31 }
  0xf5   :  { %v571_v32 = vpop.f32.mrb[0].mxu0  ;;  %v595_v33 = vpop.f32.mrb[0].mxu1 }
  0xf6   :  { %v572_v35 = vpop.f32.mrb[1].mxu0  ;;  %v596_v36 = vpop.f32.mrb[1].mxu1 }
  0xf7   :  { %v573_v37 = vadd.f32 %v572_v35, %v571_v32  ;;  %v597_v38 = vadd.f32 %v596_v36, %v595_v33  ;;  %v574_v39 = vpop.f32.mrb[2].mxu0  ;;  %v598_v40 = vpop.f32.mrb[2].mxu1 }
  0xf8   :  { %v575_v41 = vpop.f32.mrb[3].mxu0  ;;  %v599_v42 = vpop.f32.mrb[3].mxu1 }
  0xf9   :  { %v281_v43 = vadd.f32 %v573_v37, %v794_v34  ;;  %v313_v44 = vadd.f32 %v597_v38, %v794_v34  ;;  %v576_v45 = vadd.f32 %v575_v41, %v574_v39  ;;  %v600_v46 = vadd.f32 %v599_v42, %v598_v40 }
  0xfb   :  { %v284_v47 = vadd.f32 %v576_v45, %v794_v34  ;;  %v316_v48 = vadd.f32 %v600_v46, %v794_v34  ;;  %v343_v49 = vmax.f32 %v281_v43, 0.0  ;;  %v351_v50 = vmax.f32 %v313_v44, 0.0 }
  0xfd   :  { %v344_v51 = vmax.f32 %v284_v47, 0.0  ;;  %v352_v52 = vmax.f32 %v316_v48, 0.0  ;;  %v577_v53 = vpop.f32.mrb[4].mxu0  ;;  %v601_v54 = vpop.f32.mrb[4].mxu1 }
  0xfe   :  { %v578_v55 = vpop.f32.mrb[5].mxu0  ;;  %v602_v56 = vpop.f32.mrb[5].mxu1 }
  0xff   :  { %v511_v57 = vpack.c.bf16 %v344_v51, %v343_v49  ;;  %v531_v58 = vpack.c.bf16 %v352_v52, %v351_v50  ;;  %v579_v59 = vadd.f32 %v578_v55, %v577_v53  ;;  %v603_v60 = vadd.f32 %v602_v56, %v601_v54  ;;  %v580_v61 = vpop.f32.mrb[6].mxu0  ;;  %v604_v62 = vpop.f32.mrb[6].mxu1 }
 0x100   :  { %v581_v63 = vpop.f32.mrb[7].mxu0  ;;  %v605_v0 = vpop.f32.mrb[7].mxu1 }
 0x101   :  { %512 = vst [vmem:[%s839_s3] sm:$0xff] %v511_v57   ;;  %551 = vst [vmem:[%s839_s3 + $0x20] sm:$0xff] %v531_v58   ;;  %v289_v1 = vadd.f32 %v579_v59, %v794_v34  ;;  %v321_v2 = vadd.f32 %v603_v60, %v794_v34  ;;  %v582_v3 = vadd.f32 %v581_v63, %v580_v61 }
 0x102   :  { %v606_v4 = vadd.f32 %v605_v0, %v604_v62 }
 0x103   :  { %v292_v5 = vadd.f32 %v582_v3, %v794_v34  ;;  %v345_v7 = vmax.f32 %v289_v1, 0.0  ;;  %v353_v8 = vmax.f32 %v321_v2, 0.0 }
 0x104   :  { %v324_v6 = vadd.f32 %v606_v4, %v794_v34 }
 0x105   :  { %v346_v9 = vmax.f32 %v292_v5, 0.0  ;;  %v583_v11 = vpop.f32.mrb[8].mxu0  ;;  %v607_v12 = vpop.f32.mrb[8].mxu1 }
 0x106   :  { %v354_v10 = vmax.f32 %v324_v6, 0.0  ;;  %v584_v13 = vpop.f32.mrb[9].mxu0  ;;  %v608_v14 = vpop.f32.mrb[9].mxu1 }
 0x107   :  { %v516_v15 = vpack.c.bf16 %v346_v9, %v345_v7  ;;  %v585_v17 = vadd.f32 %v584_v13, %v583_v11  ;;  %v609_v18 = vadd.f32 %v608_v14, %v607_v12  ;;  %v586_v19 = vpop.f32.mrb[10].mxu0  ;;  %v610_v20 = vpop.f32.mrb[10].mxu1 }
 0x108   :  { %v536_v16 = vpack.c.bf16 %v354_v10, %v353_v8  ;;  %v587_v21 = vpop.f32.mrb[11].mxu0  ;;  %v611_v22 = vpop.f32.mrb[11].mxu1 }
 0x109   :  { %548 = vst [vmem:[%s839_s3 + $0x8] sm:$0xff] %v516_v15   ;;  %v297_v23 = vadd.f32 %v585_v17, %v794_v34  ;;  %v329_v24 = vadd.f32 %v609_v18, %v794_v34  ;;  %v588_v25 = vadd.f32 %v587_v21, %v586_v19  ;;  %v612_v26 = vadd.f32 %v611_v22, %v610_v20 }
 0x10a   :  { %552 = vst [vmem:[%s839_s3 + $0x28] sm:$0xff] %v536_v16  }
 0x10b   :  { %v300_v27 = vadd.f32 %v588_v25, %v794_v34  ;;  %v332_v28 = vadd.f32 %v612_v26, %v794_v34  ;;  %v347_v29 = vmax.f32 %v297_v23, 0.0  ;;  %v355_v30 = vmax.f32 %v329_v24, 0.0 }
 0x10d   :  { %v348_v31 = vmax.f32 %v300_v27, 0.0  ;;  %v356_v32 = vmax.f32 %v332_v28, 0.0  ;;  %v589_v33 = vpop.f32.mrb[12].mxu0  ;;  %v613_v35 = vpop.f32.mrb[12].mxu1 }
 0x10e   :  { %v590_v36 = vpop.f32.mrb[13].mxu0  ;;  %v614_v37 = vpop.f32.mrb[13].mxu1 }
 0x10f   :  { %v521_v38 = vpack.c.bf16 %v348_v31, %v347_v29  ;;  %v541_v39 = vpack.c.bf16 %v356_v32, %v355_v30  ;;  %v591_v40 = vadd.f32 %v590_v36, %v589_v33  ;;  %v615_v41 = vadd.f32 %v614_v37, %v613_v35  ;;  %v592_v42 = vpop.f32.mrb[14].mxu0  ;;  %v616_v43 = vpop.f32.mrb[14].mxu1 }
 0x110   :  { %v593_v44 = vpop.f32.mrb[15].mxu0  ;;  %v617_v45 = vpop.f32.mrb[15].mxu1 }
 0x111   :  { %549 = vst [vmem:[%s839_s3 + $0x10] sm:$0xff] %v521_v38   ;;  %553 = vst [vmem:[%s839_s3 + $0x30] sm:$0xff] %v541_v39   ;;  %v305_v46 = vadd.f32 %v591_v40, %v794_v34  ;;  %v337_v47 = vadd.f32 %v615_v41, %v794_v34  ;;  %v594_v48 = vadd.f32 %v593_v44, %v592_v42 }
 0x112   :  { %v618_v49 = vadd.f32 %v617_v45, %v616_v43 }
 0x113   :  { %v308_v50 = vadd.f32 %v594_v48, %v794_v34  ;;  %v349_v52 = vmax.f32 %v305_v46, 0.0  ;;  %v357_v53 = vmax.f32 %v337_v47, 0.0 }
 0x114   :  { %v340_v51 = vadd.f32 %v618_v49, %v794_v34 }
 0x115   :  { %v350_v54 = vmax.f32 %v308_v50, 0.0 }
 0x116   :  { %v358_v55 = vmax.f32 %v340_v51, 0.0 }
 0x117   :  { %v526_v56 = vpack.c.bf16 %v350_v54, %v349_v52 }
 0x118   :  { %v546_v57 = vpack.c.bf16 %v358_v55, %v357_v53 }
 0x119   :  { %550 = vst [vmem:[%s839_s3 + $0x18] sm:$0xff] %v526_v56  }
 0x11a   :  { %554 = vst [vmem:[%s839_s3 + $0x38] sm:$0xff] %v546_v57  }

// kernel: resnet_forward.14
= control target key start
LH: loop header
LB: loop body
LE: loop exit
PB: predicated region body
PF: predicated region fallthrough
CT: control target
= control target key end

     0   :  { %s970_s1 = inlined_call_operand.vmem [shape: bf16[640,128], index: 1, kind: input, shape index: {}]   ;;  %s971_s0 = inlined_call_operand.vmem [shape: bf16[32,640], index: 0, kind: input, shape index: {}]   ;;  %s972_s2 = inlined_call_operand.vmem [shape: f32[1,128], index: 2, kind: input, shape index: {}]   ;;  %s973_s3 = inlined_call_operand.vmem [shape: bf16[32,128], index: 3, kind: output, shape index: {}]  }
   0x1   :  { %v737_v0 = vld [vmem:[%s970_s1 + $0x40] sm:$0xff]   ;;  %v741_v4 = vld [vmem:[%s970_s1 + $0x48] sm:$0xff]   ;;  %v745_v8 = vld [vmem:[%s970_s1 + $0x50] sm:$0xff]  }
   0x2   :  { %v738_v1 = vld [vmem:[%s970_s1] sm:$0xff]   ;;  %651 = vmatprep.subr.bf16.mxu0 %v737_v0  ;;  %v742_v5 = vld [vmem:[%s970_s1 + $0x8] sm:$0xff]   ;;  %v746_v9 = vld [vmem:[%s970_s1 + $0x10] sm:$0xff]  }
   0x3   :  { %v739_v2 = vld [vmem:[%s970_s1 + $0xc0] sm:$0xff]   ;;  %652 = vmatpush3.bf16.msra.mxu0 %v738_v1  ;;  %v743_v6 = vld [vmem:[%s970_s1 + $0xc8] sm:$0xff]   ;;  %v747_v10 = vld [vmem:[%s970_s1 + $0xd0] sm:$0xff]  }
   0x4   :  { %v740_v3 = vld [vmem:[%s970_s1 + $0x80] sm:$0xff]   ;;  %679 = vmatprep.subr.bf16.mxu1 %v739_v2  ;;  %653 = vmatprep.subr.bf16.mxu0 %v741_v4  ;;  %v744_v7 = vld [vmem:[%s970_s1 + $0x88] sm:$0xff]   ;;  %v748_v11 = vld [vmem:[%s970_s1 + $0x90] sm:$0xff]  }
   0x5   :  { %680 = vmatpush3.bf16.msra.mxu1 %v740_v3  ;;  %v749_v12 = vld [vmem:[%s970_s1 + $0x58] sm:$0xff]   ;;  %v753_v16 = vld [vmem:[%s970_s1 + $0x60] sm:$0xff]   ;;  %v757_v20 = vld [vmem:[%s970_s1 + $0x68] sm:$0xff]  }
   0x6   :  { %681 = vmatprep.subr.bf16.mxu1 %v743_v6  ;;  %v750_v13 = vld [vmem:[%s970_s1 + $0x18] sm:$0xff]   ;;  %v754_v17 = vld [vmem:[%s970_s1 + $0x20] sm:$0xff]   ;;  %v758_v21 = vld [vmem:[%s970_s1 + $0x28] sm:$0xff]  }
   0x7   :  { %654 = vmatpush3.bf16.msra.mxu0 %v742_v5  ;;  %v751_v14 = vld [vmem:[%s970_s1 + $0xd8] sm:$0xff]   ;;  %v755_v18 = vld [vmem:[%s970_s1 + $0xe0] sm:$0xff]   ;;  %v759_v22 = vld [vmem:[%s970_s1 + $0xe8] sm:$0xff]  }
   0x8   :  { %655 = vmatprep.subr.bf16.mxu0 %v745_v8  ;;  %v752_v15 = vld [vmem:[%s970_s1 + $0x98] sm:$0xff]   ;;  %v756_v19 = vld [vmem:[%s970_s1 + $0xa0] sm:$0xff]   ;;  %v760_v23 = vld [vmem:[%s970_s1 + $0xa8] sm:$0xff]  }
   0x9   :  { %682 = vmatpush3.bf16.msra.mxu1 %v744_v7  ;;  %v761_v24 = vld [vmem:[%s970_s1 + $0x70] sm:$0xff]   ;;  %v765_v28 = vld [vmem:[%s970_s1 + $0x78] sm:$0xff]   ;;  %v772_v34 = vld [vmem:[%s970_s1 + $0x100] sm:$0xff]  }
   0xa   :  { %683 = vmatprep.subr.bf16.mxu1 %v747_v10  ;;  %v762_v25 = vld [vmem:[%s970_s1 + $0x30] sm:$0xff]   ;;  %v766_v29 = vld [vmem:[%s970_s1 + $0x38] sm:$0xff]   ;;  %v775_v36 = vld [vmem:[%s971_s0 + $0xc] ss:$20 sps:$4 sm:$0xff]  }
   0xb   :  { %656 = vmatpush3.bf16.msra.mxu0 %v746_v9  ;;  %v763_v26 = vld [vmem:[%s970_s1 + $0xf0] sm:$0xff]   ;;  %v767_v30 = vld [vmem:[%s970_s1 + $0xf8] sm:$0xff]   ;;  %v776_v37 = vld [vmem:[%s970_s1 + $0x108] sm:$0xff]   ;;  %487 = vmatprep.mubr.bf16.mxu1 %v775_v36 }
   0xc   :  { %657 = vmatprep.subr.bf16.mxu0 %v749_v12  ;;  %v764_v27 = vld [vmem:[%s970_s1 + $0xb0] sm:$0xff]   ;;  %v770_v32 = vld [vmem:[%s971_s0 + $0x4] ss:$20 sps:$4 sm:$0xff]   ;;  %v773_v35 = vld [vmem:[%s971_s0 + $0x8] ss:$20 sps:$4 sm:$0xff]  }
   0xd   :  { %684 = vmatpush3.bf16.msra.mxu1 %v748_v11  ;;  %v768_v31 = vld [vmem:[%s971_s0] ss:$20 sps:$4 sm:$0xff]   ;;  %v771_v33 = vld [vmem:[%s970_s1 + $0xb8] sm:$0xff]   ;;  %438 = vmatprep.mubr.bf16.mxu0 %v770_v32  ;;  %v786_v43 = vld [vmem:[%s971_s0 + $0x30] ss:$20 sps:$4 sm:$0xff]  }
   0xe   :  { %685 = vmatprep.subr.bf16.mxu1 %v751_v14  ;;  %v777_v38 = vld [vmem:[%s970_s1 + $0x110] sm:$0xff]   ;;  %v780_v39 = vld [vmem:[%s971_s0 + $0x2c] ss:$20 sps:$4 sm:$0xff]   ;;  %v778_v40 = vld [vmem:[%s970_s1 + $0x118] sm:$0xff]  }
   0xf   :  { %658 = vmatpush3.bf16.msra.mxu0 %v750_v13  ;;  %v783_v41 = vld [vmem:[%s971_s0 + $0x28] ss:$20 sps:$4 sm:$0xff]   ;;  %v779_v44 = vld [vmem:[%s970_s1 + $0x120] sm:$0xff]   ;;  %v787_v47 = vld [vmem:[%s970_s1 + $0x130] sm:$0xff]  }
  0x10   :  { %659 = vmatprep.subr.bf16.mxu0 %v753_v16  ;;  %v784_v42 = vld [vmem:[%s971_s0 + $0x34] ss:$20 sps:$4 sm:$0xff]   ;;  %v789_v45 = vld [vmem:[%s971_s0 + $0x10] ss:$20 sps:$4 sm:$0xff]   ;;  %v788_v48 = vld [vmem:[%s970_s1 + $0x138] sm:$0xff]  }
  0x11   :  { %686 = vmatpush3.bf16.msra.mxu1 %v752_v15  ;;  %v782_v46 = vld [vmem:[%s970_s1 + $0x128] sm:$0xff]   ;;  %v581_v51 = vld [vmem:[%s972_s2] ss:$0 sm:$0xff] }
  0x12   :  { %687 = vmatprep.subr.bf16.mxu1 %v755_v18  ;;  %v790_v49 = vld [vmem:[%s971_s0 + $0x38] ss:$20 sps:$4 sm:$0xff]  }
  0x13   :  { %660 = vmatpush3.bf16.msra.mxu0 %v754_v17 }
  0x14   :  { %661 = vmatprep.subr.bf16.mxu0 %v757_v20 }
  0x15   :  { %688 = vmatpush3.bf16.msra.mxu1 %v756_v19 }
  0x16   :  { %689 = vmatprep.subr.bf16.mxu1 %v759_v22 }
  0x17   :  { %662 = vmatpush3.bf16.msra.mxu0 %v758_v21 }
  0x18   :  { %663 = vmatprep.subr.bf16.mxu0 %v761_v24 }
  0x19   :  { %690 = vmatpush3.bf16.msra.mxu1 %v760_v23 }
  0x1a   :  { %691 = vmatprep.subr.bf16.mxu1 %v763_v26 }
  0x1b   :  { %664 = vmatpush3.bf16.msra.mxu0 %v762_v25 }
  0x1c   :  { %665 = vmatprep.subr.bf16.mxu0 %v765_v28 }
  0x1d   :  { %692 = vmatpush3.bf16.msra.mxu1 %v764_v27 }
  0x1e   :  { %693 = vmatprep.subr.bf16.mxu1 %v767_v30 }
  0x1f   :  { %666 = vmatpush3.bf16.msra.mxu0 %v766_v29 }
  0x20   :  { %717 = vmatprep.subr.bf16.mxu0 %v772_v34 }
  0x21   :  { %694 = vmatpush3.bf16.msra.mxu1 %v771_v33 }
  0x22   :  { %439 = vmatmul.mubr.bf16.vlgmr.msra.gmra.mrb[0].mxu0 %v768_v31 }
  0x23   :  { %718 = vmatpush3.bf16.msra.mxu0 %v772_v34  ;;  %446 = vmatprep.mubr.bf16.mxu0 %v780_v39 }
  0x24   :  { %488 = vmatmul.mubr.bf16.vlgmr.msra.gmra.mrb[0].mxu1 %v773_v35  ;;  %719 = vmatprep.subr.bf16.mxu0 %v776_v37 }
  0x25   :  { %495 = vmatprep.mubr.bf16.mxu1 %v784_v42 }
  0x27   :  { %720 = vmatpush3.bf16.msra.mxu0 %v776_v37 }
  0x28   :  { %721 = vmatprep.subr.bf16.mxu0 %v777_v38 }
  0x2a   :  { %447 = vmatmul.mubr.bf16.gmra.mrb[4].mxu0 %v783_v41 }
  0x2b   :  { %722 = vmatpush3.bf16.msra.mxu0 %v777_v38  ;;  %733 = vmatprep.mubr.bf16.mxu0 %v789_v45 }
  0x2c   :  { %723 = vmatprep.subr.bf16.mxu0 %v778_v40  ;;  %496 = vmatmul.mubr.bf16.gmra.mrb[4].mxu1 %v786_v43 }
  0x2f   :  { %724 = vmatpush3.bf16.msra.mxu0 %v778_v40 }
  0x30   :  { %725 = vmatprep.subr.bf16.mxu0 %v779_v44 }
  0x33   :  { %726 = vmatpush3.bf16.msra.mxu0 %v779_v44 }
  0x34   :  { %727 = vmatprep.subr.bf16.mxu0 %v782_v46 }
  0x37   :  { %728 = vmatpush3.bf16.msra.mxu0 %v782_v46 }
  0x38   :  { %729 = vmatprep.subr.bf16.mxu0 %v787_v47 }
  0x3b   :  { %730 = vmatpush3.bf16.msra.mxu0 %v787_v47 }
  0x3c   :  { %731 = vmatprep.subr.bf16.mxu0 %v788_v48 }
  0x3f   :  { %732 = vmatpush3.bf16.msra.mxu0 %v788_v48 }
  0x42   :  { %734 = vmatmul.mubr.bf16.vlgmr.msra.gmra.mrb[8].mxu0 %v790_v49 }
  0xf5   :  { %v667_v50 = vpop.f32.mrb[0].mxu0 }
  0xf6   :  { %v668_v52 = vpop.f32.mrb[1].mxu0 }
  0xf7   :  { %v669_v53 = vadd.f32 %v668_v52, %v667_v50  ;;  %v670_v54 = vpop.f32.mrb[2].mxu0  ;;  %v695_v55 = vpop.f32.mrb[0].mxu1 }
  0xf8   :  { %v671_v56 = vpop.f32.mrb[3].mxu0  ;;  %v696_v59 = vpop.f32.mrb[1].mxu1 }
  0xf9   :  { %v441_v57 = vadd.f32 %v669_v53, %v581_v51  ;;  %v672_v58 = vadd.f32 %v671_v56, %v670_v54  ;;  %v697_v60 = vadd.f32 %v696_v59, %v695_v55  ;;  %v698_v61 = vpop.f32.mrb[2].mxu1 }
  0xfa   :  { %v699_v63 = vpop.f32.mrb[3].mxu1 }
  0xfb   :  { %v444_v62 = vadd.f32 %v672_v58, %v581_v51  ;;  %v700_v0 = vadd.f32 %v699_v63, %v698_v61  ;;  %v490_v1 = vadd.f32 %v697_v60, %v441_v57 }
  0xfd   :  { %v673_v2 = vpop.f32.mrb[4].mxu0  ;;  %v493_v4 = vadd.f32 %v700_v0, %v444_v62 }
  0xfe   :  { %v674_v3 = vpop.f32.mrb[5].mxu0 }
  0xff   :  { %v675_v5 = vadd.f32 %v674_v3, %v673_v2  ;;  %v676_v6 = vpop.f32.mrb[6].mxu0  ;;  %v701_v7 = vpop.f32.mrb[4].mxu1 }
 0x100   :  { %v677_v8 = vpop.f32.mrb[7].mxu0  ;;  %v702_v11 = vpop.f32.mrb[5].mxu1 }
 0x101   :  { %v449_v9 = vadd.f32 %v675_v5, %v581_v51  ;;  %v678_v10 = vadd.f32 %v677_v8, %v676_v6  ;;  %v703_v12 = vadd.f32 %v702_v11, %v701_v7  ;;  %v704_v13 = vpop.f32.mrb[6].mxu1 }
 0x102   :  { %v705_v15 = vpop.f32.mrb[7].mxu1 }
 0x103   :  { %v452_v14 = vadd.f32 %v678_v10, %v581_v51  ;;  %v706_v16 = vadd.f32 %v705_v15, %v704_v13  ;;  %v498_v17 = vadd.f32 %v703_v12, %v449_v9 }
 0x105   :  { %v501_v18 = vadd.f32 %v706_v16, %v452_v14 }
 0x115   :  { %v735_v19 = vpop.f32.mrb[8].mxu0 }
 0x116   :  { %v547_v20 = vadd.f32 %v735_v19, %v498_v17  ;;  %v538_v21 = vpop.f32.mrb[9].mxu0 }
 0x117   :  { %v539_v22 = vadd.f32 %v538_v21, %v490_v1  ;;  %v736_v23 = vpop.f32.mrb[10].mxu0 }
 0x118   :  { %v550_v24 = vadd.f32 %v736_v23, %v501_v18  ;;  %v541_v25 = vpop.f32.mrb[11].mxu0  ;;  %v555_v27 = vmax.f32 %v547_v20, 0.0 }
 0x119   :  { %v542_v26 = vadd.f32 %v541_v25, %v493_v4  ;;  %v553_v29 = vmax.f32 %v539_v22, 0.0 }
 0x11a   :  { %v556_v28 = vmax.f32 %v550_v24, 0.0 }
 0x11b   :  { %v554_v30 = vmax.f32 %v542_v26, 0.0 }
 0x11c   :  { %v648_v31 = vpack.c.bf16 %v556_v28, %v555_v27 }
 0x11d   :  { %v643_v32 = vpack.c.bf16 %v554_v30, %v553_v29 }
 0x11e   :  { %650 = vst [vmem:[%s973_s3 + $0x8] sm:$0xff] %v648_v31  }
 0x11f   :  { %644 = vst [vmem:[%s973_s3] sm:$0xff] %v643_v32  }

// kernel: resnet_forward.15
= control target key start
LH: loop header
LB: loop body
LE: loop exit
PB: predicated region body
PF: predicated region fallthrough
CT: control target
= control target key end

     0   :  { %s1005_s1 = inlined_call_operand.vmem [shape: bf16[640,128], index: 1, kind: input, shape index: {}]   ;;  %s1006_s0 = inlined_call_operand.vmem [shape: bf16[32,640], index: 0, kind: input, shape index: {}]   ;;  %s1007_s2 = inlined_call_operand.vmem [shape: f32[1,128], index: 2, kind: input, shape index: {}]   ;;  %s1008_s3 = inlined_call_operand.vmem [shape: bf16[32,128], index: 3, kind: input, shape index: {}]   ;;  %s1009_s4 = inlined_call_operand.vmem [shape: bf16[32,128], index: 4, kind: output, shape index: {}]  }
   0x1   :  { %v761_v0 = vld [vmem:[%s1005_s1 + $0x40] sm:$0xff]   ;;  %v765_v4 = vld [vmem:[%s1005_s1 + $0x48] sm:$0xff]   ;;  %v769_v8 = vld [vmem:[%s1005_s1 + $0x50] sm:$0xff]  }
   0x2   :  { %v762_v1 = vld [vmem:[%s1005_s1] sm:$0xff]   ;;  %675 = vmatprep.subr.bf16.mxu0 %v761_v0  ;;  %v766_v5 = vld [vmem:[%s1005_s1 + $0x8] sm:$0xff]   ;;  %v770_v9 = vld [vmem:[%s1005_s1 + $0x10] sm:$0xff]  }
   0x3   :  { %v763_v2 = vld [vmem:[%s1005_s1 + $0xc0] sm:$0xff]   ;;  %676 = vmatpush3.bf16.msra.mxu0 %v762_v1  ;;  %v767_v6 = vld [vmem:[%s1005_s1 + $0xc8] sm:$0xff]   ;;  %v771_v10 = vld [vmem:[%s1005_s1 + $0xd0] sm:$0xff]  }
   0x4   :  { %v764_v3 = vld [vmem:[%s1005_s1 + $0x80] sm:$0xff]   ;;  %703 = vmatprep.subr.bf16.mxu1 %v763_v2  ;;  %677 = vmatprep.subr.bf16.mxu0 %v765_v4  ;;  %v768_v7 = vld [vmem:[%s1005_s1 + $0x88] sm:$0xff]   ;;  %v772_v11 = vld [vmem:[%s1005_s1 + $0x90] sm:$0xff]  }
   0x5   :  { %704 = vmatpush3.bf16.msra.mxu1 %v764_v3  ;;  %v773_v12 = vld [vmem:[%s1005_s1 + $0x58] sm:$0xff]   ;;  %v777_v16 = vld [vmem:[%s1005_s1 + $0x60] sm:$0xff]   ;;  %v781_v20 = vld [vmem:[%s1005_s1 + $0x68] sm:$0xff]  }
   0x6   :  { %705 = vmatprep.subr.bf16.mxu1 %v767_v6  ;;  %v774_v13 = vld [vmem:[%s1005_s1 + $0x18] sm:$0xff]   ;;  %v778_v17 = vld [vmem:[%s1005_s1 + $0x20] sm:$0xff]   ;;  %v782_v21 = vld [vmem:[%s1005_s1 + $0x28] sm:$0xff]  }
   0x7   :  { %678 = vmatpush3.bf16.msra.mxu0 %v766_v5  ;;  %v775_v14 = vld [vmem:[%s1005_s1 + $0xd8] sm:$0xff]   ;;  %v779_v18 = vld [vmem:[%s1005_s1 + $0xe0] sm:$0xff]   ;;  %v783_v22 = vld [vmem:[%s1005_s1 + $0xe8] sm:$0xff]  }
   0x8   :  { %679 = vmatprep.subr.bf16.mxu0 %v769_v8  ;;  %v776_v15 = vld [vmem:[%s1005_s1 + $0x98] sm:$0xff]   ;;  %v780_v19 = vld [vmem:[%s1005_s1 + $0xa0] sm:$0xff]   ;;  %v784_v23 = vld [vmem:[%s1005_s1 + $0xa8] sm:$0xff]  }
   0x9   :  { %706 = vmatpush3.bf16.msra.mxu1 %v768_v7  ;;  %v785_v24 = vld [vmem:[%s1005_s1 + $0x70] sm:$0xff]   ;;  %v789_v28 = vld [vmem:[%s1005_s1 + $0x78] sm:$0xff]   ;;  %v796_v34 = vld [vmem:[%s1005_s1 + $0x100] sm:$0xff]  }
   0xa   :  { %707 = vmatprep.subr.bf16.mxu1 %v771_v10  ;;  %v786_v25 = vld [vmem:[%s1005_s1 + $0x30] sm:$0xff]   ;;  %v790_v29 = vld [vmem:[%s1005_s1 + $0x38] sm:$0xff]   ;;  %v799_v36 = vld [vmem:[%s1006_s0 + $0xc] ss:$20 sps:$4 sm:$0xff]  }
   0xb   :  { %680 = vmatpush3.bf16.msra.mxu0 %v770_v9  ;;  %v787_v26 = vld [vmem:[%s1005_s1 + $0xf0] sm:$0xff]   ;;  %v791_v30 = vld [vmem:[%s1005_s1 + $0xf8] sm:$0xff]   ;;  %v800_v37 = vld [vmem:[%s1005_s1 + $0x108] sm:$0xff]   ;;  %490 = vmatprep.mubr.bf16.mxu1 %v799_v36 }
   0xc   :  { %681 = vmatprep.subr.bf16.mxu0 %v773_v12  ;;  %v788_v27 = vld [vmem:[%s1005_s1 + $0xb0] sm:$0xff]   ;;  %v794_v32 = vld [vmem:[%s1006_s0 + $0x4] ss:$20 sps:$4 sm:$0xff]   ;;  %v797_v35 = vld [vmem:[%s1006_s0 + $0x8] ss:$20 sps:$4 sm:$0xff]  }
   0xd   :  { %708 = vmatpush3.bf16.msra.mxu1 %v772_v11  ;;  %v792_v31 = vld [vmem:[%s1006_s0] ss:$20 sps:$4 sm:$0xff]   ;;  %v795_v33 = vld [vmem:[%s1005_s1 + $0xb8] sm:$0xff]   ;;  %441 = vmatprep.mubr.bf16.mxu0 %v794_v32  ;;  %v810_v43 = vld [vmem:[%s1006_s0 + $0x30] ss:$20 sps:$4 sm:$0xff]  }
   0xe   :  { %709 = vmatprep.subr.bf16.mxu1 %v775_v14  ;;  %v801_v38 = vld [vmem:[%s1005_s1 + $0x110] sm:$0xff]   ;;  %v804_v39 = vld [vmem:[%s1006_s0 + $0x2c] ss:$20 sps:$4 sm:$0xff]   ;;  %v802_v40 = vld [vmem:[%s1005_s1 + $0x118] sm:$0xff]  }
   0xf   :  { %682 = vmatpush3.bf16.msra.mxu0 %v774_v13  ;;  %v807_v41 = vld [vmem:[%s1006_s0 + $0x28] ss:$20 sps:$4 sm:$0xff]   ;;  %v803_v44 = vld [vmem:[%s1005_s1 + $0x120] sm:$0xff]   ;;  %v811_v47 = vld [vmem:[%s1005_s1 + $0x130] sm:$0xff]  }
  0x10   :  { %683 = vmatprep.subr.bf16.mxu0 %v777_v16  ;;  %v808_v42 = vld [vmem:[%s1006_s0 + $0x34] ss:$20 sps:$4 sm:$0xff]   ;;  %v813_v45 = vld [vmem:[%s1006_s0 + $0x10] ss:$20 sps:$4 sm:$0xff]   ;;  %v812_v48 = vld [vmem:[%s1005_s1 + $0x138] sm:$0xff]  }
  0x11   :  { %710 = vmatpush3.bf16.msra.mxu1 %v776_v15  ;;  %v806_v46 = vld [vmem:[%s1005_s1 + $0x128] sm:$0xff]   ;;  %v596_v51 = vld [vmem:[%s1007_s2] ss:$0 sm:$0xff] }
  0x12   :  { %711 = vmatprep.subr.bf16.mxu1 %v779_v18  ;;  %v814_v49 = vld [vmem:[%s1006_s0 + $0x38] ss:$20 sps:$4 sm:$0xff]  }
  0x13   :  { %684 = vmatpush3.bf16.msra.mxu0 %v778_v17 }
  0x14   :  { %685 = vmatprep.subr.bf16.mxu0 %v781_v20  ;;  %v656_v20 = vld [vmem:[%s1008_s3] sm:$0xff]  }
  0x15   :  { %712 = vmatpush3.bf16.msra.mxu1 %v780_v19  ;;  %v673_v19 = vld [vmem:[%s1008_s3 + $0x8] sm:$0xff]  }
  0x16   :  { %713 = vmatprep.subr.bf16.mxu1 %v783_v22 }
  0x17   :  { %686 = vmatpush3.bf16.msra.mxu0 %v782_v21  ;;  %v661_v21 = vunpack.c.l.bf16 %v673_v19 }
  0x18   :  { %687 = vmatprep.subr.bf16.mxu0 %v785_v24 }
  0x19   :  { %714 = vmatpush3.bf16.msra.mxu1 %v784_v23  ;;  %v657_v23 = vunpack.c.l.bf16 %v656_v20 }
  0x1a   :  { %715 = vmatprep.subr.bf16.mxu1 %v787_v26  ;;  %v662_v26 = vunpack.c.h.bf16 %v673_v19 }
  0x1b   :  { %688 = vmatpush3.bf16.msra.mxu0 %v786_v25 }
  0x1c   :  { %689 = vmatprep.subr.bf16.mxu0 %v789_v28 }
  0x1d   :  { %716 = vmatpush3.bf16.msra.mxu1 %v788_v27 }
  0x1e   :  { %717 = vmatprep.subr.bf16.mxu1 %v791_v30 }
  0x1f   :  { %690 = vmatpush3.bf16.msra.mxu0 %v790_v29  ;;  %v658_v29 = vunpack.c.h.bf16 %v656_v20 }
  0x20   :  { %741 = vmatprep.subr.bf16.mxu0 %v796_v34 }
  0x21   :  { %718 = vmatpush3.bf16.msra.mxu1 %v795_v33 }
  0x22   :  { %442 = vmatmul.mubr.bf16.vlgmr.msra.gmra.mrb[0].mxu0 %v792_v31 }
  0x23   :  { %742 = vmatpush3.bf16.msra.mxu0 %v796_v34  ;;  %449 = vmatprep.mubr.bf16.mxu0 %v804_v39 }
  0x24   :  { %491 = vmatmul.mubr.bf16.vlgmr.msra.gmra.mrb[0].mxu1 %v797_v35  ;;  %743 = vmatprep.subr.bf16.mxu0 %v800_v37 }
  0x25   :  { %498 = vmatprep.mubr.bf16.mxu1 %v808_v42 }
  0x27   :  { %744 = vmatpush3.bf16.msra.mxu0 %v800_v37 }
  0x28   :  { %745 = vmatprep.subr.bf16.mxu0 %v801_v38 }
  0x2a   :  { %450 = vmatmul.mubr.bf16.gmra.mrb[4].mxu0 %v807_v41 }
  0x2b   :  { %746 = vmatpush3.bf16.msra.mxu0 %v801_v38  ;;  %757 = vmatprep.mubr.bf16.mxu0 %v813_v45 }
  0x2c   :  { %747 = vmatprep.subr.bf16.mxu0 %v802_v40  ;;  %499 = vmatmul.mubr.bf16.gmra.mrb[4].mxu1 %v810_v43 }
  0x2f   :  { %748 = vmatpush3.bf16.msra.mxu0 %v802_v40 }
  0x30   :  { %749 = vmatprep.subr.bf16.mxu0 %v803_v44 }
  0x33   :  { %750 = vmatpush3.bf16.msra.mxu0 %v803_v44 }
  0x34   :  { %751 = vmatprep.subr.bf16.mxu0 %v806_v46 }
  0x37   :  { %752 = vmatpush3.bf16.msra.mxu0 %v806_v46 }
  0x38   :  { %753 = vmatprep.subr.bf16.mxu0 %v811_v47 }
  0x3b   :  { %754 = vmatpush3.bf16.msra.mxu0 %v811_v47 }
  0x3c   :  { %755 = vmatprep.subr.bf16.mxu0 %v812_v48 }
  0x3f   :  { %756 = vmatpush3.bf16.msra.mxu0 %v812_v48 }
  0x42   :  { %758 = vmatmul.mubr.bf16.vlgmr.msra.gmra.mrb[8].mxu0 %v814_v49 }
  0xf5   :  { %v691_v50 = vpop.f32.mrb[0].mxu0 }
  0xf6   :  { %v692_v52 = vpop.f32.mrb[1].mxu0 }
  0xf7   :  { %v693_v53 = vadd.f32 %v692_v52, %v691_v50  ;;  %v694_v54 = vpop.f32.mrb[2].mxu0  ;;  %v719_v55 = vpop.f32.mrb[0].mxu1 }
  0xf8   :  { %v695_v56 = vpop.f32.mrb[3].mxu0  ;;  %v720_v59 = vpop.f32.mrb[1].mxu1 }
  0xf9   :  { %v444_v57 = vadd.f32 %v693_v53, %v596_v51  ;;  %v696_v58 = vadd.f32 %v695_v56, %v694_v54  ;;  %v721_v60 = vadd.f32 %v720_v59, %v719_v55  ;;  %v722_v61 = vpop.f32.mrb[2].mxu1 }
  0xfa   :  { %v723_v63 = vpop.f32.mrb[3].mxu1 }
  0xfb   :  { %v447_v62 = vadd.f32 %v696_v58, %v596_v51  ;;  %v724_v0 = vadd.f32 %v723_v63, %v722_v61  ;;  %v493_v1 = vadd.f32 %v721_v60, %v444_v57 }
  0xfd   :  { %v697_v2 = vpop.f32.mrb[4].mxu0  ;;  %v496_v4 = vadd.f32 %v724_v0, %v447_v62 }
  0xfe   :  { %v698_v3 = vpop.f32.mrb[5].mxu0 }
  0xff   :  { %v699_v5 = vadd.f32 %v698_v3, %v697_v2  ;;  %v700_v6 = vpop.f32.mrb[6].mxu0  ;;  %v725_v7 = vpop.f32.mrb[4].mxu1 }
 0x100   :  { %v701_v8 = vpop.f32.mrb[7].mxu0  ;;  %v726_v11 = vpop.f32.mrb[5].mxu1 }
 0x101   :  { %v452_v9 = vadd.f32 %v699_v5, %v596_v51  ;;  %v702_v10 = vadd.f32 %v701_v8, %v700_v6  ;;  %v727_v12 = vadd.f32 %v726_v11, %v725_v7  ;;  %v728_v13 = vpop.f32.mrb[6].mxu1 }
 0x102   :  { %v729_v15 = vpop.f32.mrb[7].mxu1 }
 0x103   :  { %v455_v14 = vadd.f32 %v702_v10, %v596_v51  ;;  %v730_v16 = vadd.f32 %v729_v15, %v728_v13  ;;  %v501_v17 = vadd.f32 %v727_v12, %v452_v9 }
 0x105   :  { %v504_v18 = vadd.f32 %v730_v16, %v455_v14 }
 0x115   :  { %v759_v22 = vpop.f32.mrb[8].mxu0 }
 0x116   :  { %v550_v24 = vadd.f32 %v759_v22, %v501_v17  ;;  %v541_v25 = vpop.f32.mrb[9].mxu0 }
 0x117   :  { %v542_v27 = vadd.f32 %v541_v25, %v493_v1  ;;  %v760_v28 = vpop.f32.mrb[10].mxu0 }
 0x118   :  { %v566_v30 = vadd.f32 %v661_v21, %v550_v24  ;;  %v553_v31 = vadd.f32 %v760_v28, %v504_v18  ;;  %v544_v32 = vpop.f32.mrb[11].mxu0 }
 0x119   :  { %v564_v33 = vadd.f32 %v657_v23, %v542_v27  ;;  %v545_v34 = vadd.f32 %v544_v32, %v496_v4 }
 0x11a   :  { %v567_v35 = vadd.f32 %v662_v26, %v553_v31  ;;  %v570_v37 = vmax.f32 %v566_v30, 0.0 }
 0x11b   :  { %v565_v36 = vadd.f32 %v658_v29, %v545_v34  ;;  %v568_v39 = vmax.f32 %v564_v33, 0.0 }
 0x11c   :  { %v571_v38 = vmax.f32 %v567_v35, 0.0 }
 0x11d   :  { %v569_v40 = vmax.f32 %v565_v36, 0.0 }
 0x11e   :  { %v671_v41 = vpack.c.bf16 %v571_v38, %v570_v37 }
 0x11f   :  { %v666_v42 = vpack.c.bf16 %v569_v40, %v568_v39 }
 0x120   :  { %674 = vst [vmem:[%s1009_s4 + $0x8] sm:$0xff] %v671_v41  }
 0x121   :  { %667 = vst [vmem:[%s1009_s4] sm:$0xff] %v666_v42  }

// kernel: resnet_forward.17
= control target key start
LH: loop header
LB: loop body
LE: loop exit
PB: predicated region body
PF: predicated region fallthrough
CT: control target
= control target key end

     0   :  { %v208_v0 = vmov 0.0   ;;  %vm209_vm0 = vmmov 0   ;;  %s263_s1 = inlined_call_operand.vmem [shape: bf16[128,128], index: 1, kind: input, shape index: {}]   ;;  %s264_s0 = inlined_call_operand.vmem [shape: bf16[16,128], index: 0, kind: input, shape index: {}]   ;;  %s265_s2 = inlined_call_operand.vmem [shape: f32[1,128], index: 2, kind: input, shape index: {}]   ;;  %s266_s3 = inlined_call_operand.vmem [shape: bf16[16,128], index: 3, kind: output, shape index: {}]  }
   0x1   :  { %177 = vmatprep.subr.bf16.mxu0 %v208_v0  ;;  %v199_v1 = vld [vmem:[%s263_s1] sm:$0xff]   ;;  %193 = vmatprep.mubr.msk.bf16.mxu0 %vm209_vm0, %v208_v0  ;;  %v200_v2 = vld [vmem:[%s263_s1 + $0x8] sm:$0xff]   ;;  %v201_v3 = vld [vmem:[%s263_s1 + $0x10] sm:$0xff]  }
   0x2   :  { %178 = vmatpush3.bf16.msra.mxu0 %v199_v1  ;;  %v202_v4 = vld [vmem:[%s263_s1 + $0x18] sm:$0xff]   ;;  %v203_v5 = vld [vmem:[%s263_s1 + $0x20] sm:$0xff]   ;;  %v204_v6 = vld [vmem:[%s263_s1 + $0x28] sm:$0xff]  }
   0x3   :  { %179 = vmatprep.subr.bf16.mxu0 %v208_v0  ;;  %v205_v7 = vld [vmem:[%s263_s1 + $0x30] sm:$0xff]   ;;  %v206_v8 = vld [vmem:[%s263_s1 + $0x38] sm:$0xff]   ;;  %v207_v9 = vld [vmem:[%s264_s0] sm:$0xff]  }
   0x4   :  { %v149_v10 = vld [vmem:[%s265_s2] ss:$0 sm:$0xff] }
   0x6   :  { %180 = vmatpush3.bf16.msra.mxu0 %v200_v2 }
   0x7   :  { %181 = vmatprep.subr.bf16.mxu0 %v208_v0 }
   0xa   :  { %182 = vmatpush3.bf16.msra.mxu0 %v201_v3 }
   0xb   :  { %183 = vmatprep.subr.bf16.mxu0 %v208_v0 }
   0xe   :  { %184 = vmatpush3.bf16.msra.mxu0 %v202_v4 }
   0xf   :  { %185 = vmatprep.subr.bf16.mxu0 %v208_v0 }
  0x12   :  { %186 = vmatpush3.bf16.msra.mxu0 %v203_v5 }
  0x13   :  { %187 = vmatprep.subr.bf16.mxu0 %v208_v0 }
  0x16   :  { %188 = vmatpush3.bf16.msra.mxu0 %v204_v6 }
  0x17   :  { %189 = vmatprep.subr.bf16.mxu0 %v208_v0 }
  0x1a   :  { %190 = vmatpush3.bf16.msra.mxu0 %v205_v7 }
  0x1b   :  { %191 = vmatprep.subr.bf16.mxu0 %v208_v0 }
  0x1e   :  { %192 = vmatpush3.bf16.msra.mxu0 %v206_v8 }
  0x21   :  { %194 = vmatmul.mubr.bf16.vlgmr.msra.gmra.mrb[0].mxu0 %v207_v9 }
  0xf4   :  { %v128_v11 = vpop.f32.mrb[0].mxu0 }
  0xf5   :  { %v195_v12 = vpop.f32.mrb[1].mxu0  ;;  %v129_v14 = vadd.f32 %v149_v10, %v128_v11 }
  0xf6   :  { %v131_v13 = vpop.f32.mrb[2].mxu0 }
  0xf7   :  { %v132_v15 = vadd.f32 %v149_v10, %v131_v13  ;;  %v196_v16 = vpop.f32.mrb[3].mxu0 }
  0xf9   :  { %v166_v17 = vpack.c.bf16 %v132_v15, %v129_v14 }
  0xfb   :  { %167 = vst [vmem:[%s266_s3] sm:$0xff] %v166_v17  }

// kernel: resnet_forward.16
= control target key start
LH: loop header
LB: loop body
LE: loop exit
PB: predicated region body
PF: predicated region fallthrough
CT: control target
= control target key end

     0   :  { %v690_v33 = vmov 0.0   ;;  %vm691_vm0 = vmmov 0   ;;  %s853_s1 = inlined_call_operand.vmem [shape: bf16[640,128], index: 1, kind: input, shape index: {}]   ;;  %s854_s0 = inlined_call_operand.vmem [shape: bf16[16,640], index: 0, kind: input, shape index: {}]   ;;  %s855_s2 = inlined_call_operand.vmem [shape: f32[1,128], index: 2, kind: input, shape index: {}]   ;;  %s856_s3 = inlined_call_operand.vmem [shape: bf16[16,128], index: 3, kind: output, shape index: {}]  }
   0x1   :  { %v643_v0 = vld [vmem:[%s853_s1 + $0x40] sm:$0xff]   ;;  %v647_v4 = vld [vmem:[%s853_s1 + $0x48] sm:$0xff]   ;;  %v651_v8 = vld [vmem:[%s853_s1 + $0x50] sm:$0xff]  }
   0x2   :  { %v644_v1 = vld [vmem:[%s853_s1] sm:$0xff]   ;;  %568 = vmatprep.subr.bf16.mxu0 %v643_v0  ;;  %v648_v5 = vld [vmem:[%s853_s1 + $0x8] sm:$0xff]   ;;  %v652_v9 = vld [vmem:[%s853_s1 + $0x10] sm:$0xff]  }
   0x3   :  { %v645_v2 = vld [vmem:[%s853_s1 + $0xc0] sm:$0xff]   ;;  %569 = vmatpush3.bf16.msra.mxu0 %v644_v1  ;;  %v649_v6 = vld [vmem:[%s853_s1 + $0xc8] sm:$0xff]   ;;  %v653_v10 = vld [vmem:[%s853_s1 + $0xd0] sm:$0xff]  }
   0x4   :  { %v646_v3 = vld [vmem:[%s853_s1 + $0x80] sm:$0xff]   ;;  %590 = vmatprep.subr.bf16.mxu1 %v645_v2  ;;  %570 = vmatprep.subr.bf16.mxu0 %v647_v4  ;;  %v650_v7 = vld [vmem:[%s853_s1 + $0x88] sm:$0xff]   ;;  %v654_v11 = vld [vmem:[%s853_s1 + $0x90] sm:$0xff]  }
   0x5   :  { %591 = vmatpush3.bf16.msra.mxu1 %v646_v3  ;;  %v655_v12 = vld [vmem:[%s853_s1 + $0x58] sm:$0xff]   ;;  %v659_v16 = vld [vmem:[%s853_s1 + $0x60] sm:$0xff]   ;;  %v663_v20 = vld [vmem:[%s853_s1 + $0x68] sm:$0xff]  }
   0x6   :  { %592 = vmatprep.subr.bf16.mxu1 %v649_v6  ;;  %v656_v13 = vld [vmem:[%s853_s1 + $0x18] sm:$0xff]   ;;  %v660_v17 = vld [vmem:[%s853_s1 + $0x20] sm:$0xff]   ;;  %v664_v21 = vld [vmem:[%s853_s1 + $0x28] sm:$0xff]  }
   0x7   :  { %571 = vmatpush3.bf16.msra.mxu0 %v648_v5  ;;  %v657_v14 = vld [vmem:[%s853_s1 + $0xd8] sm:$0xff]   ;;  %v661_v18 = vld [vmem:[%s853_s1 + $0xe0] sm:$0xff]   ;;  %v665_v22 = vld [vmem:[%s853_s1 + $0xe8] sm:$0xff]  }
   0x8   :  { %572 = vmatprep.subr.bf16.mxu0 %v651_v8  ;;  %v658_v15 = vld [vmem:[%s853_s1 + $0x98] sm:$0xff]   ;;  %v662_v19 = vld [vmem:[%s853_s1 + $0xa0] sm:$0xff]   ;;  %v666_v23 = vld [vmem:[%s853_s1 + $0xa8] sm:$0xff]  }
   0x9   :  { %593 = vmatpush3.bf16.msra.mxu1 %v650_v7  ;;  %v667_v24 = vld [vmem:[%s853_s1 + $0x70] sm:$0xff]   ;;  %v671_v28 = vld [vmem:[%s853_s1 + $0x78] sm:$0xff]   ;;  %v680_v36 = vld [vmem:[%s854_s0 + $0xc] ss:$20 sps:$4 sm:$0xff]  }
   0xa   :  { %594 = vmatprep.subr.bf16.mxu1 %v653_v10  ;;  %v668_v25 = vld [vmem:[%s853_s1 + $0x30] sm:$0xff]   ;;  %v672_v29 = vld [vmem:[%s853_s1 + $0x38] sm:$0xff]   ;;  %v681_v37 = vld [vmem:[%s853_s1 + $0x100] sm:$0xff]   ;;  %447 = vmatprep.mubr.bf16.mxu1 %v680_v36 }
   0xb   :  { %573 = vmatpush3.bf16.msra.mxu0 %v652_v9  ;;  %v669_v26 = vld [vmem:[%s853_s1 + $0xf0] sm:$0xff]   ;;  %v673_v30 = vld [vmem:[%s853_s1 + $0xf8] sm:$0xff]   ;;  %v682_v38 = vld [vmem:[%s853_s1 + $0x108] sm:$0xff]  }
   0xc   :  { %574 = vmatprep.subr.bf16.mxu0 %v655_v12  ;;  %v670_v27 = vld [vmem:[%s853_s1 + $0xb0] sm:$0xff]   ;;  %v676_v32 = vld [vmem:[%s854_s0 + $0x4] ss:$20 sps:$4 sm:$0xff]   ;;  %v678_v35 = vld [vmem:[%s854_s0 + $0x8] ss:$20 sps:$4 sm:$0xff]  }
   0xd   :  { %595 = vmatpush3.bf16.msra.mxu1 %v654_v11  ;;  %v674_v31 = vld [vmem:[%s854_s0] ss:$20 sps:$4 sm:$0xff]   ;;  %v677_v34 = vld [vmem:[%s853_s1 + $0xb8] sm:$0xff]   ;;  %406 = vmatprep.mubr.bf16.mxu0 %v676_v32  ;;  %v686_v42 = vld [vmem:[%s853_s1 + $0x128] sm:$0xff]  }
   0xe   :  { %596 = vmatprep.subr.bf16.mxu1 %v657_v14  ;;  %v683_v39 = vld [vmem:[%s853_s1 + $0x110] sm:$0xff]   ;;  %v684_v40 = vld [vmem:[%s853_s1 + $0x118] sm:$0xff]   ;;  %v685_v41 = vld [vmem:[%s853_s1 + $0x120] sm:$0xff]  }
   0xf   :  { %575 = vmatpush3.bf16.msra.mxu0 %v656_v13  ;;  %v687_v43 = vld [vmem:[%s853_s1 + $0x130] sm:$0xff]   ;;  %v688_v44 = vld [vmem:[%s853_s1 + $0x138] sm:$0xff]   ;;  %v513_v47 = vld [vmem:[%s855_s2] ss:$0 sm:$0xff] }
  0x10   :  { %576 = vmatprep.subr.bf16.mxu0 %v659_v16  ;;  %v689_v45 = vld [vmem:[%s854_s0 + $0x10] ss:$20 sps:$4 sm:$0xff]  }
  0x11   :  { %597 = vmatpush3.bf16.msra.mxu1 %v658_v15 }
  0x12   :  { %598 = vmatprep.subr.bf16.mxu1 %v661_v18 }
  0x13   :  { %577 = vmatpush3.bf16.msra.mxu0 %v660_v17 }
  0x14   :  { %578 = vmatprep.subr.bf16.mxu0 %v663_v20 }
  0x15   :  { %599 = vmatpush3.bf16.msra.mxu1 %v662_v19 }
  0x16   :  { %600 = vmatprep.subr.bf16.mxu1 %v665_v22 }
  0x17   :  { %579 = vmatpush3.bf16.msra.mxu0 %v664_v21 }
  0x18   :  { %580 = vmatprep.subr.bf16.mxu0 %v667_v24 }
  0x19   :  { %601 = vmatpush3.bf16.msra.mxu1 %v666_v23 }
  0x1a   :  { %602 = vmatprep.subr.bf16.mxu1 %v669_v26 }
  0x1b   :  { %581 = vmatpush3.bf16.msra.mxu0 %v668_v25 }
  0x1c   :  { %582 = vmatprep.subr.bf16.mxu0 %v671_v28 }
  0x1d   :  { %603 = vmatpush3.bf16.msra.mxu1 %v670_v27 }
  0x1e   :  { %604 = vmatprep.subr.bf16.mxu1 %v673_v30 }
  0x1f   :  { %583 = vmatpush3.bf16.msra.mxu0 %v672_v29 }
  0x20   :  { %621 = vmatprep.subr.bf16.mxu0 %v690_v33 }
  0x21   :  { %605 = vmatpush3.bf16.msra.mxu1 %v677_v34 }
  0x22   :  { %407 = vmatmul.mubr.bf16.vlgmr.msra.gmra.mrb[0].mxu0 %v674_v31 }
  0x23   :  { %637 = vmatprep.mubr.msk.bf16.mxu0 %vm691_vm0, %v690_v33  ;;  %622 = vmatpush3.bf16.msra.mxu0 %v681_v37 }
  0x24   :  { %448 = vmatmul.mubr.bf16.vlgmr.msra.gmra.mrb[0].mxu1 %v678_v35  ;;  %623 = vmatprep.subr.bf16.mxu0 %v690_v33 }
  0x27   :  { %624 = vmatpush3.bf16.msra.mxu0 %v682_v38 }
  0x28   :  { %625 = vmatprep.subr.bf16.mxu0 %v690_v33 }
  0x2b   :  { %626 = vmatpush3.bf16.msra.mxu0 %v683_v39 }
  0x2c   :  { %627 = vmatprep.subr.bf16.mxu0 %v690_v33 }
  0x2f   :  { %628 = vmatpush3.bf16.msra.mxu0 %v684_v40 }
  0x30   :  { %629 = vmatprep.subr.bf16.mxu0 %v690_v33 }
  0x33   :  { %630 = vmatpush3.bf16.msra.mxu0 %v685_v41 }
  0x34   :  { %631 = vmatprep.subr.bf16.mxu0 %v690_v33 }
  0x37   :  { %632 = vmatpush3.bf16.msra.mxu0 %v686_v42 }
  0x38   :  { %633 = vmatprep.subr.bf16.mxu0 %v690_v33 }
  0x3b   :  { %634 = vmatpush3.bf16.msra.mxu0 %v687_v43 }
  0x3c   :  { %635 = vmatprep.subr.bf16.mxu0 %v690_v33 }
  0x3f   :  { %636 = vmatpush3.bf16.msra.mxu0 %v688_v44 }
  0x42   :  { %638 = vmatmul.mubr.bf16.vlgmr.msra.gmra.mrb[4].mxu0 %v689_v45 }
  0xf5   :  { %v584_v46 = vpop.f32.mrb[0].mxu0 }
  0xf6   :  { %v585_v48 = vpop.f32.mrb[1].mxu0 }
  0xf7   :  { %v586_v49 = vadd.f32 %v585_v48, %v584_v46  ;;  %v587_v50 = vpop.f32.mrb[2].mxu0  ;;  %v606_v51 = vpop.f32.mrb[0].mxu1 }
  0xf8   :  { %v588_v52 = vpop.f32.mrb[3].mxu0  ;;  %v607_v55 = vpop.f32.mrb[1].mxu1 }
  0xf9   :  { %v409_v53 = vadd.f32 %v586_v49, %v513_v47  ;;  %v589_v54 = vadd.f32 %v588_v52, %v587_v50  ;;  %v608_v56 = vadd.f32 %v607_v55, %v606_v51  ;;  %v609_v57 = vpop.f32.mrb[2].mxu1 }
  0xfa   :  { %v610_v59 = vpop.f32.mrb[3].mxu1 }
  0xfb   :  { %v412_v58 = vadd.f32 %v589_v54, %v513_v47  ;;  %v611_v60 = vadd.f32 %v610_v59, %v609_v57  ;;  %v450_v61 = vadd.f32 %v608_v56, %v409_v53 }
  0xfd   :  { %v453_v62 = vadd.f32 %v611_v60, %v412_v58 }
 0x115   :  { %v490_v63 = vpop.f32.mrb[4].mxu0 }
 0x116   :  { %v491_v0 = vadd.f32 %v490_v63, %v450_v61  ;;  %v639_v1 = vpop.f32.mrb[5].mxu0 }
 0x117   :  { %v493_v2 = vpop.f32.mrb[6].mxu0 }
 0x118   :  { %v494_v3 = vadd.f32 %v493_v2, %v453_v62  ;;  %v640_v4 = vpop.f32.mrb[7].mxu0  ;;  %v497_v5 = vmax.f32 %v491_v0, 0.0 }
 0x11a   :  { %v498_v6 = vmax.f32 %v494_v3, 0.0 }
 0x11c   :  { %v566_v7 = vpack.c.bf16 %v498_v6, %v497_v5 }
 0x11e   :  { %567 = vst [vmem:[%s856_s3] sm:$0xff] %v566_v7  }

// kernel: resnet_forward.20
= control target key start
LH: loop header
LB: loop body
LE: loop exit
PB: predicated region body
PF: predicated region fallthrough
CT: control target
= control target key end

     0   :  { %v239_v1 = vmov 0   ;;  %v35_v18 = vlaneseq  ;;  %s320_s1 = inlined_call_operand.vmem [shape: bf16[128,256], index: 1, kind: input, shape index: {}]   ;;  %s321_s0 = inlined_call_operand.vmem [shape: bf16[16,128], index: 0, kind: input, shape index: {}]   ;;  %s322_s2 = inlined_call_operand.vmem [shape: f32[1,256], index: 2, kind: input, shape index: {}]   ;;  %s323_s3 = inlined_call_operand.vmem [shape: bf16[16,256], index: 3, kind: output, shape index: {}]  }
   0x1   :  { %v214_v0 = vld [vmem:[%s320_s1 + $0x4] ss:$8 sps:$4 sm:$0xff]   ;;  %163 = vmatprep.mubr.bf16.mxu0 %v239_v1  ;;  %v216_v2 = vld [vmem:[%s320_s1] ss:$8 sps:$4 sm:$0xff]   ;;  %v217_v3 = vld [vmem:[%s320_s1 + $0x14] ss:$8 sps:$4 sm:$0xff]  }
   0x2   :  { %131 = vmatprep.subr.bf16.mxu0 %v214_v0  ;;  %v219_v4 = vld [vmem:[%s320_s1 + $0x10] ss:$8 sps:$4 sm:$0xff]   ;;  %v220_v5 = vld [vmem:[%s320_s1 + $0x24] ss:$8 sps:$4 sm:$0xff]   ;;  %v222_v6 = vld [vmem:[%s320_s1 + $0x20] ss:$8 sps:$4 sm:$0xff]  }
   0x3   :  { %132 = vmatpush1.bf16.msra.mxu0 %v216_v2  ;;  %v223_v7 = vld [vmem:[%s320_s1 + $0x34] ss:$8 sps:$4 sm:$0xff]   ;;  %v225_v8 = vld [vmem:[%s320_s1 + $0x30] ss:$8 sps:$4 sm:$0xff]   ;;  %v226_v9 = vld [vmem:[%s320_s1 + $0x44] ss:$8 sps:$4 sm:$0xff]  }
   0x4   :  { %133 = vmatprep.subr.bf16.mxu0 %v217_v3  ;;  %v228_v10 = vld [vmem:[%s320_s1 + $0x40] ss:$8 sps:$4 sm:$0xff]   ;;  %v229_v11 = vld [vmem:[%s320_s1 + $0x54] ss:$8 sps:$4 sm:$0xff]   ;;  %v231_v12 = vld [vmem:[%s320_s1 + $0x50] ss:$8 sps:$4 sm:$0xff]  }
   0x5   :  { %v232_v13 = vld [vmem:[%s320_s1 + $0x64] ss:$8 sps:$4 sm:$0xff]   ;;  %v234_v14 = vld [vmem:[%s320_s1 + $0x60] ss:$8 sps:$4 sm:$0xff]   ;;  %v235_v15 = vld [vmem:[%s320_s1 + $0x74] ss:$8 sps:$4 sm:$0xff]  }
   0x6   :  { %v237_v16 = vld [vmem:[%s320_s1 + $0x70] ss:$8 sps:$4 sm:$0xff]   ;;  %v238_v17 = vld [vmem:[%s321_s0] sm:$0xff]   ;;  %v36_v19 = vshrl.u32 %v35_v18, 7 }
   0x7   :  { %134 = vmatpush1.bf16.msra.mxu0 %v219_v4  ;;  %v33_v21 = vld [vmem:[%s322_s2] sm:$0x3] }
   0x8   :  { %135 = vmatprep.subr.bf16.mxu0 %v220_v5  ;;  %v37_v20 = vsub.s32 0, %v36_v19  ;;  %v41_v22 = vsub.s32 1, %v36_v19 }
   0xa   :  { %v38_v23 = vrot.slane %v33_v21, %v37_v20  ;;  %v42_v24 = vrot.slane %v33_v21, %v41_v22 }
   0xb   :  { %136 = vmatpush1.bf16.msra.mxu0 %v222_v6 }
   0xc   :  { %137 = vmatprep.subr.bf16.mxu0 %v223_v7 }
   0xf   :  { %138 = vmatpush1.bf16.msra.mxu0 %v225_v8 }
  0x10   :  { %139 = vmatprep.subr.bf16.mxu0 %v226_v9 }
  0x13   :  { %140 = vmatpush1.bf16.msra.mxu0 %v228_v10 }
  0x14   :  { %141 = vmatprep.subr.bf16.mxu0 %v229_v11 }
  0x17   :  { %142 = vmatpush1.bf16.msra.mxu0 %v231_v12 }
  0x18   :  { %143 = vmatprep.subr.bf16.mxu0 %v232_v13 }
  0x1b   :  { %144 = vmatpush1.bf16.msra.mxu0 %v234_v14 }
  0x1c   :  { %145 = vmatprep.subr.bf16.mxu0 %v235_v15 }
  0x1f   :  { %146 = vmatpush1.bf16.msra.mxu0 %v237_v16 }
  0x22   :  { %164 = vmatmul.mubr.bf16.vlgmr.msra.gmra.mrb[0].mxu0 %v238_v17 }
  0xf5   :  { %v165_v25 = vpop.f32.mrb[0].mxu0 }
  0xf6   :  { %v166_v26 = vadd.f32 %v165_v25, %v38_v23  ;;  %v167_v27 = vpop.f32.mrb[1].mxu0 }
  0xf7   :  { %v168_v28 = vadd.f32 %v167_v27, %v42_v24  ;;  %v169_v29 = vpop.f32.mrb[2].mxu0 }
  0xf8   :  { %v170_v30 = vadd.f32 %v169_v29, %v38_v23  ;;  %v171_v31 = vpop.f32.mrb[3].mxu0 }
  0xf9   :  { %v211_v32 = vpack.c.bf16 %v168_v28, %v166_v26  ;;  %v172_v33 = vadd.f32 %v171_v31, %v42_v24 }
  0xfb   :  { %186 = vst [vmem:[%s323_s3] sm:$0xff] %v211_v32  ;;  %v212_v34 = vpack.c.bf16 %v172_v33, %v170_v30 }
  0xfd   :  { %187 = vst [vmem:[%s323_s3 + $0x8] sm:$0xff] %v212_v34 }

// kernel: resnet_forward.18
= control target key start
LH: loop header
LB: loop body
LE: loop exit
PB: predicated region body
PF: predicated region fallthrough
CT: control target
= control target key end

     0   :  { %vm1184_vm0 = vmmov 0   ;;  %s1462_s1 = inlined_call_operand.vmem [shape: bf16[1152,128], index: 1, kind: input, shape index: {}]   ;;  %s1463_s0 = inlined_call_operand.vmem [shape: bf16[16,1152], index: 0, kind: input, shape index: {}]   ;;  %s1464_s2 = inlined_call_operand.vmem [shape: f32[1,128], index: 2, kind: input, shape index: {}]   ;;  %s1465_s3 = inlined_call_operand.vmem [shape: bf16[16,128], index: 3, kind: input, shape index: {}]   ;;  %s1466_s4 = inlined_call_operand.vmem [shape: bf16[16,128], index: 4, kind: output, shape index: {}]  }
   0x1   :  { %v1098_v0 = vld [vmem:[%s1462_s1 + $0x40] sm:$0xff]   ;;  %v1102_v4 = vld [vmem:[%s1462_s1 + $0x48] sm:$0xff]   ;;  %v1106_v8 = vld [vmem:[%s1462_s1 + $0x50] sm:$0xff]  }
   0x2   :  { %v1099_v1 = vld [vmem:[%s1462_s1] sm:$0xff]   ;;  %979 = vmatprep.subr.bf16.mxu0 %v1098_v0  ;;  %v1103_v5 = vld [vmem:[%s1462_s1 + $0x8] sm:$0xff]   ;;  %v1107_v9 = vld [vmem:[%s1462_s1 + $0x10] sm:$0xff]  }
   0x3   :  { %v1100_v2 = vld [vmem:[%s1462_s1 + $0xc0] sm:$0xff]   ;;  %980 = vmatpush3.bf16.msra.mxu0 %v1099_v1  ;;  %v1104_v6 = vld [vmem:[%s1462_s1 + $0xc8] sm:$0xff]   ;;  %v1108_v10 = vld [vmem:[%s1462_s1 + $0xd0] sm:$0xff]  }
   0x4   :  { %v1101_v3 = vld [vmem:[%s1462_s1 + $0x80] sm:$0xff]   ;;  %1001 = vmatprep.subr.bf16.mxu1 %v1100_v2  ;;  %981 = vmatprep.subr.bf16.mxu0 %v1102_v4  ;;  %v1105_v7 = vld [vmem:[%s1462_s1 + $0x88] sm:$0xff]   ;;  %v1109_v11 = vld [vmem:[%s1462_s1 + $0x90] sm:$0xff]  }
   0x5   :  { %1002 = vmatpush3.bf16.msra.mxu1 %v1101_v3  ;;  %v1110_v12 = vld [vmem:[%s1462_s1 + $0x58] sm:$0xff]   ;;  %v1114_v16 = vld [vmem:[%s1462_s1 + $0x60] sm:$0xff]   ;;  %v1118_v20 = vld [vmem:[%s1462_s1 + $0x68] sm:$0xff]  }
   0x6   :  { %1003 = vmatprep.subr.bf16.mxu1 %v1104_v6  ;;  %v1111_v13 = vld [vmem:[%s1462_s1 + $0x18] sm:$0xff]   ;;  %v1115_v17 = vld [vmem:[%s1462_s1 + $0x20] sm:$0xff]   ;;  %v1119_v21 = vld [vmem:[%s1462_s1 + $0x28] sm:$0xff]   ;;  %v1183_v6 = vmov 0.0  }
   0x7   :  { %982 = vmatpush3.bf16.msra.mxu0 %v1103_v5  ;;  %v1112_v14 = vld [vmem:[%s1462_s1 + $0xd8] sm:$0xff]   ;;  %v1116_v18 = vld [vmem:[%s1462_s1 + $0xe0] sm:$0xff]   ;;  %v1120_v22 = vld [vmem:[%s1462_s1 + $0xe8] sm:$0xff]  }
   0x8   :  { %983 = vmatprep.subr.bf16.mxu0 %v1106_v8  ;;  %v1113_v15 = vld [vmem:[%s1462_s1 + $0x98] sm:$0xff]   ;;  %v1117_v19 = vld [vmem:[%s1462_s1 + $0xa0] sm:$0xff]   ;;  %v1121_v23 = vld [vmem:[%s1462_s1 + $0xa8] sm:$0xff]  }
   0x9   :  { %1004 = vmatpush3.bf16.msra.mxu1 %v1105_v7  ;;  %v1122_v24 = vld [vmem:[%s1462_s1 + $0x70] sm:$0xff]   ;;  %v1126_v28 = vld [vmem:[%s1462_s1 + $0x78] sm:$0xff]   ;;  %v1129_v31 = vld [vmem:[%s1463_s0] ss:$36 sps:$4 sm:$0xff]  }
   0xa   :  { %1005 = vmatprep.subr.bf16.mxu1 %v1108_v10  ;;  %v1123_v25 = vld [vmem:[%s1462_s1 + $0x30] sm:$0xff]   ;;  %v1127_v29 = vld [vmem:[%s1462_s1 + $0x38] sm:$0xff]   ;;  %v1131_v32 = vld [vmem:[%s1463_s0 + $0x4] ss:$36 sps:$4 sm:$0xff]  }
   0xb   :  { %984 = vmatpush3.bf16.msra.mxu0 %v1107_v9  ;;  %v1124_v26 = vld [vmem:[%s1462_s1 + $0xf0] sm:$0xff]   ;;  %v1128_v30 = vld [vmem:[%s1462_s1 + $0xf8] sm:$0xff]   ;;  %689 = vmatprep.mubr.bf16.mxu0 %v1131_v32  ;;  %v1133_v34 = vld [vmem:[%s1462_s1 + $0x140] sm:$0xff]  }
   0xc   :  { %985 = vmatprep.subr.bf16.mxu0 %v1110_v12  ;;  %v1125_v27 = vld [vmem:[%s1462_s1 + $0xb0] sm:$0xff]   ;;  %v1132_v33 = vld [vmem:[%s1462_s1 + $0xb8] sm:$0xff]   ;;  %v1134_v35 = vld [vmem:[%s1463_s0 + $0x8] ss:$36 sps:$4 sm:$0xff]  }
   0xd   :  { %1006 = vmatpush3.bf16.msra.mxu1 %v1109_v11  ;;  %v1136_v36 = vld [vmem:[%s1463_s0 + $0xc] ss:$36 sps:$4 sm:$0xff]   ;;  %v1137_v37 = vld [vmem:[%s1462_s1 + $0x100] sm:$0xff]   ;;  %v1148_v48 = vld [vmem:[%s1462_s1 + $0x158] sm:$0xff]  }
   0xe   :  { %1007 = vmatprep.subr.bf16.mxu1 %v1112_v14  ;;  %730 = vmatprep.mubr.bf16.mxu1 %v1136_v36  ;;  %v1138_v38 = vld [vmem:[%s1462_s1 + $0x1c0] sm:$0xff]   ;;  %v1140_v40 = vld [vmem:[%s1462_s1 + $0x148] sm:$0xff]   ;;  %v1144_v44 = vld [vmem:[%s1462_s1 + $0x150] sm:$0xff]  }
   0xf   :  { %986 = vmatpush3.bf16.msra.mxu0 %v1111_v13  ;;  %v1139_v39 = vld [vmem:[%s1462_s1 + $0x180] sm:$0xff]   ;;  %v1141_v41 = vld [vmem:[%s1462_s1 + $0x108] sm:$0xff]   ;;  %v1145_v45 = vld [vmem:[%s1462_s1 + $0x110] sm:$0xff]  }
  0x10   :  { %987 = vmatprep.subr.bf16.mxu0 %v1114_v16  ;;  %v1142_v42 = vld [vmem:[%s1462_s1 + $0x1c8] sm:$0xff]   ;;  %v1146_v46 = vld [vmem:[%s1462_s1 + $0x1d0] sm:$0xff]   ;;  %v1149_v49 = vld [vmem:[%s1462_s1 + $0x118] sm:$0xff]  }
  0x11   :  { %1008 = vmatpush3.bf16.msra.mxu1 %v1113_v15  ;;  %v1143_v43 = vld [vmem:[%s1462_s1 + $0x188] sm:$0xff]   ;;  %v1147_v47 = vld [vmem:[%s1462_s1 + $0x190] sm:$0xff]   ;;  %v1150_v50 = vld [vmem:[%s1462_s1 + $0x1d8] sm:$0xff]  }
  0x12   :  { %1009 = vmatprep.subr.bf16.mxu1 %v1116_v18  ;;  %v1151_v51 = vld [vmem:[%s1462_s1 + $0x198] sm:$0xff]   ;;  %v1152_v52 = vld [vmem:[%s1462_s1 + $0x160] sm:$0xff]   ;;  %v1156_v56 = vld [vmem:[%s1462_s1 + $0x168] sm:$0xff]  }
  0x13   :  { %988 = vmatpush3.bf16.msra.mxu0 %v1115_v17  ;;  %v1153_v53 = vld [vmem:[%s1462_s1 + $0x120] sm:$0xff]   ;;  %v1157_v57 = vld [vmem:[%s1462_s1 + $0x128] sm:$0xff]   ;;  %v1160_v60 = vld [vmem:[%s1462_s1 + $0x170] sm:$0xff]  }
  0x14   :  { %989 = vmatprep.subr.bf16.mxu0 %v1118_v20  ;;  %v1154_v54 = vld [vmem:[%s1462_s1 + $0x1e0] sm:$0xff]   ;;  %v1158_v58 = vld [vmem:[%s1462_s1 + $0x1e8] sm:$0xff]   ;;  %v1161_v61 = vld [vmem:[%s1462_s1 + $0x130] sm:$0xff]  }
  0x15   :  { %1010 = vmatpush3.bf16.msra.mxu1 %v1117_v19  ;;  %v1155_v55 = vld [vmem:[%s1462_s1 + $0x1a0] sm:$0xff]   ;;  %v1159_v59 = vld [vmem:[%s1462_s1 + $0x1a8] sm:$0xff]   ;;  %v1162_v62 = vld [vmem:[%s1462_s1 + $0x1f0] sm:$0xff]  }
  0x16   :  { %1011 = vmatprep.subr.bf16.mxu1 %v1120_v22  ;;  %v1163_v63 = vld [vmem:[%s1462_s1 + $0x1b0] sm:$0xff]   ;;  %v1164_v0 = vld [vmem:[%s1462_s1 + $0x178] sm:$0xff]   ;;  %v1174_v9 = vld [vmem:[%s1462_s1 + $0x200] sm:$0xff]  }
  0x17   :  { %990 = vmatpush3.bf16.msra.mxu0 %v1119_v21  ;;  %v1165_v1 = vld [vmem:[%s1462_s1 + $0x138] sm:$0xff]   ;;  %v1167_v3 = vld [vmem:[%s1463_s0 + $0x10] ss:$36 sps:$4 sm:$0xff]   ;;  %v1175_v10 = vld [vmem:[%s1462_s1 + $0x208] sm:$0xff]  }
  0x18   :  { %991 = vmatprep.subr.bf16.mxu0 %v1122_v24  ;;  %v1166_v2 = vld [vmem:[%s1462_s1 + $0x1f8] sm:$0xff]   ;;  %v1176_v11 = vld [vmem:[%s1462_s1 + $0x210] sm:$0xff]   ;;  %v1178_v13 = vld [vmem:[%s1462_s1 + $0x220] sm:$0xff]  }
  0x19   :  { %1012 = vmatpush3.bf16.msra.mxu1 %v1121_v23  ;;  %v1169_v4 = vld [vmem:[%s1463_s0 + $0x14] ss:$36 sps:$4 sm:$0xff]   ;;  %v1173_v8 = vld [vmem:[%s1463_s0 + $0x1c] ss:$36 sps:$4 sm:$0xff]   ;;  %v1179_v14 = vld [vmem:[%s1462_s1 + $0x228] sm:$0xff]  }
  0x1a   :  { %1013 = vmatprep.subr.bf16.mxu1 %v1124_v26  ;;  %v1170_v5 = vld [vmem:[%s1462_s1 + $0x1b8] sm:$0xff]   ;;  %v1180_v15 = vld [vmem:[%s1462_s1 + $0x230] sm:$0xff]   ;;  %v1182_v17 = vld [vmem:[%s1463_s0 + $0x20] ss:$36 sps:$4 sm:$0xff]  }
  0x1b   :  { %992 = vmatpush3.bf16.msra.mxu0 %v1123_v25  ;;  %v1171_v7 = vld [vmem:[%s1463_s0 + $0x18] ss:$36 sps:$4 sm:$0xff]   ;;  %v884_v19 = vld [vmem:[%s1464_s2] ss:$0 sm:$0xff] }
  0x1c   :  { %993 = vmatprep.subr.bf16.mxu0 %v1126_v28  ;;  %v1177_v12 = vld [vmem:[%s1462_s1 + $0x218] sm:$0xff]  }
  0x1d   :  { %1014 = vmatpush3.bf16.msra.mxu1 %v1125_v27  ;;  %v1181_v16 = vld [vmem:[%s1462_s1 + $0x238] sm:$0xff]  }
  0x1e   :  { %1015 = vmatprep.subr.bf16.mxu1 %v1128_v30 }
  0x1f   :  { %994 = vmatpush3.bf16.msra.mxu0 %v1127_v29 }
  0x20   :  { %1023 = vmatprep.subr.bf16.mxu0 %v1133_v34 }
  0x21   :  { %1016 = vmatpush3.bf16.msra.mxu1 %v1132_v33 }
  0x22   :  { %690 = vmatmul.mubr.bf16.vlgmr.msra.gmra.mrb[0].mxu0 %v1129_v31  ;;  %1045 = vmatprep.subr.bf16.mxu1 %v1138_v38 }
  0x23   :  { %1024 = vmatpush3.bf16.msra.mxu0 %v1137_v37  ;;  %771 = vmatprep.mubr.bf16.mxu0 %v1169_v4 }
  0x24   :  { %731 = vmatmul.mubr.bf16.vlgmr.msra.gmra.mrb[0].mxu1 %v1134_v35  ;;  %1025 = vmatprep.subr.bf16.mxu0 %v1140_v40 }
  0x25   :  { %1046 = vmatpush3.bf16.msra.mxu1 %v1139_v39  ;;  %812 = vmatprep.mubr.bf16.mxu1 %v1173_v8 }
  0x26   :  { %1047 = vmatprep.subr.bf16.mxu1 %v1142_v42 }
  0x27   :  { %1026 = vmatpush3.bf16.msra.mxu0 %v1141_v41 }
  0x28   :  { %1027 = vmatprep.subr.bf16.mxu0 %v1144_v44 }
  0x29   :  { %1048 = vmatpush3.bf16.msra.mxu1 %v1143_v43 }
  0x2a   :  { %1049 = vmatprep.subr.bf16.mxu1 %v1146_v46 }
  0x2b   :  { %1028 = vmatpush3.bf16.msra.mxu0 %v1145_v45 }
  0x2c   :  { %1029 = vmatprep.subr.bf16.mxu0 %v1148_v48 }
  0x2d   :  { %1050 = vmatpush3.bf16.msra.mxu1 %v1147_v47 }
  0x2e   :  { %1051 = vmatprep.subr.bf16.mxu1 %v1150_v50 }
  0x2f   :  { %1030 = vmatpush3.bf16.msra.mxu0 %v1149_v49 }
  0x30   :  { %1031 = vmatprep.subr.bf16.mxu0 %v1152_v52 }
  0x31   :  { %1052 = vmatpush3.bf16.msra.mxu1 %v1151_v51  ;;  %v971_v51 = vld [vmem:[%s1465_s3] sm:$0xff]  }
  0x32   :  { %1053 = vmatprep.subr.bf16.mxu1 %v1154_v54  ;;  %v972_v52 = vunpack.c.l.bf16 %v971_v51 }
  0x33   :  { %1032 = vmatpush3.bf16.msra.mxu0 %v1153_v53 }
  0x34   :  { %1033 = vmatprep.subr.bf16.mxu0 %v1156_v56  ;;  %v973_v56 = vunpack.c.h.bf16 %v971_v51 }
  0x35   :  { %1054 = vmatpush3.bf16.msra.mxu1 %v1155_v55 }
  0x36   :  { %1055 = vmatprep.subr.bf16.mxu1 %v1158_v58 }
  0x37   :  { %1034 = vmatpush3.bf16.msra.mxu0 %v1157_v57 }
  0x38   :  { %1035 = vmatprep.subr.bf16.mxu0 %v1160_v60 }
  0x39   :  { %1056 = vmatpush3.bf16.msra.mxu1 %v1159_v59 }
  0x3a   :  { %1057 = vmatprep.subr.bf16.mxu1 %v1162_v62 }
  0x3b   :  { %1036 = vmatpush3.bf16.msra.mxu0 %v1161_v61 }
  0x3c   :  { %1037 = vmatprep.subr.bf16.mxu0 %v1164_v0 }
  0x3d   :  { %1058 = vmatpush3.bf16.msra.mxu1 %v1163_v63 }
  0x3e   :  { %1059 = vmatprep.subr.bf16.mxu1 %v1166_v2 }
  0x3f   :  { %1038 = vmatpush3.bf16.msra.mxu0 %v1165_v1 }
  0x40   :  { %1076 = vmatprep.subr.bf16.mxu0 %v1183_v6 }
  0x41   :  { %1060 = vmatpush3.bf16.msra.mxu1 %v1170_v5 }
  0x42   :  { %772 = vmatmul.mubr.bf16.vlgmr.msra.gmra.mrb[4].mxu0 %v1167_v3 }
  0x43   :  { %1092 = vmatprep.mubr.msk.bf16.mxu0 %vm1184_vm0, %v1183_v6  ;;  %1077 = vmatpush3.bf16.msra.mxu0 %v1174_v9 }
  0x44   :  { %813 = vmatmul.mubr.bf16.vlgmr.msra.gmra.mrb[4].mxu1 %v1171_v7  ;;  %1078 = vmatprep.subr.bf16.mxu0 %v1183_v6 }
  0x47   :  { %1079 = vmatpush3.bf16.msra.mxu0 %v1175_v10 }
  0x48   :  { %1080 = vmatprep.subr.bf16.mxu0 %v1183_v6 }
  0x4b   :  { %1081 = vmatpush3.bf16.msra.mxu0 %v1176_v11 }
  0x4c   :  { %1082 = vmatprep.subr.bf16.mxu0 %v1183_v6 }
  0x4f   :  { %1083 = vmatpush3.bf16.msra.mxu0 %v1177_v12 }
  0x50   :  { %1084 = vmatprep.subr.bf16.mxu0 %v1183_v6 }
  0x53   :  { %1085 = vmatpush3.bf16.msra.mxu0 %v1178_v13 }
  0x54   :  { %1086 = vmatprep.subr.bf16.mxu0 %v1183_v6 }
  0x57   :  { %1087 = vmatpush3.bf16.msra.mxu0 %v1179_v14 }
  0x58   :  { %1088 = vmatprep.subr.bf16.mxu0 %v1183_v6 }
  0x5b   :  { %1089 = vmatpush3.bf16.msra.mxu0 %v1180_v15 }
  0x5c   :  { %1090 = vmatprep.subr.bf16.mxu0 %v1183_v6 }
  0x5f   :  { %1091 = vmatpush3.bf16.msra.mxu0 %v1181_v16 }
  0x62   :  { %1093 = vmatmul.mubr.bf16.vlgmr.msra.gmra.mrb[8].mxu0 %v1182_v17 }
  0xf5   :  { %v995_v18 = vpop.f32.mrb[0].mxu0 }
  0xf6   :  { %v996_v20 = vpop.f32.mrb[1].mxu0 }
  0xf7   :  { %v997_v21 = vadd.f32 %v996_v20, %v995_v18  ;;  %v998_v22 = vpop.f32.mrb[2].mxu0  ;;  %v1017_v23 = vpop.f32.mrb[0].mxu1 }
  0xf8   :  { %v999_v24 = vpop.f32.mrb[3].mxu0  ;;  %v1018_v27 = vpop.f32.mrb[1].mxu1 }
  0xf9   :  { %v692_v25 = vadd.f32 %v997_v21, %v884_v19  ;;  %v1000_v26 = vadd.f32 %v999_v24, %v998_v22  ;;  %v1019_v28 = vadd.f32 %v1018_v27, %v1017_v23  ;;  %v1020_v29 = vpop.f32.mrb[2].mxu1 }
  0xfa   :  { %v1021_v31 = vpop.f32.mrb[3].mxu1 }
  0xfb   :  { %v695_v30 = vadd.f32 %v1000_v26, %v884_v19  ;;  %v733_v32 = vadd.f32 %v1019_v28, %v692_v25  ;;  %v1022_v33 = vadd.f32 %v1021_v31, %v1020_v29 }
  0xfd   :  { %v736_v34 = vadd.f32 %v1022_v33, %v695_v30 }
 0x115   :  { %v1039_v35 = vpop.f32.mrb[4].mxu0 }
 0x116   :  { %v1040_v36 = vpop.f32.mrb[5].mxu0 }
 0x117   :  { %v1041_v37 = vadd.f32 %v1040_v36, %v1039_v35  ;;  %v1042_v38 = vpop.f32.mrb[6].mxu0  ;;  %v1061_v39 = vpop.f32.mrb[4].mxu1 }
 0x118   :  { %v1043_v40 = vpop.f32.mrb[7].mxu0  ;;  %v1062_v43 = vpop.f32.mrb[5].mxu1 }
 0x119   :  { %v774_v41 = vadd.f32 %v1041_v37, %v733_v32  ;;  %v1044_v42 = vadd.f32 %v1043_v40, %v1042_v38  ;;  %v1063_v44 = vadd.f32 %v1062_v43, %v1061_v39  ;;  %v1064_v45 = vpop.f32.mrb[6].mxu1 }
 0x11a   :  { %v1065_v47 = vpop.f32.mrb[7].mxu1 }
 0x11b   :  { %v777_v46 = vadd.f32 %v1044_v42, %v736_v34  ;;  %v1066_v48 = vadd.f32 %v1065_v47, %v1064_v45  ;;  %v815_v49 = vadd.f32 %v1063_v44, %v774_v41 }
 0x11d   :  { %v818_v50 = vadd.f32 %v1066_v48, %v777_v46 }
 0x135   :  { %v855_v53 = vpop.f32.mrb[8].mxu0 }
 0x136   :  { %v856_v54 = vadd.f32 %v855_v53, %v815_v49  ;;  %v1094_v55 = vpop.f32.mrb[9].mxu0 }
 0x137   :  { %v858_v57 = vpop.f32.mrb[10].mxu0 }
 0x138   :  { %v866_v58 = vadd.f32 %v972_v52, %v856_v54  ;;  %v859_v59 = vadd.f32 %v858_v57, %v818_v50  ;;  %v1095_v60 = vpop.f32.mrb[11].mxu0 }
 0x13a   :  { %v867_v61 = vadd.f32 %v973_v56, %v859_v59  ;;  %v868_v62 = vmax.f32 %v866_v58, 0.0 }
 0x13c   :  { %v869_v63 = vmax.f32 %v867_v61, 0.0 }
 0x13e   :  { %v977_v0 = vpack.c.bf16 %v869_v63, %v868_v62 }
 0x140   :  { %978 = vst [vmem:[%s1466_s4] sm:$0xff] %v977_v0  }

// kernel: resnet_forward.19
= control target key start
LH: loop header
LB: loop body
LE: loop exit
PB: predicated region body
PF: predicated region fallthrough
CT: control target
= control target key end

     0   :  { %s2080_s1 = inlined_call_operand.vmem [shape: bf16[1152,256], index: 1, kind: input, shape index: {}]   ;;  %s2081_s0 = inlined_call_operand.vmem [shape: bf16[16,1152], index: 0, kind: input, shape index: {}]   ;;  %s2082_s2 = inlined_call_operand.vmem [shape: f32[1,256], index: 2, kind: input, shape index: {}]   ;;  %s2083_s3 = inlined_call_operand.vmem [shape: bf16[16,256], index: 3, kind: output, shape index: {}]  }
   0x1   :  { %v1362_v0 = vld [vmem:[%s2080_s1 + $0x4] ss:$8 sps:$4 sm:$0xff]   ;;  %v1366_v2 = vld [vmem:[%s2080_s1] ss:$8 sps:$4 sm:$0xff]   ;;  %v1368_v4 = vld [vmem:[%s2080_s1 + $0x14] ss:$8 sps:$4 sm:$0xff]  }
   0x2   :  { %v1364_v1 = vld [vmem:[%s2080_s1 + $0x204] ss:$8 sps:$4 sm:$0xff]   ;;  %947 = vmatprep.subr.bf16.mxu1 %v1362_v0  ;;  %v1367_v3 = vld [vmem:[%s2080_s1 + $0x200] ss:$8 sps:$4 sm:$0xff]   ;;  %v1370_v5 = vld [vmem:[%s2080_s1 + $0x214] ss:$8 sps:$4 sm:$0xff]  }
   0x3   :  { %1033 = vmatprep.subr.bf16.mxu0 %v1364_v1  ;;  %948 = vmatpush1.bf16.msra.mxu1 %v1366_v2  ;;  %v1372_v6 = vld [vmem:[%s2080_s1 + $0x10] ss:$8 sps:$4 sm:$0xff]   ;;  %v1374_v8 = vld [vmem:[%s2080_s1 + $0x24] ss:$8 sps:$4 sm:$0xff]   ;;  %v1378_v10 = vld [vmem:[%s2080_s1 + $0x20] ss:$8 sps:$4 sm:$0xff]  }
   0x4   :  { %1034 = vmatpush1.bf16.msra.mxu0 %v1367_v3  ;;  %949 = vmatprep.subr.bf16.mxu1 %v1368_v4  ;;  %v1373_v7 = vld [vmem:[%s2080_s1 + $0x210] ss:$8 sps:$4 sm:$0xff]   ;;  %v1376_v9 = vld [vmem:[%s2080_s1 + $0x224] ss:$8 sps:$4 sm:$0xff]   ;;  %v1379_v11 = vld [vmem:[%s2080_s1 + $0x220] ss:$8 sps:$4 sm:$0xff]  }
   0x5   :  { %1035 = vmatprep.subr.bf16.mxu0 %v1370_v5  ;;  %v1380_v12 = vld [vmem:[%s2080_s1 + $0x34] ss:$8 sps:$4 sm:$0xff]   ;;  %v1384_v14 = vld [vmem:[%s2080_s1 + $0x30] ss:$8 sps:$4 sm:$0xff]   ;;  %v1386_v16 = vld [vmem:[%s2080_s1 + $0x44] ss:$8 sps:$4 sm:$0xff]  }
   0x6   :  { %v1382_v13 = vld [vmem:[%s2080_s1 + $0x234] ss:$8 sps:$4 sm:$0xff]   ;;  %v1385_v15 = vld [vmem:[%s2080_s1 + $0x230] ss:$8 sps:$4 sm:$0xff]   ;;  %v1388_v17 = vld [vmem:[%s2080_s1 + $0x244] ss:$8 sps:$4 sm:$0xff]  }
   0x7   :  { %950 = vmatpush1.bf16.msra.mxu1 %v1372_v6  ;;  %v1390_v18 = vld [vmem:[%s2080_s1 + $0x40] ss:$8 sps:$4 sm:$0xff]   ;;  %v1392_v20 = vld [vmem:[%s2080_s1 + $0x54] ss:$8 sps:$4 sm:$0xff]   ;;  %v1396_v22 = vld [vmem:[%s2080_s1 + $0x50] ss:$8 sps:$4 sm:$0xff]  }
   0x8   :  { %1036 = vmatpush1.bf16.msra.mxu0 %v1373_v7  ;;  %951 = vmatprep.subr.bf16.mxu1 %v1374_v8  ;;  %v1391_v19 = vld [vmem:[%s2080_s1 + $0x240] ss:$8 sps:$4 sm:$0xff]   ;;  %v1394_v21 = vld [vmem:[%s2080_s1 + $0x254] ss:$8 sps:$4 sm:$0xff]   ;;  %v1397_v23 = vld [vmem:[%s2080_s1 + $0x250] ss:$8 sps:$4 sm:$0xff]  }
   0x9   :  { %1037 = vmatprep.subr.bf16.mxu0 %v1376_v9  ;;  %v1398_v24 = vld [vmem:[%s2080_s1 + $0x64] ss:$8 sps:$4 sm:$0xff]   ;;  %v1402_v26 = vld [vmem:[%s2080_s1 + $0x60] ss:$8 sps:$4 sm:$0xff]   ;;  %v1404_v28 = vld [vmem:[%s2080_s1 + $0x74] ss:$8 sps:$4 sm:$0xff]  }
   0xa   :  { %v1400_v25 = vld [vmem:[%s2080_s1 + $0x264] ss:$8 sps:$4 sm:$0xff]   ;;  %v1403_v27 = vld [vmem:[%s2080_s1 + $0x260] ss:$8 sps:$4 sm:$0xff]   ;;  %v1406_v29 = vld [vmem:[%s2080_s1 + $0x274] ss:$8 sps:$4 sm:$0xff]  }
   0xb   :  { %952 = vmatpush1.bf16.msra.mxu1 %v1378_v10  ;;  %v1408_v30 = vld [vmem:[%s2080_s1 + $0x70] ss:$8 sps:$4 sm:$0xff]   ;;  %v1410_v32 = vld [vmem:[%s2080_s1 + $0x84] ss:$8 sps:$4 sm:$0xff]   ;;  %v1414_v34 = vld [vmem:[%s2080_s1 + $0x80] ss:$8 sps:$4 sm:$0xff]  }
   0xc   :  { %1038 = vmatpush1.bf16.msra.mxu0 %v1379_v11  ;;  %953 = vmatprep.subr.bf16.mxu1 %v1380_v12  ;;  %v1409_v31 = vld [vmem:[%s2080_s1 + $0x270] ss:$8 sps:$4 sm:$0xff]   ;;  %v1412_v33 = vld [vmem:[%s2080_s1 + $0x284] ss:$8 sps:$4 sm:$0xff]   ;;  %v1415_v35 = vld [vmem:[%s2080_s1 + $0x280] ss:$8 sps:$4 sm:$0xff]  }
   0xd   :  { %1039 = vmatprep.subr.bf16.mxu0 %v1382_v13  ;;  %v1416_v36 = vld [vmem:[%s2080_s1 + $0x94] ss:$8 sps:$4 sm:$0xff]   ;;  %v1420_v38 = vld [vmem:[%s2080_s1 + $0x90] ss:$8 sps:$4 sm:$0xff]   ;;  %v1422_v40 = vld [vmem:[%s2080_s1 + $0xa4] ss:$8 sps:$4 sm:$0xff]  }
   0xe   :  { %v1418_v37 = vld [vmem:[%s2080_s1 + $0x294] ss:$8 sps:$4 sm:$0xff]   ;;  %v1421_v39 = vld [vmem:[%s2080_s1 + $0x290] ss:$8 sps:$4 sm:$0xff]   ;;  %v1424_v41 = vld [vmem:[%s2080_s1 + $0x2a4] ss:$8 sps:$4 sm:$0xff]  }
   0xf   :  { %954 = vmatpush1.bf16.msra.mxu1 %v1384_v14  ;;  %v1426_v42 = vld [vmem:[%s2080_s1 + $0xa0] ss:$8 sps:$4 sm:$0xff]   ;;  %v1428_v44 = vld [vmem:[%s2080_s1 + $0xb4] ss:$8 sps:$4 sm:$0xff]   ;;  %v1432_v46 = vld [vmem:[%s2080_s1 + $0xb0] ss:$8 sps:$4 sm:$0xff]  }
  0x10   :  { %1040 = vmatpush1.bf16.msra.mxu0 %v1385_v15  ;;  %955 = vmatprep.subr.bf16.mxu1 %v1386_v16  ;;  %v1427_v43 = vld [vmem:[%s2080_s1 + $0x2a0] ss:$8 sps:$4 sm:$0xff]   ;;  %v1430_v45 = vld [vmem:[%s2080_s1 + $0x2b4] ss:$8 sps:$4 sm:$0xff]   ;;  %v1433_v47 = vld [vmem:[%s2080_s1 + $0x2b0] ss:$8 sps:$4 sm:$0xff]  }
  0x11   :  { %1041 = vmatprep.subr.bf16.mxu0 %v1388_v17  ;;  %v1460_v48 = vld [vmem:[%s2081_s0 + $0x4] ss:$36 sps:$4 sm:$0xff]   ;;  %v1466_v51 = vld [vmem:[%s2081_s0 + $0x14] ss:$36 sps:$4 sm:$0xff]  }
  0x12   :  { %v1434_v49 = vld [vmem:[%s2080_s1 + $0xc4] ss:$8 sps:$4 sm:$0xff]   ;;  %979 = vmatprep.mubr.bf16.mxu1 %v1460_v48  ;;  %v1438_v52 = vld [vmem:[%s2080_s1 + $0xc0] ss:$8 sps:$4 sm:$0xff]   ;;  %v1440_v54 = vld [vmem:[%s2080_s1 + $0xd4] ss:$8 sps:$4 sm:$0xff]   ;;  %1065 = vmatprep.mubr.bf16.mxu0 %v1466_v51 }
  0x13   :  { %956 = vmatpush1.bf16.msra.mxu1 %v1390_v18  ;;  %v1436_v50 = vld [vmem:[%s2080_s1 + $0x2c4] ss:$8 sps:$4 sm:$0xff]   ;;  %v1439_v53 = vld [vmem:[%s2080_s1 + $0x2c0] ss:$8 sps:$4 sm:$0xff]   ;;  %v1442_v55 = vld [vmem:[%s2080_s1 + $0x2d4] ss:$8 sps:$4 sm:$0xff]  }
  0x14   :  { %1042 = vmatpush1.bf16.msra.mxu0 %v1391_v19  ;;  %957 = vmatprep.subr.bf16.mxu1 %v1392_v20  ;;  %v1444_v56 = vld [vmem:[%s2080_s1 + $0xd0] ss:$8 sps:$4 sm:$0xff]   ;;  %v1446_v58 = vld [vmem:[%s2080_s1 + $0xe4] ss:$8 sps:$4 sm:$0xff]   ;;  %v1450_v60 = vld [vmem:[%s2080_s1 + $0xe0] ss:$8 sps:$4 sm:$0xff]  }
  0x15   :  { %1043 = vmatprep.subr.bf16.mxu0 %v1394_v21  ;;  %v1445_v57 = vld [vmem:[%s2080_s1 + $0x2d0] ss:$8 sps:$4 sm:$0xff]   ;;  %v1448_v59 = vld [vmem:[%s2080_s1 + $0x2e4] ss:$8 sps:$4 sm:$0xff]   ;;  %v1451_v61 = vld [vmem:[%s2080_s1 + $0x2e0] ss:$8 sps:$4 sm:$0xff]  }
  0x16   :  { %v1452_v62 = vld [vmem:[%s2080_s1 + $0xf4] ss:$8 sps:$4 sm:$0xff]   ;;  %v1456_v0 = vld [vmem:[%s2080_s1 + $0xf0] ss:$8 sps:$4 sm:$0xff]   ;;  %v1463_v2 = vld [vmem:[%s2080_s1 + $0x104] ss:$8 sps:$4 sm:$0xff]  }
  0x17   :  { %958 = vmatpush1.bf16.msra.mxu1 %v1396_v22  ;;  %v1454_v63 = vld [vmem:[%s2080_s1 + $0x2f4] ss:$8 sps:$4 sm:$0xff]   ;;  %v1457_v1 = vld [vmem:[%s2080_s1 + $0x2f0] ss:$8 sps:$4 sm:$0xff]   ;;  %v1469_v3 = vld [vmem:[%s2080_s1 + $0x304] ss:$8 sps:$4 sm:$0xff]  }
  0x18   :  { %1044 = vmatpush1.bf16.msra.mxu0 %v1397_v23  ;;  %959 = vmatprep.subr.bf16.mxu1 %v1398_v24  ;;  %v1458_v4 = vld [vmem:[%s2081_s0] ss:$36 sps:$4 sm:$0xff]   ;;  %v1464_v6 = vld [vmem:[%s2081_s0 + $0x10] ss:$36 sps:$4 sm:$0xff]  }
  0x19   :  { %1045 = vmatprep.subr.bf16.mxu0 %v1400_v25  ;;  %v1461_v5 = vld [vmem:[%s2080_s1 + $0x100] ss:$8 sps:$4 sm:$0xff]   ;;  %v1472_v8 = vld [vmem:[%s2080_s1 + $0x114] ss:$8 sps:$4 sm:$0xff]   ;;  %v1470_v10 = vld [vmem:[%s2080_s1 + $0x110] ss:$8 sps:$4 sm:$0xff]  }
  0x1a   :  { %v1467_v7 = vld [vmem:[%s2080_s1 + $0x300] ss:$8 sps:$4 sm:$0xff]   ;;  %v1475_v9 = vld [vmem:[%s2080_s1 + $0x314] ss:$8 sps:$4 sm:$0xff]   ;;  %v1473_v11 = vld [vmem:[%s2080_s1 + $0x310] ss:$8 sps:$4 sm:$0xff]  }
  0x1b   :  { %960 = vmatpush1.bf16.msra.mxu1 %v1402_v26  ;;  %v1478_v12 = vld [vmem:[%s2080_s1 + $0x124] ss:$8 sps:$4 sm:$0xff]   ;;  %v1476_v14 = vld [vmem:[%s2080_s1 + $0x120] ss:$8 sps:$4 sm:$0xff]   ;;  %v1484_v16 = vld [vmem:[%s2080_s1 + $0x134] ss:$8 sps:$4 sm:$0xff]  }
  0x1c   :  { %1046 = vmatpush1.bf16.msra.mxu0 %v1403_v27  ;;  %961 = vmatprep.subr.bf16.mxu1 %v1404_v28  ;;  %v1481_v13 = vld [vmem:[%s2080_s1 + $0x324] ss:$8 sps:$4 sm:$0xff]   ;;  %v1479_v15 = vld [vmem:[%s2080_s1 + $0x320] ss:$8 sps:$4 sm:$0xff]   ;;  %v1487_v17 = vld [vmem:[%s2080_s1 + $0x334] ss:$8 sps:$4 sm:$0xff]  }
  0x1d   :  { %1047 = vmatprep.subr.bf16.mxu0 %v1406_v29  ;;  %v1482_v18 = vld [vmem:[%s2080_s1 + $0x130] ss:$8 sps:$4 sm:$0xff]   ;;  %v1490_v20 = vld [vmem:[%s2080_s1 + $0x144] ss:$8 sps:$4 sm:$0xff]   ;;  %v1488_v22 = vld [vmem:[%s2080_s1 + $0x140] ss:$8 sps:$4 sm:$0xff]  }
  0x1e   :  { %v1485_v19 = vld [vmem:[%s2080_s1 + $0x330] ss:$8 sps:$4 sm:$0xff]   ;;  %v1493_v21 = vld [vmem:[%s2080_s1 + $0x344] ss:$8 sps:$4 sm:$0xff]   ;;  %v1491_v23 = vld [vmem:[%s2080_s1 + $0x340] ss:$8 sps:$4 sm:$0xff]  }
  0x1f   :  { %962 = vmatpush1.bf16.msra.mxu1 %v1408_v30  ;;  %v1496_v24 = vld [vmem:[%s2080_s1 + $0x154] ss:$8 sps:$4 sm:$0xff]   ;;  %v1494_v26 = vld [vmem:[%s2080_s1 + $0x150] ss:$8 sps:$4 sm:$0xff]   ;;  %v1502_v28 = vld [vmem:[%s2080_s1 + $0x164] ss:$8 sps:$4 sm:$0xff]  }
  0x20   :  { %1048 = vmatpush1.bf16.msra.mxu0 %v1409_v31  ;;  %963 = vmatprep.subr.bf16.mxu1 %v1410_v32  ;;  %v1499_v25 = vld [vmem:[%s2080_s1 + $0x354] ss:$8 sps:$4 sm:$0xff]   ;;  %v1497_v27 = vld [vmem:[%s2080_s1 + $0x350] ss:$8 sps:$4 sm:$0xff]   ;;  %v1505_v29 = vld [vmem:[%s2080_s1 + $0x364] ss:$8 sps:$4 sm:$0xff]  }
  0x21   :  { %1049 = vmatprep.subr.bf16.mxu0 %v1412_v33  ;;  %v1500_v30 = vld [vmem:[%s2080_s1 + $0x160] ss:$8 sps:$4 sm:$0xff]   ;;  %v1508_v32 = vld [vmem:[%s2080_s1 + $0x174] ss:$8 sps:$4 sm:$0xff]  }
  0x22   :  { %v1503_v31 = vld [vmem:[%s2080_s1 + $0x360] ss:$8 sps:$4 sm:$0xff]   ;;  %v1511_v33 = vld [vmem:[%s2080_s1 + $0x374] ss:$8 sps:$4 sm:$0xff]  }
  0x23   :  { %964 = vmatpush1.bf16.msra.mxu1 %v1414_v34  ;;  %v1562_v34 = vld [vmem:[%s2081_s0 + $0xc] ss:$36 sps:$4 sm:$0xff]   ;;  %v1524_v48 = vld [vmem:[%s2080_s1 + $0x1a0] ss:$8 sps:$4 sm:$0xff]   ;;  %v1535_v51 = vld [vmem:[%s2080_s1 + $0x3b4] ss:$8 sps:$4 sm:$0xff]  }
  0x24   :  { %1050 = vmatpush1.bf16.msra.mxu0 %v1415_v35  ;;  %965 = vmatprep.subr.bf16.mxu1 %v1416_v36  ;;  %v1565_v35 = vld [vmem:[%s2081_s0 + $0x1c] ss:$36 sps:$4 sm:$0xff]   ;;  %v1506_v36 = vld [vmem:[%s2080_s1 + $0x170] ss:$8 sps:$4 sm:$0xff]  }
  0x25   :  { %1051 = vmatprep.subr.bf16.mxu0 %v1418_v37  ;;  %v1509_v37 = vld [vmem:[%s2080_s1 + $0x370] ss:$8 sps:$4 sm:$0xff]  }
  0x27   :  { %966 = vmatpush1.bf16.msra.mxu1 %v1420_v38  ;;  %v1514_v38 = vld [vmem:[%s2080_s1 + $0x184] ss:$8 sps:$4 sm:$0xff]  }
  0x28   :  { %1052 = vmatpush1.bf16.msra.mxu0 %v1421_v39  ;;  %967 = vmatprep.subr.bf16.mxu1 %v1422_v40  ;;  %v1517_v39 = vld [vmem:[%s2080_s1 + $0x384] ss:$8 sps:$4 sm:$0xff]   ;;  %v1512_v40 = vld [vmem:[%s2080_s1 + $0x180] ss:$8 sps:$4 sm:$0xff]  }
  0x29   :  { %1053 = vmatprep.subr.bf16.mxu0 %v1424_v41  ;;  %v1515_v41 = vld [vmem:[%s2080_s1 + $0x380] ss:$8 sps:$4 sm:$0xff]  }
  0x2b   :  { %968 = vmatpush1.bf16.msra.mxu1 %v1426_v42  ;;  %v1520_v42 = vld [vmem:[%s2080_s1 + $0x194] ss:$8 sps:$4 sm:$0xff]  }
  0x2c   :  { %1054 = vmatpush1.bf16.msra.mxu0 %v1427_v43  ;;  %969 = vmatprep.subr.bf16.mxu1 %v1428_v44  ;;  %v1523_v43 = vld [vmem:[%s2080_s1 + $0x394] ss:$8 sps:$4 sm:$0xff]   ;;  %v1518_v44 = vld [vmem:[%s2080_s1 + $0x190] ss:$8 sps:$4 sm:$0xff]  }
  0x2d   :  { %1055 = vmatprep.subr.bf16.mxu0 %v1430_v45  ;;  %v1521_v45 = vld [vmem:[%s2080_s1 + $0x390] ss:$8 sps:$4 sm:$0xff]  }
  0x2f   :  { %970 = vmatpush1.bf16.msra.mxu1 %v1432_v46  ;;  %v1526_v46 = vld [vmem:[%s2080_s1 + $0x1a4] ss:$8 sps:$4 sm:$0xff]  }
  0x30   :  { %1056 = vmatpush1.bf16.msra.mxu0 %v1433_v47  ;;  %971 = vmatprep.subr.bf16.mxu1 %v1434_v49  ;;  %v1529_v47 = vld [vmem:[%s2080_s1 + $0x3a4] ss:$8 sps:$4 sm:$0xff]   ;;  %v1527_v49 = vld [vmem:[%s2080_s1 + $0x3a0] ss:$8 sps:$4 sm:$0xff]  }
  0x31   :  { %1057 = vmatprep.subr.bf16.mxu0 %v1436_v50  ;;  %v1532_v50 = vld [vmem:[%s2080_s1 + $0x1b4] ss:$8 sps:$4 sm:$0xff]  }
  0x33   :  { %972 = vmatpush1.bf16.msra.mxu1 %v1438_v52  ;;  %v1530_v52 = vld [vmem:[%s2080_s1 + $0x1b0] ss:$8 sps:$4 sm:$0xff]  }
  0x34   :  { %1058 = vmatpush1.bf16.msra.mxu0 %v1439_v53  ;;  %973 = vmatprep.subr.bf16.mxu1 %v1440_v54  ;;  %v1533_v53 = vld [vmem:[%s2080_s1 + $0x3b0] ss:$8 sps:$4 sm:$0xff]   ;;  %v1538_v54 = vld [vmem:[%s2080_s1 + $0x1c4] ss:$8 sps:$4 sm:$0xff]  }
  0x35   :  { %1059 = vmatprep.subr.bf16.mxu0 %v1442_v55  ;;  %v1541_v55 = vld [vmem:[%s2080_s1 + $0x3c4] ss:$8 sps:$4 sm:$0xff]  }
  0x37   :  { %974 = vmatpush1.bf16.msra.mxu1 %v1444_v56  ;;  %v1536_v56 = vld [vmem:[%s2080_s1 + $0x1c0] ss:$8 sps:$4 sm:$0xff]  }
  0x38   :  { %1060 = vmatpush1.bf16.msra.mxu0 %v1445_v57  ;;  %975 = vmatprep.subr.bf16.mxu1 %v1446_v58  ;;  %v1539_v57 = vld [vmem:[%s2080_s1 + $0x3c0] ss:$8 sps:$4 sm:$0xff]   ;;  %v1544_v58 = vld [vmem:[%s2080_s1 + $0x1d4] ss:$8 sps:$4 sm:$0xff]  }
  0x39   :  { %1061 = vmatprep.subr.bf16.mxu0 %v1448_v59  ;;  %v1547_v59 = vld [vmem:[%s2080_s1 + $0x3d4] ss:$8 sps:$4 sm:$0xff]  }
  0x3b   :  { %976 = vmatpush1.bf16.msra.mxu1 %v1450_v60  ;;  %v1542_v60 = vld [vmem:[%s2080_s1 + $0x1d0] ss:$8 sps:$4 sm:$0xff]  }
  0x3c   :  { %1062 = vmatpush1.bf16.msra.mxu0 %v1451_v61  ;;  %977 = vmatprep.subr.bf16.mxu1 %v1452_v62  ;;  %v1545_v61 = vld [vmem:[%s2080_s1 + $0x3d0] ss:$8 sps:$4 sm:$0xff]   ;;  %v1550_v62 = vld [vmem:[%s2080_s1 + $0x1e4] ss:$8 sps:$4 sm:$0xff]  }
  0x3d   :  { %1063 = vmatprep.subr.bf16.mxu0 %v1454_v63  ;;  %v1553_v63 = vld [vmem:[%s2080_s1 + $0x3e4] ss:$8 sps:$4 sm:$0xff]  }
  0x3f   :  { %978 = vmatpush1.bf16.msra.mxu1 %v1456_v0  ;;  %v1548_v0 = vld [vmem:[%s2080_s1 + $0x1e0] ss:$8 sps:$4 sm:$0xff]  }
  0x40   :  { %1064 = vmatpush1.bf16.msra.mxu0 %v1457_v1  ;;  %990 = vmatprep.subr.bf16.mxu1 %v1463_v2  ;;  %v1551_v1 = vld [vmem:[%s2080_s1 + $0x3e0] ss:$8 sps:$4 sm:$0xff]   ;;  %v1556_v2 = vld [vmem:[%s2080_s1 + $0x1f4] ss:$8 sps:$4 sm:$0xff]  }
  0x41   :  { %1076 = vmatprep.subr.bf16.mxu0 %v1469_v3  ;;  %v1559_v3 = vld [vmem:[%s2080_s1 + $0x3f4] ss:$8 sps:$4 sm:$0xff]  }
  0x42   :  { %980 = vmatmul.mubr.bf16.vlgmr.msra.gmra.mrb[0].mxu1 %v1458_v4  ;;  %v1554_v4 = vld [vmem:[%s2080_s1 + $0x1f0] ss:$8 sps:$4 sm:$0xff]  }
  0x43   :  { %1066 = vmatmul.mubr.bf16.vlgmr.msra.gmra.mrb[0].mxu0 %v1464_v6  ;;  %991 = vmatpush1.bf16.msra.mxu1 %v1461_v5  ;;  %v1557_v5 = vld [vmem:[%s2080_s1 + $0x3f0] ss:$8 sps:$4 sm:$0xff]   ;;  %v1568_v6 = vld [vmem:[%s2080_s1 + $0x404] ss:$8 sps:$4 sm:$0xff]  }
  0x44   :  { %1077 = vmatpush1.bf16.msra.mxu0 %v1467_v7  ;;  %992 = vmatprep.subr.bf16.mxu1 %v1472_v8  ;;  %v1560_v7 = vld [vmem:[%s2081_s0 + $0x8] ss:$36 sps:$4 sm:$0xff]   ;;  %v1563_v8 = vld [vmem:[%s2081_s0 + $0x18] ss:$36 sps:$4 sm:$0xff]  }
  0x45   :  { %1078 = vmatprep.subr.bf16.mxu0 %v1475_v9  ;;  %1022 = vmatprep.mubr.bf16.mxu1 %v1562_v34  ;;  %v1566_v9 = vld [vmem:[%s2080_s1 + $0x400] ss:$8 sps:$4 sm:$0xff]  }
  0x46   :  { %1108 = vmatprep.mubr.bf16.mxu0 %v1565_v35 }
  0x47   :  { %993 = vmatpush1.bf16.msra.mxu1 %v1470_v10  ;;  %v1571_v10 = vld [vmem:[%s2080_s1 + $0x414] ss:$8 sps:$4 sm:$0xff]  }
  0x48   :  { %1079 = vmatpush1.bf16.msra.mxu0 %v1473_v11  ;;  %994 = vmatprep.subr.bf16.mxu1 %v1478_v12  ;;  %v1569_v11 = vld [vmem:[%s2080_s1 + $0x410] ss:$8 sps:$4 sm:$0xff]   ;;  %v1591_v12 = vmov 0  }
  0x49   :  { %1080 = vmatprep.subr.bf16.mxu0 %v1481_v13  ;;  %v1574_v13 = vld [vmem:[%s2080_s1 + $0x424] ss:$8 sps:$4 sm:$0xff]  }
  0x4b   :  { %995 = vmatpush1.bf16.msra.mxu1 %v1476_v14  ;;  %v1572_v14 = vld [vmem:[%s2080_s1 + $0x420] ss:$8 sps:$4 sm:$0xff]  }
  0x4c   :  { %1081 = vmatpush1.bf16.msra.mxu0 %v1479_v15  ;;  %996 = vmatprep.subr.bf16.mxu1 %v1484_v16  ;;  %v1577_v15 = vld [vmem:[%s2080_s1 + $0x434] ss:$8 sps:$4 sm:$0xff]   ;;  %v1575_v16 = vld [vmem:[%s2080_s1 + $0x430] ss:$8 sps:$4 sm:$0xff]  }
  0x4d   :  { %1082 = vmatprep.subr.bf16.mxu0 %v1487_v17  ;;  %v1580_v17 = vld [vmem:[%s2080_s1 + $0x444] ss:$8 sps:$4 sm:$0xff]  }
  0x4f   :  { %997 = vmatpush1.bf16.msra.mxu1 %v1482_v18  ;;  %v1578_v18 = vld [vmem:[%s2080_s1 + $0x440] ss:$8 sps:$4 sm:$0xff]  }
  0x50   :  { %1083 = vmatpush1.bf16.msra.mxu0 %v1485_v19  ;;  %998 = vmatprep.subr.bf16.mxu1 %v1490_v20  ;;  %v1583_v19 = vld [vmem:[%s2080_s1 + $0x454] ss:$8 sps:$4 sm:$0xff]   ;;  %v1581_v20 = vld [vmem:[%s2080_s1 + $0x450] ss:$8 sps:$4 sm:$0xff]  }
  0x51   :  { %1084 = vmatprep.subr.bf16.mxu0 %v1493_v21  ;;  %v1586_v21 = vld [vmem:[%s2080_s1 + $0x464] ss:$8 sps:$4 sm:$0xff]  }
  0x53   :  { %999 = vmatpush1.bf16.msra.mxu1 %v1488_v22  ;;  %v1584_v22 = vld [vmem:[%s2080_s1 + $0x460] ss:$8 sps:$4 sm:$0xff]  }
  0x54   :  { %1085 = vmatpush1.bf16.msra.mxu0 %v1491_v23  ;;  %1000 = vmatprep.subr.bf16.mxu1 %v1496_v24  ;;  %v1589_v23 = vld [vmem:[%s2080_s1 + $0x474] ss:$8 sps:$4 sm:$0xff]   ;;  %v1587_v24 = vld [vmem:[%s2080_s1 + $0x470] ss:$8 sps:$4 sm:$0xff]  }
  0x55   :  { %1086 = vmatprep.subr.bf16.mxu0 %v1499_v25  ;;  %v1590_v25 = vld [vmem:[%s2081_s0 + $0x20] ss:$36 sps:$4 sm:$0xff]  }
  0x57   :  { %1001 = vmatpush1.bf16.msra.mxu1 %v1494_v26 }
  0x58   :  { %1087 = vmatpush1.bf16.msra.mxu0 %v1497_v27  ;;  %1002 = vmatprep.subr.bf16.mxu1 %v1502_v28 }
  0x59   :  { %1088 = vmatprep.subr.bf16.mxu0 %v1505_v29 }
  0x5b   :  { %1003 = vmatpush1.bf16.msra.mxu1 %v1500_v30  ;;  %v171_v30 = vlaneseq }
  0x5c   :  { %1089 = vmatpush1.bf16.msra.mxu0 %v1503_v31  ;;  %1004 = vmatprep.subr.bf16.mxu1 %v1508_v32 }
  0x5d   :  { %1090 = vmatprep.subr.bf16.mxu0 %v1511_v33  ;;  %v172_v31 = vshrl.u32 %v171_v30, 7  ;;  %v169_v33 = vld [vmem:[%s2082_s2] sm:$0x3] }
  0x5f   :  { %1005 = vmatpush1.bf16.msra.mxu1 %v1506_v36  ;;  %v173_v32 = vsub.s32 0, %v172_v31  ;;  %v177_v34 = vsub.s32 1, %v172_v31 }
  0x60   :  { %1091 = vmatpush1.bf16.msra.mxu0 %v1509_v37  ;;  %1006 = vmatprep.subr.bf16.mxu1 %v1514_v38 }
  0x61   :  { %1092 = vmatprep.subr.bf16.mxu0 %v1517_v39  ;;  %v174_v35 = vrot.slane %v169_v33, %v173_v32  ;;  %v178_v36 = vrot.slane %v169_v33, %v177_v34 }
  0x63   :  { %1007 = vmatpush1.bf16.msra.mxu1 %v1512_v40 }
  0x64   :  { %1093 = vmatpush1.bf16.msra.mxu0 %v1515_v41  ;;  %1008 = vmatprep.subr.bf16.mxu1 %v1520_v42 }
  0x65   :  { %1094 = vmatprep.subr.bf16.mxu0 %v1523_v43 }
  0x67   :  { %1009 = vmatpush1.bf16.msra.mxu1 %v1518_v44 }
  0x68   :  { %1095 = vmatpush1.bf16.msra.mxu0 %v1521_v45  ;;  %1010 = vmatprep.subr.bf16.mxu1 %v1526_v46 }
  0x69   :  { %1096 = vmatprep.subr.bf16.mxu0 %v1529_v47 }
  0x6b   :  { %1011 = vmatpush1.bf16.msra.mxu1 %v1524_v48 }
  0x6c   :  { %1097 = vmatpush1.bf16.msra.mxu0 %v1527_v49  ;;  %1012 = vmatprep.subr.bf16.mxu1 %v1532_v50 }
  0x6d   :  { %1098 = vmatprep.subr.bf16.mxu0 %v1535_v51 }
  0x6f   :  { %1013 = vmatpush1.bf16.msra.mxu1 %v1530_v52 }
  0x70   :  { %1099 = vmatpush1.bf16.msra.mxu0 %v1533_v53  ;;  %1014 = vmatprep.subr.bf16.mxu1 %v1538_v54 }
  0x71   :  { %1100 = vmatprep.subr.bf16.mxu0 %v1541_v55 }
  0x73   :  { %1015 = vmatpush1.bf16.msra.mxu1 %v1536_v56 }
  0x74   :  { %1101 = vmatpush1.bf16.msra.mxu0 %v1539_v57  ;;  %1016 = vmatprep.subr.bf16.mxu1 %v1544_v58 }
  0x75   :  { %1102 = vmatprep.subr.bf16.mxu0 %v1547_v59 }
  0x77   :  { %1017 = vmatpush1.bf16.msra.mxu1 %v1542_v60 }
  0x78   :  { %1103 = vmatpush1.bf16.msra.mxu0 %v1545_v61  ;;  %1018 = vmatprep.subr.bf16.mxu1 %v1550_v62 }
  0x79   :  { %1104 = vmatprep.subr.bf16.mxu0 %v1553_v63 }
  0x7b   :  { %1019 = vmatpush1.bf16.msra.mxu1 %v1548_v0 }
  0x7c   :  { %1105 = vmatpush1.bf16.msra.mxu0 %v1551_v1  ;;  %1020 = vmatprep.subr.bf16.mxu1 %v1556_v2 }
  0x7d   :  { %1106 = vmatprep.subr.bf16.mxu0 %v1559_v3 }
  0x7f   :  { %1021 = vmatpush1.bf16.msra.mxu1 %v1554_v4 }
  0x80   :  { %1107 = vmatpush1.bf16.msra.mxu0 %v1557_v5 }
  0x81   :  { %1119 = vmatprep.subr.bf16.mxu0 %v1568_v6 }
  0x82   :  { %1023 = vmatmul.mubr.bf16.vlgmr.msra.gmra.mrb[0].mxu1 %v1560_v7 }
  0x83   :  { %1109 = vmatmul.mubr.bf16.vlgmr.msra.gmra.mrb[0].mxu0 %v1563_v8 }
  0x84   :  { %1120 = vmatpush1.bf16.msra.mxu0 %v1566_v9  ;;  %1151 = vmatprep.mubr.bf16.mxu0 %v1591_v12 }
  0x85   :  { %1121 = vmatprep.subr.bf16.mxu0 %v1571_v10 }
  0x88   :  { %1122 = vmatpush1.bf16.msra.mxu0 %v1569_v11 }
  0x89   :  { %1123 = vmatprep.subr.bf16.mxu0 %v1574_v13 }
  0x8c   :  { %1124 = vmatpush1.bf16.msra.mxu0 %v1572_v14 }
  0x8d   :  { %1125 = vmatprep.subr.bf16.mxu0 %v1577_v15 }
  0x90   :  { %1126 = vmatpush1.bf16.msra.mxu0 %v1575_v16 }
  0x91   :  { %1127 = vmatprep.subr.bf16.mxu0 %v1580_v17 }
  0x94   :  { %1128 = vmatpush1.bf16.msra.mxu0 %v1578_v18 }
  0x95   :  { %1129 = vmatprep.subr.bf16.mxu0 %v1583_v19 }
  0x98   :  { %1130 = vmatpush1.bf16.msra.mxu0 %v1581_v20 }
  0x99   :  { %1131 = vmatprep.subr.bf16.mxu0 %v1586_v21 }
  0x9c   :  { %1132 = vmatpush1.bf16.msra.mxu0 %v1584_v22 }
  0x9d   :  { %1133 = vmatprep.subr.bf16.mxu0 %v1589_v23 }
  0xa0   :  { %1134 = vmatpush1.bf16.msra.mxu0 %v1587_v24 }
  0xa3   :  { %1152 = vmatmul.mubr.bf16.vlgmr.msra.gmra.mrb[0].mxu0 %v1590_v25 }
 0x155   :  { %v1024_v26 = vpop.f32.mrb[0].mxu1 }
 0x156   :  { %v1026_v27 = vpop.f32.mrb[1].mxu1  ;;  %v1341_v37 = vadd.f32 %v1024_v26, %v174_v35 }
 0x157   :  { %v1028_v28 = vpop.f32.mrb[2].mxu1  ;;  %v1343_v38 = vadd.f32 %v1026_v27, %v178_v36 }
 0x158   :  { %v1030_v29 = vpop.f32.mrb[3].mxu1  ;;  %v1345_v40 = vadd.f32 %v1028_v28, %v174_v35 }
 0x159   :  { %v1347_v43 = vadd.f32 %v1030_v29, %v178_v36 }
 0x176   :  { %v1153_v39 = vpop.f32.mrb[0].mxu0 }
 0x177   :  { %v1342_v41 = vadd.f32 %v1341_v37, %v1153_v39  ;;  %v1155_v42 = vpop.f32.mrb[1].mxu0 }
 0x178   :  { %v1344_v44 = vadd.f32 %v1343_v38, %v1155_v42  ;;  %v1157_v45 = vpop.f32.mrb[2].mxu0 }
 0x179   :  { %v1162_v46 = vmax.f32 %v1342_v41, 0.0  ;;  %v1346_v47 = vadd.f32 %v1345_v40, %v1157_v45  ;;  %v1159_v48 = vpop.f32.mrb[3].mxu0 }
 0x17a   :  { %v1163_v49 = vmax.f32 %v1344_v44, 0.0  ;;  %v1348_v50 = vadd.f32 %v1347_v43, %v1159_v48 }
 0x17b   :  { %v1164_v51 = vmax.f32 %v1346_v47, 0.0 }
 0x17c   :  { %v1339_v52 = vpack.c.bf16 %v1163_v49, %v1162_v46  ;;  %v1165_v53 = vmax.f32 %v1348_v50, 0.0 }
 0x17e   :  { %1178 = vst [vmem:[%s2083_s3] sm:$0xff] %v1339_v52  ;;  %v1340_v54 = vpack.c.bf16 %v1165_v53, %v1164_v51 }
 0x180   :  { %1179 = vst [vmem:[%s2083_s3 + $0x8] sm:$0xff] %v1340_v54 }

// kernel: resnet_forward.21
= control target key start
LH: loop header
LB: loop body
LE: loop exit
PB: predicated region body
PF: predicated region fallthrough
CT: control target
= control target key end

     0   :  { %s4047_s1 = inlined_call_operand.vmem [shape: bf16[2304,256], index: 1, kind: input, shape index: {}]   ;;  %s4048_s0 = inlined_call_operand.vmem [shape: bf16[16,2304], index: 0, kind: input, shape index: {}]   ;;  %s4049_s2 = inlined_call_operand.vmem [shape: f32[1,256], index: 2, kind: input, shape index: {}]   ;;  %s4050_s3 = inlined_call_operand.vmem [shape: bf16[16,256], index: 3, kind: input, shape index: {}]   ;;  %s4051_s4 = inlined_call_operand.vmem [shape: bf16[16,256], index: 4, kind: output, shape index: {}]  }
   0x1   :  { %v2630_v0 = vld [vmem:[%s4047_s1 + $0x4] ss:$8 sps:$4 sm:$0xff]   ;;  %v2634_v2 = vld [vmem:[%s4047_s1] ss:$8 sps:$4 sm:$0xff]   ;;  %v2636_v4 = vld [vmem:[%s4047_s1 + $0x14] ss:$8 sps:$4 sm:$0xff]  }
   0x2   :  { %v2632_v1 = vld [vmem:[%s4047_s1 + $0x404] ss:$8 sps:$4 sm:$0xff]   ;;  %1865 = vmatprep.subr.bf16.mxu1 %v2630_v0  ;;  %v2635_v3 = vld [vmem:[%s4047_s1 + $0x400] ss:$8 sps:$4 sm:$0xff]   ;;  %v2638_v5 = vld [vmem:[%s4047_s1 + $0x414] ss:$8 sps:$4 sm:$0xff]  }
   0x3   :  { %2037 = vmatprep.subr.bf16.mxu0 %v2632_v1  ;;  %1866 = vmatpush1.bf16.msra.mxu1 %v2634_v2  ;;  %v2640_v6 = vld [vmem:[%s4047_s1 + $0x10] ss:$8 sps:$4 sm:$0xff]   ;;  %v2642_v8 = vld [vmem:[%s4047_s1 + $0x24] ss:$8 sps:$4 sm:$0xff]   ;;  %v2646_v10 = vld [vmem:[%s4047_s1 + $0x20] ss:$8 sps:$4 sm:$0xff]  }
   0x4   :  { %2038 = vmatpush1.bf16.msra.mxu0 %v2635_v3  ;;  %1867 = vmatprep.subr.bf16.mxu1 %v2636_v4  ;;  %v2641_v7 = vld [vmem:[%s4047_s1 + $0x410] ss:$8 sps:$4 sm:$0xff]   ;;  %v2644_v9 = vld [vmem:[%s4047_s1 + $0x424] ss:$8 sps:$4 sm:$0xff]   ;;  %v2647_v11 = vld [vmem:[%s4047_s1 + $0x420] ss:$8 sps:$4 sm:$0xff]  }
   0x5   :  { %2039 = vmatprep.subr.bf16.mxu0 %v2638_v5  ;;  %v2648_v12 = vld [vmem:[%s4047_s1 + $0x34] ss:$8 sps:$4 sm:$0xff]   ;;  %v2652_v14 = vld [vmem:[%s4047_s1 + $0x30] ss:$8 sps:$4 sm:$0xff]   ;;  %v2654_v16 = vld [vmem:[%s4047_s1 + $0x44] ss:$8 sps:$4 sm:$0xff]  }
   0x6   :  { %v2650_v13 = vld [vmem:[%s4047_s1 + $0x434] ss:$8 sps:$4 sm:$0xff]   ;;  %v2653_v15 = vld [vmem:[%s4047_s1 + $0x430] ss:$8 sps:$4 sm:$0xff]   ;;  %v2656_v17 = vld [vmem:[%s4047_s1 + $0x444] ss:$8 sps:$4 sm:$0xff]  }
   0x7   :  { %1868 = vmatpush1.bf16.msra.mxu1 %v2640_v6  ;;  %v2658_v18 = vld [vmem:[%s4047_s1 + $0x40] ss:$8 sps:$4 sm:$0xff]   ;;  %v2660_v20 = vld [vmem:[%s4047_s1 + $0x54] ss:$8 sps:$4 sm:$0xff]   ;;  %v2664_v22 = vld [vmem:[%s4047_s1 + $0x50] ss:$8 sps:$4 sm:$0xff]  }
   0x8   :  { %2040 = vmatpush1.bf16.msra.mxu0 %v2641_v7  ;;  %1869 = vmatprep.subr.bf16.mxu1 %v2642_v8  ;;  %v2659_v19 = vld [vmem:[%s4047_s1 + $0x440] ss:$8 sps:$4 sm:$0xff]   ;;  %v2662_v21 = vld [vmem:[%s4047_s1 + $0x454] ss:$8 sps:$4 sm:$0xff]   ;;  %v2665_v23 = vld [vmem:[%s4047_s1 + $0x450] ss:$8 sps:$4 sm:$0xff]  }
   0x9   :  { %2041 = vmatprep.subr.bf16.mxu0 %v2644_v9  ;;  %v2666_v24 = vld [vmem:[%s4047_s1 + $0x64] ss:$8 sps:$4 sm:$0xff]   ;;  %v2670_v26 = vld [vmem:[%s4047_s1 + $0x60] ss:$8 sps:$4 sm:$0xff]   ;;  %v2672_v28 = vld [vmem:[%s4047_s1 + $0x74] ss:$8 sps:$4 sm:$0xff]  }
   0xa   :  { %v2668_v25 = vld [vmem:[%s4047_s1 + $0x464] ss:$8 sps:$4 sm:$0xff]   ;;  %v2671_v27 = vld [vmem:[%s4047_s1 + $0x460] ss:$8 sps:$4 sm:$0xff]   ;;  %v2674_v29 = vld [vmem:[%s4047_s1 + $0x474] ss:$8 sps:$4 sm:$0xff]  }
   0xb   :  { %1870 = vmatpush1.bf16.msra.mxu1 %v2646_v10  ;;  %v2676_v30 = vld [vmem:[%s4047_s1 + $0x70] ss:$8 sps:$4 sm:$0xff]   ;;  %v2678_v32 = vld [vmem:[%s4047_s1 + $0x84] ss:$8 sps:$4 sm:$0xff]   ;;  %v2682_v34 = vld [vmem:[%s4047_s1 + $0x80] ss:$8 sps:$4 sm:$0xff]  }
   0xc   :  { %2042 = vmatpush1.bf16.msra.mxu0 %v2647_v11  ;;  %1871 = vmatprep.subr.bf16.mxu1 %v2648_v12  ;;  %v2677_v31 = vld [vmem:[%s4047_s1 + $0x470] ss:$8 sps:$4 sm:$0xff]   ;;  %v2680_v33 = vld [vmem:[%s4047_s1 + $0x484] ss:$8 sps:$4 sm:$0xff]   ;;  %v2683_v35 = vld [vmem:[%s4047_s1 + $0x480] ss:$8 sps:$4 sm:$0xff]  }
   0xd   :  { %2043 = vmatprep.subr.bf16.mxu0 %v2650_v13  ;;  %v2684_v36 = vld [vmem:[%s4047_s1 + $0x94] ss:$8 sps:$4 sm:$0xff]   ;;  %v2688_v38 = vld [vmem:[%s4047_s1 + $0x90] ss:$8 sps:$4 sm:$0xff]   ;;  %v2690_v40 = vld [vmem:[%s4047_s1 + $0xa4] ss:$8 sps:$4 sm:$0xff]  }
   0xe   :  { %v2686_v37 = vld [vmem:[%s4047_s1 + $0x494] ss:$8 sps:$4 sm:$0xff]   ;;  %v2689_v39 = vld [vmem:[%s4047_s1 + $0x490] ss:$8 sps:$4 sm:$0xff]   ;;  %v2692_v41 = vld [vmem:[%s4047_s1 + $0x4a4] ss:$8 sps:$4 sm:$0xff]  }
   0xf   :  { %1872 = vmatpush1.bf16.msra.mxu1 %v2652_v14  ;;  %v2694_v42 = vld [vmem:[%s4047_s1 + $0xa0] ss:$8 sps:$4 sm:$0xff]   ;;  %v2696_v44 = vld [vmem:[%s4047_s1 + $0xb4] ss:$8 sps:$4 sm:$0xff]   ;;  %v2700_v46 = vld [vmem:[%s4047_s1 + $0xb0] ss:$8 sps:$4 sm:$0xff]  }
  0x10   :  { %2044 = vmatpush1.bf16.msra.mxu0 %v2653_v15  ;;  %1873 = vmatprep.subr.bf16.mxu1 %v2654_v16  ;;  %v2695_v43 = vld [vmem:[%s4047_s1 + $0x4a0] ss:$8 sps:$4 sm:$0xff]   ;;  %v2698_v45 = vld [vmem:[%s4047_s1 + $0x4b4] ss:$8 sps:$4 sm:$0xff]   ;;  %v2701_v47 = vld [vmem:[%s4047_s1 + $0x4b0] ss:$8 sps:$4 sm:$0xff]  }
  0x11   :  { %2045 = vmatprep.subr.bf16.mxu0 %v2656_v17  ;;  %v2728_v48 = vld [vmem:[%s4048_s0 + $0x4] ss:$72 sps:$4 sm:$0xff]   ;;  %v2706_v52 = vld [vmem:[%s4047_s1 + $0xc0] ss:$8 sps:$4 sm:$0xff]   ;;  %v2708_v54 = vld [vmem:[%s4047_s1 + $0xd4] ss:$8 sps:$4 sm:$0xff]  }
  0x12   :  { %v2702_v49 = vld [vmem:[%s4047_s1 + $0xc4] ss:$8 sps:$4 sm:$0xff]   ;;  %1897 = vmatprep.mubr.bf16.mxu1 %v2728_v48  ;;  %v2707_v53 = vld [vmem:[%s4047_s1 + $0x4c0] ss:$8 sps:$4 sm:$0xff]   ;;  %v2710_v55 = vld [vmem:[%s4047_s1 + $0x4d4] ss:$8 sps:$4 sm:$0xff]  }
  0x13   :  { %1874 = vmatpush1.bf16.msra.mxu1 %v2658_v18  ;;  %v2704_v50 = vld [vmem:[%s4047_s1 + $0x4c4] ss:$8 sps:$4 sm:$0xff]   ;;  %v2712_v56 = vld [vmem:[%s4047_s1 + $0xd0] ss:$8 sps:$4 sm:$0xff]   ;;  %v2718_v60 = vld [vmem:[%s4047_s1 + $0xe0] ss:$8 sps:$4 sm:$0xff]  }
  0x14   :  { %2046 = vmatpush1.bf16.msra.mxu0 %v2659_v19  ;;  %1875 = vmatprep.subr.bf16.mxu1 %v2660_v20  ;;  %v2734_v51 = vld [vmem:[%s4048_s0 + $0x24] ss:$72 sps:$4 sm:$0xff]   ;;  %v2713_v57 = vld [vmem:[%s4047_s1 + $0x4d0] ss:$8 sps:$4 sm:$0xff]   ;;  %v2719_v61 = vld [vmem:[%s4047_s1 + $0x4e0] ss:$8 sps:$4 sm:$0xff]  }
  0x15   :  { %2047 = vmatprep.subr.bf16.mxu0 %v2662_v21  ;;  %2069 = vmatprep.mubr.bf16.mxu0 %v2734_v51  ;;  %v2714_v58 = vld [vmem:[%s4047_s1 + $0xe4] ss:$8 sps:$4 sm:$0xff]   ;;  %v2720_v62 = vld [vmem:[%s4047_s1 + $0xf4] ss:$8 sps:$4 sm:$0xff]   ;;  %v2724_v0 = vld [vmem:[%s4047_s1 + $0xf0] ss:$8 sps:$4 sm:$0xff]  }
  0x16   :  { %v2716_v59 = vld [vmem:[%s4047_s1 + $0x4e4] ss:$8 sps:$4 sm:$0xff]   ;;  %v2722_v63 = vld [vmem:[%s4047_s1 + $0x4f4] ss:$8 sps:$4 sm:$0xff]   ;;  %v2725_v1 = vld [vmem:[%s4047_s1 + $0x4f0] ss:$8 sps:$4 sm:$0xff]  }
  0x17   :  { %1876 = vmatpush1.bf16.msra.mxu1 %v2664_v22  ;;  %v2731_v2 = vld [vmem:[%s4047_s1 + $0x104] ss:$8 sps:$4 sm:$0xff]   ;;  %v2726_v4 = vld [vmem:[%s4048_s0] ss:$72 sps:$4 sm:$0xff]   ;;  %v2740_v8 = vld [vmem:[%s4047_s1 + $0x114] ss:$8 sps:$4 sm:$0xff]  }
  0x18   :  { %2048 = vmatpush1.bf16.msra.mxu0 %v2665_v23  ;;  %1877 = vmatprep.subr.bf16.mxu1 %v2666_v24  ;;  %v2737_v3 = vld [vmem:[%s4047_s1 + $0x504] ss:$8 sps:$4 sm:$0xff]   ;;  %v2729_v5 = vld [vmem:[%s4047_s1 + $0x100] ss:$8 sps:$4 sm:$0xff]   ;;  %v2743_v9 = vld [vmem:[%s4047_s1 + $0x514] ss:$8 sps:$4 sm:$0xff]  }
  0x19   :  { %2049 = vmatprep.subr.bf16.mxu0 %v2668_v25  ;;  %v2732_v6 = vld [vmem:[%s4048_s0 + $0x20] ss:$72 sps:$4 sm:$0xff]   ;;  %v2738_v10 = vld [vmem:[%s4047_s1 + $0x110] ss:$8 sps:$4 sm:$0xff]   ;;  %v2746_v12 = vld [vmem:[%s4047_s1 + $0x124] ss:$8 sps:$4 sm:$0xff]  }
  0x1a   :  { %v2735_v7 = vld [vmem:[%s4047_s1 + $0x500] ss:$8 sps:$4 sm:$0xff]   ;;  %v2741_v11 = vld [vmem:[%s4047_s1 + $0x510] ss:$8 sps:$4 sm:$0xff]   ;;  %v2749_v13 = vld [vmem:[%s4047_s1 + $0x524] ss:$8 sps:$4 sm:$0xff]  }
  0x1b   :  { %1878 = vmatpush1.bf16.msra.mxu1 %v2670_v26  ;;  %v2744_v14 = vld [vmem:[%s4047_s1 + $0x120] ss:$8 sps:$4 sm:$0xff]   ;;  %v2752_v16 = vld [vmem:[%s4047_s1 + $0x134] ss:$8 sps:$4 sm:$0xff]   ;;  %v2750_v18 = vld [vmem:[%s4047_s1 + $0x130] ss:$8 sps:$4 sm:$0xff]  }
  0x1c   :  { %2050 = vmatpush1.bf16.msra.mxu0 %v2671_v27  ;;  %1879 = vmatprep.subr.bf16.mxu1 %v2672_v28  ;;  %v2747_v15 = vld [vmem:[%s4047_s1 + $0x520] ss:$8 sps:$4 sm:$0xff]   ;;  %v2755_v17 = vld [vmem:[%s4047_s1 + $0x534] ss:$8 sps:$4 sm:$0xff]   ;;  %v2753_v19 = vld [vmem:[%s4047_s1 + $0x530] ss:$8 sps:$4 sm:$0xff]  }
  0x1d   :  { %2051 = vmatprep.subr.bf16.mxu0 %v2674_v29  ;;  %v2758_v20 = vld [vmem:[%s4047_s1 + $0x144] ss:$8 sps:$4 sm:$0xff]   ;;  %v2756_v22 = vld [vmem:[%s4047_s1 + $0x140] ss:$8 sps:$4 sm:$0xff]   ;;  %v2764_v24 = vld [vmem:[%s4047_s1 + $0x154] ss:$8 sps:$4 sm:$0xff]  }
  0x1e   :  { %v2761_v21 = vld [vmem:[%s4047_s1 + $0x544] ss:$8 sps:$4 sm:$0xff]   ;;  %v2759_v23 = vld [vmem:[%s4047_s1 + $0x540] ss:$8 sps:$4 sm:$0xff]   ;;  %v2767_v25 = vld [vmem:[%s4047_s1 + $0x554] ss:$8 sps:$4 sm:$0xff]  }
  0x1f   :  { %1880 = vmatpush1.bf16.msra.mxu1 %v2676_v30  ;;  %v2762_v26 = vld [vmem:[%s4047_s1 + $0x150] ss:$8 sps:$4 sm:$0xff]   ;;  %v2770_v28 = vld [vmem:[%s4047_s1 + $0x164] ss:$8 sps:$4 sm:$0xff]   ;;  %v2768_v30 = vld [vmem:[%s4047_s1 + $0x160] ss:$8 sps:$4 sm:$0xff]  }
  0x20   :  { %2052 = vmatpush1.bf16.msra.mxu0 %v2677_v31  ;;  %1881 = vmatprep.subr.bf16.mxu1 %v2678_v32  ;;  %v2765_v27 = vld [vmem:[%s4047_s1 + $0x550] ss:$8 sps:$4 sm:$0xff]   ;;  %v2773_v29 = vld [vmem:[%s4047_s1 + $0x564] ss:$8 sps:$4 sm:$0xff]   ;;  %v2771_v31 = vld [vmem:[%s4047_s1 + $0x560] ss:$8 sps:$4 sm:$0xff]  }
  0x21   :  { %2053 = vmatprep.subr.bf16.mxu0 %v2680_v33  ;;  %v2776_v32 = vld [vmem:[%s4047_s1 + $0x174] ss:$8 sps:$4 sm:$0xff]   ;;  %v2792_v48 = vld [vmem:[%s4047_s1 + $0x1a0] ss:$8 sps:$4 sm:$0xff]  }
  0x22   :  { %v2779_v33 = vld [vmem:[%s4047_s1 + $0x574] ss:$8 sps:$4 sm:$0xff]  }
  0x23   :  { %1882 = vmatpush1.bf16.msra.mxu1 %v2682_v34  ;;  %v2830_v34 = vld [vmem:[%s4048_s0 + $0xc] ss:$72 sps:$4 sm:$0xff]  }
  0x24   :  { %2054 = vmatpush1.bf16.msra.mxu0 %v2683_v35  ;;  %1883 = vmatprep.subr.bf16.mxu1 %v2684_v36  ;;  %v2774_v35 = vld [vmem:[%s4047_s1 + $0x170] ss:$8 sps:$4 sm:$0xff]   ;;  %v2803_v51 = vld [vmem:[%s4047_s1 + $0x5b4] ss:$8 sps:$4 sm:$0xff]  }
  0x25   :  { %2055 = vmatprep.subr.bf16.mxu0 %v2686_v37  ;;  %v2777_v36 = vld [vmem:[%s4047_s1 + $0x570] ss:$8 sps:$4 sm:$0xff]   ;;  %v2836_v37 = vld [vmem:[%s4048_s0 + $0x2c] ss:$72 sps:$4 sm:$0xff]  }
  0x27   :  { %1884 = vmatpush1.bf16.msra.mxu1 %v2688_v38  ;;  %v2782_v38 = vld [vmem:[%s4047_s1 + $0x184] ss:$8 sps:$4 sm:$0xff]  }
  0x28   :  { %2056 = vmatpush1.bf16.msra.mxu0 %v2689_v39  ;;  %1885 = vmatprep.subr.bf16.mxu1 %v2690_v40  ;;  %v2785_v39 = vld [vmem:[%s4047_s1 + $0x584] ss:$8 sps:$4 sm:$0xff]   ;;  %v2780_v40 = vld [vmem:[%s4047_s1 + $0x180] ss:$8 sps:$4 sm:$0xff]  }
  0x29   :  { %2057 = vmatprep.subr.bf16.mxu0 %v2692_v41  ;;  %v2783_v41 = vld [vmem:[%s4047_s1 + $0x580] ss:$8 sps:$4 sm:$0xff]  }
  0x2b   :  { %1886 = vmatpush1.bf16.msra.mxu1 %v2694_v42  ;;  %v2788_v42 = vld [vmem:[%s4047_s1 + $0x194] ss:$8 sps:$4 sm:$0xff]  }
  0x2c   :  { %2058 = vmatpush1.bf16.msra.mxu0 %v2695_v43  ;;  %1887 = vmatprep.subr.bf16.mxu1 %v2696_v44  ;;  %v2791_v43 = vld [vmem:[%s4047_s1 + $0x594] ss:$8 sps:$4 sm:$0xff]   ;;  %v2786_v44 = vld [vmem:[%s4047_s1 + $0x190] ss:$8 sps:$4 sm:$0xff]  }
  0x2d   :  { %2059 = vmatprep.subr.bf16.mxu0 %v2698_v45  ;;  %v2789_v45 = vld [vmem:[%s4047_s1 + $0x590] ss:$8 sps:$4 sm:$0xff]  }
  0x2f   :  { %1888 = vmatpush1.bf16.msra.mxu1 %v2700_v46  ;;  %v2794_v46 = vld [vmem:[%s4047_s1 + $0x1a4] ss:$8 sps:$4 sm:$0xff]  }
  0x30   :  { %2060 = vmatpush1.bf16.msra.mxu0 %v2701_v47  ;;  %1889 = vmatprep.subr.bf16.mxu1 %v2702_v49  ;;  %v2797_v47 = vld [vmem:[%s4047_s1 + $0x5a4] ss:$8 sps:$4 sm:$0xff]   ;;  %v2795_v49 = vld [vmem:[%s4047_s1 + $0x5a0] ss:$8 sps:$4 sm:$0xff]  }
  0x31   :  { %2061 = vmatprep.subr.bf16.mxu0 %v2704_v50  ;;  %v2800_v50 = vld [vmem:[%s4047_s1 + $0x1b4] ss:$8 sps:$4 sm:$0xff]  }
  0x33   :  { %1890 = vmatpush1.bf16.msra.mxu1 %v2706_v52  ;;  %v2798_v52 = vld [vmem:[%s4047_s1 + $0x1b0] ss:$8 sps:$4 sm:$0xff]  }
  0x34   :  { %2062 = vmatpush1.bf16.msra.mxu0 %v2707_v53  ;;  %1891 = vmatprep.subr.bf16.mxu1 %v2708_v54  ;;  %v2801_v53 = vld [vmem:[%s4047_s1 + $0x5b0] ss:$8 sps:$4 sm:$0xff]   ;;  %v2806_v54 = vld [vmem:[%s4047_s1 + $0x1c4] ss:$8 sps:$4 sm:$0xff]  }
  0x35   :  { %2063 = vmatprep.subr.bf16.mxu0 %v2710_v55  ;;  %v2809_v55 = vld [vmem:[%s4047_s1 + $0x5c4] ss:$8 sps:$4 sm:$0xff]  }
  0x37   :  { %1892 = vmatpush1.bf16.msra.mxu1 %v2712_v56  ;;  %v2804_v56 = vld [vmem:[%s4047_s1 + $0x1c0] ss:$8 sps:$4 sm:$0xff]  }
  0x38   :  { %2064 = vmatpush1.bf16.msra.mxu0 %v2713_v57  ;;  %1893 = vmatprep.subr.bf16.mxu1 %v2714_v58  ;;  %v2807_v57 = vld [vmem:[%s4047_s1 + $0x5c0] ss:$8 sps:$4 sm:$0xff]   ;;  %v2812_v58 = vld [vmem:[%s4047_s1 + $0x1d4] ss:$8 sps:$4 sm:$0xff]  }
  0x39   :  { %2065 = vmatprep.subr.bf16.mxu0 %v2716_v59  ;;  %v2815_v59 = vld [vmem:[%s4047_s1 + $0x5d4] ss:$8 sps:$4 sm:$0xff]  }
  0x3b   :  { %1894 = vmatpush1.bf16.msra.mxu1 %v2718_v60  ;;  %v2810_v60 = vld [vmem:[%s4047_s1 + $0x1d0] ss:$8 sps:$4 sm:$0xff]  }
  0x3c   :  { %2066 = vmatpush1.bf16.msra.mxu0 %v2719_v61  ;;  %1895 = vmatprep.subr.bf16.mxu1 %v2720_v62  ;;  %v2813_v61 = vld [vmem:[%s4047_s1 + $0x5d0] ss:$8 sps:$4 sm:$0xff]   ;;  %v2818_v62 = vld [vmem:[%s4047_s1 + $0x1e4] ss:$8 sps:$4 sm:$0xff]  }
  0x3d   :  { %2067 = vmatprep.subr.bf16.mxu0 %v2722_v63  ;;  %v2821_v63 = vld [vmem:[%s4047_s1 + $0x5e4] ss:$8 sps:$4 sm:$0xff]  }
  0x3f   :  { %1896 = vmatpush1.bf16.msra.mxu1 %v2724_v0  ;;  %v2816_v0 = vld [vmem:[%s4047_s1 + $0x1e0] ss:$8 sps:$4 sm:$0xff]  }
  0x40   :  { %2068 = vmatpush1.bf16.msra.mxu0 %v2725_v1  ;;  %1908 = vmatprep.subr.bf16.mxu1 %v2731_v2  ;;  %v2819_v1 = vld [vmem:[%s4047_s1 + $0x5e0] ss:$8 sps:$4 sm:$0xff]   ;;  %v2824_v2 = vld [vmem:[%s4047_s1 + $0x1f4] ss:$8 sps:$4 sm:$0xff]  }
  0x41   :  { %2080 = vmatprep.subr.bf16.mxu0 %v2737_v3  ;;  %v2827_v3 = vld [vmem:[%s4047_s1 + $0x5f4] ss:$8 sps:$4 sm:$0xff]  }
  0x42   :  { %1898 = vmatmul.mubr.bf16.vlgmr.msra.gmra.mrb[0].mxu1 %v2726_v4  ;;  %v2822_v4 = vld [vmem:[%s4047_s1 + $0x1f0] ss:$8 sps:$4 sm:$0xff]  }
  0x43   :  { %2070 = vmatmul.mubr.bf16.vlgmr.msra.gmra.mrb[0].mxu0 %v2732_v6  ;;  %1909 = vmatpush1.bf16.msra.mxu1 %v2729_v5  ;;  %v2825_v5 = vld [vmem:[%s4047_s1 + $0x5f0] ss:$8 sps:$4 sm:$0xff]   ;;  %v2833_v6 = vld [vmem:[%s4047_s1 + $0x204] ss:$8 sps:$4 sm:$0xff]  }
  0x44   :  { %2081 = vmatpush1.bf16.msra.mxu0 %v2735_v7  ;;  %1910 = vmatprep.subr.bf16.mxu1 %v2740_v8  ;;  %v2839_v7 = vld [vmem:[%s4047_s1 + $0x604] ss:$8 sps:$4 sm:$0xff]   ;;  %v2828_v8 = vld [vmem:[%s4048_s0 + $0x8] ss:$72 sps:$4 sm:$0xff]  }
  0x45   :  { %2082 = vmatprep.subr.bf16.mxu0 %v2743_v9  ;;  %1940 = vmatprep.mubr.bf16.mxu1 %v2830_v34  ;;  %v2831_v9 = vld [vmem:[%s4047_s1 + $0x200] ss:$8 sps:$4 sm:$0xff]   ;;  %v2872_v34 = vld [vmem:[%s4047_s1 + $0x264] ss:$8 sps:$4 sm:$0xff]  }
  0x46   :  { %2112 = vmatprep.mubr.bf16.mxu0 %v2836_v37  ;;  %v2873_v37 = vld [vmem:[%s4047_s1 + $0x660] ss:$8 sps:$4 sm:$0xff]  }
  0x47   :  { %1911 = vmatpush1.bf16.msra.mxu1 %v2738_v10  ;;  %v2834_v10 = vld [vmem:[%s4048_s0 + $0x28] ss:$72 sps:$4 sm:$0xff]  }
  0x48   :  { %2083 = vmatpush1.bf16.msra.mxu0 %v2741_v11  ;;  %1912 = vmatprep.subr.bf16.mxu1 %v2746_v12  ;;  %v2837_v11 = vld [vmem:[%s4047_s1 + $0x600] ss:$8 sps:$4 sm:$0xff]   ;;  %v2842_v12 = vld [vmem:[%s4047_s1 + $0x214] ss:$8 sps:$4 sm:$0xff]  }
  0x49   :  { %2084 = vmatprep.subr.bf16.mxu0 %v2749_v13  ;;  %v2845_v13 = vld [vmem:[%s4047_s1 + $0x614] ss:$8 sps:$4 sm:$0xff]  }
  0x4b   :  { %1913 = vmatpush1.bf16.msra.mxu1 %v2744_v14  ;;  %v2840_v14 = vld [vmem:[%s4047_s1 + $0x210] ss:$8 sps:$4 sm:$0xff]  }
  0x4c   :  { %2085 = vmatpush1.bf16.msra.mxu0 %v2747_v15  ;;  %1914 = vmatprep.subr.bf16.mxu1 %v2752_v16  ;;  %v2843_v15 = vld [vmem:[%s4047_s1 + $0x610] ss:$8 sps:$4 sm:$0xff]   ;;  %v2848_v16 = vld [vmem:[%s4047_s1 + $0x224] ss:$8 sps:$4 sm:$0xff]  }
  0x4d   :  { %2086 = vmatprep.subr.bf16.mxu0 %v2755_v17  ;;  %v2851_v17 = vld [vmem:[%s4047_s1 + $0x624] ss:$8 sps:$4 sm:$0xff]  }
  0x4f   :  { %1915 = vmatpush1.bf16.msra.mxu1 %v2750_v18  ;;  %v2846_v18 = vld [vmem:[%s4047_s1 + $0x220] ss:$8 sps:$4 sm:$0xff]  }
  0x50   :  { %2087 = vmatpush1.bf16.msra.mxu0 %v2753_v19  ;;  %1916 = vmatprep.subr.bf16.mxu1 %v2758_v20  ;;  %v2932_v19 = vld [vmem:[%s4048_s0 + $0x14] ss:$72 sps:$4 sm:$0xff]   ;;  %v2849_v20 = vld [vmem:[%s4047_s1 + $0x620] ss:$8 sps:$4 sm:$0xff]  }
  0x51   :  { %2088 = vmatprep.subr.bf16.mxu0 %v2761_v21  ;;  %v2854_v21 = vld [vmem:[%s4047_s1 + $0x234] ss:$8 sps:$4 sm:$0xff]  }
  0x53   :  { %1917 = vmatpush1.bf16.msra.mxu1 %v2756_v22  ;;  %v2857_v22 = vld [vmem:[%s4047_s1 + $0x634] ss:$8 sps:$4 sm:$0xff]  }
  0x54   :  { %2089 = vmatpush1.bf16.msra.mxu0 %v2759_v23  ;;  %1918 = vmatprep.subr.bf16.mxu1 %v2764_v24  ;;  %v2938_v23 = vld [vmem:[%s4048_s0 + $0x34] ss:$72 sps:$4 sm:$0xff]   ;;  %v2852_v24 = vld [vmem:[%s4047_s1 + $0x230] ss:$8 sps:$4 sm:$0xff]  }
  0x55   :  { %2090 = vmatprep.subr.bf16.mxu0 %v2767_v25  ;;  %v2855_v25 = vld [vmem:[%s4047_s1 + $0x630] ss:$8 sps:$4 sm:$0xff]  }
  0x57   :  { %1919 = vmatpush1.bf16.msra.mxu1 %v2762_v26  ;;  %v2860_v26 = vld [vmem:[%s4047_s1 + $0x244] ss:$8 sps:$4 sm:$0xff]  }
  0x58   :  { %2091 = vmatpush1.bf16.msra.mxu0 %v2765_v27  ;;  %1920 = vmatprep.subr.bf16.mxu1 %v2770_v28  ;;  %v2863_v27 = vld [vmem:[%s4047_s1 + $0x644] ss:$8 sps:$4 sm:$0xff]   ;;  %v2858_v28 = vld [vmem:[%s4047_s1 + $0x240] ss:$8 sps:$4 sm:$0xff]  }
  0x59   :  { %2092 = vmatprep.subr.bf16.mxu0 %v2773_v29  ;;  %v2861_v29 = vld [vmem:[%s4047_s1 + $0x640] ss:$8 sps:$4 sm:$0xff]  }
  0x5b   :  { %1921 = vmatpush1.bf16.msra.mxu1 %v2768_v30  ;;  %v2866_v30 = vld [vmem:[%s4047_s1 + $0x254] ss:$8 sps:$4 sm:$0xff]  }
  0x5c   :  { %2093 = vmatpush1.bf16.msra.mxu0 %v2771_v31  ;;  %1922 = vmatprep.subr.bf16.mxu1 %v2776_v32  ;;  %v2869_v31 = vld [vmem:[%s4047_s1 + $0x654] ss:$8 sps:$4 sm:$0xff]   ;;  %v2864_v32 = vld [vmem:[%s4047_s1 + $0x250] ss:$8 sps:$4 sm:$0xff]  }
  0x5d   :  { %2094 = vmatprep.subr.bf16.mxu0 %v2779_v33  ;;  %v2867_v33 = vld [vmem:[%s4047_s1 + $0x650] ss:$8 sps:$4 sm:$0xff]  }
  0x5f   :  { %1923 = vmatpush1.bf16.msra.mxu1 %v2774_v35  ;;  %v2875_v35 = vld [vmem:[%s4047_s1 + $0x664] ss:$8 sps:$4 sm:$0xff]  }
  0x60   :  { %2095 = vmatpush1.bf16.msra.mxu0 %v2777_v36  ;;  %1924 = vmatprep.subr.bf16.mxu1 %v2782_v38  ;;  %v2870_v36 = vld [vmem:[%s4047_s1 + $0x260] ss:$8 sps:$4 sm:$0xff]   ;;  %v2878_v38 = vld [vmem:[%s4047_s1 + $0x274] ss:$8 sps:$4 sm:$0xff]  }
  0x61   :  { %2096 = vmatprep.subr.bf16.mxu0 %v2785_v39  ;;  %v2881_v39 = vld [vmem:[%s4047_s1 + $0x674] ss:$8 sps:$4 sm:$0xff]  }
  0x63   :  { %1925 = vmatpush1.bf16.msra.mxu1 %v2780_v40  ;;  %v2876_v40 = vld [vmem:[%s4047_s1 + $0x270] ss:$8 sps:$4 sm:$0xff]  }
  0x64   :  { %2097 = vmatpush1.bf16.msra.mxu0 %v2783_v41  ;;  %1926 = vmatprep.subr.bf16.mxu1 %v2788_v42  ;;  %v2879_v41 = vld [vmem:[%s4047_s1 + $0x670] ss:$8 sps:$4 sm:$0xff]   ;;  %v2884_v42 = vld [vmem:[%s4047_s1 + $0x284] ss:$8 sps:$4 sm:$0xff]  }
  0x65   :  { %2098 = vmatprep.subr.bf16.mxu0 %v2791_v43  ;;  %v2887_v43 = vld [vmem:[%s4047_s1 + $0x684] ss:$8 sps:$4 sm:$0xff]  }
  0x67   :  { %1927 = vmatpush1.bf16.msra.mxu1 %v2786_v44  ;;  %v2882_v44 = vld [vmem:[%s4047_s1 + $0x280] ss:$8 sps:$4 sm:$0xff]  }
  0x68   :  { %2099 = vmatpush1.bf16.msra.mxu0 %v2789_v45  ;;  %1928 = vmatprep.subr.bf16.mxu1 %v2794_v46  ;;  %v2885_v45 = vld [vmem:[%s4047_s1 + $0x680] ss:$8 sps:$4 sm:$0xff]   ;;  %v2890_v46 = vld [vmem:[%s4047_s1 + $0x294] ss:$8 sps:$4 sm:$0xff]  }
  0x69   :  { %2100 = vmatprep.subr.bf16.mxu0 %v2797_v47  ;;  %v2893_v47 = vld [vmem:[%s4047_s1 + $0x694] ss:$8 sps:$4 sm:$0xff]  }
  0x6b   :  { %1929 = vmatpush1.bf16.msra.mxu1 %v2792_v48  ;;  %v2888_v48 = vld [vmem:[%s4047_s1 + $0x290] ss:$8 sps:$4 sm:$0xff]  }
  0x6c   :  { %2101 = vmatpush1.bf16.msra.mxu0 %v2795_v49  ;;  %1930 = vmatprep.subr.bf16.mxu1 %v2800_v50  ;;  %v2891_v49 = vld [vmem:[%s4047_s1 + $0x690] ss:$8 sps:$4 sm:$0xff]   ;;  %v2896_v50 = vld [vmem:[%s4047_s1 + $0x2a4] ss:$8 sps:$4 sm:$0xff]  }
  0x6d   :  { %2102 = vmatprep.subr.bf16.mxu0 %v2803_v51  ;;  %v2899_v51 = vld [vmem:[%s4047_s1 + $0x6a4] ss:$8 sps:$4 sm:$0xff]  }
  0x6f   :  { %1931 = vmatpush1.bf16.msra.mxu1 %v2798_v52  ;;  %v2894_v52 = vld [vmem:[%s4047_s1 + $0x2a0] ss:$8 sps:$4 sm:$0xff]  }
  0x70   :  { %2103 = vmatpush1.bf16.msra.mxu0 %v2801_v53  ;;  %1932 = vmatprep.subr.bf16.mxu1 %v2806_v54  ;;  %v2897_v53 = vld [vmem:[%s4047_s1 + $0x6a0] ss:$8 sps:$4 sm:$0xff]   ;;  %v2902_v54 = vld [vmem:[%s4047_s1 + $0x2b4] ss:$8 sps:$4 sm:$0xff]  }
  0x71   :  { %2104 = vmatprep.subr.bf16.mxu0 %v2809_v55  ;;  %v2905_v55 = vld [vmem:[%s4047_s1 + $0x6b4] ss:$8 sps:$4 sm:$0xff]  }
  0x73   :  { %1933 = vmatpush1.bf16.msra.mxu1 %v2804_v56  ;;  %v2900_v56 = vld [vmem:[%s4047_s1 + $0x2b0] ss:$8 sps:$4 sm:$0xff]  }
  0x74   :  { %2105 = vmatpush1.bf16.msra.mxu0 %v2807_v57  ;;  %1934 = vmatprep.subr.bf16.mxu1 %v2812_v58  ;;  %v2903_v57 = vld [vmem:[%s4047_s1 + $0x6b0] ss:$8 sps:$4 sm:$0xff]   ;;  %v2908_v58 = vld [vmem:[%s4047_s1 + $0x2c4] ss:$8 sps:$4 sm:$0xff]  }
  0x75   :  { %2106 = vmatprep.subr.bf16.mxu0 %v2815_v59  ;;  %v2911_v59 = vld [vmem:[%s4047_s1 + $0x6c4] ss:$8 sps:$4 sm:$0xff]  }
  0x77   :  { %1935 = vmatpush1.bf16.msra.mxu1 %v2810_v60  ;;  %v2906_v60 = vld [vmem:[%s4047_s1 + $0x2c0] ss:$8 sps:$4 sm:$0xff]  }
  0x78   :  { %2107 = vmatpush1.bf16.msra.mxu0 %v2813_v61  ;;  %1936 = vmatprep.subr.bf16.mxu1 %v2818_v62  ;;  %v2909_v61 = vld [vmem:[%s4047_s1 + $0x6c0] ss:$8 sps:$4 sm:$0xff]   ;;  %v2914_v62 = vld [vmem:[%s4047_s1 + $0x2d4] ss:$8 sps:$4 sm:$0xff]  }
  0x79   :  { %2108 = vmatprep.subr.bf16.mxu0 %v2821_v63  ;;  %v2917_v63 = vld [vmem:[%s4047_s1 + $0x6d4] ss:$8 sps:$4 sm:$0xff]  }
  0x7b   :  { %1937 = vmatpush1.bf16.msra.mxu1 %v2816_v0  ;;  %v2912_v0 = vld [vmem:[%s4047_s1 + $0x2d0] ss:$8 sps:$4 sm:$0xff]  }
  0x7c   :  { %2109 = vmatpush1.bf16.msra.mxu0 %v2819_v1  ;;  %1938 = vmatprep.subr.bf16.mxu1 %v2824_v2  ;;  %v2915_v1 = vld [vmem:[%s4047_s1 + $0x6d0] ss:$8 sps:$4 sm:$0xff]   ;;  %v2920_v2 = vld [vmem:[%s4047_s1 + $0x2e4] ss:$8 sps:$4 sm:$0xff]  }
  0x7d   :  { %2110 = vmatprep.subr.bf16.mxu0 %v2827_v3  ;;  %v2923_v3 = vld [vmem:[%s4047_s1 + $0x6e4] ss:$8 sps:$4 sm:$0xff]  }
  0x7f   :  { %1939 = vmatpush1.bf16.msra.mxu1 %v2822_v4  ;;  %v2918_v4 = vld [vmem:[%s4047_s1 + $0x2e0] ss:$8 sps:$4 sm:$0xff]  }
  0x80   :  { %2111 = vmatpush1.bf16.msra.mxu0 %v2825_v5  ;;  %1951 = vmatprep.subr.bf16.mxu1 %v2833_v6  ;;  %v2921_v5 = vld [vmem:[%s4047_s1 + $0x6e0] ss:$8 sps:$4 sm:$0xff]   ;;  %v2926_v6 = vld [vmem:[%s4047_s1 + $0x2f4] ss:$8 sps:$4 sm:$0xff]  }
  0x81   :  { %2123 = vmatprep.subr.bf16.mxu0 %v2839_v7  ;;  %v2929_v7 = vld [vmem:[%s4047_s1 + $0x6f4] ss:$8 sps:$4 sm:$0xff]  }
  0x82   :  { %1941 = vmatmul.mubr.bf16.vlgmr.msra.gmra.mrb[0].mxu1 %v2828_v8  ;;  %v2924_v8 = vld [vmem:[%s4047_s1 + $0x2f0] ss:$8 sps:$4 sm:$0xff]  }
  0x83   :  { %2113 = vmatmul.mubr.bf16.vlgmr.msra.gmra.mrb[0].mxu0 %v2834_v10  ;;  %1952 = vmatpush1.bf16.msra.mxu1 %v2831_v9  ;;  %v2927_v9 = vld [vmem:[%s4047_s1 + $0x6f0] ss:$8 sps:$4 sm:$0xff]   ;;  %v2935_v10 = vld [vmem:[%s4047_s1 + $0x304] ss:$8 sps:$4 sm:$0xff]  }
  0x84   :  { %2124 = vmatpush1.bf16.msra.mxu0 %v2837_v11  ;;  %1953 = vmatprep.subr.bf16.mxu1 %v2842_v12  ;;  %v2941_v11 = vld [vmem:[%s4047_s1 + $0x704] ss:$8 sps:$4 sm:$0xff]   ;;  %v2930_v12 = vld [vmem:[%s4048_s0 + $0x10] ss:$72 sps:$4 sm:$0xff]  }
  0x85   :  { %2125 = vmatprep.subr.bf16.mxu0 %v2845_v13  ;;  %1983 = vmatprep.mubr.bf16.mxu1 %v2932_v19  ;;  %v2933_v13 = vld [vmem:[%s4047_s1 + $0x300] ss:$8 sps:$4 sm:$0xff]   ;;  %v3037_v19 = vld [vmem:[%s4048_s0 + $0x3c] ss:$72 sps:$4 sm:$0xff]  }
  0x86   :  { %2155 = vmatprep.mubr.bf16.mxu0 %v2938_v23  ;;  %v2953_v23 = vld [vmem:[%s4047_s1 + $0x724] ss:$8 sps:$4 sm:$0xff]  }
  0x87   :  { %1954 = vmatpush1.bf16.msra.mxu1 %v2840_v14  ;;  %v2936_v14 = vld [vmem:[%s4048_s0 + $0x30] ss:$72 sps:$4 sm:$0xff]  }
  0x88   :  { %2126 = vmatpush1.bf16.msra.mxu0 %v2843_v15  ;;  %1955 = vmatprep.subr.bf16.mxu1 %v2848_v16  ;;  %v2939_v15 = vld [vmem:[%s4047_s1 + $0x700] ss:$8 sps:$4 sm:$0xff]   ;;  %v2944_v16 = vld [vmem:[%s4047_s1 + $0x314] ss:$8 sps:$4 sm:$0xff]  }
  0x89   :  { %2127 = vmatprep.subr.bf16.mxu0 %v2851_v17  ;;  %v2947_v17 = vld [vmem:[%s4047_s1 + $0x714] ss:$8 sps:$4 sm:$0xff]  }
  0x8b   :  { %1956 = vmatpush1.bf16.msra.mxu1 %v2846_v18  ;;  %v3034_v18 = vld [vmem:[%s4048_s0 + $0x1c] ss:$72 sps:$4 sm:$0xff]  }
  0x8c   :  { %2128 = vmatpush1.bf16.msra.mxu0 %v2849_v20  ;;  %1957 = vmatprep.subr.bf16.mxu1 %v2854_v21  ;;  %v2942_v20 = vld [vmem:[%s4047_s1 + $0x310] ss:$8 sps:$4 sm:$0xff]  }
  0x8d   :  { %2129 = vmatprep.subr.bf16.mxu0 %v2857_v22  ;;  %v2945_v21 = vld [vmem:[%s4047_s1 + $0x710] ss:$8 sps:$4 sm:$0xff]   ;;  %v2950_v22 = vld [vmem:[%s4047_s1 + $0x324] ss:$8 sps:$4 sm:$0xff]  }
  0x8f   :  { %1958 = vmatpush1.bf16.msra.mxu1 %v2852_v24  ;;  %v2948_v24 = vld [vmem:[%s4047_s1 + $0x320] ss:$8 sps:$4 sm:$0xff]  }
  0x90   :  { %2130 = vmatpush1.bf16.msra.mxu0 %v2855_v25  ;;  %1959 = vmatprep.subr.bf16.mxu1 %v2860_v26  ;;  %v2951_v25 = vld [vmem:[%s4047_s1 + $0x720] ss:$8 sps:$4 sm:$0xff]   ;;  %v2956_v26 = vld [vmem:[%s4047_s1 + $0x334] ss:$8 sps:$4 sm:$0xff]  }
  0x91   :  { %2131 = vmatprep.subr.bf16.mxu0 %v2863_v27  ;;  %v2959_v27 = vld [vmem:[%s4047_s1 + $0x734] ss:$8 sps:$4 sm:$0xff]  }
  0x93   :  { %1960 = vmatpush1.bf16.msra.mxu1 %v2858_v28  ;;  %v2954_v28 = vld [vmem:[%s4047_s1 + $0x330] ss:$8 sps:$4 sm:$0xff]  }
  0x94   :  { %2132 = vmatpush1.bf16.msra.mxu0 %v2861_v29  ;;  %1961 = vmatprep.subr.bf16.mxu1 %v2866_v30  ;;  %v2957_v29 = vld [vmem:[%s4047_s1 + $0x730] ss:$8 sps:$4 sm:$0xff]   ;;  %v2962_v30 = vld [vmem:[%s4047_s1 + $0x344] ss:$8 sps:$4 sm:$0xff]  }
  0x95   :  { %2133 = vmatprep.subr.bf16.mxu0 %v2869_v31  ;;  %v2965_v31 = vld [vmem:[%s4047_s1 + $0x744] ss:$8 sps:$4 sm:$0xff]  }
  0x97   :  { %1962 = vmatpush1.bf16.msra.mxu1 %v2864_v32  ;;  %v2960_v32 = vld [vmem:[%s4047_s1 + $0x340] ss:$8 sps:$4 sm:$0xff]  }
  0x98   :  { %2134 = vmatpush1.bf16.msra.mxu0 %v2867_v33  ;;  %1963 = vmatprep.subr.bf16.mxu1 %v2872_v34  ;;  %v2963_v33 = vld [vmem:[%s4047_s1 + $0x740] ss:$8 sps:$4 sm:$0xff]   ;;  %v2968_v34 = vld [vmem:[%s4047_s1 + $0x354] ss:$8 sps:$4 sm:$0xff]  }
  0x99   :  { %2135 = vmatprep.subr.bf16.mxu0 %v2875_v35  ;;  %v2971_v35 = vld [vmem:[%s4047_s1 + $0x754] ss:$8 sps:$4 sm:$0xff]  }
  0x9b   :  { %1964 = vmatpush1.bf16.msra.mxu1 %v2870_v36  ;;  %v2966_v36 = vld [vmem:[%s4047_s1 + $0x350] ss:$8 sps:$4 sm:$0xff]  }
  0x9c   :  { %2136 = vmatpush1.bf16.msra.mxu0 %v2873_v37  ;;  %1965 = vmatprep.subr.bf16.mxu1 %v2878_v38  ;;  %v2969_v37 = vld [vmem:[%s4047_s1 + $0x750] ss:$8 sps:$4 sm:$0xff]   ;;  %v2974_v38 = vld [vmem:[%s4047_s1 + $0x364] ss:$8 sps:$4 sm:$0xff]  }
  0x9d   :  { %2137 = vmatprep.subr.bf16.mxu0 %v2881_v39  ;;  %v2977_v39 = vld [vmem:[%s4047_s1 + $0x764] ss:$8 sps:$4 sm:$0xff]  }
  0x9f   :  { %1966 = vmatpush1.bf16.msra.mxu1 %v2876_v40  ;;  %v2972_v40 = vld [vmem:[%s4047_s1 + $0x360] ss:$8 sps:$4 sm:$0xff]  }
  0xa0   :  { %2138 = vmatpush1.bf16.msra.mxu0 %v2879_v41  ;;  %1967 = vmatprep.subr.bf16.mxu1 %v2884_v42  ;;  %v2975_v41 = vld [vmem:[%s4047_s1 + $0x760] ss:$8 sps:$4 sm:$0xff]   ;;  %v2980_v42 = vld [vmem:[%s4047_s1 + $0x374] ss:$8 sps:$4 sm:$0xff]  }
  0xa1   :  { %2139 = vmatprep.subr.bf16.mxu0 %v2887_v43  ;;  %v2983_v43 = vld [vmem:[%s4047_s1 + $0x774] ss:$8 sps:$4 sm:$0xff]  }
  0xa3   :  { %1968 = vmatpush1.bf16.msra.mxu1 %v2882_v44  ;;  %v2978_v44 = vld [vmem:[%s4047_s1 + $0x370] ss:$8 sps:$4 sm:$0xff]  }
  0xa4   :  { %2140 = vmatpush1.bf16.msra.mxu0 %v2885_v45  ;;  %1969 = vmatprep.subr.bf16.mxu1 %v2890_v46  ;;  %v2981_v45 = vld [vmem:[%s4047_s1 + $0x770] ss:$8 sps:$4 sm:$0xff]   ;;  %v2986_v46 = vld [vmem:[%s4047_s1 + $0x384] ss:$8 sps:$4 sm:$0xff]  }
  0xa5   :  { %2141 = vmatprep.subr.bf16.mxu0 %v2893_v47  ;;  %v2989_v47 = vld [vmem:[%s4047_s1 + $0x784] ss:$8 sps:$4 sm:$0xff]  }
  0xa7   :  { %1970 = vmatpush1.bf16.msra.mxu1 %v2888_v48  ;;  %v2984_v48 = vld [vmem:[%s4047_s1 + $0x380] ss:$8 sps:$4 sm:$0xff]  }
  0xa8   :  { %2142 = vmatpush1.bf16.msra.mxu0 %v2891_v49  ;;  %1971 = vmatprep.subr.bf16.mxu1 %v2896_v50  ;;  %v2987_v49 = vld [vmem:[%s4047_s1 + $0x780] ss:$8 sps:$4 sm:$0xff]   ;;  %v2992_v50 = vld [vmem:[%s4047_s1 + $0x394] ss:$8 sps:$4 sm:$0xff]  }
  0xa9   :  { %2143 = vmatprep.subr.bf16.mxu0 %v2899_v51  ;;  %v2995_v51 = vld [vmem:[%s4047_s1 + $0x794] ss:$8 sps:$4 sm:$0xff]  }
  0xab   :  { %1972 = vmatpush1.bf16.msra.mxu1 %v2894_v52  ;;  %v2990_v52 = vld [vmem:[%s4047_s1 + $0x390] ss:$8 sps:$4 sm:$0xff]  }
  0xac   :  { %2144 = vmatpush1.bf16.msra.mxu0 %v2897_v53  ;;  %1973 = vmatprep.subr.bf16.mxu1 %v2902_v54  ;;  %v2993_v53 = vld [vmem:[%s4047_s1 + $0x790] ss:$8 sps:$4 sm:$0xff]   ;;  %v2998_v54 = vld [vmem:[%s4047_s1 + $0x3a4] ss:$8 sps:$4 sm:$0xff]  }
  0xad   :  { %2145 = vmatprep.subr.bf16.mxu0 %v2905_v55  ;;  %v3001_v55 = vld [vmem:[%s4047_s1 + $0x7a4] ss:$8 sps:$4 sm:$0xff]  }
  0xaf   :  { %1974 = vmatpush1.bf16.msra.mxu1 %v2900_v56  ;;  %v2996_v56 = vld [vmem:[%s4047_s1 + $0x3a0] ss:$8 sps:$4 sm:$0xff]  }
  0xb0   :  { %2146 = vmatpush1.bf16.msra.mxu0 %v2903_v57  ;;  %1975 = vmatprep.subr.bf16.mxu1 %v2908_v58  ;;  %v2999_v57 = vld [vmem:[%s4047_s1 + $0x7a0] ss:$8 sps:$4 sm:$0xff]   ;;  %v3004_v58 = vld [vmem:[%s4047_s1 + $0x3b4] ss:$8 sps:$4 sm:$0xff]  }
  0xb1   :  { %2147 = vmatprep.subr.bf16.mxu0 %v2911_v59  ;;  %v3007_v59 = vld [vmem:[%s4047_s1 + $0x7b4] ss:$8 sps:$4 sm:$0xff]  }
  0xb3   :  { %1976 = vmatpush1.bf16.msra.mxu1 %v2906_v60  ;;  %v3002_v60 = vld [vmem:[%s4047_s1 + $0x3b0] ss:$8 sps:$4 sm:$0xff]  }
  0xb4   :  { %2148 = vmatpush1.bf16.msra.mxu0 %v2909_v61  ;;  %1977 = vmatprep.subr.bf16.mxu1 %v2914_v62  ;;  %v3005_v61 = vld [vmem:[%s4047_s1 + $0x7b0] ss:$8 sps:$4 sm:$0xff]   ;;  %v3010_v62 = vld [vmem:[%s4047_s1 + $0x3c4] ss:$8 sps:$4 sm:$0xff]  }
  0xb5   :  { %2149 = vmatprep.subr.bf16.mxu0 %v2917_v63  ;;  %v3013_v63 = vld [vmem:[%s4047_s1 + $0x7c4] ss:$8 sps:$4 sm:$0xff]  }
  0xb7   :  { %1978 = vmatpush1.bf16.msra.mxu1 %v2912_v0  ;;  %v3008_v0 = vld [vmem:[%s4047_s1 + $0x3c0] ss:$8 sps:$4 sm:$0xff]  }
  0xb8   :  { %2150 = vmatpush1.bf16.msra.mxu0 %v2915_v1  ;;  %1979 = vmatprep.subr.bf16.mxu1 %v2920_v2  ;;  %v3011_v1 = vld [vmem:[%s4047_s1 + $0x7c0] ss:$8 sps:$4 sm:$0xff]   ;;  %v3016_v2 = vld [vmem:[%s4047_s1 + $0x3d4] ss:$8 sps:$4 sm:$0xff]  }
  0xb9   :  { %2151 = vmatprep.subr.bf16.mxu0 %v2923_v3  ;;  %v3019_v3 = vld [vmem:[%s4047_s1 + $0x7d4] ss:$8 sps:$4 sm:$0xff]  }
  0xbb   :  { %1980 = vmatpush1.bf16.msra.mxu1 %v2918_v4  ;;  %v3014_v4 = vld [vmem:[%s4047_s1 + $0x3d0] ss:$8 sps:$4 sm:$0xff]  }
  0xbc   :  { %2152 = vmatpush1.bf16.msra.mxu0 %v2921_v5  ;;  %1981 = vmatprep.subr.bf16.mxu1 %v2926_v6  ;;  %v3017_v5 = vld [vmem:[%s4047_s1 + $0x7d0] ss:$8 sps:$4 sm:$0xff]   ;;  %v3022_v6 = vld [vmem:[%s4047_s1 + $0x3e4] ss:$8 sps:$4 sm:$0xff]  }
  0xbd   :  { %2153 = vmatprep.subr.bf16.mxu0 %v2929_v7  ;;  %v3025_v7 = vld [vmem:[%s4047_s1 + $0x7e4] ss:$8 sps:$4 sm:$0xff]  }
  0xbf   :  { %1982 = vmatpush1.bf16.msra.mxu1 %v2924_v8  ;;  %v3020_v8 = vld [vmem:[%s4047_s1 + $0x3e0] ss:$8 sps:$4 sm:$0xff]  }
  0xc0   :  { %2154 = vmatpush1.bf16.msra.mxu0 %v2927_v9  ;;  %1994 = vmatprep.subr.bf16.mxu1 %v2935_v10  ;;  %v3023_v9 = vld [vmem:[%s4047_s1 + $0x7e0] ss:$8 sps:$4 sm:$0xff]   ;;  %v3028_v10 = vld [vmem:[%s4047_s1 + $0x3f4] ss:$8 sps:$4 sm:$0xff]  }
  0xc1   :  { %2166 = vmatprep.subr.bf16.mxu0 %v2941_v11  ;;  %v3031_v11 = vld [vmem:[%s4047_s1 + $0x7f4] ss:$8 sps:$4 sm:$0xff]  }
  0xc2   :  { %1984 = vmatmul.mubr.bf16.vlgmr.msra.gmra.mrb[0].mxu1 %v2930_v12  ;;  %v3026_v12 = vld [vmem:[%s4047_s1 + $0x3f0] ss:$8 sps:$4 sm:$0xff]  }
  0xc3   :  { %2156 = vmatmul.mubr.bf16.vlgmr.msra.gmra.mrb[0].mxu0 %v2936_v14  ;;  %1995 = vmatpush1.bf16.msra.mxu1 %v2933_v13  ;;  %v3029_v13 = vld [vmem:[%s4047_s1 + $0x7f0] ss:$8 sps:$4 sm:$0xff]   ;;  %v3040_v14 = vld [vmem:[%s4047_s1 + $0x804] ss:$8 sps:$4 sm:$0xff]  }
  0xc4   :  { %2167 = vmatpush1.bf16.msra.mxu0 %v2939_v15  ;;  %1996 = vmatprep.subr.bf16.mxu1 %v2944_v16  ;;  %v3032_v15 = vld [vmem:[%s4048_s0 + $0x18] ss:$72 sps:$4 sm:$0xff]  }
  0xc5   :  { %2168 = vmatprep.subr.bf16.mxu0 %v2947_v17  ;;  %2026 = vmatprep.mubr.bf16.mxu1 %v3034_v18  ;;  %v3035_v16 = vld [vmem:[%s4048_s0 + $0x38] ss:$72 sps:$4 sm:$0xff]   ;;  %v3088_v18 = vld [vmem:[%s4048_s0 + $0x44] ss:$72 sps:$4 sm:$0xff]  }
  0xc6   :  { %2198 = vmatprep.mubr.bf16.mxu0 %v3037_v19  ;;  %v3038_v17 = vld [vmem:[%s4047_s1 + $0x800] ss:$8 sps:$4 sm:$0xff]   ;;  %v3043_v19 = vld [vmem:[%s4047_s1 + $0x814] ss:$8 sps:$4 sm:$0xff]  }
  0xc7   :  { %1997 = vmatpush1.bf16.msra.mxu1 %v2942_v20  ;;  %v3041_v20 = vld [vmem:[%s4047_s1 + $0x810] ss:$8 sps:$4 sm:$0xff]  }
  0xc8   :  { %2169 = vmatpush1.bf16.msra.mxu0 %v2945_v21  ;;  %1998 = vmatprep.subr.bf16.mxu1 %v2950_v22  ;;  %v3046_v21 = vld [vmem:[%s4047_s1 + $0x824] ss:$8 sps:$4 sm:$0xff]   ;;  %v3044_v22 = vld [vmem:[%s4047_s1 + $0x820] ss:$8 sps:$4 sm:$0xff]  }
  0xc9   :  { %2170 = vmatprep.subr.bf16.mxu0 %v2953_v23  ;;  %v3049_v23 = vld [vmem:[%s4047_s1 + $0x834] ss:$8 sps:$4 sm:$0xff]  }
  0xcb   :  { %1999 = vmatpush1.bf16.msra.mxu1 %v2948_v24  ;;  %v3047_v24 = vld [vmem:[%s4047_s1 + $0x830] ss:$8 sps:$4 sm:$0xff]  }
  0xcc   :  { %2171 = vmatpush1.bf16.msra.mxu0 %v2951_v25  ;;  %2000 = vmatprep.subr.bf16.mxu1 %v2956_v26  ;;  %v3052_v25 = vld [vmem:[%s4047_s1 + $0x844] ss:$8 sps:$4 sm:$0xff]   ;;  %v3050_v26 = vld [vmem:[%s4047_s1 + $0x840] ss:$8 sps:$4 sm:$0xff]  }
  0xcd   :  { %2172 = vmatprep.subr.bf16.mxu0 %v2959_v27  ;;  %v3055_v27 = vld [vmem:[%s4047_s1 + $0x854] ss:$8 sps:$4 sm:$0xff]  }
  0xcf   :  { %2001 = vmatpush1.bf16.msra.mxu1 %v2954_v28  ;;  %v3053_v28 = vld [vmem:[%s4047_s1 + $0x850] ss:$8 sps:$4 sm:$0xff]  }
  0xd0   :  { %2173 = vmatpush1.bf16.msra.mxu0 %v2957_v29  ;;  %2002 = vmatprep.subr.bf16.mxu1 %v2962_v30  ;;  %v3058_v29 = vld [vmem:[%s4047_s1 + $0x864] ss:$8 sps:$4 sm:$0xff]   ;;  %v3056_v30 = vld [vmem:[%s4047_s1 + $0x860] ss:$8 sps:$4 sm:$0xff]  }
  0xd1   :  { %2174 = vmatprep.subr.bf16.mxu0 %v2965_v31  ;;  %v3061_v31 = vld [vmem:[%s4047_s1 + $0x874] ss:$8 sps:$4 sm:$0xff]  }
  0xd3   :  { %2003 = vmatpush1.bf16.msra.mxu1 %v2960_v32  ;;  %v3059_v32 = vld [vmem:[%s4047_s1 + $0x870] ss:$8 sps:$4 sm:$0xff]  }
  0xd4   :  { %2175 = vmatpush1.bf16.msra.mxu0 %v2963_v33  ;;  %2004 = vmatprep.subr.bf16.mxu1 %v2968_v34  ;;  %v3064_v33 = vld [vmem:[%s4047_s1 + $0x884] ss:$8 sps:$4 sm:$0xff]   ;;  %v3062_v34 = vld [vmem:[%s4047_s1 + $0x880] ss:$8 sps:$4 sm:$0xff]  }
  0xd5   :  { %2176 = vmatprep.subr.bf16.mxu0 %v2971_v35  ;;  %v3067_v35 = vld [vmem:[%s4047_s1 + $0x894] ss:$8 sps:$4 sm:$0xff]  }
  0xd7   :  { %2005 = vmatpush1.bf16.msra.mxu1 %v2966_v36  ;;  %v3065_v36 = vld [vmem:[%s4047_s1 + $0x890] ss:$8 sps:$4 sm:$0xff]  }
  0xd8   :  { %2177 = vmatpush1.bf16.msra.mxu0 %v2969_v37  ;;  %2006 = vmatprep.subr.bf16.mxu1 %v2974_v38  ;;  %v3070_v37 = vld [vmem:[%s4047_s1 + $0x8a4] ss:$8 sps:$4 sm:$0xff]   ;;  %v3068_v38 = vld [vmem:[%s4047_s1 + $0x8a0] ss:$8 sps:$4 sm:$0xff]  }
  0xd9   :  { %2178 = vmatprep.subr.bf16.mxu0 %v2977_v39  ;;  %v3073_v39 = vld [vmem:[%s4047_s1 + $0x8b4] ss:$8 sps:$4 sm:$0xff]  }
  0xdb   :  { %2007 = vmatpush1.bf16.msra.mxu1 %v2972_v40  ;;  %v3071_v40 = vld [vmem:[%s4047_s1 + $0x8b0] ss:$8 sps:$4 sm:$0xff]  }
  0xdc   :  { %2179 = vmatpush1.bf16.msra.mxu0 %v2975_v41  ;;  %2008 = vmatprep.subr.bf16.mxu1 %v2980_v42  ;;  %v3076_v41 = vld [vmem:[%s4047_s1 + $0x8c4] ss:$8 sps:$4 sm:$0xff]   ;;  %v3074_v42 = vld [vmem:[%s4047_s1 + $0x8c0] ss:$8 sps:$4 sm:$0xff]  }
  0xdd   :  { %2180 = vmatprep.subr.bf16.mxu0 %v2983_v43  ;;  %v3079_v43 = vld [vmem:[%s4047_s1 + $0x8d4] ss:$8 sps:$4 sm:$0xff]  }
  0xdf   :  { %2009 = vmatpush1.bf16.msra.mxu1 %v2978_v44  ;;  %v3077_v44 = vld [vmem:[%s4047_s1 + $0x8d0] ss:$8 sps:$4 sm:$0xff]  }
  0xe0   :  { %2181 = vmatpush1.bf16.msra.mxu0 %v2981_v45  ;;  %2010 = vmatprep.subr.bf16.mxu1 %v2986_v46  ;;  %v3082_v45 = vld [vmem:[%s4047_s1 + $0x8e4] ss:$8 sps:$4 sm:$0xff]   ;;  %v3080_v46 = vld [vmem:[%s4047_s1 + $0x8e0] ss:$8 sps:$4 sm:$0xff]  }
  0xe1   :  { %2182 = vmatprep.subr.bf16.mxu0 %v2989_v47  ;;  %v3085_v47 = vld [vmem:[%s4047_s1 + $0x8f4] ss:$8 sps:$4 sm:$0xff]  }
  0xe3   :  { %2011 = vmatpush1.bf16.msra.mxu1 %v2984_v48  ;;  %v3083_v48 = vld [vmem:[%s4047_s1 + $0x8f0] ss:$8 sps:$4 sm:$0xff]  }
  0xe4   :  { %2183 = vmatpush1.bf16.msra.mxu0 %v2987_v49  ;;  %2012 = vmatprep.subr.bf16.mxu1 %v2992_v50  ;;  %v3086_v49 = vld [vmem:[%s4048_s0 + $0x40] ss:$72 sps:$4 sm:$0xff]  }
  0xe5   :  { %2184 = vmatprep.subr.bf16.mxu0 %v2995_v51 }
  0xe7   :  { %2013 = vmatpush1.bf16.msra.mxu1 %v2990_v52 }
  0xe8   :  { %2185 = vmatpush1.bf16.msra.mxu0 %v2993_v53  ;;  %2014 = vmatprep.subr.bf16.mxu1 %v2998_v54  ;;  %v325_v54 = vlaneseq }
  0xe9   :  { %2186 = vmatprep.subr.bf16.mxu0 %v3001_v55 }
  0xea   :  { %v326_v55 = vshrl.u32 %v325_v54, 7 }
  0xeb   :  { %2015 = vmatpush1.bf16.msra.mxu1 %v2996_v56 }
  0xec   :  { %2187 = vmatpush1.bf16.msra.mxu0 %v2999_v57  ;;  %2016 = vmatprep.subr.bf16.mxu1 %v3004_v58  ;;  %v327_v56 = vsub.s32 0, %v326_v55  ;;  %v323_v57 = vld [vmem:[%s4049_s2] sm:$0x3]  ;;  %v331_v58 = vsub.s32 1, %v326_v55 }
  0xed   :  { %2188 = vmatprep.subr.bf16.mxu0 %v3007_v59 }
  0xee   :  { %v328_v59 = vrot.slane %v323_v57, %v327_v56 }
  0xef   :  { %2017 = vmatpush1.bf16.msra.mxu1 %v3002_v60  ;;  %v332_v60 = vrot.slane %v323_v57, %v331_v58 }
  0xf0   :  { %2189 = vmatpush1.bf16.msra.mxu0 %v3005_v61  ;;  %2018 = vmatprep.subr.bf16.mxu1 %v3010_v62  ;;  %v2252_v61 = vld [vmem:[%s4050_s3] sm:$0xff]  ;;  %v2253_v62 = vld [vmem:[%s4050_s3 + $0x8] sm:$0xff] }
  0xf1   :  { %2190 = vmatprep.subr.bf16.mxu0 %v3013_v63 }
  0xf3   :  { %2019 = vmatpush1.bf16.msra.mxu1 %v3008_v0  ;;  %v2254_v0 = vunpack.c.l.bf16 %v2252_v61 }
  0xf4   :  { %2191 = vmatpush1.bf16.msra.mxu0 %v3011_v1  ;;  %2020 = vmatprep.subr.bf16.mxu1 %v3016_v2 }
  0xf5   :  { %2192 = vmatprep.subr.bf16.mxu0 %v3019_v3  ;;  %v2255_v3 = vunpack.c.h.bf16 %v2252_v61 }
  0xf7   :  { %2021 = vmatpush1.bf16.msra.mxu1 %v3014_v4 }
  0xf8   :  { %2193 = vmatpush1.bf16.msra.mxu0 %v3017_v5  ;;  %2022 = vmatprep.subr.bf16.mxu1 %v3022_v6 }
  0xf9   :  { %2194 = vmatprep.subr.bf16.mxu0 %v3025_v7  ;;  %v2256_v7 = vunpack.c.l.bf16 %v2253_v62 }
  0xfb   :  { %2023 = vmatpush1.bf16.msra.mxu1 %v3020_v8 }
  0xfc   :  { %2195 = vmatpush1.bf16.msra.mxu0 %v3023_v9  ;;  %2024 = vmatprep.subr.bf16.mxu1 %v3028_v10 }
  0xfd   :  { %2196 = vmatprep.subr.bf16.mxu0 %v3031_v11  ;;  %v2257_v11 = vunpack.c.h.bf16 %v2253_v62 }
  0xff   :  { %2025 = vmatpush1.bf16.msra.mxu1 %v3026_v12 }
 0x100   :  { %2197 = vmatpush1.bf16.msra.mxu0 %v3029_v13 }
 0x101   :  { %2209 = vmatprep.subr.bf16.mxu0 %v3040_v14 }
 0x102   :  { %2027 = vmatmul.mubr.bf16.vlgmr.msra.gmra.mrb[0].mxu1 %v3032_v15 }
 0x103   :  { %2199 = vmatmul.mubr.bf16.vlgmr.msra.gmra.mrb[0].mxu0 %v3035_v16 }
 0x104   :  { %2210 = vmatpush1.bf16.msra.mxu0 %v3038_v17  ;;  %2241 = vmatprep.mubr.bf16.mxu0 %v3088_v18 }
 0x105   :  { %2211 = vmatprep.subr.bf16.mxu0 %v3043_v19 }
 0x108   :  { %2212 = vmatpush1.bf16.msra.mxu0 %v3041_v20 }
 0x109   :  { %2213 = vmatprep.subr.bf16.mxu0 %v3046_v21 }
 0x10c   :  { %2214 = vmatpush1.bf16.msra.mxu0 %v3044_v22 }
 0x10d   :  { %2215 = vmatprep.subr.bf16.mxu0 %v3049_v23 }
 0x110   :  { %2216 = vmatpush1.bf16.msra.mxu0 %v3047_v24 }
 0x111   :  { %2217 = vmatprep.subr.bf16.mxu0 %v3052_v25 }
 0x114   :  { %2218 = vmatpush1.bf16.msra.mxu0 %v3050_v26 }
 0x115   :  { %2219 = vmatprep.subr.bf16.mxu0 %v3055_v27 }
 0x118   :  { %2220 = vmatpush1.bf16.msra.mxu0 %v3053_v28 }
 0x119   :  { %2221 = vmatprep.subr.bf16.mxu0 %v3058_v29 }
 0x11c   :  { %2222 = vmatpush1.bf16.msra.mxu0 %v3056_v30 }
 0x11d   :  { %2223 = vmatprep.subr.bf16.mxu0 %v3061_v31 }
 0x120   :  { %2224 = vmatpush1.bf16.msra.mxu0 %v3059_v32 }
 0x121   :  { %2225 = vmatprep.subr.bf16.mxu0 %v3064_v33 }
 0x124   :  { %2226 = vmatpush1.bf16.msra.mxu0 %v3062_v34 }
 0x125   :  { %2227 = vmatprep.subr.bf16.mxu0 %v3067_v35 }
 0x128   :  { %2228 = vmatpush1.bf16.msra.mxu0 %v3065_v36 }
 0x129   :  { %2229 = vmatprep.subr.bf16.mxu0 %v3070_v37 }
 0x12c   :  { %2230 = vmatpush1.bf16.msra.mxu0 %v3068_v38 }
 0x12d   :  { %2231 = vmatprep.subr.bf16.mxu0 %v3073_v39 }
 0x130   :  { %2232 = vmatpush1.bf16.msra.mxu0 %v3071_v40 }
 0x131   :  { %2233 = vmatprep.subr.bf16.mxu0 %v3076_v41 }
 0x134   :  { %2234 = vmatpush1.bf16.msra.mxu0 %v3074_v42 }
 0x135   :  { %2235 = vmatprep.subr.bf16.mxu0 %v3079_v43 }
 0x138   :  { %2236 = vmatpush1.bf16.msra.mxu0 %v3077_v44 }
 0x139   :  { %2237 = vmatprep.subr.bf16.mxu0 %v3082_v45 }
 0x13c   :  { %2238 = vmatpush1.bf16.msra.mxu0 %v3080_v46 }
 0x13d   :  { %2239 = vmatprep.subr.bf16.mxu0 %v3085_v47 }
 0x140   :  { %2240 = vmatpush1.bf16.msra.mxu0 %v3083_v48 }
 0x143   :  { %2242 = vmatmul.mubr.bf16.vlgmr.msra.gmra.mrb[0].mxu0 %v3086_v49 }
 0x1d5   :  { %v2028_v50 = vpop.f32.mrb[0].mxu1 }
 0x1d6   :  { %v2030_v51 = vpop.f32.mrb[1].mxu1  ;;  %v2594_v63 = vadd.f32 %v2028_v50, %v328_v59 }
 0x1d7   :  { %v2032_v52 = vpop.f32.mrb[2].mxu1  ;;  %v2596_v1 = vadd.f32 %v2030_v51, %v332_v60 }
 0x1d8   :  { %v2034_v53 = vpop.f32.mrb[3].mxu1  ;;  %v2598_v4 = vadd.f32 %v2032_v52, %v328_v59 }
 0x1d9   :  { %v2600_v8 = vadd.f32 %v2034_v53, %v332_v60 }
 0x216   :  { %v2243_v2 = vpop.f32.mrb[0].mxu0 }
 0x217   :  { %v2595_v5 = vadd.f32 %v2594_v63, %v2243_v2  ;;  %v2245_v6 = vpop.f32.mrb[1].mxu0 }
 0x218   :  { %v2597_v9 = vadd.f32 %v2596_v1, %v2245_v6  ;;  %v2247_v10 = vpop.f32.mrb[2].mxu0 }
 0x219   :  { %v2258_v12 = vadd.f32 %v2595_v5, %v2254_v0  ;;  %v2599_v13 = vadd.f32 %v2598_v4, %v2247_v10  ;;  %v2249_v14 = vpop.f32.mrb[3].mxu0 }
 0x21a   :  { %v2259_v15 = vadd.f32 %v2597_v9, %v2255_v3  ;;  %v2601_v16 = vadd.f32 %v2600_v8, %v2249_v14 }
 0x21b   :  { %v2262_v17 = vmax.f32 %v2258_v12, 0.0  ;;  %v2260_v18 = vadd.f32 %v2599_v13, %v2256_v7 }
 0x21c   :  { %v2263_v19 = vmax.f32 %v2259_v15, 0.0  ;;  %v2261_v20 = vadd.f32 %v2601_v16, %v2257_v11 }
 0x21d   :  { %v2264_v21 = vmax.f32 %v2260_v18, 0.0 }
 0x21e   :  { %v2592_v22 = vpack.c.bf16 %v2263_v19, %v2262_v17  ;;  %v2265_v23 = vmax.f32 %v2261_v20, 0.0 }
 0x220   :  { %2278 = vst [vmem:[%s4051_s4] sm:$0xff] %v2592_v22  ;;  %v2593_v24 = vpack.c.bf16 %v2265_v23, %v2264_v21 }
 0x222   :  { %2279 = vst [vmem:[%s4051_s4 + $0x8] sm:$0xff] %v2593_v24 }

// kernel: resnet_forward.23
= control target key start
LH: loop header
LB: loop body
LE: loop exit
PB: predicated region body
PF: predicated region fallthrough
CT: control target
= control target key end

     0   :  { %s956_s1 = inlined_call_operand.vmem [shape: bf16[256,512], index: 1, kind: input, shape index: {}]   ;;  %s957_s0 = inlined_call_operand.vmem [shape: bf16[16,256], index: 0, kind: input, shape index: {}]   ;;  %s958_s2 = inlined_call_operand.vmem [shape: f32[1,512], index: 2, kind: input, shape index: {}]   ;;  %s959_s3 = inlined_call_operand.vmem [shape: bf16[16,512], index: 3, kind: output, shape index: {}]  }
   0x1   :  { %v624_v0 = vld [vmem:[%s956_s1 + $0x4] ss:$16 sps:$4 sm:$0xff]   ;;  %v626_v1 = vld [vmem:[%s956_s1 + $0xc] ss:$16 sps:$4 sm:$0xff]   ;;  %v628_v2 = vld [vmem:[%s956_s1] ss:$16 sps:$4 sm:$0xff]  }
   0x2   :  { %432 = vmatprep.subr.bf16.mxu0 %v624_v0  ;;  %v629_v3 = vld [vmem:[%s956_s1 + $0x8] ss:$16 sps:$4 sm:$0xff]   ;;  %475 = vmatprep.subr.bf16.mxu1 %v626_v1  ;;  %v630_v4 = vld [vmem:[%s956_s1 + $0x24] ss:$16 sps:$4 sm:$0xff]   ;;  %v632_v5 = vld [vmem:[%s956_s1 + $0x2c] ss:$16 sps:$4 sm:$0xff]  }
   0x3   :  { %433 = vmatpush1.bf16.msra.mxu0 %v628_v2  ;;  %476 = vmatpush1.bf16.msra.mxu1 %v629_v3  ;;  %v634_v6 = vld [vmem:[%s956_s1 + $0x20] ss:$16 sps:$4 sm:$0xff]   ;;  %v635_v7 = vld [vmem:[%s956_s1 + $0x28] ss:$16 sps:$4 sm:$0xff]   ;;  %v636_v8 = vld [vmem:[%s956_s1 + $0x44] ss:$16 sps:$4 sm:$0xff]   ;;  %v82_v2 = vlaneseq }
   0x4   :  { %434 = vmatprep.subr.bf16.mxu0 %v630_v4  ;;  %477 = vmatprep.subr.bf16.mxu1 %v632_v5  ;;  %v638_v9 = vld [vmem:[%s956_s1 + $0x4c] ss:$16 sps:$4 sm:$0xff]   ;;  %v640_v10 = vld [vmem:[%s956_s1 + $0x40] ss:$16 sps:$4 sm:$0xff]   ;;  %v641_v11 = vld [vmem:[%s956_s1 + $0x48] ss:$16 sps:$4 sm:$0xff]  }
   0x5   :  { %v642_v12 = vld [vmem:[%s956_s1 + $0x64] ss:$16 sps:$4 sm:$0xff]   ;;  %v644_v13 = vld [vmem:[%s956_s1 + $0x6c] ss:$16 sps:$4 sm:$0xff]   ;;  %v646_v14 = vld [vmem:[%s956_s1 + $0x60] ss:$16 sps:$4 sm:$0xff]  }
   0x6   :  { %v647_v15 = vld [vmem:[%s956_s1 + $0x68] ss:$16 sps:$4 sm:$0xff]   ;;  %v648_v16 = vld [vmem:[%s956_s1 + $0x84] ss:$16 sps:$4 sm:$0xff]   ;;  %v650_v17 = vld [vmem:[%s956_s1 + $0x8c] ss:$16 sps:$4 sm:$0xff]  }
   0x7   :  { %435 = vmatpush1.bf16.msra.mxu0 %v634_v6  ;;  %478 = vmatpush1.bf16.msra.mxu1 %v635_v7  ;;  %v652_v18 = vld [vmem:[%s956_s1 + $0x80] ss:$16 sps:$4 sm:$0xff]   ;;  %v653_v19 = vld [vmem:[%s956_s1 + $0x88] ss:$16 sps:$4 sm:$0xff]   ;;  %v654_v20 = vld [vmem:[%s956_s1 + $0xa4] ss:$16 sps:$4 sm:$0xff]  }
   0x8   :  { %436 = vmatprep.subr.bf16.mxu0 %v636_v8  ;;  %479 = vmatprep.subr.bf16.mxu1 %v638_v9  ;;  %v656_v21 = vld [vmem:[%s956_s1 + $0xac] ss:$16 sps:$4 sm:$0xff]   ;;  %v658_v22 = vld [vmem:[%s956_s1 + $0xa0] ss:$16 sps:$4 sm:$0xff]   ;;  %v659_v23 = vld [vmem:[%s956_s1 + $0xa8] ss:$16 sps:$4 sm:$0xff]  }
   0x9   :  { %v660_v24 = vld [vmem:[%s956_s1 + $0xc4] ss:$16 sps:$4 sm:$0xff]   ;;  %v662_v25 = vld [vmem:[%s956_s1 + $0xcc] ss:$16 sps:$4 sm:$0xff]   ;;  %v664_v26 = vld [vmem:[%s956_s1 + $0xc0] ss:$16 sps:$4 sm:$0xff]  }
   0xa   :  { %v665_v27 = vld [vmem:[%s956_s1 + $0xc8] ss:$16 sps:$4 sm:$0xff]   ;;  %v666_v28 = vld [vmem:[%s956_s1 + $0xe4] ss:$16 sps:$4 sm:$0xff]   ;;  %v668_v29 = vld [vmem:[%s956_s1 + $0xec] ss:$16 sps:$4 sm:$0xff]  }
   0xb   :  { %437 = vmatpush1.bf16.msra.mxu0 %v640_v10  ;;  %480 = vmatpush1.bf16.msra.mxu1 %v641_v11  ;;  %v670_v30 = vld [vmem:[%s956_s1 + $0xe0] ss:$16 sps:$4 sm:$0xff]   ;;  %v671_v31 = vld [vmem:[%s956_s1 + $0xe8] ss:$16 sps:$4 sm:$0xff]   ;;  %v672_v32 = vld [vmem:[%s956_s1 + $0x104] ss:$16 sps:$4 sm:$0xff]  }
   0xc   :  { %438 = vmatprep.subr.bf16.mxu0 %v642_v12  ;;  %481 = vmatprep.subr.bf16.mxu1 %v644_v13  ;;  %v674_v33 = vld [vmem:[%s956_s1 + $0x10c] ss:$16 sps:$4 sm:$0xff]   ;;  %v676_v34 = vld [vmem:[%s956_s1 + $0x100] ss:$16 sps:$4 sm:$0xff]   ;;  %v677_v35 = vld [vmem:[%s956_s1 + $0x108] ss:$16 sps:$4 sm:$0xff]  }
   0xd   :  { %v678_v36 = vld [vmem:[%s956_s1 + $0x124] ss:$16 sps:$4 sm:$0xff]   ;;  %v680_v37 = vld [vmem:[%s956_s1 + $0x12c] ss:$16 sps:$4 sm:$0xff]   ;;  %v682_v38 = vld [vmem:[%s956_s1 + $0x120] ss:$16 sps:$4 sm:$0xff]  }
   0xe   :  { %v683_v39 = vld [vmem:[%s956_s1 + $0x128] ss:$16 sps:$4 sm:$0xff]   ;;  %v684_v40 = vld [vmem:[%s956_s1 + $0x144] ss:$16 sps:$4 sm:$0xff]   ;;  %v686_v41 = vld [vmem:[%s956_s1 + $0x14c] ss:$16 sps:$4 sm:$0xff]  }
   0xf   :  { %439 = vmatpush1.bf16.msra.mxu0 %v646_v14  ;;  %482 = vmatpush1.bf16.msra.mxu1 %v647_v15  ;;  %v688_v42 = vld [vmem:[%s956_s1 + $0x140] ss:$16 sps:$4 sm:$0xff]   ;;  %v689_v43 = vld [vmem:[%s956_s1 + $0x148] ss:$16 sps:$4 sm:$0xff]   ;;  %v690_v44 = vld [vmem:[%s956_s1 + $0x164] ss:$16 sps:$4 sm:$0xff]  }
  0x10   :  { %440 = vmatprep.subr.bf16.mxu0 %v648_v16  ;;  %483 = vmatprep.subr.bf16.mxu1 %v650_v17  ;;  %v692_v45 = vld [vmem:[%s956_s1 + $0x16c] ss:$16 sps:$4 sm:$0xff]   ;;  %v694_v47 = vld [vmem:[%s956_s1 + $0x160] ss:$16 sps:$4 sm:$0xff]   ;;  %v695_v48 = vld [vmem:[%s956_s1 + $0x168] ss:$16 sps:$4 sm:$0xff]  }
  0x11   :  { %v722_v46 = vld [vmem:[%s957_s0 + $0x4] ss:$8 sps:$4 sm:$0xff]   ;;  %v700_v51 = vld [vmem:[%s956_s1 + $0x180] ss:$16 sps:$4 sm:$0xff]   ;;  %v701_v52 = vld [vmem:[%s956_s1 + $0x188] ss:$16 sps:$4 sm:$0xff]  }
  0x12   :  { %v696_v49 = vld [vmem:[%s956_s1 + $0x184] ss:$16 sps:$4 sm:$0xff]   ;;  %v698_v50 = vld [vmem:[%s956_s1 + $0x18c] ss:$16 sps:$4 sm:$0xff]   ;;  %464 = vmatprep.mubr.bf16.mxu0 %v722_v46  ;;  %507 = vmatprep.mubr.bf16.mxu1 %v722_v46  ;;  %v706_v55 = vld [vmem:[%s956_s1 + $0x1a0] ss:$16 sps:$4 sm:$0xff]  }
  0x13   :  { %441 = vmatpush1.bf16.msra.mxu0 %v652_v18  ;;  %484 = vmatpush1.bf16.msra.mxu1 %v653_v19  ;;  %v702_v53 = vld [vmem:[%s956_s1 + $0x1a4] ss:$16 sps:$4 sm:$0xff]   ;;  %v704_v54 = vld [vmem:[%s956_s1 + $0x1ac] ss:$16 sps:$4 sm:$0xff]   ;;  %v707_v56 = vld [vmem:[%s956_s1 + $0x1a8] ss:$16 sps:$4 sm:$0xff]  }
  0x14   :  { %442 = vmatprep.subr.bf16.mxu0 %v654_v20  ;;  %485 = vmatprep.subr.bf16.mxu1 %v656_v21  ;;  %v708_v57 = vld [vmem:[%s956_s1 + $0x1c4] ss:$16 sps:$4 sm:$0xff]   ;;  %v710_v58 = vld [vmem:[%s956_s1 + $0x1cc] ss:$16 sps:$4 sm:$0xff]   ;;  %v712_v59 = vld [vmem:[%s956_s1 + $0x1c0] ss:$16 sps:$4 sm:$0xff]  }
  0x15   :  { %v713_v60 = vld [vmem:[%s956_s1 + $0x1c8] ss:$16 sps:$4 sm:$0xff]   ;;  %v714_v61 = vld [vmem:[%s956_s1 + $0x1e4] ss:$16 sps:$4 sm:$0xff]   ;;  %v716_v62 = vld [vmem:[%s956_s1 + $0x1ec] ss:$16 sps:$4 sm:$0xff]  }
  0x16   :  { %v718_v63 = vld [vmem:[%s956_s1 + $0x1e0] ss:$16 sps:$4 sm:$0xff]   ;;  %v719_v0 = vld [vmem:[%s956_s1 + $0x1e8] ss:$16 sps:$4 sm:$0xff]   ;;  %v83_v3 = vshrl.u32 %v82_v2, 7 }
  0x17   :  { %443 = vmatpush1.bf16.msra.mxu0 %v658_v22  ;;  %486 = vmatpush1.bf16.msra.mxu1 %v659_v23  ;;  %v720_v1 = vld [vmem:[%s957_s0] ss:$8 sps:$4 sm:$0xff]  }
  0x18   :  { %444 = vmatprep.subr.bf16.mxu0 %v660_v24  ;;  %487 = vmatprep.subr.bf16.mxu1 %v662_v25  ;;  %v84_v4 = vsub.s32 0, %v83_v3  ;;  %v92_v5 = vsub.s32 2, %v83_v3  ;;  %v80_v6 = vld [vmem:[%s958_s2] sm:$0xf]  ;;  %v88_v7 = vsub.s32 1, %v83_v3  ;;  %v96_v8 = vsub.s32 3, %v83_v3 }
  0x1a   :  { %v85_v9 = vrot.slane %v80_v6, %v84_v4  ;;  %v93_v10 = vrot.slane %v80_v6, %v92_v5  ;;  %v89_v11 = vrot.slane %v80_v6, %v88_v7  ;;  %v97_v12 = vrot.slane %v80_v6, %v96_v8 }
  0x1b   :  { %445 = vmatpush1.bf16.msra.mxu0 %v664_v26  ;;  %488 = vmatpush1.bf16.msra.mxu1 %v665_v27 }
  0x1c   :  { %446 = vmatprep.subr.bf16.mxu0 %v666_v28  ;;  %489 = vmatprep.subr.bf16.mxu1 %v668_v29 }
  0x1f   :  { %447 = vmatpush1.bf16.msra.mxu0 %v670_v30  ;;  %490 = vmatpush1.bf16.msra.mxu1 %v671_v31 }
  0x20   :  { %448 = vmatprep.subr.bf16.mxu0 %v672_v32  ;;  %491 = vmatprep.subr.bf16.mxu1 %v674_v33 }
  0x23   :  { %449 = vmatpush1.bf16.msra.mxu0 %v676_v34  ;;  %492 = vmatpush1.bf16.msra.mxu1 %v677_v35 }
  0x24   :  { %450 = vmatprep.subr.bf16.mxu0 %v678_v36  ;;  %493 = vmatprep.subr.bf16.mxu1 %v680_v37 }
  0x27   :  { %451 = vmatpush1.bf16.msra.mxu0 %v682_v38  ;;  %494 = vmatpush1.bf16.msra.mxu1 %v683_v39 }
  0x28   :  { %452 = vmatprep.subr.bf16.mxu0 %v684_v40  ;;  %495 = vmatprep.subr.bf16.mxu1 %v686_v41 }
  0x2b   :  { %453 = vmatpush1.bf16.msra.mxu0 %v688_v42  ;;  %496 = vmatpush1.bf16.msra.mxu1 %v689_v43 }
  0x2c   :  { %454 = vmatprep.subr.bf16.mxu0 %v690_v44  ;;  %497 = vmatprep.subr.bf16.mxu1 %v692_v45 }
  0x2f   :  { %455 = vmatpush1.bf16.msra.mxu0 %v694_v47  ;;  %498 = vmatpush1.bf16.msra.mxu1 %v695_v48 }
  0x30   :  { %456 = vmatprep.subr.bf16.mxu0 %v696_v49  ;;  %499 = vmatprep.subr.bf16.mxu1 %v698_v50 }
  0x33   :  { %457 = vmatpush1.bf16.msra.mxu0 %v700_v51  ;;  %500 = vmatpush1.bf16.msra.mxu1 %v701_v52 }
  0x34   :  { %458 = vmatprep.subr.bf16.mxu0 %v702_v53  ;;  %501 = vmatprep.subr.bf16.mxu1 %v704_v54 }
  0x37   :  { %459 = vmatpush1.bf16.msra.mxu0 %v706_v55  ;;  %502 = vmatpush1.bf16.msra.mxu1 %v707_v56 }
  0x38   :  { %460 = vmatprep.subr.bf16.mxu0 %v708_v57  ;;  %503 = vmatprep.subr.bf16.mxu1 %v710_v58 }
  0x3b   :  { %461 = vmatpush1.bf16.msra.mxu0 %v712_v59  ;;  %504 = vmatpush1.bf16.msra.mxu1 %v713_v60 }
  0x3c   :  { %462 = vmatprep.subr.bf16.mxu0 %v714_v61  ;;  %505 = vmatprep.subr.bf16.mxu1 %v716_v62 }
  0x3f   :  { %463 = vmatpush1.bf16.msra.mxu0 %v718_v63  ;;  %506 = vmatpush1.bf16.msra.mxu1 %v719_v0 }
  0x42   :  { %465 = vmatmul.mubr.bf16.vlgmr.msra.gmra.mrb[0].mxu0 %v720_v1  ;;  %508 = vmatmul.mubr.bf16.vlgmr.msra.gmra.mrb[0].mxu1 %v720_v1 }
 0x115   :  { %v466_v13 = vpop.f32.mrb[0].mxu0  ;;  %v509_v14 = vpop.f32.mrb[0].mxu1 }
 0x116   :  { %v467_v15 = vadd.f32 %v466_v13, %v85_v9  ;;  %v510_v16 = vadd.f32 %v509_v14, %v93_v10  ;;  %v468_v17 = vpop.f32.mrb[1].mxu0  ;;  %v511_v18 = vpop.f32.mrb[1].mxu1 }
 0x117   :  { %v469_v19 = vadd.f32 %v468_v17, %v89_v11  ;;  %v512_v20 = vadd.f32 %v511_v18, %v97_v12  ;;  %v470_v21 = vpop.f32.mrb[2].mxu0  ;;  %v513_v22 = vpop.f32.mrb[2].mxu1 }
 0x118   :  { %v471_v23 = vadd.f32 %v470_v21, %v85_v9  ;;  %v514_v24 = vadd.f32 %v513_v22, %v93_v10  ;;  %v472_v25 = vpop.f32.mrb[3].mxu0  ;;  %v515_v26 = vpop.f32.mrb[3].mxu1 }
 0x119   :  { %v620_v27 = vpack.c.bf16 %v469_v19, %v467_v15  ;;  %v621_v28 = vpack.c.bf16 %v512_v20, %v510_v16  ;;  %v473_v29 = vadd.f32 %v472_v25, %v89_v11  ;;  %v516_v30 = vadd.f32 %v515_v26, %v97_v12 }
 0x11b   :  { %542 = vst [vmem:[%s959_s3] sm:$0xff] %v620_v27  ;;  %543 = vst [vmem:[%s959_s3 + $0x8] sm:$0xff] %v621_v28  ;;  %v622_v31 = vpack.c.bf16 %v473_v29, %v471_v23  ;;  %v623_v32 = vpack.c.bf16 %v516_v30, %v514_v24 }
 0x11d   :  { %544 = vst [vmem:[%s959_s3 + $0x10] sm:$0xff] %v622_v31  ;;  %545 = vst [vmem:[%s959_s3 + $0x18] sm:$0xff] %v623_v32 }

// kernel: resnet_forward.22
= control target key start
LH: loop header
LB: loop body
LE: loop exit
PB: predicated region body
PF: predicated region fallthrough
CT: control target
= control target key end

     0   :  { %s7796_s1 = inlined_call_operand.vmem [shape: bf16[2304,512], index: 1, kind: input, shape index: {}]   ;;  %s7797_s0 = inlined_call_operand.vmem [shape: bf16[16,2304], index: 0, kind: input, shape index: {}]   ;;  %s7798_s2 = inlined_call_operand.vmem [shape: f32[1,512], index: 2, kind: input, shape index: {}]   ;;  %s7799_s3 = inlined_call_operand.vmem [shape: bf16[16,512], index: 3, kind: output, shape index: {}]  }
   0x1   :  { %v5088_v0 = vld [vmem:[%s7796_s1 + $0x4] ss:$16 sps:$4 sm:$0xff]   ;;  %v5090_v1 = vld [vmem:[%s7796_s1 + $0xc] ss:$16 sps:$4 sm:$0xff]   ;;  %v5092_v2 = vld [vmem:[%s7796_s1] ss:$16 sps:$4 sm:$0xff]  }
   0x2   :  { %3600 = vmatprep.subr.bf16.mxu0 %v5088_v0  ;;  %v5093_v3 = vld [vmem:[%s7796_s1 + $0x8] ss:$16 sps:$4 sm:$0xff]   ;;  %3987 = vmatprep.subr.bf16.mxu1 %v5090_v1  ;;  %v5094_v4 = vld [vmem:[%s7796_s1 + $0x24] ss:$16 sps:$4 sm:$0xff]   ;;  %v5096_v5 = vld [vmem:[%s7796_s1 + $0x2c] ss:$16 sps:$4 sm:$0xff]  }
   0x3   :  { %3601 = vmatpush1.bf16.msra.mxu0 %v5092_v2  ;;  %3988 = vmatpush1.bf16.msra.mxu1 %v5093_v3  ;;  %v5098_v6 = vld [vmem:[%s7796_s1 + $0x20] ss:$16 sps:$4 sm:$0xff]   ;;  %v5099_v7 = vld [vmem:[%s7796_s1 + $0x28] ss:$16 sps:$4 sm:$0xff]   ;;  %v5100_v8 = vld [vmem:[%s7796_s1 + $0x44] ss:$16 sps:$4 sm:$0xff]  }
   0x4   :  { %3602 = vmatprep.subr.bf16.mxu0 %v5094_v4  ;;  %3989 = vmatprep.subr.bf16.mxu1 %v5096_v5  ;;  %v5102_v9 = vld [vmem:[%s7796_s1 + $0x4c] ss:$16 sps:$4 sm:$0xff]   ;;  %v5104_v10 = vld [vmem:[%s7796_s1 + $0x40] ss:$16 sps:$4 sm:$0xff]   ;;  %v5105_v11 = vld [vmem:[%s7796_s1 + $0x48] ss:$16 sps:$4 sm:$0xff]  }
   0x5   :  { %v5106_v12 = vld [vmem:[%s7796_s1 + $0x64] ss:$16 sps:$4 sm:$0xff]   ;;  %v5108_v13 = vld [vmem:[%s7796_s1 + $0x6c] ss:$16 sps:$4 sm:$0xff]   ;;  %v5110_v14 = vld [vmem:[%s7796_s1 + $0x60] ss:$16 sps:$4 sm:$0xff]  }
   0x6   :  { %v5111_v15 = vld [vmem:[%s7796_s1 + $0x68] ss:$16 sps:$4 sm:$0xff]   ;;  %v5112_v16 = vld [vmem:[%s7796_s1 + $0x84] ss:$16 sps:$4 sm:$0xff]   ;;  %v5114_v17 = vld [vmem:[%s7796_s1 + $0x8c] ss:$16 sps:$4 sm:$0xff]  }
   0x7   :  { %3603 = vmatpush1.bf16.msra.mxu0 %v5098_v6  ;;  %3990 = vmatpush1.bf16.msra.mxu1 %v5099_v7  ;;  %v5116_v18 = vld [vmem:[%s7796_s1 + $0x80] ss:$16 sps:$4 sm:$0xff]   ;;  %v5117_v19 = vld [vmem:[%s7796_s1 + $0x88] ss:$16 sps:$4 sm:$0xff]   ;;  %v5118_v20 = vld [vmem:[%s7796_s1 + $0xa4] ss:$16 sps:$4 sm:$0xff]  }
   0x8   :  { %3604 = vmatprep.subr.bf16.mxu0 %v5100_v8  ;;  %3991 = vmatprep.subr.bf16.mxu1 %v5102_v9  ;;  %v5120_v21 = vld [vmem:[%s7796_s1 + $0xac] ss:$16 sps:$4 sm:$0xff]   ;;  %v5122_v22 = vld [vmem:[%s7796_s1 + $0xa0] ss:$16 sps:$4 sm:$0xff]   ;;  %v5123_v23 = vld [vmem:[%s7796_s1 + $0xa8] ss:$16 sps:$4 sm:$0xff]  }
   0x9   :  { %v5124_v24 = vld [vmem:[%s7796_s1 + $0xc4] ss:$16 sps:$4 sm:$0xff]   ;;  %v5126_v25 = vld [vmem:[%s7796_s1 + $0xcc] ss:$16 sps:$4 sm:$0xff]   ;;  %v5128_v26 = vld [vmem:[%s7796_s1 + $0xc0] ss:$16 sps:$4 sm:$0xff]  }
   0xa   :  { %v5129_v27 = vld [vmem:[%s7796_s1 + $0xc8] ss:$16 sps:$4 sm:$0xff]   ;;  %v5130_v28 = vld [vmem:[%s7796_s1 + $0xe4] ss:$16 sps:$4 sm:$0xff]   ;;  %v5132_v29 = vld [vmem:[%s7796_s1 + $0xec] ss:$16 sps:$4 sm:$0xff]  }
   0xb   :  { %3605 = vmatpush1.bf16.msra.mxu0 %v5104_v10  ;;  %3992 = vmatpush1.bf16.msra.mxu1 %v5105_v11  ;;  %v5134_v30 = vld [vmem:[%s7796_s1 + $0xe0] ss:$16 sps:$4 sm:$0xff]   ;;  %v5135_v31 = vld [vmem:[%s7796_s1 + $0xe8] ss:$16 sps:$4 sm:$0xff]   ;;  %v5136_v32 = vld [vmem:[%s7796_s1 + $0x104] ss:$16 sps:$4 sm:$0xff]  }
   0xc   :  { %3606 = vmatprep.subr.bf16.mxu0 %v5106_v12  ;;  %3993 = vmatprep.subr.bf16.mxu1 %v5108_v13  ;;  %v5138_v33 = vld [vmem:[%s7796_s1 + $0x10c] ss:$16 sps:$4 sm:$0xff]   ;;  %v5140_v34 = vld [vmem:[%s7796_s1 + $0x100] ss:$16 sps:$4 sm:$0xff]   ;;  %v5141_v35 = vld [vmem:[%s7796_s1 + $0x108] ss:$16 sps:$4 sm:$0xff]  }
   0xd   :  { %v5142_v36 = vld [vmem:[%s7796_s1 + $0x124] ss:$16 sps:$4 sm:$0xff]   ;;  %v5144_v37 = vld [vmem:[%s7796_s1 + $0x12c] ss:$16 sps:$4 sm:$0xff]   ;;  %v5146_v38 = vld [vmem:[%s7796_s1 + $0x120] ss:$16 sps:$4 sm:$0xff]  }
   0xe   :  { %v5147_v39 = vld [vmem:[%s7796_s1 + $0x128] ss:$16 sps:$4 sm:$0xff]   ;;  %v5148_v40 = vld [vmem:[%s7796_s1 + $0x144] ss:$16 sps:$4 sm:$0xff]   ;;  %v5150_v41 = vld [vmem:[%s7796_s1 + $0x14c] ss:$16 sps:$4 sm:$0xff]  }
   0xf   :  { %3607 = vmatpush1.bf16.msra.mxu0 %v5110_v14  ;;  %3994 = vmatpush1.bf16.msra.mxu1 %v5111_v15  ;;  %v5152_v42 = vld [vmem:[%s7796_s1 + $0x140] ss:$16 sps:$4 sm:$0xff]   ;;  %v5153_v43 = vld [vmem:[%s7796_s1 + $0x148] ss:$16 sps:$4 sm:$0xff]   ;;  %v5154_v44 = vld [vmem:[%s7796_s1 + $0x164] ss:$16 sps:$4 sm:$0xff]  }
  0x10   :  { %3608 = vmatprep.subr.bf16.mxu0 %v5112_v16  ;;  %3995 = vmatprep.subr.bf16.mxu1 %v5114_v17  ;;  %v5156_v45 = vld [vmem:[%s7796_s1 + $0x16c] ss:$16 sps:$4 sm:$0xff]   ;;  %v5158_v46 = vld [vmem:[%s7796_s1 + $0x160] ss:$16 sps:$4 sm:$0xff]   ;;  %v5159_v47 = vld [vmem:[%s7796_s1 + $0x168] ss:$16 sps:$4 sm:$0xff]  }
  0x11   :  { %v5186_v48 = vld [vmem:[%s7797_s0 + $0x4] ss:$72 sps:$4 sm:$0xff]   ;;  %v5164_v51 = vld [vmem:[%s7796_s1 + $0x180] ss:$16 sps:$4 sm:$0xff]   ;;  %v5165_v52 = vld [vmem:[%s7796_s1 + $0x188] ss:$16 sps:$4 sm:$0xff]  }
  0x12   :  { %v5160_v49 = vld [vmem:[%s7796_s1 + $0x184] ss:$16 sps:$4 sm:$0xff]   ;;  %v5162_v50 = vld [vmem:[%s7796_s1 + $0x18c] ss:$16 sps:$4 sm:$0xff]   ;;  %3632 = vmatprep.mubr.bf16.mxu0 %v5186_v48  ;;  %4019 = vmatprep.mubr.bf16.mxu1 %v5186_v48  ;;  %v5170_v55 = vld [vmem:[%s7796_s1 + $0x1a0] ss:$16 sps:$4 sm:$0xff]  }
  0x13   :  { %3609 = vmatpush1.bf16.msra.mxu0 %v5116_v18  ;;  %3996 = vmatpush1.bf16.msra.mxu1 %v5117_v19  ;;  %v5166_v53 = vld [vmem:[%s7796_s1 + $0x1a4] ss:$16 sps:$4 sm:$0xff]   ;;  %v5168_v54 = vld [vmem:[%s7796_s1 + $0x1ac] ss:$16 sps:$4 sm:$0xff]   ;;  %v5171_v56 = vld [vmem:[%s7796_s1 + $0x1a8] ss:$16 sps:$4 sm:$0xff]  }
  0x14   :  { %3610 = vmatprep.subr.bf16.mxu0 %v5118_v20  ;;  %3997 = vmatprep.subr.bf16.mxu1 %v5120_v21  ;;  %v5172_v57 = vld [vmem:[%s7796_s1 + $0x1c4] ss:$16 sps:$4 sm:$0xff]   ;;  %v5174_v58 = vld [vmem:[%s7796_s1 + $0x1cc] ss:$16 sps:$4 sm:$0xff]   ;;  %v5176_v59 = vld [vmem:[%s7796_s1 + $0x1c0] ss:$16 sps:$4 sm:$0xff]  }
  0x15   :  { %v5177_v60 = vld [vmem:[%s7796_s1 + $0x1c8] ss:$16 sps:$4 sm:$0xff]   ;;  %v5178_v61 = vld [vmem:[%s7796_s1 + $0x1e4] ss:$16 sps:$4 sm:$0xff]   ;;  %v5180_v62 = vld [vmem:[%s7796_s1 + $0x1ec] ss:$16 sps:$4 sm:$0xff]  }
  0x16   :  { %v5182_v63 = vld [vmem:[%s7796_s1 + $0x1e0] ss:$16 sps:$4 sm:$0xff]   ;;  %v5183_v0 = vld [vmem:[%s7796_s1 + $0x1e8] ss:$16 sps:$4 sm:$0xff]   ;;  %v5189_v1 = vld [vmem:[%s7796_s1 + $0x204] ss:$16 sps:$4 sm:$0xff]  }
  0x17   :  { %3611 = vmatpush1.bf16.msra.mxu0 %v5122_v22  ;;  %3998 = vmatpush1.bf16.msra.mxu1 %v5123_v23  ;;  %v5192_v2 = vld [vmem:[%s7796_s1 + $0x20c] ss:$16 sps:$4 sm:$0xff]   ;;  %v5184_v3 = vld [vmem:[%s7797_s0] ss:$72 sps:$4 sm:$0xff]   ;;  %v5195_v6 = vld [vmem:[%s7796_s1 + $0x224] ss:$16 sps:$4 sm:$0xff]  }
  0x18   :  { %3612 = vmatprep.subr.bf16.mxu0 %v5124_v24  ;;  %3999 = vmatprep.subr.bf16.mxu1 %v5126_v25  ;;  %v5187_v4 = vld [vmem:[%s7796_s1 + $0x200] ss:$16 sps:$4 sm:$0xff]   ;;  %v5190_v5 = vld [vmem:[%s7796_s1 + $0x208] ss:$16 sps:$4 sm:$0xff]   ;;  %v5198_v7 = vld [vmem:[%s7796_s1 + $0x22c] ss:$16 sps:$4 sm:$0xff]  }
  0x19   :  { %v5193_v8 = vld [vmem:[%s7796_s1 + $0x220] ss:$16 sps:$4 sm:$0xff]   ;;  %v5196_v9 = vld [vmem:[%s7796_s1 + $0x228] ss:$16 sps:$4 sm:$0xff]   ;;  %v5201_v10 = vld [vmem:[%s7796_s1 + $0x244] ss:$16 sps:$4 sm:$0xff]  }
  0x1a   :  { %v5204_v11 = vld [vmem:[%s7796_s1 + $0x24c] ss:$16 sps:$4 sm:$0xff]   ;;  %v5199_v12 = vld [vmem:[%s7796_s1 + $0x240] ss:$16 sps:$4 sm:$0xff]   ;;  %v5202_v13 = vld [vmem:[%s7796_s1 + $0x248] ss:$16 sps:$4 sm:$0xff]  }
  0x1b   :  { %3613 = vmatpush1.bf16.msra.mxu0 %v5128_v26  ;;  %4000 = vmatpush1.bf16.msra.mxu1 %v5129_v27  ;;  %v5207_v14 = vld [vmem:[%s7796_s1 + $0x264] ss:$16 sps:$4 sm:$0xff]   ;;  %v5210_v15 = vld [vmem:[%s7796_s1 + $0x26c] ss:$16 sps:$4 sm:$0xff]   ;;  %v5205_v16 = vld [vmem:[%s7796_s1 + $0x260] ss:$16 sps:$4 sm:$0xff]  }
  0x1c   :  { %3614 = vmatprep.subr.bf16.mxu0 %v5130_v28  ;;  %4001 = vmatprep.subr.bf16.mxu1 %v5132_v29  ;;  %v5208_v17 = vld [vmem:[%s7796_s1 + $0x268] ss:$16 sps:$4 sm:$0xff]   ;;  %v5213_v18 = vld [vmem:[%s7796_s1 + $0x284] ss:$16 sps:$4 sm:$0xff]   ;;  %v5216_v19 = vld [vmem:[%s7796_s1 + $0x28c] ss:$16 sps:$4 sm:$0xff]  }
  0x1d   :  { %v5211_v20 = vld [vmem:[%s7796_s1 + $0x280] ss:$16 sps:$4 sm:$0xff]   ;;  %v5214_v21 = vld [vmem:[%s7796_s1 + $0x288] ss:$16 sps:$4 sm:$0xff]   ;;  %v5219_v22 = vld [vmem:[%s7796_s1 + $0x2a4] ss:$16 sps:$4 sm:$0xff]  }
  0x1e   :  { %v5222_v23 = vld [vmem:[%s7796_s1 + $0x2ac] ss:$16 sps:$4 sm:$0xff]   ;;  %v5217_v24 = vld [vmem:[%s7796_s1 + $0x2a0] ss:$16 sps:$4 sm:$0xff]   ;;  %v5220_v25 = vld [vmem:[%s7796_s1 + $0x2a8] ss:$16 sps:$4 sm:$0xff]  }
  0x1f   :  { %3615 = vmatpush1.bf16.msra.mxu0 %v5134_v30  ;;  %4002 = vmatpush1.bf16.msra.mxu1 %v5135_v31  ;;  %v5225_v26 = vld [vmem:[%s7796_s1 + $0x2c4] ss:$16 sps:$4 sm:$0xff]   ;;  %v5228_v27 = vld [vmem:[%s7796_s1 + $0x2cc] ss:$16 sps:$4 sm:$0xff]   ;;  %v5223_v28 = vld [vmem:[%s7796_s1 + $0x2c0] ss:$16 sps:$4 sm:$0xff]  }
  0x20   :  { %3616 = vmatprep.subr.bf16.mxu0 %v5136_v32  ;;  %4003 = vmatprep.subr.bf16.mxu1 %v5138_v33  ;;  %v5226_v29 = vld [vmem:[%s7796_s1 + $0x2c8] ss:$16 sps:$4 sm:$0xff]   ;;  %v5285_v30 = vld [vmem:[%s7797_s0 + $0xc] ss:$72 sps:$4 sm:$0xff]   ;;  %v5229_v33 = vld [vmem:[%s7796_s1 + $0x2e0] ss:$16 sps:$4 sm:$0xff]  }
  0x21   :  { %v5231_v31 = vld [vmem:[%s7796_s1 + $0x2e4] ss:$16 sps:$4 sm:$0xff]   ;;  %v5234_v32 = vld [vmem:[%s7796_s1 + $0x2ec] ss:$16 sps:$4 sm:$0xff]  }
  0x22   :  { %v5258_v48 = vld [vmem:[%s7796_s1 + $0x36c] ss:$16 sps:$4 sm:$0xff]  }
  0x23   :  { %3617 = vmatpush1.bf16.msra.mxu0 %v5140_v34  ;;  %4004 = vmatpush1.bf16.msra.mxu1 %v5141_v35  ;;  %v5232_v34 = vld [vmem:[%s7796_s1 + $0x2e8] ss:$16 sps:$4 sm:$0xff]   ;;  %v5237_v35 = vld [vmem:[%s7796_s1 + $0x304] ss:$16 sps:$4 sm:$0xff]  }
  0x24   :  { %3618 = vmatprep.subr.bf16.mxu0 %v5142_v36  ;;  %4005 = vmatprep.subr.bf16.mxu1 %v5144_v37  ;;  %v5240_v36 = vld [vmem:[%s7796_s1 + $0x30c] ss:$16 sps:$4 sm:$0xff]   ;;  %v5235_v37 = vld [vmem:[%s7796_s1 + $0x300] ss:$16 sps:$4 sm:$0xff]  }
  0x27   :  { %3619 = vmatpush1.bf16.msra.mxu0 %v5146_v38  ;;  %4006 = vmatpush1.bf16.msra.mxu1 %v5147_v39  ;;  %v5238_v38 = vld [vmem:[%s7796_s1 + $0x308] ss:$16 sps:$4 sm:$0xff]   ;;  %v5243_v39 = vld [vmem:[%s7796_s1 + $0x324] ss:$16 sps:$4 sm:$0xff]  }
  0x28   :  { %3620 = vmatprep.subr.bf16.mxu0 %v5148_v40  ;;  %4007 = vmatprep.subr.bf16.mxu1 %v5150_v41  ;;  %v5246_v40 = vld [vmem:[%s7796_s1 + $0x32c] ss:$16 sps:$4 sm:$0xff]   ;;  %v5241_v41 = vld [vmem:[%s7796_s1 + $0x320] ss:$16 sps:$4 sm:$0xff]  }
  0x2b   :  { %3621 = vmatpush1.bf16.msra.mxu0 %v5152_v42  ;;  %4008 = vmatpush1.bf16.msra.mxu1 %v5153_v43  ;;  %v5244_v42 = vld [vmem:[%s7796_s1 + $0x328] ss:$16 sps:$4 sm:$0xff]   ;;  %v5249_v43 = vld [vmem:[%s7796_s1 + $0x344] ss:$16 sps:$4 sm:$0xff]  }
  0x2c   :  { %3622 = vmatprep.subr.bf16.mxu0 %v5154_v44  ;;  %4009 = vmatprep.subr.bf16.mxu1 %v5156_v45  ;;  %v5252_v44 = vld [vmem:[%s7796_s1 + $0x34c] ss:$16 sps:$4 sm:$0xff]   ;;  %v5247_v45 = vld [vmem:[%s7796_s1 + $0x340] ss:$16 sps:$4 sm:$0xff]  }
  0x2f   :  { %3623 = vmatpush1.bf16.msra.mxu0 %v5158_v46  ;;  %4010 = vmatpush1.bf16.msra.mxu1 %v5159_v47  ;;  %v5250_v46 = vld [vmem:[%s7796_s1 + $0x348] ss:$16 sps:$4 sm:$0xff]   ;;  %v5255_v47 = vld [vmem:[%s7796_s1 + $0x364] ss:$16 sps:$4 sm:$0xff]  }
  0x30   :  { %3624 = vmatprep.subr.bf16.mxu0 %v5160_v49  ;;  %4011 = vmatprep.subr.bf16.mxu1 %v5162_v50  ;;  %v5253_v49 = vld [vmem:[%s7796_s1 + $0x360] ss:$16 sps:$4 sm:$0xff]   ;;  %v5256_v50 = vld [vmem:[%s7796_s1 + $0x368] ss:$16 sps:$4 sm:$0xff]  }
  0x33   :  { %3625 = vmatpush1.bf16.msra.mxu0 %v5164_v51  ;;  %4012 = vmatpush1.bf16.msra.mxu1 %v5165_v52  ;;  %v5261_v51 = vld [vmem:[%s7796_s1 + $0x384] ss:$16 sps:$4 sm:$0xff]   ;;  %v5264_v52 = vld [vmem:[%s7796_s1 + $0x38c] ss:$16 sps:$4 sm:$0xff]  }
  0x34   :  { %3626 = vmatprep.subr.bf16.mxu0 %v5166_v53  ;;  %4013 = vmatprep.subr.bf16.mxu1 %v5168_v54  ;;  %v5259_v53 = vld [vmem:[%s7796_s1 + $0x380] ss:$16 sps:$4 sm:$0xff]   ;;  %v5262_v54 = vld [vmem:[%s7796_s1 + $0x388] ss:$16 sps:$4 sm:$0xff]  }
  0x37   :  { %3627 = vmatpush1.bf16.msra.mxu0 %v5170_v55  ;;  %4014 = vmatpush1.bf16.msra.mxu1 %v5171_v56  ;;  %v5267_v55 = vld [vmem:[%s7796_s1 + $0x3a4] ss:$16 sps:$4 sm:$0xff]   ;;  %v5270_v56 = vld [vmem:[%s7796_s1 + $0x3ac] ss:$16 sps:$4 sm:$0xff]  }
  0x38   :  { %3628 = vmatprep.subr.bf16.mxu0 %v5172_v57  ;;  %4015 = vmatprep.subr.bf16.mxu1 %v5174_v58  ;;  %v5265_v57 = vld [vmem:[%s7796_s1 + $0x3a0] ss:$16 sps:$4 sm:$0xff]   ;;  %v5268_v58 = vld [vmem:[%s7796_s1 + $0x3a8] ss:$16 sps:$4 sm:$0xff]  }
  0x3b   :  { %3629 = vmatpush1.bf16.msra.mxu0 %v5176_v59  ;;  %4016 = vmatpush1.bf16.msra.mxu1 %v5177_v60  ;;  %v5273_v59 = vld [vmem:[%s7796_s1 + $0x3c4] ss:$16 sps:$4 sm:$0xff]   ;;  %v5276_v60 = vld [vmem:[%s7796_s1 + $0x3cc] ss:$16 sps:$4 sm:$0xff]  }
  0x3c   :  { %3630 = vmatprep.subr.bf16.mxu0 %v5178_v61  ;;  %4017 = vmatprep.subr.bf16.mxu1 %v5180_v62  ;;  %v5271_v61 = vld [vmem:[%s7796_s1 + $0x3c0] ss:$16 sps:$4 sm:$0xff]   ;;  %v5274_v62 = vld [vmem:[%s7796_s1 + $0x3c8] ss:$16 sps:$4 sm:$0xff]  }
  0x3f   :  { %3631 = vmatpush1.bf16.msra.mxu0 %v5182_v63  ;;  %4018 = vmatpush1.bf16.msra.mxu1 %v5183_v0  ;;  %v5279_v63 = vld [vmem:[%s7796_s1 + $0x3e4] ss:$16 sps:$4 sm:$0xff]   ;;  %v5282_v0 = vld [vmem:[%s7796_s1 + $0x3ec] ss:$16 sps:$4 sm:$0xff]  }
  0x40   :  { %3643 = vmatprep.subr.bf16.mxu0 %v5189_v1  ;;  %4030 = vmatprep.subr.bf16.mxu1 %v5192_v2  ;;  %v5277_v1 = vld [vmem:[%s7796_s1 + $0x3e0] ss:$16 sps:$4 sm:$0xff]   ;;  %v5280_v2 = vld [vmem:[%s7796_s1 + $0x3e8] ss:$16 sps:$4 sm:$0xff]  }
  0x42   :  { %3633 = vmatmul.mubr.bf16.vlgmr.msra.gmra.mrb[0].mxu0 %v5184_v3  ;;  %4020 = vmatmul.mubr.bf16.vlgmr.msra.gmra.mrb[0].mxu1 %v5184_v3  ;;  %v5288_v3 = vld [vmem:[%s7796_s1 + $0x404] ss:$16 sps:$4 sm:$0xff]  }
  0x43   :  { %3644 = vmatpush1.bf16.msra.mxu0 %v5187_v4  ;;  %4031 = vmatpush1.bf16.msra.mxu1 %v5190_v5  ;;  %v5291_v4 = vld [vmem:[%s7796_s1 + $0x40c] ss:$16 sps:$4 sm:$0xff]   ;;  %v5283_v5 = vld [vmem:[%s7797_s0 + $0x8] ss:$72 sps:$4 sm:$0xff]  }
  0x44   :  { %3645 = vmatprep.subr.bf16.mxu0 %v5195_v6  ;;  %4032 = vmatprep.subr.bf16.mxu1 %v5198_v7  ;;  %v5286_v6 = vld [vmem:[%s7796_s1 + $0x400] ss:$16 sps:$4 sm:$0xff]   ;;  %v5289_v7 = vld [vmem:[%s7796_s1 + $0x408] ss:$16 sps:$4 sm:$0xff]  }
  0x45   :  { %3675 = vmatprep.mubr.bf16.mxu0 %v5285_v30  ;;  %4062 = vmatprep.mubr.bf16.mxu1 %v5285_v30  ;;  %v5327_v30 = vld [vmem:[%s7796_s1 + $0x4cc] ss:$16 sps:$4 sm:$0xff]  }
  0x47   :  { %3646 = vmatpush1.bf16.msra.mxu0 %v5193_v8  ;;  %4033 = vmatpush1.bf16.msra.mxu1 %v5196_v9  ;;  %v5294_v8 = vld [vmem:[%s7796_s1 + $0x424] ss:$16 sps:$4 sm:$0xff]   ;;  %v5297_v9 = vld [vmem:[%s7796_s1 + $0x42c] ss:$16 sps:$4 sm:$0xff]  }
  0x48   :  { %3647 = vmatprep.subr.bf16.mxu0 %v5201_v10  ;;  %4034 = vmatprep.subr.bf16.mxu1 %v5204_v11  ;;  %v5292_v10 = vld [vmem:[%s7796_s1 + $0x420] ss:$16 sps:$4 sm:$0xff]   ;;  %v5295_v11 = vld [vmem:[%s7796_s1 + $0x428] ss:$16 sps:$4 sm:$0xff]  }
  0x4b   :  { %3648 = vmatpush1.bf16.msra.mxu0 %v5199_v12  ;;  %4035 = vmatpush1.bf16.msra.mxu1 %v5202_v13  ;;  %v5384_v12 = vld [vmem:[%s7797_s0 + $0x14] ss:$72 sps:$4 sm:$0xff]  }
  0x4c   :  { %3649 = vmatprep.subr.bf16.mxu0 %v5207_v14  ;;  %4036 = vmatprep.subr.bf16.mxu1 %v5210_v15  ;;  %v5300_v13 = vld [vmem:[%s7796_s1 + $0x444] ss:$16 sps:$4 sm:$0xff]   ;;  %v5303_v14 = vld [vmem:[%s7796_s1 + $0x44c] ss:$16 sps:$4 sm:$0xff]   ;;  %v5298_v15 = vld [vmem:[%s7796_s1 + $0x440] ss:$16 sps:$4 sm:$0xff]  }
  0x4f   :  { %3650 = vmatpush1.bf16.msra.mxu0 %v5205_v16  ;;  %4037 = vmatpush1.bf16.msra.mxu1 %v5208_v17  ;;  %v5301_v16 = vld [vmem:[%s7796_s1 + $0x448] ss:$16 sps:$4 sm:$0xff]   ;;  %v5306_v17 = vld [vmem:[%s7796_s1 + $0x464] ss:$16 sps:$4 sm:$0xff]  }
  0x50   :  { %3651 = vmatprep.subr.bf16.mxu0 %v5213_v18  ;;  %4038 = vmatprep.subr.bf16.mxu1 %v5216_v19  ;;  %v5309_v18 = vld [vmem:[%s7796_s1 + $0x46c] ss:$16 sps:$4 sm:$0xff]   ;;  %v5304_v19 = vld [vmem:[%s7796_s1 + $0x460] ss:$16 sps:$4 sm:$0xff]  }
  0x53   :  { %3652 = vmatpush1.bf16.msra.mxu0 %v5211_v20  ;;  %4039 = vmatpush1.bf16.msra.mxu1 %v5214_v21  ;;  %v5307_v20 = vld [vmem:[%s7796_s1 + $0x468] ss:$16 sps:$4 sm:$0xff]   ;;  %v5312_v21 = vld [vmem:[%s7796_s1 + $0x484] ss:$16 sps:$4 sm:$0xff]  }
  0x54   :  { %3653 = vmatprep.subr.bf16.mxu0 %v5219_v22  ;;  %4040 = vmatprep.subr.bf16.mxu1 %v5222_v23  ;;  %v5315_v22 = vld [vmem:[%s7796_s1 + $0x48c] ss:$16 sps:$4 sm:$0xff]   ;;  %v5310_v23 = vld [vmem:[%s7796_s1 + $0x480] ss:$16 sps:$4 sm:$0xff]  }
  0x57   :  { %3654 = vmatpush1.bf16.msra.mxu0 %v5217_v24  ;;  %4041 = vmatpush1.bf16.msra.mxu1 %v5220_v25  ;;  %v5313_v24 = vld [vmem:[%s7796_s1 + $0x488] ss:$16 sps:$4 sm:$0xff]   ;;  %v5318_v25 = vld [vmem:[%s7796_s1 + $0x4a4] ss:$16 sps:$4 sm:$0xff]  }
  0x58   :  { %3655 = vmatprep.subr.bf16.mxu0 %v5225_v26  ;;  %4042 = vmatprep.subr.bf16.mxu1 %v5228_v27  ;;  %v5321_v26 = vld [vmem:[%s7796_s1 + $0x4ac] ss:$16 sps:$4 sm:$0xff]   ;;  %v5316_v27 = vld [vmem:[%s7796_s1 + $0x4a0] ss:$16 sps:$4 sm:$0xff]  }
  0x5b   :  { %3656 = vmatpush1.bf16.msra.mxu0 %v5223_v28  ;;  %4043 = vmatpush1.bf16.msra.mxu1 %v5226_v29  ;;  %v5319_v28 = vld [vmem:[%s7796_s1 + $0x4a8] ss:$16 sps:$4 sm:$0xff]   ;;  %v5324_v29 = vld [vmem:[%s7796_s1 + $0x4c4] ss:$16 sps:$4 sm:$0xff]  }
  0x5c   :  { %3657 = vmatprep.subr.bf16.mxu0 %v5231_v31  ;;  %4044 = vmatprep.subr.bf16.mxu1 %v5234_v32  ;;  %v5322_v31 = vld [vmem:[%s7796_s1 + $0x4c0] ss:$16 sps:$4 sm:$0xff]   ;;  %v5325_v32 = vld [vmem:[%s7796_s1 + $0x4c8] ss:$16 sps:$4 sm:$0xff]  }
  0x5f   :  { %3658 = vmatpush1.bf16.msra.mxu0 %v5229_v33  ;;  %4045 = vmatpush1.bf16.msra.mxu1 %v5232_v34  ;;  %v5330_v33 = vld [vmem:[%s7796_s1 + $0x4e4] ss:$16 sps:$4 sm:$0xff]   ;;  %v5333_v34 = vld [vmem:[%s7796_s1 + $0x4ec] ss:$16 sps:$4 sm:$0xff]  }
  0x60   :  { %3659 = vmatprep.subr.bf16.mxu0 %v5237_v35  ;;  %4046 = vmatprep.subr.bf16.mxu1 %v5240_v36  ;;  %v5328_v35 = vld [vmem:[%s7796_s1 + $0x4e0] ss:$16 sps:$4 sm:$0xff]   ;;  %v5331_v36 = vld [vmem:[%s7796_s1 + $0x4e8] ss:$16 sps:$4 sm:$0xff]  }
  0x63   :  { %3660 = vmatpush1.bf16.msra.mxu0 %v5235_v37  ;;  %4047 = vmatpush1.bf16.msra.mxu1 %v5238_v38  ;;  %v5336_v37 = vld [vmem:[%s7796_s1 + $0x504] ss:$16 sps:$4 sm:$0xff]   ;;  %v5339_v38 = vld [vmem:[%s7796_s1 + $0x50c] ss:$16 sps:$4 sm:$0xff]  }
  0x64   :  { %3661 = vmatprep.subr.bf16.mxu0 %v5243_v39  ;;  %4048 = vmatprep.subr.bf16.mxu1 %v5246_v40  ;;  %v5334_v39 = vld [vmem:[%s7796_s1 + $0x500] ss:$16 sps:$4 sm:$0xff]   ;;  %v5337_v40 = vld [vmem:[%s7796_s1 + $0x508] ss:$16 sps:$4 sm:$0xff]  }
  0x67   :  { %3662 = vmatpush1.bf16.msra.mxu0 %v5241_v41  ;;  %4049 = vmatpush1.bf16.msra.mxu1 %v5244_v42  ;;  %v5342_v41 = vld [vmem:[%s7796_s1 + $0x524] ss:$16 sps:$4 sm:$0xff]   ;;  %v5345_v42 = vld [vmem:[%s7796_s1 + $0x52c] ss:$16 sps:$4 sm:$0xff]  }
  0x68   :  { %3663 = vmatprep.subr.bf16.mxu0 %v5249_v43  ;;  %4050 = vmatprep.subr.bf16.mxu1 %v5252_v44  ;;  %v5340_v43 = vld [vmem:[%s7796_s1 + $0x520] ss:$16 sps:$4 sm:$0xff]   ;;  %v5343_v44 = vld [vmem:[%s7796_s1 + $0x528] ss:$16 sps:$4 sm:$0xff]  }
  0x6b   :  { %3664 = vmatpush1.bf16.msra.mxu0 %v5247_v45  ;;  %4051 = vmatpush1.bf16.msra.mxu1 %v5250_v46  ;;  %v5348_v45 = vld [vmem:[%s7796_s1 + $0x544] ss:$16 sps:$4 sm:$0xff]   ;;  %v5351_v46 = vld [vmem:[%s7796_s1 + $0x54c] ss:$16 sps:$4 sm:$0xff]  }
  0x6c   :  { %3665 = vmatprep.subr.bf16.mxu0 %v5255_v47  ;;  %4052 = vmatprep.subr.bf16.mxu1 %v5258_v48  ;;  %v5346_v47 = vld [vmem:[%s7796_s1 + $0x540] ss:$16 sps:$4 sm:$0xff]   ;;  %v5349_v48 = vld [vmem:[%s7796_s1 + $0x548] ss:$16 sps:$4 sm:$0xff]  }
  0x6f   :  { %3666 = vmatpush1.bf16.msra.mxu0 %v5253_v49  ;;  %4053 = vmatpush1.bf16.msra.mxu1 %v5256_v50  ;;  %v5354_v49 = vld [vmem:[%s7796_s1 + $0x564] ss:$16 sps:$4 sm:$0xff]   ;;  %v5357_v50 = vld [vmem:[%s7796_s1 + $0x56c] ss:$16 sps:$4 sm:$0xff]  }
  0x70   :  { %3667 = vmatprep.subr.bf16.mxu0 %v5261_v51  ;;  %4054 = vmatprep.subr.bf16.mxu1 %v5264_v52  ;;  %v5352_v51 = vld [vmem:[%s7796_s1 + $0x560] ss:$16 sps:$4 sm:$0xff]   ;;  %v5355_v52 = vld [vmem:[%s7796_s1 + $0x568] ss:$16 sps:$4 sm:$0xff]  }
  0x73   :  { %3668 = vmatpush1.bf16.msra.mxu0 %v5259_v53  ;;  %4055 = vmatpush1.bf16.msra.mxu1 %v5262_v54  ;;  %v5360_v53 = vld [vmem:[%s7796_s1 + $0x584] ss:$16 sps:$4 sm:$0xff]   ;;  %v5363_v54 = vld [vmem:[%s7796_s1 + $0x58c] ss:$16 sps:$4 sm:$0xff]  }
  0x74   :  { %3669 = vmatprep.subr.bf16.mxu0 %v5267_v55  ;;  %4056 = vmatprep.subr.bf16.mxu1 %v5270_v56  ;;  %v5358_v55 = vld [vmem:[%s7796_s1 + $0x580] ss:$16 sps:$4 sm:$0xff]   ;;  %v5361_v56 = vld [vmem:[%s7796_s1 + $0x588] ss:$16 sps:$4 sm:$0xff]  }
  0x77   :  { %3670 = vmatpush1.bf16.msra.mxu0 %v5265_v57  ;;  %4057 = vmatpush1.bf16.msra.mxu1 %v5268_v58  ;;  %v5366_v57 = vld [vmem:[%s7796_s1 + $0x5a4] ss:$16 sps:$4 sm:$0xff]   ;;  %v5369_v58 = vld [vmem:[%s7796_s1 + $0x5ac] ss:$16 sps:$4 sm:$0xff]  }
  0x78   :  { %3671 = vmatprep.subr.bf16.mxu0 %v5273_v59  ;;  %4058 = vmatprep.subr.bf16.mxu1 %v5276_v60  ;;  %v5364_v59 = vld [vmem:[%s7796_s1 + $0x5a0] ss:$16 sps:$4 sm:$0xff]   ;;  %v5367_v60 = vld [vmem:[%s7796_s1 + $0x5a8] ss:$16 sps:$4 sm:$0xff]  }
  0x7b   :  { %3672 = vmatpush1.bf16.msra.mxu0 %v5271_v61  ;;  %4059 = vmatpush1.bf16.msra.mxu1 %v5274_v62  ;;  %v5372_v61 = vld [vmem:[%s7796_s1 + $0x5c4] ss:$16 sps:$4 sm:$0xff]   ;;  %v5375_v62 = vld [vmem:[%s7796_s1 + $0x5cc] ss:$16 sps:$4 sm:$0xff]  }
  0x7c   :  { %3673 = vmatprep.subr.bf16.mxu0 %v5279_v63  ;;  %4060 = vmatprep.subr.bf16.mxu1 %v5282_v0  ;;  %v5370_v63 = vld [vmem:[%s7796_s1 + $0x5c0] ss:$16 sps:$4 sm:$0xff]   ;;  %v5373_v0 = vld [vmem:[%s7796_s1 + $0x5c8] ss:$16 sps:$4 sm:$0xff]  }
  0x7f   :  { %3674 = vmatpush1.bf16.msra.mxu0 %v5277_v1  ;;  %4061 = vmatpush1.bf16.msra.mxu1 %v5280_v2  ;;  %v5378_v1 = vld [vmem:[%s7796_s1 + $0x5e4] ss:$16 sps:$4 sm:$0xff]   ;;  %v5381_v2 = vld [vmem:[%s7796_s1 + $0x5ec] ss:$16 sps:$4 sm:$0xff]  }
  0x80   :  { %3686 = vmatprep.subr.bf16.mxu0 %v5288_v3  ;;  %4073 = vmatprep.subr.bf16.mxu1 %v5291_v4  ;;  %v5376_v3 = vld [vmem:[%s7796_s1 + $0x5e0] ss:$16 sps:$4 sm:$0xff]   ;;  %v5379_v4 = vld [vmem:[%s7796_s1 + $0x5e8] ss:$16 sps:$4 sm:$0xff]  }
  0x82   :  { %3676 = vmatmul.mubr.bf16.vlgmr.msra.gmra.mrb[0].mxu0 %v5283_v5  ;;  %4063 = vmatmul.mubr.bf16.vlgmr.msra.gmra.mrb[0].mxu1 %v5283_v5  ;;  %v5387_v5 = vld [vmem:[%s7796_s1 + $0x604] ss:$16 sps:$4 sm:$0xff]  }
  0x83   :  { %3687 = vmatpush1.bf16.msra.mxu0 %v5286_v6  ;;  %4074 = vmatpush1.bf16.msra.mxu1 %v5289_v7  ;;  %v5390_v6 = vld [vmem:[%s7796_s1 + $0x60c] ss:$16 sps:$4 sm:$0xff]   ;;  %v5382_v7 = vld [vmem:[%s7797_s0 + $0x10] ss:$72 sps:$4 sm:$0xff]  }
  0x84   :  { %3688 = vmatprep.subr.bf16.mxu0 %v5294_v8  ;;  %4075 = vmatprep.subr.bf16.mxu1 %v5297_v9  ;;  %v5385_v8 = vld [vmem:[%s7796_s1 + $0x600] ss:$16 sps:$4 sm:$0xff]   ;;  %v5388_v9 = vld [vmem:[%s7796_s1 + $0x608] ss:$16 sps:$4 sm:$0xff]  }
  0x85   :  { %3718 = vmatprep.mubr.bf16.mxu0 %v5384_v12  ;;  %4105 = vmatprep.mubr.bf16.mxu1 %v5384_v12  ;;  %v5483_v12 = vld [vmem:[%s7797_s0 + $0x1c] ss:$72 sps:$4 sm:$0xff]  }
  0x87   :  { %3689 = vmatpush1.bf16.msra.mxu0 %v5292_v10  ;;  %4076 = vmatpush1.bf16.msra.mxu1 %v5295_v11  ;;  %v5393_v10 = vld [vmem:[%s7796_s1 + $0x624] ss:$16 sps:$4 sm:$0xff]   ;;  %v5396_v11 = vld [vmem:[%s7796_s1 + $0x62c] ss:$16 sps:$4 sm:$0xff]  }
  0x88   :  { %3690 = vmatprep.subr.bf16.mxu0 %v5300_v13  ;;  %4077 = vmatprep.subr.bf16.mxu1 %v5303_v14  ;;  %v5391_v13 = vld [vmem:[%s7796_s1 + $0x620] ss:$16 sps:$4 sm:$0xff]   ;;  %v5394_v14 = vld [vmem:[%s7796_s1 + $0x628] ss:$16 sps:$4 sm:$0xff]  }
  0x8b   :  { %3691 = vmatpush1.bf16.msra.mxu0 %v5298_v15  ;;  %4078 = vmatpush1.bf16.msra.mxu1 %v5301_v16  ;;  %v5399_v15 = vld [vmem:[%s7796_s1 + $0x644] ss:$16 sps:$4 sm:$0xff]   ;;  %v5402_v16 = vld [vmem:[%s7796_s1 + $0x64c] ss:$16 sps:$4 sm:$0xff]  }
  0x8c   :  { %3692 = vmatprep.subr.bf16.mxu0 %v5306_v17  ;;  %4079 = vmatprep.subr.bf16.mxu1 %v5309_v18  ;;  %v5397_v17 = vld [vmem:[%s7796_s1 + $0x640] ss:$16 sps:$4 sm:$0xff]   ;;  %v5400_v18 = vld [vmem:[%s7796_s1 + $0x648] ss:$16 sps:$4 sm:$0xff]  }
  0x8f   :  { %3693 = vmatpush1.bf16.msra.mxu0 %v5304_v19  ;;  %4080 = vmatpush1.bf16.msra.mxu1 %v5307_v20  ;;  %v5405_v19 = vld [vmem:[%s7796_s1 + $0x664] ss:$16 sps:$4 sm:$0xff]   ;;  %v5408_v20 = vld [vmem:[%s7796_s1 + $0x66c] ss:$16 sps:$4 sm:$0xff]  }
  0x90   :  { %3694 = vmatprep.subr.bf16.mxu0 %v5312_v21  ;;  %4081 = vmatprep.subr.bf16.mxu1 %v5315_v22  ;;  %v5403_v21 = vld [vmem:[%s7796_s1 + $0x660] ss:$16 sps:$4 sm:$0xff]   ;;  %v5406_v22 = vld [vmem:[%s7796_s1 + $0x668] ss:$16 sps:$4 sm:$0xff]  }
  0x93   :  { %3695 = vmatpush1.bf16.msra.mxu0 %v5310_v23  ;;  %4082 = vmatpush1.bf16.msra.mxu1 %v5313_v24  ;;  %v5411_v23 = vld [vmem:[%s7796_s1 + $0x684] ss:$16 sps:$4 sm:$0xff]   ;;  %v5414_v24 = vld [vmem:[%s7796_s1 + $0x68c] ss:$16 sps:$4 sm:$0xff]  }
  0x94   :  { %3696 = vmatprep.subr.bf16.mxu0 %v5318_v25  ;;  %4083 = vmatprep.subr.bf16.mxu1 %v5321_v26  ;;  %v5409_v25 = vld [vmem:[%s7796_s1 + $0x680] ss:$16 sps:$4 sm:$0xff]   ;;  %v5412_v26 = vld [vmem:[%s7796_s1 + $0x688] ss:$16 sps:$4 sm:$0xff]  }
  0x97   :  { %3697 = vmatpush1.bf16.msra.mxu0 %v5316_v27  ;;  %4084 = vmatpush1.bf16.msra.mxu1 %v5319_v28  ;;  %v5417_v27 = vld [vmem:[%s7796_s1 + $0x6a4] ss:$16 sps:$4 sm:$0xff]   ;;  %v5420_v28 = vld [vmem:[%s7796_s1 + $0x6ac] ss:$16 sps:$4 sm:$0xff]  }
  0x98   :  { %3698 = vmatprep.subr.bf16.mxu0 %v5324_v29  ;;  %4085 = vmatprep.subr.bf16.mxu1 %v5327_v30  ;;  %v5415_v29 = vld [vmem:[%s7796_s1 + $0x6a0] ss:$16 sps:$4 sm:$0xff]   ;;  %v5418_v30 = vld [vmem:[%s7796_s1 + $0x6a8] ss:$16 sps:$4 sm:$0xff]  }
  0x9b   :  { %3699 = vmatpush1.bf16.msra.mxu0 %v5322_v31  ;;  %4086 = vmatpush1.bf16.msra.mxu1 %v5325_v32  ;;  %v5423_v31 = vld [vmem:[%s7796_s1 + $0x6c4] ss:$16 sps:$4 sm:$0xff]   ;;  %v5426_v32 = vld [vmem:[%s7796_s1 + $0x6cc] ss:$16 sps:$4 sm:$0xff]  }
  0x9c   :  { %3700 = vmatprep.subr.bf16.mxu0 %v5330_v33  ;;  %4087 = vmatprep.subr.bf16.mxu1 %v5333_v34  ;;  %v5421_v33 = vld [vmem:[%s7796_s1 + $0x6c0] ss:$16 sps:$4 sm:$0xff]   ;;  %v5424_v34 = vld [vmem:[%s7796_s1 + $0x6c8] ss:$16 sps:$4 sm:$0xff]  }
  0x9f   :  { %3701 = vmatpush1.bf16.msra.mxu0 %v5328_v35  ;;  %4088 = vmatpush1.bf16.msra.mxu1 %v5331_v36  ;;  %v5429_v35 = vld [vmem:[%s7796_s1 + $0x6e4] ss:$16 sps:$4 sm:$0xff]   ;;  %v5432_v36 = vld [vmem:[%s7796_s1 + $0x6ec] ss:$16 sps:$4 sm:$0xff]  }
  0xa0   :  { %3702 = vmatprep.subr.bf16.mxu0 %v5336_v37  ;;  %4089 = vmatprep.subr.bf16.mxu1 %v5339_v38  ;;  %v5427_v37 = vld [vmem:[%s7796_s1 + $0x6e0] ss:$16 sps:$4 sm:$0xff]   ;;  %v5430_v38 = vld [vmem:[%s7796_s1 + $0x6e8] ss:$16 sps:$4 sm:$0xff]  }
  0xa3   :  { %3703 = vmatpush1.bf16.msra.mxu0 %v5334_v39  ;;  %4090 = vmatpush1.bf16.msra.mxu1 %v5337_v40  ;;  %v5435_v39 = vld [vmem:[%s7796_s1 + $0x704] ss:$16 sps:$4 sm:$0xff]   ;;  %v5438_v40 = vld [vmem:[%s7796_s1 + $0x70c] ss:$16 sps:$4 sm:$0xff]  }
  0xa4   :  { %3704 = vmatprep.subr.bf16.mxu0 %v5342_v41  ;;  %4091 = vmatprep.subr.bf16.mxu1 %v5345_v42  ;;  %v5433_v41 = vld [vmem:[%s7796_s1 + $0x700] ss:$16 sps:$4 sm:$0xff]   ;;  %v5436_v42 = vld [vmem:[%s7796_s1 + $0x708] ss:$16 sps:$4 sm:$0xff]  }
  0xa7   :  { %3705 = vmatpush1.bf16.msra.mxu0 %v5340_v43  ;;  %4092 = vmatpush1.bf16.msra.mxu1 %v5343_v44  ;;  %v5441_v43 = vld [vmem:[%s7796_s1 + $0x724] ss:$16 sps:$4 sm:$0xff]   ;;  %v5444_v44 = vld [vmem:[%s7796_s1 + $0x72c] ss:$16 sps:$4 sm:$0xff]  }
  0xa8   :  { %3706 = vmatprep.subr.bf16.mxu0 %v5348_v45  ;;  %4093 = vmatprep.subr.bf16.mxu1 %v5351_v46  ;;  %v5439_v45 = vld [vmem:[%s7796_s1 + $0x720] ss:$16 sps:$4 sm:$0xff]   ;;  %v5442_v46 = vld [vmem:[%s7796_s1 + $0x728] ss:$16 sps:$4 sm:$0xff]  }
  0xab   :  { %3707 = vmatpush1.bf16.msra.mxu0 %v5346_v47  ;;  %4094 = vmatpush1.bf16.msra.mxu1 %v5349_v48  ;;  %v5447_v47 = vld [vmem:[%s7796_s1 + $0x744] ss:$16 sps:$4 sm:$0xff]   ;;  %v5450_v48 = vld [vmem:[%s7796_s1 + $0x74c] ss:$16 sps:$4 sm:$0xff]  }
  0xac   :  { %3708 = vmatprep.subr.bf16.mxu0 %v5354_v49  ;;  %4095 = vmatprep.subr.bf16.mxu1 %v5357_v50  ;;  %v5445_v49 = vld [vmem:[%s7796_s1 + $0x740] ss:$16 sps:$4 sm:$0xff]   ;;  %v5448_v50 = vld [vmem:[%s7796_s1 + $0x748] ss:$16 sps:$4 sm:$0xff]  }
  0xaf   :  { %3709 = vmatpush1.bf16.msra.mxu0 %v5352_v51  ;;  %4096 = vmatpush1.bf16.msra.mxu1 %v5355_v52  ;;  %v5453_v51 = vld [vmem:[%s7796_s1 + $0x764] ss:$16 sps:$4 sm:$0xff]   ;;  %v5456_v52 = vld [vmem:[%s7796_s1 + $0x76c] ss:$16 sps:$4 sm:$0xff]  }
  0xb0   :  { %3710 = vmatprep.subr.bf16.mxu0 %v5360_v53  ;;  %4097 = vmatprep.subr.bf16.mxu1 %v5363_v54  ;;  %v5451_v53 = vld [vmem:[%s7796_s1 + $0x760] ss:$16 sps:$4 sm:$0xff]   ;;  %v5454_v54 = vld [vmem:[%s7796_s1 + $0x768] ss:$16 sps:$4 sm:$0xff]  }
  0xb3   :  { %3711 = vmatpush1.bf16.msra.mxu0 %v5358_v55  ;;  %4098 = vmatpush1.bf16.msra.mxu1 %v5361_v56  ;;  %v5459_v55 = vld [vmem:[%s7796_s1 + $0x784] ss:$16 sps:$4 sm:$0xff]   ;;  %v5462_v56 = vld [vmem:[%s7796_s1 + $0x78c] ss:$16 sps:$4 sm:$0xff]  }
  0xb4   :  { %3712 = vmatprep.subr.bf16.mxu0 %v5366_v57  ;;  %4099 = vmatprep.subr.bf16.mxu1 %v5369_v58  ;;  %v5457_v57 = vld [vmem:[%s7796_s1 + $0x780] ss:$16 sps:$4 sm:$0xff]   ;;  %v5460_v58 = vld [vmem:[%s7796_s1 + $0x788] ss:$16 sps:$4 sm:$0xff]  }
  0xb7   :  { %3713 = vmatpush1.bf16.msra.mxu0 %v5364_v59  ;;  %4100 = vmatpush1.bf16.msra.mxu1 %v5367_v60  ;;  %v5465_v59 = vld [vmem:[%s7796_s1 + $0x7a4] ss:$16 sps:$4 sm:$0xff]   ;;  %v5468_v60 = vld [vmem:[%s7796_s1 + $0x7ac] ss:$16 sps:$4 sm:$0xff]  }
  0xb8   :  { %3714 = vmatprep.subr.bf16.mxu0 %v5372_v61  ;;  %4101 = vmatprep.subr.bf16.mxu1 %v5375_v62  ;;  %v5463_v61 = vld [vmem:[%s7796_s1 + $0x7a0] ss:$16 sps:$4 sm:$0xff]   ;;  %v5466_v62 = vld [vmem:[%s7796_s1 + $0x7a8] ss:$16 sps:$4 sm:$0xff]  }
  0xbb   :  { %3715 = vmatpush1.bf16.msra.mxu0 %v5370_v63  ;;  %4102 = vmatpush1.bf16.msra.mxu1 %v5373_v0  ;;  %v5471_v63 = vld [vmem:[%s7796_s1 + $0x7c4] ss:$16 sps:$4 sm:$0xff]   ;;  %v5474_v0 = vld [vmem:[%s7796_s1 + $0x7cc] ss:$16 sps:$4 sm:$0xff]  }
  0xbc   :  { %3716 = vmatprep.subr.bf16.mxu0 %v5378_v1  ;;  %4103 = vmatprep.subr.bf16.mxu1 %v5381_v2  ;;  %v5469_v1 = vld [vmem:[%s7796_s1 + $0x7c0] ss:$16 sps:$4 sm:$0xff]   ;;  %v5472_v2 = vld [vmem:[%s7796_s1 + $0x7c8] ss:$16 sps:$4 sm:$0xff]  }
  0xbf   :  { %3717 = vmatpush1.bf16.msra.mxu0 %v5376_v3  ;;  %4104 = vmatpush1.bf16.msra.mxu1 %v5379_v4  ;;  %v5477_v3 = vld [vmem:[%s7796_s1 + $0x7e4] ss:$16 sps:$4 sm:$0xff]   ;;  %v5480_v4 = vld [vmem:[%s7796_s1 + $0x7ec] ss:$16 sps:$4 sm:$0xff]  }
  0xc0   :  { %3729 = vmatprep.subr.bf16.mxu0 %v5387_v5  ;;  %4116 = vmatprep.subr.bf16.mxu1 %v5390_v6  ;;  %v5475_v5 = vld [vmem:[%s7796_s1 + $0x7e0] ss:$16 sps:$4 sm:$0xff]   ;;  %v5478_v6 = vld [vmem:[%s7796_s1 + $0x7e8] ss:$16 sps:$4 sm:$0xff]  }
  0xc2   :  { %3719 = vmatmul.mubr.bf16.vlgmr.msra.gmra.mrb[0].mxu0 %v5382_v7  ;;  %4106 = vmatmul.mubr.bf16.vlgmr.msra.gmra.mrb[0].mxu1 %v5382_v7  ;;  %v5486_v7 = vld [vmem:[%s7796_s1 + $0x804] ss:$16 sps:$4 sm:$0xff]  }
  0xc3   :  { %3730 = vmatpush1.bf16.msra.mxu0 %v5385_v8  ;;  %4117 = vmatpush1.bf16.msra.mxu1 %v5388_v9  ;;  %v5489_v8 = vld [vmem:[%s7796_s1 + $0x80c] ss:$16 sps:$4 sm:$0xff]   ;;  %v5481_v9 = vld [vmem:[%s7797_s0 + $0x18] ss:$72 sps:$4 sm:$0xff]  }
  0xc4   :  { %3731 = vmatprep.subr.bf16.mxu0 %v5393_v10  ;;  %4118 = vmatprep.subr.bf16.mxu1 %v5396_v11  ;;  %v5484_v10 = vld [vmem:[%s7796_s1 + $0x800] ss:$16 sps:$4 sm:$0xff]   ;;  %v5487_v11 = vld [vmem:[%s7796_s1 + $0x808] ss:$16 sps:$4 sm:$0xff]  }
  0xc5   :  { %3761 = vmatprep.mubr.bf16.mxu0 %v5483_v12  ;;  %4148 = vmatprep.mubr.bf16.mxu1 %v5483_v12  ;;  %v5492_v12 = vld [vmem:[%s7796_s1 + $0x824] ss:$16 sps:$4 sm:$0xff]  }
  0xc7   :  { %3732 = vmatpush1.bf16.msra.mxu0 %v5391_v13  ;;  %4119 = vmatpush1.bf16.msra.mxu1 %v5394_v14  ;;  %v5495_v13 = vld [vmem:[%s7796_s1 + $0x82c] ss:$16 sps:$4 sm:$0xff]  }
  0xc8   :  { %3733 = vmatprep.subr.bf16.mxu0 %v5399_v15  ;;  %4120 = vmatprep.subr.bf16.mxu1 %v5402_v16  ;;  %v5582_v14 = vld [vmem:[%s7797_s0 + $0x24] ss:$72 sps:$4 sm:$0xff]   ;;  %v5490_v15 = vld [vmem:[%s7796_s1 + $0x820] ss:$16 sps:$4 sm:$0xff]   ;;  %v5493_v16 = vld [vmem:[%s7796_s1 + $0x828] ss:$16 sps:$4 sm:$0xff]  }
  0xcb   :  { %3734 = vmatpush1.bf16.msra.mxu0 %v5397_v17  ;;  %4121 = vmatpush1.bf16.msra.mxu1 %v5400_v18  ;;  %v5498_v17 = vld [vmem:[%s7796_s1 + $0x844] ss:$16 sps:$4 sm:$0xff]   ;;  %v5501_v18 = vld [vmem:[%s7796_s1 + $0x84c] ss:$16 sps:$4 sm:$0xff]  }
  0xcc   :  { %3735 = vmatprep.subr.bf16.mxu0 %v5405_v19  ;;  %4122 = vmatprep.subr.bf16.mxu1 %v5408_v20  ;;  %v5496_v19 = vld [vmem:[%s7796_s1 + $0x840] ss:$16 sps:$4 sm:$0xff]   ;;  %v5499_v20 = vld [vmem:[%s7796_s1 + $0x848] ss:$16 sps:$4 sm:$0xff]  }
  0xcf   :  { %3736 = vmatpush1.bf16.msra.mxu0 %v5403_v21  ;;  %4123 = vmatpush1.bf16.msra.mxu1 %v5406_v22  ;;  %v5504_v21 = vld [vmem:[%s7796_s1 + $0x864] ss:$16 sps:$4 sm:$0xff]   ;;  %v5507_v22 = vld [vmem:[%s7796_s1 + $0x86c] ss:$16 sps:$4 sm:$0xff]  }
  0xd0   :  { %3737 = vmatprep.subr.bf16.mxu0 %v5411_v23  ;;  %4124 = vmatprep.subr.bf16.mxu1 %v5414_v24  ;;  %v5502_v23 = vld [vmem:[%s7796_s1 + $0x860] ss:$16 sps:$4 sm:$0xff]   ;;  %v5505_v24 = vld [vmem:[%s7796_s1 + $0x868] ss:$16 sps:$4 sm:$0xff]  }
  0xd3   :  { %3738 = vmatpush1.bf16.msra.mxu0 %v5409_v25  ;;  %4125 = vmatpush1.bf16.msra.mxu1 %v5412_v26  ;;  %v5510_v25 = vld [vmem:[%s7796_s1 + $0x884] ss:$16 sps:$4 sm:$0xff]   ;;  %v5513_v26 = vld [vmem:[%s7796_s1 + $0x88c] ss:$16 sps:$4 sm:$0xff]  }
  0xd4   :  { %3739 = vmatprep.subr.bf16.mxu0 %v5417_v27  ;;  %4126 = vmatprep.subr.bf16.mxu1 %v5420_v28  ;;  %v5508_v27 = vld [vmem:[%s7796_s1 + $0x880] ss:$16 sps:$4 sm:$0xff]   ;;  %v5511_v28 = vld [vmem:[%s7796_s1 + $0x888] ss:$16 sps:$4 sm:$0xff]  }
  0xd7   :  { %3740 = vmatpush1.bf16.msra.mxu0 %v5415_v29  ;;  %4127 = vmatpush1.bf16.msra.mxu1 %v5418_v30  ;;  %v5516_v29 = vld [vmem:[%s7796_s1 + $0x8a4] ss:$16 sps:$4 sm:$0xff]   ;;  %v5519_v30 = vld [vmem:[%s7796_s1 + $0x8ac] ss:$16 sps:$4 sm:$0xff]  }
  0xd8   :  { %3741 = vmatprep.subr.bf16.mxu0 %v5423_v31  ;;  %4128 = vmatprep.subr.bf16.mxu1 %v5426_v32  ;;  %v5514_v31 = vld [vmem:[%s7796_s1 + $0x8a0] ss:$16 sps:$4 sm:$0xff]   ;;  %v5517_v32 = vld [vmem:[%s7796_s1 + $0x8a8] ss:$16 sps:$4 sm:$0xff]  }
  0xdb   :  { %3742 = vmatpush1.bf16.msra.mxu0 %v5421_v33  ;;  %4129 = vmatpush1.bf16.msra.mxu1 %v5424_v34  ;;  %v5522_v33 = vld [vmem:[%s7796_s1 + $0x8c4] ss:$16 sps:$4 sm:$0xff]   ;;  %v5525_v34 = vld [vmem:[%s7796_s1 + $0x8cc] ss:$16 sps:$4 sm:$0xff]  }
  0xdc   :  { %3743 = vmatprep.subr.bf16.mxu0 %v5429_v35  ;;  %4130 = vmatprep.subr.bf16.mxu1 %v5432_v36  ;;  %v5520_v35 = vld [vmem:[%s7796_s1 + $0x8c0] ss:$16 sps:$4 sm:$0xff]   ;;  %v5523_v36 = vld [vmem:[%s7796_s1 + $0x8c8] ss:$16 sps:$4 sm:$0xff]  }
  0xdf   :  { %3744 = vmatpush1.bf16.msra.mxu0 %v5427_v37  ;;  %4131 = vmatpush1.bf16.msra.mxu1 %v5430_v38  ;;  %v5528_v37 = vld [vmem:[%s7796_s1 + $0x8e4] ss:$16 sps:$4 sm:$0xff]   ;;  %v5531_v38 = vld [vmem:[%s7796_s1 + $0x8ec] ss:$16 sps:$4 sm:$0xff]  }
  0xe0   :  { %3745 = vmatprep.subr.bf16.mxu0 %v5435_v39  ;;  %4132 = vmatprep.subr.bf16.mxu1 %v5438_v40  ;;  %v5526_v39 = vld [vmem:[%s7796_s1 + $0x8e0] ss:$16 sps:$4 sm:$0xff]   ;;  %v5529_v40 = vld [vmem:[%s7796_s1 + $0x8e8] ss:$16 sps:$4 sm:$0xff]  }
  0xe3   :  { %3746 = vmatpush1.bf16.msra.mxu0 %v5433_v41  ;;  %4133 = vmatpush1.bf16.msra.mxu1 %v5436_v42  ;;  %v5534_v41 = vld [vmem:[%s7796_s1 + $0x904] ss:$16 sps:$4 sm:$0xff]   ;;  %v5537_v42 = vld [vmem:[%s7796_s1 + $0x90c] ss:$16 sps:$4 sm:$0xff]  }
  0xe4   :  { %3747 = vmatprep.subr.bf16.mxu0 %v5441_v43  ;;  %4134 = vmatprep.subr.bf16.mxu1 %v5444_v44  ;;  %v5532_v43 = vld [vmem:[%s7796_s1 + $0x900] ss:$16 sps:$4 sm:$0xff]   ;;  %v5535_v44 = vld [vmem:[%s7796_s1 + $0x908] ss:$16 sps:$4 sm:$0xff]  }
  0xe7   :  { %3748 = vmatpush1.bf16.msra.mxu0 %v5439_v45  ;;  %4135 = vmatpush1.bf16.msra.mxu1 %v5442_v46  ;;  %v5540_v45 = vld [vmem:[%s7796_s1 + $0x924] ss:$16 sps:$4 sm:$0xff]   ;;  %v5543_v46 = vld [vmem:[%s7796_s1 + $0x92c] ss:$16 sps:$4 sm:$0xff]  }
  0xe8   :  { %3749 = vmatprep.subr.bf16.mxu0 %v5447_v47  ;;  %4136 = vmatprep.subr.bf16.mxu1 %v5450_v48  ;;  %v5538_v47 = vld [vmem:[%s7796_s1 + $0x920] ss:$16 sps:$4 sm:$0xff]   ;;  %v5541_v48 = vld [vmem:[%s7796_s1 + $0x928] ss:$16 sps:$4 sm:$0xff]  }
  0xeb   :  { %3750 = vmatpush1.bf16.msra.mxu0 %v5445_v49  ;;  %4137 = vmatpush1.bf16.msra.mxu1 %v5448_v50  ;;  %v5546_v49 = vld [vmem:[%s7796_s1 + $0x944] ss:$16 sps:$4 sm:$0xff]   ;;  %v5549_v50 = vld [vmem:[%s7796_s1 + $0x94c] ss:$16 sps:$4 sm:$0xff]  }
  0xec   :  { %3751 = vmatprep.subr.bf16.mxu0 %v5453_v51  ;;  %4138 = vmatprep.subr.bf16.mxu1 %v5456_v52  ;;  %v5544_v51 = vld [vmem:[%s7796_s1 + $0x940] ss:$16 sps:$4 sm:$0xff]   ;;  %v5547_v52 = vld [vmem:[%s7796_s1 + $0x948] ss:$16 sps:$4 sm:$0xff]  }
  0xef   :  { %3752 = vmatpush1.bf16.msra.mxu0 %v5451_v53  ;;  %4139 = vmatpush1.bf16.msra.mxu1 %v5454_v54  ;;  %v5552_v53 = vld [vmem:[%s7796_s1 + $0x964] ss:$16 sps:$4 sm:$0xff]   ;;  %v5555_v54 = vld [vmem:[%s7796_s1 + $0x96c] ss:$16 sps:$4 sm:$0xff]  }
  0xf0   :  { %3753 = vmatprep.subr.bf16.mxu0 %v5459_v55  ;;  %4140 = vmatprep.subr.bf16.mxu1 %v5462_v56  ;;  %v5550_v55 = vld [vmem:[%s7796_s1 + $0x960] ss:$16 sps:$4 sm:$0xff]   ;;  %v5553_v56 = vld [vmem:[%s7796_s1 + $0x968] ss:$16 sps:$4 sm:$0xff]  }
  0xf3   :  { %3754 = vmatpush1.bf16.msra.mxu0 %v5457_v57  ;;  %4141 = vmatpush1.bf16.msra.mxu1 %v5460_v58  ;;  %v5558_v57 = vld [vmem:[%s7796_s1 + $0x984] ss:$16 sps:$4 sm:$0xff]   ;;  %v5561_v58 = vld [vmem:[%s7796_s1 + $0x98c] ss:$16 sps:$4 sm:$0xff]  }
  0xf4   :  { %3755 = vmatprep.subr.bf16.mxu0 %v5465_v59  ;;  %4142 = vmatprep.subr.bf16.mxu1 %v5468_v60  ;;  %v5556_v59 = vld [vmem:[%s7796_s1 + $0x980] ss:$16 sps:$4 sm:$0xff]   ;;  %v5559_v60 = vld [vmem:[%s7796_s1 + $0x988] ss:$16 sps:$4 sm:$0xff]  }
  0xf7   :  { %3756 = vmatpush1.bf16.msra.mxu0 %v5463_v61  ;;  %4143 = vmatpush1.bf16.msra.mxu1 %v5466_v62  ;;  %v5564_v61 = vld [vmem:[%s7796_s1 + $0x9a4] ss:$16 sps:$4 sm:$0xff]   ;;  %v5567_v62 = vld [vmem:[%s7796_s1 + $0x9ac] ss:$16 sps:$4 sm:$0xff]  }
  0xf8   :  { %3757 = vmatprep.subr.bf16.mxu0 %v5471_v63  ;;  %4144 = vmatprep.subr.bf16.mxu1 %v5474_v0  ;;  %v5562_v63 = vld [vmem:[%s7796_s1 + $0x9a0] ss:$16 sps:$4 sm:$0xff]   ;;  %v5565_v0 = vld [vmem:[%s7796_s1 + $0x9a8] ss:$16 sps:$4 sm:$0xff]  }
  0xfb   :  { %3758 = vmatpush1.bf16.msra.mxu0 %v5469_v1  ;;  %4145 = vmatpush1.bf16.msra.mxu1 %v5472_v2  ;;  %v5570_v1 = vld [vmem:[%s7796_s1 + $0x9c4] ss:$16 sps:$4 sm:$0xff]   ;;  %v5573_v2 = vld [vmem:[%s7796_s1 + $0x9cc] ss:$16 sps:$4 sm:$0xff]  }
  0xfc   :  { %3759 = vmatprep.subr.bf16.mxu0 %v5477_v3  ;;  %4146 = vmatprep.subr.bf16.mxu1 %v5480_v4  ;;  %v5568_v3 = vld [vmem:[%s7796_s1 + $0x9c0] ss:$16 sps:$4 sm:$0xff]   ;;  %v5571_v4 = vld [vmem:[%s7796_s1 + $0x9c8] ss:$16 sps:$4 sm:$0xff]  }
  0xff   :  { %3760 = vmatpush1.bf16.msra.mxu0 %v5475_v5  ;;  %4147 = vmatpush1.bf16.msra.mxu1 %v5478_v6  ;;  %v5576_v5 = vld [vmem:[%s7796_s1 + $0x9e4] ss:$16 sps:$4 sm:$0xff]   ;;  %v5579_v6 = vld [vmem:[%s7796_s1 + $0x9ec] ss:$16 sps:$4 sm:$0xff]  }
 0x100   :  { %3772 = vmatprep.subr.bf16.mxu0 %v5486_v7  ;;  %4159 = vmatprep.subr.bf16.mxu1 %v5489_v8  ;;  %v5574_v7 = vld [vmem:[%s7796_s1 + $0x9e0] ss:$16 sps:$4 sm:$0xff]   ;;  %v5577_v8 = vld [vmem:[%s7796_s1 + $0x9e8] ss:$16 sps:$4 sm:$0xff]  }
 0x102   :  { %3762 = vmatmul.mubr.bf16.vlgmr.msra.gmra.mrb[0].mxu0 %v5481_v9  ;;  %4149 = vmatmul.mubr.bf16.vlgmr.msra.gmra.mrb[0].mxu1 %v5481_v9  ;;  %v5580_v9 = vld [vmem:[%s7797_s0 + $0x20] ss:$72 sps:$4 sm:$0xff]  }
 0x103   :  { %3773 = vmatpush1.bf16.msra.mxu0 %v5484_v10  ;;  %4160 = vmatpush1.bf16.msra.mxu1 %v5487_v11  ;;  %v5585_v10 = vld [vmem:[%s7796_s1 + $0xa04] ss:$16 sps:$4 sm:$0xff]   ;;  %v5588_v11 = vld [vmem:[%s7796_s1 + $0xa0c] ss:$16 sps:$4 sm:$0xff]  }
 0x104   :  { %3774 = vmatprep.subr.bf16.mxu0 %v5492_v12  ;;  %4161 = vmatprep.subr.bf16.mxu1 %v5495_v13  ;;  %v5583_v12 = vld [vmem:[%s7796_s1 + $0xa00] ss:$16 sps:$4 sm:$0xff]   ;;  %v5586_v13 = vld [vmem:[%s7796_s1 + $0xa08] ss:$16 sps:$4 sm:$0xff]  }
 0x105   :  { %3804 = vmatprep.mubr.bf16.mxu0 %v5582_v14  ;;  %4191 = vmatprep.mubr.bf16.mxu1 %v5582_v14  ;;  %v5591_v14 = vld [vmem:[%s7796_s1 + $0xa24] ss:$16 sps:$4 sm:$0xff]  }
 0x107   :  { %3775 = vmatpush1.bf16.msra.mxu0 %v5490_v15  ;;  %4162 = vmatpush1.bf16.msra.mxu1 %v5493_v16  ;;  %v5594_v15 = vld [vmem:[%s7796_s1 + $0xa2c] ss:$16 sps:$4 sm:$0xff]  }
 0x108   :  { %3776 = vmatprep.subr.bf16.mxu0 %v5498_v17  ;;  %4163 = vmatprep.subr.bf16.mxu1 %v5501_v18  ;;  %v5681_v16 = vld [vmem:[%s7797_s0 + $0x2c] ss:$72 sps:$4 sm:$0xff]   ;;  %v5589_v17 = vld [vmem:[%s7796_s1 + $0xa20] ss:$16 sps:$4 sm:$0xff]   ;;  %v5592_v18 = vld [vmem:[%s7796_s1 + $0xa28] ss:$16 sps:$4 sm:$0xff]  }
 0x10b   :  { %3777 = vmatpush1.bf16.msra.mxu0 %v5496_v19  ;;  %4164 = vmatpush1.bf16.msra.mxu1 %v5499_v20  ;;  %v5597_v19 = vld [vmem:[%s7796_s1 + $0xa44] ss:$16 sps:$4 sm:$0xff]   ;;  %v5600_v20 = vld [vmem:[%s7796_s1 + $0xa4c] ss:$16 sps:$4 sm:$0xff]  }
 0x10c   :  { %3778 = vmatprep.subr.bf16.mxu0 %v5504_v21  ;;  %4165 = vmatprep.subr.bf16.mxu1 %v5507_v22  ;;  %v5595_v21 = vld [vmem:[%s7796_s1 + $0xa40] ss:$16 sps:$4 sm:$0xff]   ;;  %v5598_v22 = vld [vmem:[%s7796_s1 + $0xa48] ss:$16 sps:$4 sm:$0xff]  }
 0x10f   :  { %3779 = vmatpush1.bf16.msra.mxu0 %v5502_v23  ;;  %4166 = vmatpush1.bf16.msra.mxu1 %v5505_v24  ;;  %v5603_v23 = vld [vmem:[%s7796_s1 + $0xa64] ss:$16 sps:$4 sm:$0xff]   ;;  %v5606_v24 = vld [vmem:[%s7796_s1 + $0xa6c] ss:$16 sps:$4 sm:$0xff]  }
 0x110   :  { %3780 = vmatprep.subr.bf16.mxu0 %v5510_v25  ;;  %4167 = vmatprep.subr.bf16.mxu1 %v5513_v26  ;;  %v5601_v25 = vld [vmem:[%s7796_s1 + $0xa60] ss:$16 sps:$4 sm:$0xff]   ;;  %v5604_v26 = vld [vmem:[%s7796_s1 + $0xa68] ss:$16 sps:$4 sm:$0xff]  }
 0x113   :  { %3781 = vmatpush1.bf16.msra.mxu0 %v5508_v27  ;;  %4168 = vmatpush1.bf16.msra.mxu1 %v5511_v28  ;;  %v5609_v27 = vld [vmem:[%s7796_s1 + $0xa84] ss:$16 sps:$4 sm:$0xff]   ;;  %v5612_v28 = vld [vmem:[%s7796_s1 + $0xa8c] ss:$16 sps:$4 sm:$0xff]  }
 0x114   :  { %3782 = vmatprep.subr.bf16.mxu0 %v5516_v29  ;;  %4169 = vmatprep.subr.bf16.mxu1 %v5519_v30  ;;  %v5607_v29 = vld [vmem:[%s7796_s1 + $0xa80] ss:$16 sps:$4 sm:$0xff]   ;;  %v5610_v30 = vld [vmem:[%s7796_s1 + $0xa88] ss:$16 sps:$4 sm:$0xff]  }
 0x117   :  { %3783 = vmatpush1.bf16.msra.mxu0 %v5514_v31  ;;  %4170 = vmatpush1.bf16.msra.mxu1 %v5517_v32  ;;  %v5615_v31 = vld [vmem:[%s7796_s1 + $0xaa4] ss:$16 sps:$4 sm:$0xff]   ;;  %v5618_v32 = vld [vmem:[%s7796_s1 + $0xaac] ss:$16 sps:$4 sm:$0xff]  }
 0x118   :  { %3784 = vmatprep.subr.bf16.mxu0 %v5522_v33  ;;  %4171 = vmatprep.subr.bf16.mxu1 %v5525_v34  ;;  %v5613_v33 = vld [vmem:[%s7796_s1 + $0xaa0] ss:$16 sps:$4 sm:$0xff]   ;;  %v5616_v34 = vld [vmem:[%s7796_s1 + $0xaa8] ss:$16 sps:$4 sm:$0xff]  }
 0x11b   :  { %3785 = vmatpush1.bf16.msra.mxu0 %v5520_v35  ;;  %4172 = vmatpush1.bf16.msra.mxu1 %v5523_v36  ;;  %v5621_v35 = vld [vmem:[%s7796_s1 + $0xac4] ss:$16 sps:$4 sm:$0xff]   ;;  %v5624_v36 = vld [vmem:[%s7796_s1 + $0xacc] ss:$16 sps:$4 sm:$0xff]  }
 0x11c   :  { %3786 = vmatprep.subr.bf16.mxu0 %v5528_v37  ;;  %4173 = vmatprep.subr.bf16.mxu1 %v5531_v38  ;;  %v5619_v37 = vld [vmem:[%s7796_s1 + $0xac0] ss:$16 sps:$4 sm:$0xff]   ;;  %v5622_v38 = vld [vmem:[%s7796_s1 + $0xac8] ss:$16 sps:$4 sm:$0xff]  }
 0x11f   :  { %3787 = vmatpush1.bf16.msra.mxu0 %v5526_v39  ;;  %4174 = vmatpush1.bf16.msra.mxu1 %v5529_v40  ;;  %v5627_v39 = vld [vmem:[%s7796_s1 + $0xae4] ss:$16 sps:$4 sm:$0xff]   ;;  %v5630_v40 = vld [vmem:[%s7796_s1 + $0xaec] ss:$16 sps:$4 sm:$0xff]  }
 0x120   :  { %3788 = vmatprep.subr.bf16.mxu0 %v5534_v41  ;;  %4175 = vmatprep.subr.bf16.mxu1 %v5537_v42  ;;  %v5625_v41 = vld [vmem:[%s7796_s1 + $0xae0] ss:$16 sps:$4 sm:$0xff]   ;;  %v5628_v42 = vld [vmem:[%s7796_s1 + $0xae8] ss:$16 sps:$4 sm:$0xff]  }
 0x123   :  { %3789 = vmatpush1.bf16.msra.mxu0 %v5532_v43  ;;  %4176 = vmatpush1.bf16.msra.mxu1 %v5535_v44  ;;  %v5633_v43 = vld [vmem:[%s7796_s1 + $0xb04] ss:$16 sps:$4 sm:$0xff]   ;;  %v5636_v44 = vld [vmem:[%s7796_s1 + $0xb0c] ss:$16 sps:$4 sm:$0xff]  }
 0x124   :  { %3790 = vmatprep.subr.bf16.mxu0 %v5540_v45  ;;  %4177 = vmatprep.subr.bf16.mxu1 %v5543_v46  ;;  %v5631_v45 = vld [vmem:[%s7796_s1 + $0xb00] ss:$16 sps:$4 sm:$0xff]   ;;  %v5634_v46 = vld [vmem:[%s7796_s1 + $0xb08] ss:$16 sps:$4 sm:$0xff]  }
 0x127   :  { %3791 = vmatpush1.bf16.msra.mxu0 %v5538_v47  ;;  %4178 = vmatpush1.bf16.msra.mxu1 %v5541_v48  ;;  %v5639_v47 = vld [vmem:[%s7796_s1 + $0xb24] ss:$16 sps:$4 sm:$0xff]   ;;  %v5642_v48 = vld [vmem:[%s7796_s1 + $0xb2c] ss:$16 sps:$4 sm:$0xff]  }
 0x128   :  { %3792 = vmatprep.subr.bf16.mxu0 %v5546_v49  ;;  %4179 = vmatprep.subr.bf16.mxu1 %v5549_v50  ;;  %v5637_v49 = vld [vmem:[%s7796_s1 + $0xb20] ss:$16 sps:$4 sm:$0xff]   ;;  %v5640_v50 = vld [vmem:[%s7796_s1 + $0xb28] ss:$16 sps:$4 sm:$0xff]  }
 0x12b   :  { %3793 = vmatpush1.bf16.msra.mxu0 %v5544_v51  ;;  %4180 = vmatpush1.bf16.msra.mxu1 %v5547_v52  ;;  %v5645_v51 = vld [vmem:[%s7796_s1 + $0xb44] ss:$16 sps:$4 sm:$0xff]   ;;  %v5648_v52 = vld [vmem:[%s7796_s1 + $0xb4c] ss:$16 sps:$4 sm:$0xff]  }
 0x12c   :  { %3794 = vmatprep.subr.bf16.mxu0 %v5552_v53  ;;  %4181 = vmatprep.subr.bf16.mxu1 %v5555_v54  ;;  %v5643_v53 = vld [vmem:[%s7796_s1 + $0xb40] ss:$16 sps:$4 sm:$0xff]   ;;  %v5646_v54 = vld [vmem:[%s7796_s1 + $0xb48] ss:$16 sps:$4 sm:$0xff]  }
 0x12f   :  { %3795 = vmatpush1.bf16.msra.mxu0 %v5550_v55  ;;  %4182 = vmatpush1.bf16.msra.mxu1 %v5553_v56  ;;  %v5651_v55 = vld [vmem:[%s7796_s1 + $0xb64] ss:$16 sps:$4 sm:$0xff]   ;;  %v5654_v56 = vld [vmem:[%s7796_s1 + $0xb6c] ss:$16 sps:$4 sm:$0xff]  }
 0x130   :  { %3796 = vmatprep.subr.bf16.mxu0 %v5558_v57  ;;  %4183 = vmatprep.subr.bf16.mxu1 %v5561_v58  ;;  %v5649_v57 = vld [vmem:[%s7796_s1 + $0xb60] ss:$16 sps:$4 sm:$0xff]   ;;  %v5652_v58 = vld [vmem:[%s7796_s1 + $0xb68] ss:$16 sps:$4 sm:$0xff]  }
 0x133   :  { %3797 = vmatpush1.bf16.msra.mxu0 %v5556_v59  ;;  %4184 = vmatpush1.bf16.msra.mxu1 %v5559_v60  ;;  %v5657_v59 = vld [vmem:[%s7796_s1 + $0xb84] ss:$16 sps:$4 sm:$0xff]   ;;  %v5660_v60 = vld [vmem:[%s7796_s1 + $0xb8c] ss:$16 sps:$4 sm:$0xff]  }
 0x134   :  { %3798 = vmatprep.subr.bf16.mxu0 %v5564_v61  ;;  %4185 = vmatprep.subr.bf16.mxu1 %v5567_v62  ;;  %v5655_v61 = vld [vmem:[%s7796_s1 + $0xb80] ss:$16 sps:$4 sm:$0xff]   ;;  %v5658_v62 = vld [vmem:[%s7796_s1 + $0xb88] ss:$16 sps:$4 sm:$0xff]  }
 0x137   :  { %3799 = vmatpush1.bf16.msra.mxu0 %v5562_v63  ;;  %4186 = vmatpush1.bf16.msra.mxu1 %v5565_v0  ;;  %v5663_v63 = vld [vmem:[%s7796_s1 + $0xba4] ss:$16 sps:$4 sm:$0xff]   ;;  %v5666_v0 = vld [vmem:[%s7796_s1 + $0xbac] ss:$16 sps:$4 sm:$0xff]  }
 0x138   :  { %3800 = vmatprep.subr.bf16.mxu0 %v5570_v1  ;;  %4187 = vmatprep.subr.bf16.mxu1 %v5573_v2  ;;  %v5661_v1 = vld [vmem:[%s7796_s1 + $0xba0] ss:$16 sps:$4 sm:$0xff]   ;;  %v5664_v2 = vld [vmem:[%s7796_s1 + $0xba8] ss:$16 sps:$4 sm:$0xff]  }
 0x13b   :  { %3801 = vmatpush1.bf16.msra.mxu0 %v5568_v3  ;;  %4188 = vmatpush1.bf16.msra.mxu1 %v5571_v4  ;;  %v5669_v3 = vld [vmem:[%s7796_s1 + $0xbc4] ss:$16 sps:$4 sm:$0xff]   ;;  %v5672_v4 = vld [vmem:[%s7796_s1 + $0xbcc] ss:$16 sps:$4 sm:$0xff]  }
 0x13c   :  { %3802 = vmatprep.subr.bf16.mxu0 %v5576_v5  ;;  %4189 = vmatprep.subr.bf16.mxu1 %v5579_v6  ;;  %v5667_v5 = vld [vmem:[%s7796_s1 + $0xbc0] ss:$16 sps:$4 sm:$0xff]   ;;  %v5670_v6 = vld [vmem:[%s7796_s1 + $0xbc8] ss:$16 sps:$4 sm:$0xff]  }
 0x13f   :  { %3803 = vmatpush1.bf16.msra.mxu0 %v5574_v7  ;;  %4190 = vmatpush1.bf16.msra.mxu1 %v5577_v8  ;;  %v5675_v7 = vld [vmem:[%s7796_s1 + $0xbe4] ss:$16 sps:$4 sm:$0xff]   ;;  %v5678_v8 = vld [vmem:[%s7796_s1 + $0xbec] ss:$16 sps:$4 sm:$0xff]  }
 0x140   :  { %3815 = vmatprep.subr.bf16.mxu0 %v5585_v10  ;;  %4202 = vmatprep.subr.bf16.mxu1 %v5588_v11  ;;  %v5676_v10 = vld [vmem:[%s7796_s1 + $0xbe8] ss:$16 sps:$4 sm:$0xff]   ;;  %v5684_v11 = vld [vmem:[%s7796_s1 + $0xc04] ss:$16 sps:$4 sm:$0xff]  }
 0x142   :  { %3805 = vmatmul.mubr.bf16.vlgmr.msra.gmra.mrb[0].mxu0 %v5580_v9  ;;  %4192 = vmatmul.mubr.bf16.vlgmr.msra.gmra.mrb[0].mxu1 %v5580_v9  ;;  %v5673_v9 = vld [vmem:[%s7796_s1 + $0xbe0] ss:$16 sps:$4 sm:$0xff]  }
 0x143   :  { %3816 = vmatpush1.bf16.msra.mxu0 %v5583_v12  ;;  %4203 = vmatpush1.bf16.msra.mxu1 %v5586_v13  ;;  %v5687_v12 = vld [vmem:[%s7796_s1 + $0xc0c] ss:$16 sps:$4 sm:$0xff]   ;;  %v5679_v13 = vld [vmem:[%s7797_s0 + $0x28] ss:$72 sps:$4 sm:$0xff]  }
 0x144   :  { %3817 = vmatprep.subr.bf16.mxu0 %v5591_v14  ;;  %4204 = vmatprep.subr.bf16.mxu1 %v5594_v15  ;;  %v5682_v14 = vld [vmem:[%s7796_s1 + $0xc00] ss:$16 sps:$4 sm:$0xff]   ;;  %v5685_v15 = vld [vmem:[%s7796_s1 + $0xc08] ss:$16 sps:$4 sm:$0xff]  }
 0x145   :  { %3847 = vmatprep.mubr.bf16.mxu0 %v5681_v16  ;;  %4234 = vmatprep.mubr.bf16.mxu1 %v5681_v16  ;;  %v5690_v16 = vld [vmem:[%s7796_s1 + $0xc24] ss:$16 sps:$4 sm:$0xff]  }
 0x147   :  { %3818 = vmatpush1.bf16.msra.mxu0 %v5589_v17  ;;  %4205 = vmatpush1.bf16.msra.mxu1 %v5592_v18  ;;  %v5693_v17 = vld [vmem:[%s7796_s1 + $0xc2c] ss:$16 sps:$4 sm:$0xff]  }
 0x148   :  { %3819 = vmatprep.subr.bf16.mxu0 %v5597_v19  ;;  %4206 = vmatprep.subr.bf16.mxu1 %v5600_v20  ;;  %v5780_v18 = vld [vmem:[%s7797_s0 + $0x34] ss:$72 sps:$4 sm:$0xff]   ;;  %v5688_v19 = vld [vmem:[%s7796_s1 + $0xc20] ss:$16 sps:$4 sm:$0xff]   ;;  %v5691_v20 = vld [vmem:[%s7796_s1 + $0xc28] ss:$16 sps:$4 sm:$0xff]  }
 0x14b   :  { %3820 = vmatpush1.bf16.msra.mxu0 %v5595_v21  ;;  %4207 = vmatpush1.bf16.msra.mxu1 %v5598_v22  ;;  %v5696_v21 = vld [vmem:[%s7796_s1 + $0xc44] ss:$16 sps:$4 sm:$0xff]   ;;  %v5699_v22 = vld [vmem:[%s7796_s1 + $0xc4c] ss:$16 sps:$4 sm:$0xff]  }
 0x14c   :  { %3821 = vmatprep.subr.bf16.mxu0 %v5603_v23  ;;  %4208 = vmatprep.subr.bf16.mxu1 %v5606_v24  ;;  %v5694_v23 = vld [vmem:[%s7796_s1 + $0xc40] ss:$16 sps:$4 sm:$0xff]   ;;  %v5697_v24 = vld [vmem:[%s7796_s1 + $0xc48] ss:$16 sps:$4 sm:$0xff]  }
 0x14f   :  { %3822 = vmatpush1.bf16.msra.mxu0 %v5601_v25  ;;  %4209 = vmatpush1.bf16.msra.mxu1 %v5604_v26  ;;  %v5702_v25 = vld [vmem:[%s7796_s1 + $0xc64] ss:$16 sps:$4 sm:$0xff]   ;;  %v5705_v26 = vld [vmem:[%s7796_s1 + $0xc6c] ss:$16 sps:$4 sm:$0xff]  }
 0x150   :  { %3823 = vmatprep.subr.bf16.mxu0 %v5609_v27  ;;  %4210 = vmatprep.subr.bf16.mxu1 %v5612_v28  ;;  %v5700_v27 = vld [vmem:[%s7796_s1 + $0xc60] ss:$16 sps:$4 sm:$0xff]   ;;  %v5703_v28 = vld [vmem:[%s7796_s1 + $0xc68] ss:$16 sps:$4 sm:$0xff]  }
 0x153   :  { %3824 = vmatpush1.bf16.msra.mxu0 %v5607_v29  ;;  %4211 = vmatpush1.bf16.msra.mxu1 %v5610_v30  ;;  %v5708_v29 = vld [vmem:[%s7796_s1 + $0xc84] ss:$16 sps:$4 sm:$0xff]   ;;  %v5711_v30 = vld [vmem:[%s7796_s1 + $0xc8c] ss:$16 sps:$4 sm:$0xff]  }
 0x154   :  { %3825 = vmatprep.subr.bf16.mxu0 %v5615_v31  ;;  %4212 = vmatprep.subr.bf16.mxu1 %v5618_v32  ;;  %v5706_v31 = vld [vmem:[%s7796_s1 + $0xc80] ss:$16 sps:$4 sm:$0xff]   ;;  %v5709_v32 = vld [vmem:[%s7796_s1 + $0xc88] ss:$16 sps:$4 sm:$0xff]  }
 0x157   :  { %3826 = vmatpush1.bf16.msra.mxu0 %v5613_v33  ;;  %4213 = vmatpush1.bf16.msra.mxu1 %v5616_v34  ;;  %v5714_v33 = vld [vmem:[%s7796_s1 + $0xca4] ss:$16 sps:$4 sm:$0xff]   ;;  %v5717_v34 = vld [vmem:[%s7796_s1 + $0xcac] ss:$16 sps:$4 sm:$0xff]  }
 0x158   :  { %3827 = vmatprep.subr.bf16.mxu0 %v5621_v35  ;;  %4214 = vmatprep.subr.bf16.mxu1 %v5624_v36  ;;  %v5712_v35 = vld [vmem:[%s7796_s1 + $0xca0] ss:$16 sps:$4 sm:$0xff]   ;;  %v5715_v36 = vld [vmem:[%s7796_s1 + $0xca8] ss:$16 sps:$4 sm:$0xff]  }
 0x15b   :  { %3828 = vmatpush1.bf16.msra.mxu0 %v5619_v37  ;;  %4215 = vmatpush1.bf16.msra.mxu1 %v5622_v38  ;;  %v5720_v37 = vld [vmem:[%s7796_s1 + $0xcc4] ss:$16 sps:$4 sm:$0xff]   ;;  %v5723_v38 = vld [vmem:[%s7796_s1 + $0xccc] ss:$16 sps:$4 sm:$0xff]  }
 0x15c   :  { %3829 = vmatprep.subr.bf16.mxu0 %v5627_v39  ;;  %4216 = vmatprep.subr.bf16.mxu1 %v5630_v40  ;;  %v5718_v39 = vld [vmem:[%s7796_s1 + $0xcc0] ss:$16 sps:$4 sm:$0xff]   ;;  %v5721_v40 = vld [vmem:[%s7796_s1 + $0xcc8] ss:$16 sps:$4 sm:$0xff]  }
 0x15f   :  { %3830 = vmatpush1.bf16.msra.mxu0 %v5625_v41  ;;  %4217 = vmatpush1.bf16.msra.mxu1 %v5628_v42  ;;  %v5726_v41 = vld [vmem:[%s7796_s1 + $0xce4] ss:$16 sps:$4 sm:$0xff]   ;;  %v5729_v42 = vld [vmem:[%s7796_s1 + $0xcec] ss:$16 sps:$4 sm:$0xff]  }
 0x160   :  { %3831 = vmatprep.subr.bf16.mxu0 %v5633_v43  ;;  %4218 = vmatprep.subr.bf16.mxu1 %v5636_v44  ;;  %v5724_v43 = vld [vmem:[%s7796_s1 + $0xce0] ss:$16 sps:$4 sm:$0xff]   ;;  %v5727_v44 = vld [vmem:[%s7796_s1 + $0xce8] ss:$16 sps:$4 sm:$0xff]  }
 0x163   :  { %3832 = vmatpush1.bf16.msra.mxu0 %v5631_v45  ;;  %4219 = vmatpush1.bf16.msra.mxu1 %v5634_v46  ;;  %v5732_v45 = vld [vmem:[%s7796_s1 + $0xd04] ss:$16 sps:$4 sm:$0xff]   ;;  %v5735_v46 = vld [vmem:[%s7796_s1 + $0xd0c] ss:$16 sps:$4 sm:$0xff]  }
 0x164   :  { %3833 = vmatprep.subr.bf16.mxu0 %v5639_v47  ;;  %4220 = vmatprep.subr.bf16.mxu1 %v5642_v48  ;;  %v5730_v47 = vld [vmem:[%s7796_s1 + $0xd00] ss:$16 sps:$4 sm:$0xff]   ;;  %v5733_v48 = vld [vmem:[%s7796_s1 + $0xd08] ss:$16 sps:$4 sm:$0xff]  }
 0x167   :  { %3834 = vmatpush1.bf16.msra.mxu0 %v5637_v49  ;;  %4221 = vmatpush1.bf16.msra.mxu1 %v5640_v50  ;;  %v5738_v49 = vld [vmem:[%s7796_s1 + $0xd24] ss:$16 sps:$4 sm:$0xff]   ;;  %v5741_v50 = vld [vmem:[%s7796_s1 + $0xd2c] ss:$16 sps:$4 sm:$0xff]  }
 0x168   :  { %3835 = vmatprep.subr.bf16.mxu0 %v5645_v51  ;;  %4222 = vmatprep.subr.bf16.mxu1 %v5648_v52  ;;  %v5736_v51 = vld [vmem:[%s7796_s1 + $0xd20] ss:$16 sps:$4 sm:$0xff]   ;;  %v5739_v52 = vld [vmem:[%s7796_s1 + $0xd28] ss:$16 sps:$4 sm:$0xff]  }
 0x16b   :  { %3836 = vmatpush1.bf16.msra.mxu0 %v5643_v53  ;;  %4223 = vmatpush1.bf16.msra.mxu1 %v5646_v54  ;;  %v5744_v53 = vld [vmem:[%s7796_s1 + $0xd44] ss:$16 sps:$4 sm:$0xff]   ;;  %v5747_v54 = vld [vmem:[%s7796_s1 + $0xd4c] ss:$16 sps:$4 sm:$0xff]  }
 0x16c   :  { %3837 = vmatprep.subr.bf16.mxu0 %v5651_v55  ;;  %4224 = vmatprep.subr.bf16.mxu1 %v5654_v56  ;;  %v5742_v55 = vld [vmem:[%s7796_s1 + $0xd40] ss:$16 sps:$4 sm:$0xff]   ;;  %v5745_v56 = vld [vmem:[%s7796_s1 + $0xd48] ss:$16 sps:$4 sm:$0xff]  }
 0x16f   :  { %3838 = vmatpush1.bf16.msra.mxu0 %v5649_v57  ;;  %4225 = vmatpush1.bf16.msra.mxu1 %v5652_v58  ;;  %v5750_v57 = vld [vmem:[%s7796_s1 + $0xd64] ss:$16 sps:$4 sm:$0xff]   ;;  %v5753_v58 = vld [vmem:[%s7796_s1 + $0xd6c] ss:$16 sps:$4 sm:$0xff]  }
 0x170   :  { %3839 = vmatprep.subr.bf16.mxu0 %v5657_v59  ;;  %4226 = vmatprep.subr.bf16.mxu1 %v5660_v60  ;;  %v5748_v59 = vld [vmem:[%s7796_s1 + $0xd60] ss:$16 sps:$4 sm:$0xff]   ;;  %v5751_v60 = vld [vmem:[%s7796_s1 + $0xd68] ss:$16 sps:$4 sm:$0xff]  }
 0x173   :  { %3840 = vmatpush1.bf16.msra.mxu0 %v5655_v61  ;;  %4227 = vmatpush1.bf16.msra.mxu1 %v5658_v62  ;;  %v5756_v61 = vld [vmem:[%s7796_s1 + $0xd84] ss:$16 sps:$4 sm:$0xff]   ;;  %v5759_v62 = vld [vmem:[%s7796_s1 + $0xd8c] ss:$16 sps:$4 sm:$0xff]  }
 0x174   :  { %3841 = vmatprep.subr.bf16.mxu0 %v5663_v63  ;;  %4228 = vmatprep.subr.bf16.mxu1 %v5666_v0  ;;  %v5754_v63 = vld [vmem:[%s7796_s1 + $0xd80] ss:$16 sps:$4 sm:$0xff]   ;;  %v5757_v0 = vld [vmem:[%s7796_s1 + $0xd88] ss:$16 sps:$4 sm:$0xff]  }
 0x177   :  { %3842 = vmatpush1.bf16.msra.mxu0 %v5661_v1  ;;  %4229 = vmatpush1.bf16.msra.mxu1 %v5664_v2  ;;  %v5762_v1 = vld [vmem:[%s7796_s1 + $0xda4] ss:$16 sps:$4 sm:$0xff]   ;;  %v5765_v2 = vld [vmem:[%s7796_s1 + $0xdac] ss:$16 sps:$4 sm:$0xff]  }
 0x178   :  { %3843 = vmatprep.subr.bf16.mxu0 %v5669_v3  ;;  %4230 = vmatprep.subr.bf16.mxu1 %v5672_v4  ;;  %v5760_v3 = vld [vmem:[%s7796_s1 + $0xda0] ss:$16 sps:$4 sm:$0xff]   ;;  %v5763_v4 = vld [vmem:[%s7796_s1 + $0xda8] ss:$16 sps:$4 sm:$0xff]  }
 0x17b   :  { %3844 = vmatpush1.bf16.msra.mxu0 %v5667_v5  ;;  %4231 = vmatpush1.bf16.msra.mxu1 %v5670_v6  ;;  %v5768_v5 = vld [vmem:[%s7796_s1 + $0xdc4] ss:$16 sps:$4 sm:$0xff]   ;;  %v5771_v6 = vld [vmem:[%s7796_s1 + $0xdcc] ss:$16 sps:$4 sm:$0xff]  }
 0x17c   :  { %3845 = vmatprep.subr.bf16.mxu0 %v5675_v7  ;;  %4232 = vmatprep.subr.bf16.mxu1 %v5678_v8  ;;  %v5766_v7 = vld [vmem:[%s7796_s1 + $0xdc0] ss:$16 sps:$4 sm:$0xff]   ;;  %v5769_v8 = vld [vmem:[%s7796_s1 + $0xdc8] ss:$16 sps:$4 sm:$0xff]  }
 0x17f   :  { %3846 = vmatpush1.bf16.msra.mxu0 %v5673_v9  ;;  %4233 = vmatpush1.bf16.msra.mxu1 %v5676_v10  ;;  %v5774_v9 = vld [vmem:[%s7796_s1 + $0xde4] ss:$16 sps:$4 sm:$0xff]   ;;  %v5777_v10 = vld [vmem:[%s7796_s1 + $0xdec] ss:$16 sps:$4 sm:$0xff]  }
 0x180   :  { %3858 = vmatprep.subr.bf16.mxu0 %v5684_v11  ;;  %4245 = vmatprep.subr.bf16.mxu1 %v5687_v12  ;;  %v5772_v11 = vld [vmem:[%s7796_s1 + $0xde0] ss:$16 sps:$4 sm:$0xff]   ;;  %v5775_v12 = vld [vmem:[%s7796_s1 + $0xde8] ss:$16 sps:$4 sm:$0xff]  }
 0x182   :  { %3848 = vmatmul.mubr.bf16.vlgmr.msra.gmra.mrb[0].mxu0 %v5679_v13  ;;  %4235 = vmatmul.mubr.bf16.vlgmr.msra.gmra.mrb[0].mxu1 %v5679_v13  ;;  %v5783_v13 = vld [vmem:[%s7796_s1 + $0xe04] ss:$16 sps:$4 sm:$0xff]  }
 0x183   :  { %3859 = vmatpush1.bf16.msra.mxu0 %v5682_v14  ;;  %4246 = vmatpush1.bf16.msra.mxu1 %v5685_v15  ;;  %v5786_v14 = vld [vmem:[%s7796_s1 + $0xe0c] ss:$16 sps:$4 sm:$0xff]   ;;  %v5778_v15 = vld [vmem:[%s7797_s0 + $0x30] ss:$72 sps:$4 sm:$0xff]  }
 0x184   :  { %3860 = vmatprep.subr.bf16.mxu0 %v5690_v16  ;;  %4247 = vmatprep.subr.bf16.mxu1 %v5693_v17  ;;  %v5781_v16 = vld [vmem:[%s7796_s1 + $0xe00] ss:$16 sps:$4 sm:$0xff]   ;;  %v5784_v17 = vld [vmem:[%s7796_s1 + $0xe08] ss:$16 sps:$4 sm:$0xff]  }
 0x185   :  { %3890 = vmatprep.mubr.bf16.mxu0 %v5780_v18  ;;  %4277 = vmatprep.mubr.bf16.mxu1 %v5780_v18  ;;  %v5789_v18 = vld [vmem:[%s7796_s1 + $0xe24] ss:$16 sps:$4 sm:$0xff]  }
 0x187   :  { %3861 = vmatpush1.bf16.msra.mxu0 %v5688_v19  ;;  %4248 = vmatpush1.bf16.msra.mxu1 %v5691_v20  ;;  %v5792_v19 = vld [vmem:[%s7796_s1 + $0xe2c] ss:$16 sps:$4 sm:$0xff]  }
 0x188   :  { %3862 = vmatprep.subr.bf16.mxu0 %v5696_v21  ;;  %4249 = vmatprep.subr.bf16.mxu1 %v5699_v22  ;;  %v5879_v20 = vld [vmem:[%s7797_s0 + $0x3c] ss:$72 sps:$4 sm:$0xff]   ;;  %v5787_v21 = vld [vmem:[%s7796_s1 + $0xe20] ss:$16 sps:$4 sm:$0xff]   ;;  %v5790_v22 = vld [vmem:[%s7796_s1 + $0xe28] ss:$16 sps:$4 sm:$0xff]  }
 0x18b   :  { %3863 = vmatpush1.bf16.msra.mxu0 %v5694_v23  ;;  %4250 = vmatpush1.bf16.msra.mxu1 %v5697_v24  ;;  %v5795_v23 = vld [vmem:[%s7796_s1 + $0xe44] ss:$16 sps:$4 sm:$0xff]   ;;  %v5798_v24 = vld [vmem:[%s7796_s1 + $0xe4c] ss:$16 sps:$4 sm:$0xff]  }
 0x18c   :  { %3864 = vmatprep.subr.bf16.mxu0 %v5702_v25  ;;  %4251 = vmatprep.subr.bf16.mxu1 %v5705_v26  ;;  %v5793_v25 = vld [vmem:[%s7796_s1 + $0xe40] ss:$16 sps:$4 sm:$0xff]   ;;  %v5796_v26 = vld [vmem:[%s7796_s1 + $0xe48] ss:$16 sps:$4 sm:$0xff]  }
 0x18f   :  { %3865 = vmatpush1.bf16.msra.mxu0 %v5700_v27  ;;  %4252 = vmatpush1.bf16.msra.mxu1 %v5703_v28  ;;  %v5801_v27 = vld [vmem:[%s7796_s1 + $0xe64] ss:$16 sps:$4 sm:$0xff]   ;;  %v5804_v28 = vld [vmem:[%s7796_s1 + $0xe6c] ss:$16 sps:$4 sm:$0xff]  }
 0x190   :  { %3866 = vmatprep.subr.bf16.mxu0 %v5708_v29  ;;  %4253 = vmatprep.subr.bf16.mxu1 %v5711_v30  ;;  %v5799_v29 = vld [vmem:[%s7796_s1 + $0xe60] ss:$16 sps:$4 sm:$0xff]   ;;  %v5802_v30 = vld [vmem:[%s7796_s1 + $0xe68] ss:$16 sps:$4 sm:$0xff]  }
 0x193   :  { %3867 = vmatpush1.bf16.msra.mxu0 %v5706_v31  ;;  %4254 = vmatpush1.bf16.msra.mxu1 %v5709_v32  ;;  %v5807_v31 = vld [vmem:[%s7796_s1 + $0xe84] ss:$16 sps:$4 sm:$0xff]   ;;  %v5810_v32 = vld [vmem:[%s7796_s1 + $0xe8c] ss:$16 sps:$4 sm:$0xff]  }
 0x194   :  { %3868 = vmatprep.subr.bf16.mxu0 %v5714_v33  ;;  %4255 = vmatprep.subr.bf16.mxu1 %v5717_v34  ;;  %v5805_v33 = vld [vmem:[%s7796_s1 + $0xe80] ss:$16 sps:$4 sm:$0xff]   ;;  %v5808_v34 = vld [vmem:[%s7796_s1 + $0xe88] ss:$16 sps:$4 sm:$0xff]  }
 0x197   :  { %3869 = vmatpush1.bf16.msra.mxu0 %v5712_v35  ;;  %4256 = vmatpush1.bf16.msra.mxu1 %v5715_v36  ;;  %v5813_v35 = vld [vmem:[%s7796_s1 + $0xea4] ss:$16 sps:$4 sm:$0xff]   ;;  %v5816_v36 = vld [vmem:[%s7796_s1 + $0xeac] ss:$16 sps:$4 sm:$0xff]  }
 0x198   :  { %3870 = vmatprep.subr.bf16.mxu0 %v5720_v37  ;;  %4257 = vmatprep.subr.bf16.mxu1 %v5723_v38  ;;  %v5811_v37 = vld [vmem:[%s7796_s1 + $0xea0] ss:$16 sps:$4 sm:$0xff]   ;;  %v5814_v38 = vld [vmem:[%s7796_s1 + $0xea8] ss:$16 sps:$4 sm:$0xff]  }
 0x19b   :  { %3871 = vmatpush1.bf16.msra.mxu0 %v5718_v39  ;;  %4258 = vmatpush1.bf16.msra.mxu1 %v5721_v40  ;;  %v5819_v39 = vld [vmem:[%s7796_s1 + $0xec4] ss:$16 sps:$4 sm:$0xff]   ;;  %v5822_v40 = vld [vmem:[%s7796_s1 + $0xecc] ss:$16 sps:$4 sm:$0xff]  }
 0x19c   :  { %3872 = vmatprep.subr.bf16.mxu0 %v5726_v41  ;;  %4259 = vmatprep.subr.bf16.mxu1 %v5729_v42  ;;  %v5817_v41 = vld [vmem:[%s7796_s1 + $0xec0] ss:$16 sps:$4 sm:$0xff]   ;;  %v5820_v42 = vld [vmem:[%s7796_s1 + $0xec8] ss:$16 sps:$4 sm:$0xff]  }
 0x19f   :  { %3873 = vmatpush1.bf16.msra.mxu0 %v5724_v43  ;;  %4260 = vmatpush1.bf16.msra.mxu1 %v5727_v44  ;;  %v5825_v43 = vld [vmem:[%s7796_s1 + $0xee4] ss:$16 sps:$4 sm:$0xff]   ;;  %v5828_v44 = vld [vmem:[%s7796_s1 + $0xeec] ss:$16 sps:$4 sm:$0xff]  }
 0x1a0   :  { %3874 = vmatprep.subr.bf16.mxu0 %v5732_v45  ;;  %4261 = vmatprep.subr.bf16.mxu1 %v5735_v46  ;;  %v5823_v45 = vld [vmem:[%s7796_s1 + $0xee0] ss:$16 sps:$4 sm:$0xff]   ;;  %v5826_v46 = vld [vmem:[%s7796_s1 + $0xee8] ss:$16 sps:$4 sm:$0xff]  }
 0x1a3   :  { %3875 = vmatpush1.bf16.msra.mxu0 %v5730_v47  ;;  %4262 = vmatpush1.bf16.msra.mxu1 %v5733_v48  ;;  %v5831_v47 = vld [vmem:[%s7796_s1 + $0xf04] ss:$16 sps:$4 sm:$0xff]   ;;  %v5834_v48 = vld [vmem:[%s7796_s1 + $0xf0c] ss:$16 sps:$4 sm:$0xff]  }
 0x1a4   :  { %3876 = vmatprep.subr.bf16.mxu0 %v5738_v49  ;;  %4263 = vmatprep.subr.bf16.mxu1 %v5741_v50  ;;  %v5829_v49 = vld [vmem:[%s7796_s1 + $0xf00] ss:$16 sps:$4 sm:$0xff]   ;;  %v5832_v50 = vld [vmem:[%s7796_s1 + $0xf08] ss:$16 sps:$4 sm:$0xff]  }
 0x1a7   :  { %3877 = vmatpush1.bf16.msra.mxu0 %v5736_v51  ;;  %4264 = vmatpush1.bf16.msra.mxu1 %v5739_v52  ;;  %v5837_v51 = vld [vmem:[%s7796_s1 + $0xf24] ss:$16 sps:$4 sm:$0xff]   ;;  %v5840_v52 = vld [vmem:[%s7796_s1 + $0xf2c] ss:$16 sps:$4 sm:$0xff]  }
 0x1a8   :  { %3878 = vmatprep.subr.bf16.mxu0 %v5744_v53  ;;  %4265 = vmatprep.subr.bf16.mxu1 %v5747_v54  ;;  %v5835_v53 = vld [vmem:[%s7796_s1 + $0xf20] ss:$16 sps:$4 sm:$0xff]   ;;  %v5838_v54 = vld [vmem:[%s7796_s1 + $0xf28] ss:$16 sps:$4 sm:$0xff]  }
 0x1ab   :  { %3879 = vmatpush1.bf16.msra.mxu0 %v5742_v55  ;;  %4266 = vmatpush1.bf16.msra.mxu1 %v5745_v56  ;;  %v5843_v55 = vld [vmem:[%s7796_s1 + $0xf44] ss:$16 sps:$4 sm:$0xff]   ;;  %v5846_v56 = vld [vmem:[%s7796_s1 + $0xf4c] ss:$16 sps:$4 sm:$0xff]  }
 0x1ac   :  { %3880 = vmatprep.subr.bf16.mxu0 %v5750_v57  ;;  %4267 = vmatprep.subr.bf16.mxu1 %v5753_v58  ;;  %v5841_v57 = vld [vmem:[%s7796_s1 + $0xf40] ss:$16 sps:$4 sm:$0xff]   ;;  %v5844_v58 = vld [vmem:[%s7796_s1 + $0xf48] ss:$16 sps:$4 sm:$0xff]  }
 0x1af   :  { %3881 = vmatpush1.bf16.msra.mxu0 %v5748_v59  ;;  %4268 = vmatpush1.bf16.msra.mxu1 %v5751_v60  ;;  %v5849_v59 = vld [vmem:[%s7796_s1 + $0xf64] ss:$16 sps:$4 sm:$0xff]   ;;  %v5852_v60 = vld [vmem:[%s7796_s1 + $0xf6c] ss:$16 sps:$4 sm:$0xff]  }
 0x1b0   :  { %3882 = vmatprep.subr.bf16.mxu0 %v5756_v61  ;;  %4269 = vmatprep.subr.bf16.mxu1 %v5759_v62  ;;  %v5847_v61 = vld [vmem:[%s7796_s1 + $0xf60] ss:$16 sps:$4 sm:$0xff]   ;;  %v5850_v62 = vld [vmem:[%s7796_s1 + $0xf68] ss:$16 sps:$4 sm:$0xff]  }
 0x1b3   :  { %3883 = vmatpush1.bf16.msra.mxu0 %v5754_v63  ;;  %4270 = vmatpush1.bf16.msra.mxu1 %v5757_v0  ;;  %v5855_v63 = vld [vmem:[%s7796_s1 + $0xf84] ss:$16 sps:$4 sm:$0xff]   ;;  %v5858_v0 = vld [vmem:[%s7796_s1 + $0xf8c] ss:$16 sps:$4 sm:$0xff]  }
 0x1b4   :  { %3884 = vmatprep.subr.bf16.mxu0 %v5762_v1  ;;  %4271 = vmatprep.subr.bf16.mxu1 %v5765_v2  ;;  %v5853_v1 = vld [vmem:[%s7796_s1 + $0xf80] ss:$16 sps:$4 sm:$0xff]   ;;  %v5856_v2 = vld [vmem:[%s7796_s1 + $0xf88] ss:$16 sps:$4 sm:$0xff]  }
 0x1b7   :  { %3885 = vmatpush1.bf16.msra.mxu0 %v5760_v3  ;;  %4272 = vmatpush1.bf16.msra.mxu1 %v5763_v4  ;;  %v5861_v3 = vld [vmem:[%s7796_s1 + $0xfa4] ss:$16 sps:$4 sm:$0xff]   ;;  %v5864_v4 = vld [vmem:[%s7796_s1 + $0xfac] ss:$16 sps:$4 sm:$0xff]  }
 0x1b8   :  { %3886 = vmatprep.subr.bf16.mxu0 %v5768_v5  ;;  %4273 = vmatprep.subr.bf16.mxu1 %v5771_v6  ;;  %v5859_v5 = vld [vmem:[%s7796_s1 + $0xfa0] ss:$16 sps:$4 sm:$0xff]   ;;  %v5862_v6 = vld [vmem:[%s7796_s1 + $0xfa8] ss:$16 sps:$4 sm:$0xff]  }
 0x1bb   :  { %3887 = vmatpush1.bf16.msra.mxu0 %v5766_v7  ;;  %4274 = vmatpush1.bf16.msra.mxu1 %v5769_v8  ;;  %v5867_v7 = vld [vmem:[%s7796_s1 + $0xfc4] ss:$16 sps:$4 sm:$0xff]   ;;  %v5870_v8 = vld [vmem:[%s7796_s1 + $0xfcc] ss:$16 sps:$4 sm:$0xff]  }
 0x1bc   :  { %3888 = vmatprep.subr.bf16.mxu0 %v5774_v9  ;;  %4275 = vmatprep.subr.bf16.mxu1 %v5777_v10  ;;  %v5865_v9 = vld [vmem:[%s7796_s1 + $0xfc0] ss:$16 sps:$4 sm:$0xff]   ;;  %v5868_v10 = vld [vmem:[%s7796_s1 + $0xfc8] ss:$16 sps:$4 sm:$0xff]  }
 0x1bf   :  { %3889 = vmatpush1.bf16.msra.mxu0 %v5772_v11  ;;  %4276 = vmatpush1.bf16.msra.mxu1 %v5775_v12  ;;  %v5873_v11 = vld [vmem:[%s7796_s1 + $0xfe4] ss:$16 sps:$4 sm:$0xff]   ;;  %v5876_v12 = vld [vmem:[%s7796_s1 + $0xfec] ss:$16 sps:$4 sm:$0xff]  }
 0x1c0   :  { %3901 = vmatprep.subr.bf16.mxu0 %v5783_v13  ;;  %4288 = vmatprep.subr.bf16.mxu1 %v5786_v14  ;;  %v5871_v13 = vld [vmem:[%s7796_s1 + $0xfe0] ss:$16 sps:$4 sm:$0xff]   ;;  %v5874_v14 = vld [vmem:[%s7796_s1 + $0xfe8] ss:$16 sps:$4 sm:$0xff]  }
 0x1c2   :  { %3891 = vmatmul.mubr.bf16.vlgmr.msra.gmra.mrb[0].mxu0 %v5778_v15  ;;  %4278 = vmatmul.mubr.bf16.vlgmr.msra.gmra.mrb[0].mxu1 %v5778_v15  ;;  %v5882_v15 = vld [vmem:[%s7796_s1 + $0x1004] ss:$16 sps:$4 sm:$0xff]  }
 0x1c3   :  { %3902 = vmatpush1.bf16.msra.mxu0 %v5781_v16  ;;  %4289 = vmatpush1.bf16.msra.mxu1 %v5784_v17  ;;  %v5885_v16 = vld [vmem:[%s7796_s1 + $0x100c] ss:$16 sps:$4 sm:$0xff]   ;;  %v5877_v17 = vld [vmem:[%s7797_s0 + $0x38] ss:$72 sps:$4 sm:$0xff]  }
 0x1c4   :  { %3903 = vmatprep.subr.bf16.mxu0 %v5789_v18  ;;  %4290 = vmatprep.subr.bf16.mxu1 %v5792_v19  ;;  %v5880_v18 = vld [vmem:[%s7796_s1 + $0x1000] ss:$16 sps:$4 sm:$0xff]   ;;  %v5883_v19 = vld [vmem:[%s7796_s1 + $0x1008] ss:$16 sps:$4 sm:$0xff]  }
 0x1c5   :  { %3933 = vmatprep.mubr.bf16.mxu0 %v5879_v20  ;;  %4320 = vmatprep.mubr.bf16.mxu1 %v5879_v20  ;;  %v5888_v20 = vld [vmem:[%s7796_s1 + $0x1024] ss:$16 sps:$4 sm:$0xff]  }
 0x1c7   :  { %3904 = vmatpush1.bf16.msra.mxu0 %v5787_v21  ;;  %4291 = vmatpush1.bf16.msra.mxu1 %v5790_v22  ;;  %v5891_v21 = vld [vmem:[%s7796_s1 + $0x102c] ss:$16 sps:$4 sm:$0xff]  }
 0x1c8   :  { %3905 = vmatprep.subr.bf16.mxu0 %v5795_v23  ;;  %4292 = vmatprep.subr.bf16.mxu1 %v5798_v24  ;;  %v5978_v22 = vld [vmem:[%s7797_s0 + $0x44] ss:$72 sps:$4 sm:$0xff]   ;;  %v5886_v23 = vld [vmem:[%s7796_s1 + $0x1020] ss:$16 sps:$4 sm:$0xff]   ;;  %v5889_v24 = vld [vmem:[%s7796_s1 + $0x1028] ss:$16 sps:$4 sm:$0xff]  }
 0x1cb   :  { %3906 = vmatpush1.bf16.msra.mxu0 %v5793_v25  ;;  %4293 = vmatpush1.bf16.msra.mxu1 %v5796_v26  ;;  %v5894_v25 = vld [vmem:[%s7796_s1 + $0x1044] ss:$16 sps:$4 sm:$0xff]   ;;  %v5897_v26 = vld [vmem:[%s7796_s1 + $0x104c] ss:$16 sps:$4 sm:$0xff]  }
 0x1cc   :  { %3907 = vmatprep.subr.bf16.mxu0 %v5801_v27  ;;  %4294 = vmatprep.subr.bf16.mxu1 %v5804_v28  ;;  %v5892_v27 = vld [vmem:[%s7796_s1 + $0x1040] ss:$16 sps:$4 sm:$0xff]   ;;  %v5895_v28 = vld [vmem:[%s7796_s1 + $0x1048] ss:$16 sps:$4 sm:$0xff]  }
 0x1cf   :  { %3908 = vmatpush1.bf16.msra.mxu0 %v5799_v29  ;;  %4295 = vmatpush1.bf16.msra.mxu1 %v5802_v30  ;;  %v5900_v29 = vld [vmem:[%s7796_s1 + $0x1064] ss:$16 sps:$4 sm:$0xff]   ;;  %v5903_v30 = vld [vmem:[%s7796_s1 + $0x106c] ss:$16 sps:$4 sm:$0xff]  }
 0x1d0   :  { %3909 = vmatprep.subr.bf16.mxu0 %v5807_v31  ;;  %4296 = vmatprep.subr.bf16.mxu1 %v5810_v32  ;;  %v5898_v31 = vld [vmem:[%s7796_s1 + $0x1060] ss:$16 sps:$4 sm:$0xff]   ;;  %v5901_v32 = vld [vmem:[%s7796_s1 + $0x1068] ss:$16 sps:$4 sm:$0xff]  }
 0x1d3   :  { %3910 = vmatpush1.bf16.msra.mxu0 %v5805_v33  ;;  %4297 = vmatpush1.bf16.msra.mxu1 %v5808_v34  ;;  %v5906_v33 = vld [vmem:[%s7796_s1 + $0x1084] ss:$16 sps:$4 sm:$0xff]   ;;  %v5909_v34 = vld [vmem:[%s7796_s1 + $0x108c] ss:$16 sps:$4 sm:$0xff]  }
 0x1d4   :  { %3911 = vmatprep.subr.bf16.mxu0 %v5813_v35  ;;  %4298 = vmatprep.subr.bf16.mxu1 %v5816_v36  ;;  %v5904_v35 = vld [vmem:[%s7796_s1 + $0x1080] ss:$16 sps:$4 sm:$0xff]   ;;  %v5907_v36 = vld [vmem:[%s7796_s1 + $0x1088] ss:$16 sps:$4 sm:$0xff]  }
 0x1d7   :  { %3912 = vmatpush1.bf16.msra.mxu0 %v5811_v37  ;;  %4299 = vmatpush1.bf16.msra.mxu1 %v5814_v38  ;;  %v5912_v37 = vld [vmem:[%s7796_s1 + $0x10a4] ss:$16 sps:$4 sm:$0xff]   ;;  %v5915_v38 = vld [vmem:[%s7796_s1 + $0x10ac] ss:$16 sps:$4 sm:$0xff]  }
 0x1d8   :  { %3913 = vmatprep.subr.bf16.mxu0 %v5819_v39  ;;  %4300 = vmatprep.subr.bf16.mxu1 %v5822_v40  ;;  %v5910_v39 = vld [vmem:[%s7796_s1 + $0x10a0] ss:$16 sps:$4 sm:$0xff]   ;;  %v5913_v40 = vld [vmem:[%s7796_s1 + $0x10a8] ss:$16 sps:$4 sm:$0xff]  }
 0x1db   :  { %3914 = vmatpush1.bf16.msra.mxu0 %v5817_v41  ;;  %4301 = vmatpush1.bf16.msra.mxu1 %v5820_v42  ;;  %v5918_v41 = vld [vmem:[%s7796_s1 + $0x10c4] ss:$16 sps:$4 sm:$0xff]   ;;  %v5921_v42 = vld [vmem:[%s7796_s1 + $0x10cc] ss:$16 sps:$4 sm:$0xff]  }
 0x1dc   :  { %3915 = vmatprep.subr.bf16.mxu0 %v5825_v43  ;;  %4302 = vmatprep.subr.bf16.mxu1 %v5828_v44  ;;  %v5916_v43 = vld [vmem:[%s7796_s1 + $0x10c0] ss:$16 sps:$4 sm:$0xff]   ;;  %v5919_v44 = vld [vmem:[%s7796_s1 + $0x10c8] ss:$16 sps:$4 sm:$0xff]  }
 0x1df   :  { %3916 = vmatpush1.bf16.msra.mxu0 %v5823_v45  ;;  %4303 = vmatpush1.bf16.msra.mxu1 %v5826_v46  ;;  %v5924_v45 = vld [vmem:[%s7796_s1 + $0x10e4] ss:$16 sps:$4 sm:$0xff]   ;;  %v5927_v46 = vld [vmem:[%s7796_s1 + $0x10ec] ss:$16 sps:$4 sm:$0xff]  }
 0x1e0   :  { %3917 = vmatprep.subr.bf16.mxu0 %v5831_v47  ;;  %4304 = vmatprep.subr.bf16.mxu1 %v5834_v48  ;;  %v5922_v47 = vld [vmem:[%s7796_s1 + $0x10e0] ss:$16 sps:$4 sm:$0xff]   ;;  %v5925_v48 = vld [vmem:[%s7796_s1 + $0x10e8] ss:$16 sps:$4 sm:$0xff]  }
 0x1e3   :  { %3918 = vmatpush1.bf16.msra.mxu0 %v5829_v49  ;;  %4305 = vmatpush1.bf16.msra.mxu1 %v5832_v50  ;;  %v5930_v49 = vld [vmem:[%s7796_s1 + $0x1104] ss:$16 sps:$4 sm:$0xff]   ;;  %v5933_v50 = vld [vmem:[%s7796_s1 + $0x110c] ss:$16 sps:$4 sm:$0xff]  }
 0x1e4   :  { %3919 = vmatprep.subr.bf16.mxu0 %v5837_v51  ;;  %4306 = vmatprep.subr.bf16.mxu1 %v5840_v52  ;;  %v5928_v51 = vld [vmem:[%s7796_s1 + $0x1100] ss:$16 sps:$4 sm:$0xff]   ;;  %v5931_v52 = vld [vmem:[%s7796_s1 + $0x1108] ss:$16 sps:$4 sm:$0xff]  }
 0x1e7   :  { %3920 = vmatpush1.bf16.msra.mxu0 %v5835_v53  ;;  %4307 = vmatpush1.bf16.msra.mxu1 %v5838_v54  ;;  %v5936_v53 = vld [vmem:[%s7796_s1 + $0x1124] ss:$16 sps:$4 sm:$0xff]   ;;  %v5939_v54 = vld [vmem:[%s7796_s1 + $0x112c] ss:$16 sps:$4 sm:$0xff]  }
 0x1e8   :  { %3921 = vmatprep.subr.bf16.mxu0 %v5843_v55  ;;  %4308 = vmatprep.subr.bf16.mxu1 %v5846_v56  ;;  %v5934_v55 = vld [vmem:[%s7796_s1 + $0x1120] ss:$16 sps:$4 sm:$0xff]   ;;  %v5937_v56 = vld [vmem:[%s7796_s1 + $0x1128] ss:$16 sps:$4 sm:$0xff]  }
 0x1eb   :  { %3922 = vmatpush1.bf16.msra.mxu0 %v5841_v57  ;;  %4309 = vmatpush1.bf16.msra.mxu1 %v5844_v58  ;;  %v5942_v57 = vld [vmem:[%s7796_s1 + $0x1144] ss:$16 sps:$4 sm:$0xff]   ;;  %v5945_v58 = vld [vmem:[%s7796_s1 + $0x114c] ss:$16 sps:$4 sm:$0xff]  }
 0x1ec   :  { %3923 = vmatprep.subr.bf16.mxu0 %v5849_v59  ;;  %4310 = vmatprep.subr.bf16.mxu1 %v5852_v60  ;;  %v5940_v59 = vld [vmem:[%s7796_s1 + $0x1140] ss:$16 sps:$4 sm:$0xff]   ;;  %v5943_v60 = vld [vmem:[%s7796_s1 + $0x1148] ss:$16 sps:$4 sm:$0xff]  }
 0x1ef   :  { %3924 = vmatpush1.bf16.msra.mxu0 %v5847_v61  ;;  %4311 = vmatpush1.bf16.msra.mxu1 %v5850_v62  ;;  %v5948_v61 = vld [vmem:[%s7796_s1 + $0x1164] ss:$16 sps:$4 sm:$0xff]   ;;  %v5951_v62 = vld [vmem:[%s7796_s1 + $0x116c] ss:$16 sps:$4 sm:$0xff]  }
 0x1f0   :  { %3925 = vmatprep.subr.bf16.mxu0 %v5855_v63  ;;  %4312 = vmatprep.subr.bf16.mxu1 %v5858_v0  ;;  %v5946_v63 = vld [vmem:[%s7796_s1 + $0x1160] ss:$16 sps:$4 sm:$0xff]   ;;  %v5949_v0 = vld [vmem:[%s7796_s1 + $0x1168] ss:$16 sps:$4 sm:$0xff]  }
 0x1f3   :  { %3926 = vmatpush1.bf16.msra.mxu0 %v5853_v1  ;;  %4313 = vmatpush1.bf16.msra.mxu1 %v5856_v2  ;;  %v5954_v1 = vld [vmem:[%s7796_s1 + $0x1184] ss:$16 sps:$4 sm:$0xff]   ;;  %v5957_v2 = vld [vmem:[%s7796_s1 + $0x118c] ss:$16 sps:$4 sm:$0xff]  }
 0x1f4   :  { %3927 = vmatprep.subr.bf16.mxu0 %v5861_v3  ;;  %4314 = vmatprep.subr.bf16.mxu1 %v5864_v4  ;;  %v5952_v3 = vld [vmem:[%s7796_s1 + $0x1180] ss:$16 sps:$4 sm:$0xff]   ;;  %v5955_v4 = vld [vmem:[%s7796_s1 + $0x1188] ss:$16 sps:$4 sm:$0xff]  }
 0x1f7   :  { %3928 = vmatpush1.bf16.msra.mxu0 %v5859_v5  ;;  %4315 = vmatpush1.bf16.msra.mxu1 %v5862_v6  ;;  %v5960_v5 = vld [vmem:[%s7796_s1 + $0x11a4] ss:$16 sps:$4 sm:$0xff]   ;;  %v5963_v6 = vld [vmem:[%s7796_s1 + $0x11ac] ss:$16 sps:$4 sm:$0xff]  }
 0x1f8   :  { %3929 = vmatprep.subr.bf16.mxu0 %v5867_v7  ;;  %4316 = vmatprep.subr.bf16.mxu1 %v5870_v8  ;;  %v5958_v7 = vld [vmem:[%s7796_s1 + $0x11a0] ss:$16 sps:$4 sm:$0xff]   ;;  %v5961_v8 = vld [vmem:[%s7796_s1 + $0x11a8] ss:$16 sps:$4 sm:$0xff]  }
 0x1fb   :  { %3930 = vmatpush1.bf16.msra.mxu0 %v5865_v9  ;;  %4317 = vmatpush1.bf16.msra.mxu1 %v5868_v10  ;;  %v5966_v9 = vld [vmem:[%s7796_s1 + $0x11c4] ss:$16 sps:$4 sm:$0xff]   ;;  %v5969_v10 = vld [vmem:[%s7796_s1 + $0x11cc] ss:$16 sps:$4 sm:$0xff]  }
 0x1fc   :  { %3931 = vmatprep.subr.bf16.mxu0 %v5873_v11  ;;  %4318 = vmatprep.subr.bf16.mxu1 %v5876_v12  ;;  %v5964_v11 = vld [vmem:[%s7796_s1 + $0x11c0] ss:$16 sps:$4 sm:$0xff]   ;;  %v5967_v12 = vld [vmem:[%s7796_s1 + $0x11c8] ss:$16 sps:$4 sm:$0xff]  }
 0x1ff   :  { %3932 = vmatpush1.bf16.msra.mxu0 %v5871_v13  ;;  %4319 = vmatpush1.bf16.msra.mxu1 %v5874_v14  ;;  %v5972_v13 = vld [vmem:[%s7796_s1 + $0x11e4] ss:$16 sps:$4 sm:$0xff]   ;;  %v5975_v14 = vld [vmem:[%s7796_s1 + $0x11ec] ss:$16 sps:$4 sm:$0xff]  }
 0x200   :  { %3944 = vmatprep.subr.bf16.mxu0 %v5882_v15  ;;  %4331 = vmatprep.subr.bf16.mxu1 %v5885_v16  ;;  %v5970_v15 = vld [vmem:[%s7796_s1 + $0x11e0] ss:$16 sps:$4 sm:$0xff]   ;;  %v5973_v16 = vld [vmem:[%s7796_s1 + $0x11e8] ss:$16 sps:$4 sm:$0xff]  }
 0x202   :  { %3934 = vmatmul.mubr.bf16.vlgmr.msra.gmra.mrb[0].mxu0 %v5877_v17  ;;  %4321 = vmatmul.mubr.bf16.vlgmr.msra.gmra.mrb[0].mxu1 %v5877_v17  ;;  %v5976_v17 = vld [vmem:[%s7797_s0 + $0x40] ss:$72 sps:$4 sm:$0xff]  }
 0x203   :  { %3945 = vmatpush1.bf16.msra.mxu0 %v5880_v18  ;;  %4332 = vmatpush1.bf16.msra.mxu1 %v5883_v19  ;;  %v610_v18 = vlaneseq }
 0x204   :  { %3946 = vmatprep.subr.bf16.mxu0 %v5888_v20  ;;  %4333 = vmatprep.subr.bf16.mxu1 %v5891_v21 }
 0x205   :  { %3976 = vmatprep.mubr.bf16.mxu0 %v5978_v22  ;;  %4363 = vmatprep.mubr.bf16.mxu1 %v5978_v22  ;;  %v611_v19 = vshrl.u32 %v610_v18, 7  ;;  %v608_v22 = vld [vmem:[%s7798_s2] sm:$0xf] }
 0x207   :  { %3947 = vmatpush1.bf16.msra.mxu0 %v5886_v23  ;;  %4334 = vmatpush1.bf16.msra.mxu1 %v5889_v24  ;;  %v612_v20 = vsub.s32 0, %v611_v19  ;;  %v620_v21 = vsub.s32 2, %v611_v19  ;;  %v616_v23 = vsub.s32 1, %v611_v19  ;;  %v624_v24 = vsub.s32 3, %v611_v19 }
 0x208   :  { %3948 = vmatprep.subr.bf16.mxu0 %v5894_v25  ;;  %4335 = vmatprep.subr.bf16.mxu1 %v5897_v26 }
 0x209   :  { %v613_v25 = vrot.slane %v608_v22, %v612_v20  ;;  %v621_v26 = vrot.slane %v608_v22, %v620_v21 }
 0x20b   :  { %3949 = vmatpush1.bf16.msra.mxu0 %v5892_v27  ;;  %4336 = vmatpush1.bf16.msra.mxu1 %v5895_v28  ;;  %v617_v27 = vrot.slane %v608_v22, %v616_v23  ;;  %v625_v28 = vrot.slane %v608_v22, %v624_v24 }
 0x20c   :  { %3950 = vmatprep.subr.bf16.mxu0 %v5900_v29  ;;  %4337 = vmatprep.subr.bf16.mxu1 %v5903_v30 }
 0x20f   :  { %3951 = vmatpush1.bf16.msra.mxu0 %v5898_v31  ;;  %4338 = vmatpush1.bf16.msra.mxu1 %v5901_v32 }
 0x210   :  { %3952 = vmatprep.subr.bf16.mxu0 %v5906_v33  ;;  %4339 = vmatprep.subr.bf16.mxu1 %v5909_v34 }
 0x213   :  { %3953 = vmatpush1.bf16.msra.mxu0 %v5904_v35  ;;  %4340 = vmatpush1.bf16.msra.mxu1 %v5907_v36 }
 0x214   :  { %3954 = vmatprep.subr.bf16.mxu0 %v5912_v37  ;;  %4341 = vmatprep.subr.bf16.mxu1 %v5915_v38 }
 0x217   :  { %3955 = vmatpush1.bf16.msra.mxu0 %v5910_v39  ;;  %4342 = vmatpush1.bf16.msra.mxu1 %v5913_v40 }
 0x218   :  { %3956 = vmatprep.subr.bf16.mxu0 %v5918_v41  ;;  %4343 = vmatprep.subr.bf16.mxu1 %v5921_v42 }
 0x21b   :  { %3957 = vmatpush1.bf16.msra.mxu0 %v5916_v43  ;;  %4344 = vmatpush1.bf16.msra.mxu1 %v5919_v44 }
 0x21c   :  { %3958 = vmatprep.subr.bf16.mxu0 %v5924_v45  ;;  %4345 = vmatprep.subr.bf16.mxu1 %v5927_v46 }
 0x21f   :  { %3959 = vmatpush1.bf16.msra.mxu0 %v5922_v47  ;;  %4346 = vmatpush1.bf16.msra.mxu1 %v5925_v48 }
 0x220   :  { %3960 = vmatprep.subr.bf16.mxu0 %v5930_v49  ;;  %4347 = vmatprep.subr.bf16.mxu1 %v5933_v50 }
 0x223   :  { %3961 = vmatpush1.bf16.msra.mxu0 %v5928_v51  ;;  %4348 = vmatpush1.bf16.msra.mxu1 %v5931_v52 }
 0x224   :  { %3962 = vmatprep.subr.bf16.mxu0 %v5936_v53  ;;  %4349 = vmatprep.subr.bf16.mxu1 %v5939_v54 }
 0x227   :  { %3963 = vmatpush1.bf16.msra.mxu0 %v5934_v55  ;;  %4350 = vmatpush1.bf16.msra.mxu1 %v5937_v56 }
 0x228   :  { %3964 = vmatprep.subr.bf16.mxu0 %v5942_v57  ;;  %4351 = vmatprep.subr.bf16.mxu1 %v5945_v58 }
 0x22b   :  { %3965 = vmatpush1.bf16.msra.mxu0 %v5940_v59  ;;  %4352 = vmatpush1.bf16.msra.mxu1 %v5943_v60 }
 0x22c   :  { %3966 = vmatprep.subr.bf16.mxu0 %v5948_v61  ;;  %4353 = vmatprep.subr.bf16.mxu1 %v5951_v62 }
 0x22f   :  { %3967 = vmatpush1.bf16.msra.mxu0 %v5946_v63  ;;  %4354 = vmatpush1.bf16.msra.mxu1 %v5949_v0 }
 0x230   :  { %3968 = vmatprep.subr.bf16.mxu0 %v5954_v1  ;;  %4355 = vmatprep.subr.bf16.mxu1 %v5957_v2 }
 0x233   :  { %3969 = vmatpush1.bf16.msra.mxu0 %v5952_v3  ;;  %4356 = vmatpush1.bf16.msra.mxu1 %v5955_v4 }
 0x234   :  { %3970 = vmatprep.subr.bf16.mxu0 %v5960_v5  ;;  %4357 = vmatprep.subr.bf16.mxu1 %v5963_v6 }
 0x237   :  { %3971 = vmatpush1.bf16.msra.mxu0 %v5958_v7  ;;  %4358 = vmatpush1.bf16.msra.mxu1 %v5961_v8 }
 0x238   :  { %3972 = vmatprep.subr.bf16.mxu0 %v5966_v9  ;;  %4359 = vmatprep.subr.bf16.mxu1 %v5969_v10 }
 0x23b   :  { %3973 = vmatpush1.bf16.msra.mxu0 %v5964_v11  ;;  %4360 = vmatpush1.bf16.msra.mxu1 %v5967_v12 }
 0x23c   :  { %3974 = vmatprep.subr.bf16.mxu0 %v5972_v13  ;;  %4361 = vmatprep.subr.bf16.mxu1 %v5975_v14 }
 0x23f   :  { %3975 = vmatpush1.bf16.msra.mxu0 %v5970_v15  ;;  %4362 = vmatpush1.bf16.msra.mxu1 %v5973_v16 }
 0x242   :  { %3977 = vmatmul.mubr.bf16.vlgmr.msra.gmra.mrb[0].mxu0 %v5976_v17  ;;  %4364 = vmatmul.mubr.bf16.vlgmr.msra.gmra.mrb[0].mxu1 %v5976_v17 }
 0x315   :  { %v3978_v29 = vpop.f32.mrb[0].mxu0  ;;  %v4365_v30 = vpop.f32.mrb[0].mxu1 }
 0x316   :  { %v5016_v31 = vadd.f32 %v3978_v29, %v613_v25  ;;  %v5020_v32 = vadd.f32 %v4365_v30, %v621_v26  ;;  %v3980_v33 = vpop.f32.mrb[1].mxu0  ;;  %v4367_v34 = vpop.f32.mrb[1].mxu1 }
 0x317   :  { %v5017_v35 = vadd.f32 %v3980_v33, %v617_v27  ;;  %v5021_v36 = vadd.f32 %v4367_v34, %v625_v28  ;;  %v3982_v37 = vpop.f32.mrb[2].mxu0  ;;  %v4369_v38 = vpop.f32.mrb[2].mxu1 }
 0x318   :  { %v4374_v39 = vmax.f32 %v5016_v31, 0.0  ;;  %v4376_v40 = vmax.f32 %v5020_v32, 0.0  ;;  %v5018_v41 = vadd.f32 %v3982_v37, %v613_v25  ;;  %v5022_v42 = vadd.f32 %v4369_v38, %v621_v26  ;;  %v3984_v43 = vpop.f32.mrb[3].mxu0  ;;  %v4371_v44 = vpop.f32.mrb[3].mxu1 }
 0x319   :  { %v4375_v45 = vmax.f32 %v5017_v35, 0.0  ;;  %v4377_v46 = vmax.f32 %v5021_v36, 0.0  ;;  %v5019_v47 = vadd.f32 %v3984_v43, %v617_v27  ;;  %v5023_v48 = vadd.f32 %v4371_v44, %v625_v28 }
 0x31a   :  { %v4378_v49 = vmax.f32 %v5018_v41, 0.0  ;;  %v4380_v50 = vmax.f32 %v5022_v42, 0.0 }
 0x31b   :  { %v5012_v51 = vpack.c.bf16 %v4375_v45, %v4374_v39  ;;  %v5013_v52 = vpack.c.bf16 %v4377_v46, %v4376_v40  ;;  %v4379_v53 = vmax.f32 %v5019_v47, 0.0  ;;  %v4381_v54 = vmax.f32 %v5023_v48, 0.0 }
 0x31d   :  { %4406 = vst [vmem:[%s7799_s3] sm:$0xff] %v5012_v51  ;;  %4407 = vst [vmem:[%s7799_s3 + $0x8] sm:$0xff] %v5013_v52  ;;  %v5014_v55 = vpack.c.bf16 %v4379_v53, %v4378_v49  ;;  %v5015_v56 = vpack.c.bf16 %v4381_v54, %v4380_v50 }
 0x31f   :  { %4408 = vst [vmem:[%s7799_s3 + $0x10] sm:$0xff] %v5014_v55  ;;  %4409 = vst [vmem:[%s7799_s3 + $0x18] sm:$0xff] %v5015_v56 }

// kernel: resnet_forward.25
= control target key start
LH: loop header
LB: loop body
LE: loop exit
PB: predicated region body
PF: predicated region fallthrough
CT: control target
= control target key end

     0   :  { %v47_v24 = vlaneseq  ;;  %vm375_vm0 = vcmask 1041409   ;;  %vm378_vm1 = vcmask 1042434   ;;  %vm381_vm2 = vcmask 1043459   ;;  %s1080_s1 = inlined_call_operand.vmem [shape: bf16[512,128], index: 1, kind: input, shape index: {}]   ;;  %s1081_s0 = inlined_call_operand.vmem [shape: bf16[8,1,512], index: 0, kind: input, shape index: {}]   ;;  %s1082_s2 = inlined_call_operand.vmem [shape: f32[1,128], index: 2, kind: input, shape index: {}]   ;;  %s1083_s3 = inlined_call_operand.vmem [shape: f32[8,128], index: 3, kind: output, shape index: {}]  }
   0x1   :  { %v818_v0 = vld [vmem:[%s1080_s1 + $0x40] sm:$0xff]   ;;  %v822_v4 = vld [vmem:[%s1080_s1 + $0x48] sm:$0xff]   ;;  %v826_v8 = vld [vmem:[%s1080_s1 + $0x50] sm:$0xff]   ;;  %vm384_vm3 = vcmask 1044484   ;;  %vm387_vm4 = vcmask 1045509   ;;  %vm390_vm5 = vcmask 1046534  }
   0x2   :  { %v819_v1 = vld [vmem:[%s1080_s1 + $0xc0] sm:$0xff]   ;;  %774 = vmatprep.subr.bf16.mxu0 %v818_v0  ;;  %v823_v5 = vld [vmem:[%s1080_s1 + $0xc8] sm:$0xff]   ;;  %v827_v9 = vld [vmem:[%s1080_s1 + $0xd0] sm:$0xff]   ;;  %v48_v29 = vshrl.u32 %v47_v24, 7  ;;  %vm393_vm6 = vcmask 1047559  }
   0x3   :  { %v820_v2 = vld [vmem:[%s1080_s1] sm:$0xff]   ;;  %796 = vmatprep.subr.bf16.mxu1 %v819_v1  ;;  %v824_v6 = vld [vmem:[%s1080_s1 + $0x8] sm:$0xff]   ;;  %v828_v10 = vld [vmem:[%s1080_s1 + $0x10] sm:$0xff]  }
   0x4   :  { %v821_v3 = vld [vmem:[%s1080_s1 + $0x80] sm:$0xff]   ;;  %775 = vmatpush3.bf16.msra.mxu0 %v820_v2  ;;  %v825_v7 = vld [vmem:[%s1080_s1 + $0x88] sm:$0xff]   ;;  %v829_v11 = vld [vmem:[%s1080_s1 + $0x90] sm:$0xff]   ;;  %v53_v34 = vsub.s32 2, %v48_v29  ;;  %v61_v38 = vsub.s32 6, %v48_v29  ;;  %v975_v39 = vsub.s32 0, %v48_v29 }
   0x5   :  { %797 = vmatpush3.bf16.msra.mxu1 %v821_v3  ;;  %776 = vmatprep.subr.bf16.mxu0 %v822_v4  ;;  %v830_v12 = vld [vmem:[%s1080_s1 + $0x58] sm:$0xff]   ;;  %v834_v16 = vld [vmem:[%s1080_s1 + $0x60] sm:$0xff]   ;;  %v838_v20 = vld [vmem:[%s1080_s1 + $0x68] sm:$0xff]   ;;  %v977_v40 = vsub.s32 4, %v48_v29 }
   0x6   :  { %798 = vmatprep.subr.bf16.mxu1 %v823_v5  ;;  %v831_v13 = vld [vmem:[%s1080_s1 + $0xd8] sm:$0xff]   ;;  %v835_v17 = vld [vmem:[%s1080_s1 + $0xe0] sm:$0xff]   ;;  %v839_v21 = vld [vmem:[%s1080_s1 + $0xe8] sm:$0xff]  }
   0x7   :  { %v832_v14 = vld [vmem:[%s1080_s1 + $0x18] sm:$0xff]   ;;  %v836_v18 = vld [vmem:[%s1080_s1 + $0x20] sm:$0xff]   ;;  %v840_v22 = vld [vmem:[%s1080_s1 + $0x28] sm:$0xff]  }
   0x8   :  { %777 = vmatpush3.bf16.msra.mxu0 %v824_v6  ;;  %v833_v15 = vld [vmem:[%s1080_s1 + $0x98] sm:$0xff]   ;;  %v837_v19 = vld [vmem:[%s1080_s1 + $0xa0] sm:$0xff]   ;;  %v841_v23 = vld [vmem:[%s1080_s1 + $0xa8] sm:$0xff]  }
   0x9   :  { %799 = vmatpush3.bf16.msra.mxu1 %v825_v7  ;;  %778 = vmatprep.subr.bf16.mxu0 %v826_v8  ;;  %v842_v25 = vld [vmem:[%s1080_s1 + $0x70] sm:$0xff]   ;;  %v846_v30 = vld [vmem:[%s1080_s1 + $0x78] sm:$0xff]   ;;  %v756_v35 = vld [vmem:[%s1081_s0] sm:$0xff]  }
   0xa   :  { %800 = vmatprep.subr.bf16.mxu1 %v827_v9  ;;  %v843_v26 = vld [vmem:[%s1080_s1 + $0xf0] sm:$0xff]   ;;  %v847_v31 = vld [vmem:[%s1080_s1 + $0xf8] sm:$0xff]   ;;  %v771_v36 = vld [vmem:[%s1081_s0 + $0x8] sm:$0xff]   ;;  %v979_v41 = vunpack.c.l.bf16 %v756_v35  ;;  %v981_v42 = vunpack.c.h.bf16 %v756_v35 }
   0xb   :  { %v844_v27 = vld [vmem:[%s1080_s1 + $0x30] sm:$0xff]   ;;  %v848_v32 = vld [vmem:[%s1080_s1 + $0x38] sm:$0xff]   ;;  %v983_v43 = vunpack.c.l.bf16 %v771_v36  ;;  %v985_v44 = vunpack.c.h.bf16 %v771_v36 }
   0xc   :  { %779 = vmatpush3.bf16.msra.mxu0 %v828_v10  ;;  %v845_v28 = vld [vmem:[%s1080_s1 + $0xb0] sm:$0xff]   ;;  %v849_v33 = vld [vmem:[%s1080_s1 + $0xb8] sm:$0xff]   ;;  %v54_v50 = vrot.slane %v979_v41, %v53_v34  ;;  %v70_v51 = vrot.slane %v981_v42, %v53_v34 }
   0xd   :  { %801 = vmatpush3.bf16.msra.mxu1 %v829_v11  ;;  %780 = vmatprep.subr.bf16.mxu0 %v830_v12  ;;  %v772_v37 = vld [vmem:[%s1081_s0 + $0x10] sm:$0xff]   ;;  %v773_v45 = vld [vmem:[%s1081_s0 + $0x18] sm:$0xff]   ;;  %v86_v52 = vrot.slane %v983_v43, %v53_v34  ;;  %v102_v53 = vrot.slane %v985_v44, %v53_v34 }
   0xe   :  { %802 = vmatprep.subr.bf16.mxu1 %v831_v13  ;;  %v990_v46 = vunpack.c.l.bf16 %v772_v37  ;;  %v992_v47 = vunpack.c.h.bf16 %v772_v37  ;;  %v994_v48 = vunpack.c.l.bf16 %v773_v45  ;;  %v996_v49 = vunpack.c.h.bf16 %v773_v45 }
   0xf   :  { %v208_v58 = vpack.c.bf16 %v54_v50, %v54_v50  ;;  %v212_v59 = vpack.c.bf16 %v70_v51, %v70_v51  ;;  %v216_v60 = vpack.c.bf16 %v86_v52, %v86_v52  ;;  %v220_v61 = vpack.c.bf16 %v102_v53, %v102_v53 }
  0x10   :  { %781 = vmatpush3.bf16.msra.mxu0 %v832_v14  ;;  %v118_v54 = vrot.slane %v990_v46, %v53_v34  ;;  %v134_v55 = vrot.slane %v992_v47, %v53_v34  ;;  %v150_v56 = vrot.slane %v994_v48, %v53_v34  ;;  %v166_v57 = vrot.slane %v996_v49, %v53_v34 }
  0x11   :  { %803 = vmatpush3.bf16.msra.mxu1 %v833_v15  ;;  %782 = vmatprep.subr.bf16.mxu0 %v834_v16  ;;  %v343_v2 = vunpack.c.l.b16 %v208_v58  ;;  %v347_v3 = vunpack.c.l.b16 %v212_v59  ;;  %v351_v4 = vunpack.c.l.b16 %v216_v60  ;;  %v355_v5 = vunpack.c.l.b16 %v220_v61 }
  0x12   :  { %804 = vmatprep.subr.bf16.mxu1 %v835_v17  ;;  %v224_v62 = vpack.c.bf16 %v118_v54, %v118_v54  ;;  %v228_v63 = vpack.c.bf16 %v134_v55, %v134_v55  ;;  %v232_v0 = vpack.c.bf16 %v150_v56, %v150_v56  ;;  %v236_v1 = vpack.c.bf16 %v166_v57, %v166_v57 }
  0x13   :  { %v395_v10 = vrot.slane %v347_v3, 7  ;;  %v397_v11 = vrot.slane %v351_v4, 6  ;;  %v399_v12 = vrot.slane %v355_v5, 5  ;;  %v62_v13 = vrot.slane %v979_v41, %v61_v38 }
  0x14   :  { %783 = vmatpush3.bf16.msra.mxu0 %v836_v18  ;;  %v359_v6 = vunpack.c.l.b16 %v224_v62  ;;  %v363_v7 = vunpack.c.l.b16 %v228_v63  ;;  %v367_v8 = vunpack.c.l.b16 %v232_v0  ;;  %v371_v9 = vunpack.c.l.b16 %v236_v1 }
  0x15   :  { %805 = vmatpush3.bf16.msra.mxu1 %v837_v19  ;;  %784 = vmatprep.subr.bf16.mxu0 %v838_v20  ;;  %v396_v18 = vsel %vm375_vm0, %v395_v10, %v343_v2  ;;  %v78_v19 = vrot.slane %v981_v42, %v61_v38  ;;  %v94_v20 = vrot.slane %v983_v43, %v61_v38 }
  0x16   :  { %806 = vmatprep.subr.bf16.mxu1 %v839_v21  ;;  %v401_v14 = vrot.slane %v359_v6, 4  ;;  %v403_v15 = vrot.slane %v363_v7, 3  ;;  %v405_v16 = vrot.slane %v367_v8, 2  ;;  %v407_v17 = vrot.slane %v371_v9, 1 }
  0x17   :  { %v110_v21 = vrot.slane %v985_v44, %v61_v38  ;;  %v142_v24 = vrot.slane %v992_v47, %v61_v38  ;;  %v214_v29 = vpack.c.bf16 %v78_v19, %v78_v19  ;;  %v50_v3 = vrot.slane %v979_v41, %v975_v39 }
  0x18   :  { %785 = vmatpush3.bf16.msra.mxu0 %v840_v22  ;;  %v398_v22 = vsel %vm378_vm1, %v397_v11, %v396_v18  ;;  %v66_v5 = vrot.slane %v981_v42, %v975_v39  ;;  %v82_v6 = vrot.slane %v983_v43, %v975_v39  ;;  %v98_v7 = vrot.slane %v985_v44, %v975_v39 }
  0x19   :  { %807 = vmatpush3.bf16.msra.mxu1 %v841_v23  ;;  %786 = vmatprep.subr.bf16.mxu0 %v842_v25  ;;  %v126_v23 = vrot.slane %v990_v46, %v61_v38  ;;  %v158_v25 = vrot.slane %v994_v48, %v61_v38  ;;  %v230_v35 = vpack.c.bf16 %v142_v24, %v142_v24  ;;  %v349_v51 = vunpack.c.l.b16 %v214_v29 }
  0x1a   :  { %808 = vmatprep.subr.bf16.mxu1 %v843_v26  ;;  %v400_v26 = vsel %vm381_vm2, %v399_v12, %v398_v22  ;;  %v114_v9 = vrot.slane %v990_v46, %v975_v39  ;;  %v130_v10 = vrot.slane %v992_v47, %v975_v39  ;;  %v146_v11 = vrot.slane %v994_v48, %v975_v39 }
  0x1b   :  { %v234_v36 = vpack.c.bf16 %v158_v25, %v158_v25  ;;  %v365_v55 = vunpack.c.l.b16 %v230_v35  ;;  %v423_v59 = vrot.slane %v349_v51, 7  ;;  %v219_v18 = vpack.c.bf16 %v98_v7, %v98_v7 }
  0x1c   :  { %787 = vmatpush3.bf16.msra.mxu0 %v844_v27  ;;  %v174_v27 = vrot.slane %v996_v49, %v61_v38  ;;  %v223_v19 = vpack.c.bf16 %v114_v9, %v114_v9  ;;  %v231_v22 = vpack.c.bf16 %v146_v11, %v146_v11 }
  0x1d   :  { %809 = vmatpush3.bf16.msra.mxu1 %v845_v28  ;;  %788 = vmatprep.subr.bf16.mxu0 %v846_v30  ;;  %v210_v28 = vpack.c.bf16 %v62_v13, %v62_v13  ;;  %v402_v30 = vsel %vm384_vm3, %v401_v14, %v400_v26  ;;  %v369_v57 = vunpack.c.l.b16 %v234_v36  ;;  %v431_v63 = vrot.slane %v365_v55, 3 }
  0x1e   :  { %810 = vmatprep.subr.bf16.mxu1 %v847_v31  ;;  %v218_v31 = vpack.c.bf16 %v94_v20, %v94_v20  ;;  %v404_v34 = vsel %vm387_vm4, %v403_v15, %v402_v30  ;;  %v238_v37 = vpack.c.bf16 %v174_v27, %v174_v27  ;;  %v162_v13 = vrot.slane %v996_v49, %v975_v39 }
  0x1f   :  { %v406_v45 = vsel %vm390_vm5, %v405_v16, %v404_v34  ;;  %v345_v50 = vunpack.c.l.b16 %v210_v28  ;;  %v433_v1 = vrot.slane %v369_v57, 2  ;;  %v207_v14 = vpack.c.bf16 %v50_v3, %v50_v3 }
  0x20   :  { %789 = vmatpush3.bf16.msra.mxu0 %v848_v32  ;;  %v222_v32 = vpack.c.bf16 %v110_v21, %v110_v21  ;;  %v353_v52 = vunpack.c.l.b16 %v218_v31  ;;  %v408_v53 = vsel %vm393_vm6, %v407_v17, %v406_v45  ;;  %v373_v58 = vunpack.c.l.b16 %v238_v37 }
  0x21   :  { %811 = vmatpush3.bf16.msra.mxu1 %v849_v33  ;;  %v226_v33 = vpack.c.bf16 %v126_v23, %v126_v23  ;;  %v438_v56 = vpack.c.b16 %v408_v53, %v408_v53  ;;  %v424_v0 = vsel %vm375_vm0, %v423_v59, %v345_v50  ;;  %v211_v15 = vpack.c.bf16 %v66_v5, %v66_v5 }
  0x22   :  { %v357_v38 = vunpack.c.l.b16 %v222_v32  ;;  %v425_v60 = vrot.slane %v353_v52, 6  ;;  %v435_v2 = vrot.slane %v373_v58, 1  ;;  %v215_v17 = vpack.c.bf16 %v82_v6, %v82_v6 }
  0x23   :  { %v361_v54 = vunpack.c.l.b16 %v226_v33  ;;  %669 = vmatprep.mubr.bf16.mxu0 %v438_v56  ;;  %v227_v21 = vpack.c.bf16 %v130_v10, %v130_v10  ;;  %v235_v23 = vpack.c.bf16 %v162_v13, %v162_v13  ;;  %v342_v25 = vunpack.c.l.b16 %v207_v14 }
  0x24   :  { %v427_v61 = vrot.slane %v357_v38, 5  ;;  %v426_v4 = vsel %vm378_vm1, %v425_v60, %v424_v0  ;;  %v346_v26 = vunpack.c.l.b16 %v211_v15  ;;  %v350_v27 = vunpack.c.l.b16 %v215_v17 }
  0x25   :  { %v429_v62 = vrot.slane %v361_v54, 4  ;;  %v354_v29 = vunpack.c.l.b16 %v219_v18  ;;  %v358_v39 = vunpack.c.l.b16 %v223_v19  ;;  %v362_v30 = vunpack.c.l.b16 %v227_v21 }
  0x26   :  { %v428_v8 = vsel %vm381_vm2, %v427_v61, %v426_v4  ;;  %v366_v31 = vunpack.c.l.b16 %v231_v22  ;;  %v370_v32 = vunpack.c.l.b16 %v235_v23  ;;  %v374_v33 = vrot.slane %v346_v26, 7 }
  0x27   :  { %v430_v12 = vsel %vm384_vm3, %v429_v62, %v428_v8  ;;  %v377_v34 = vrot.slane %v350_v27, 6  ;;  %v380_v35 = vrot.slane %v354_v29, 5  ;;  %v383_v36 = vrot.slane %v358_v39, 4  ;;  %v722_v29 = vld [vmem:[%s1082_s2] ss:$0 sm:$0xff] }
  0x28   :  { %v432_v16 = vsel %vm387_vm4, %v431_v63, %v430_v12  ;;  %v386_v37 = vrot.slane %v362_v30, 3  ;;  %v58_v45 = vrot.slane %v979_v41, %v977_v40  ;;  %v376_v50 = vsel %vm375_vm0, %v374_v33, %v342_v25 }
  0x29   :  { %v434_v20 = vsel %vm390_vm5, %v433_v1, %v432_v16  ;;  %v389_v51 = vrot.slane %v366_v31, 2  ;;  %v392_v52 = vrot.slane %v370_v32, 1  ;;  %v74_v53 = vrot.slane %v981_v42, %v977_v40 }
  0x2a   :  { %v436_v24 = vsel %vm393_vm6, %v435_v2, %v434_v20  ;;  %v379_v38 = vsel %vm378_vm1, %v377_v34, %v376_v50  ;;  %v90_v54 = vrot.slane %v983_v43, %v977_v40  ;;  %v106_v55 = vrot.slane %v985_v44, %v977_v40 }
  0x2b   :  { %v440_v28 = vpack.c.b16 %v436_v24, %v436_v24  ;;  %v122_v56 = vrot.slane %v990_v46, %v977_v40  ;;  %v382_v41 = vsel %vm381_vm2, %v380_v35, %v379_v38  ;;  %v138_v57 = vrot.slane %v992_v47, %v977_v40 }
  0x2c   :  { %v154_v58 = vrot.slane %v994_v48, %v977_v40  ;;  %v170_v42 = vrot.slane %v996_v49, %v977_v40  ;;  %v385_v59 = vsel %vm384_vm3, %v383_v36, %v382_v41  ;;  %v209_v43 = vpack.c.bf16 %v58_v45, %v58_v45 }
  0x2d   :  { %709 = vmatprep.mubr.bf16.mxu1 %v440_v28  ;;  %v213_v60 = vpack.c.bf16 %v74_v53, %v74_v53  ;;  %v217_v61 = vpack.c.bf16 %v90_v54, %v90_v54  ;;  %v388_v44 = vsel %vm387_vm4, %v386_v37, %v385_v59  ;;  %v221_v62 = vpack.c.bf16 %v106_v55, %v106_v55 }
  0x2e   :  { %v225_v46 = vpack.c.bf16 %v122_v56, %v122_v56  ;;  %v229_v63 = vpack.c.bf16 %v138_v57, %v138_v57  ;;  %v391_v0 = vsel %vm390_vm5, %v389_v51, %v388_v44  ;;  %v233_v1 = vpack.c.bf16 %v154_v58, %v154_v58 }
  0x2f   :  { %v237_v47 = vpack.c.bf16 %v170_v42, %v170_v42  ;;  %v344_v2 = vunpack.c.l.b16 %v209_v43  ;;  %v394_v48 = vsel %vm393_vm6, %v392_v52, %v391_v0  ;;  %v348_v3 = vunpack.c.l.b16 %v213_v60 }
  0x30   :  { %v352_v4 = vunpack.c.l.b16 %v217_v61  ;;  %v356_v40 = vunpack.c.l.b16 %v221_v62  ;;  %v437_v49 = vpack.c.b16 %v394_v48, %v394_v48  ;;  %v360_v5 = vunpack.c.l.b16 %v225_v46 }
  0x31   :  { %v364_v6 = vunpack.c.l.b16 %v229_v63  ;;  %v368_v7 = vunpack.c.l.b16 %v233_v1  ;;  %v372_v8 = vunpack.c.l.b16 %v237_v47  ;;  %v409_v9 = vrot.slane %v348_v3, 7 }
  0x32   :  { %v411_v10 = vrot.slane %v352_v4, 6  ;;  %v413_v11 = vrot.slane %v356_v40, 5  ;;  %670 = vmatmul.mubr.bf16.vlgmr.msra.gmra.mrb[0].mxu0 %v437_v49  ;;  %v415_v12 = vrot.slane %v360_v5, 4 }
  0x33   :  { %v410_v13 = vsel %vm375_vm0, %v409_v9, %v344_v2  ;;  %v417_v14 = vrot.slane %v364_v6, 3  ;;  %v419_v16 = vrot.slane %v368_v7, 2  ;;  %v421_v18 = vrot.slane %v372_v8, 1 }
  0x34   :  { %v412_v15 = vsel %vm378_vm1, %v411_v10, %v410_v13 }
  0x35   :  { %v414_v17 = vsel %vm381_vm2, %v413_v11, %v412_v15 }
  0x36   :  { %v416_v19 = vsel %vm384_vm3, %v415_v12, %v414_v17 }
  0x37   :  { %v418_v20 = vsel %vm387_vm4, %v417_v14, %v416_v19 }
  0x38   :  { %v420_v21 = vsel %vm390_vm5, %v419_v16, %v418_v20 }
  0x39   :  { %v422_v22 = vsel %vm393_vm6, %v421_v18, %v420_v21 }
  0x3a   :  { %v439_v23 = vpack.c.b16 %v422_v22, %v422_v22 }
  0x3c   :  { %710 = vmatmul.mubr.bf16.vlgmr.msra.gmra.mrb[0].mxu1 %v439_v23 }
 0x105   :  { %v790_v24 = vpop.f32.mrb[0].mxu0 }
 0x106   :  { %v791_v25 = vpop.f32.mrb[1].mxu0 }
 0x107   :  { %v792_v26 = vadd.f32 %v791_v25, %v790_v24  ;;  %v793_v27 = vpop.f32.mrb[2].mxu0 }
 0x108   :  { %v794_v28 = vpop.f32.mrb[3].mxu0 }
 0x109   :  { %v672_v30 = vadd.f32 %v792_v26, %v722_v29 }
 0x10f   :  { %v812_v39 = vpop.f32.mrb[0].mxu1 }
 0x110   :  { %v813_v31 = vpop.f32.mrb[1].mxu1 }
 0x111   :  { %v814_v32 = vadd.f32 %v813_v31, %v812_v39  ;;  %v815_v33 = vpop.f32.mrb[2].mxu1 }
 0x112   :  { %v816_v34 = vpop.f32.mrb[3].mxu1 }
 0x113   :  { %v712_v35 = vadd.f32 %v814_v32, %v672_v30 }
 0x115   :  { %717 = vst [vmem:[%s1083_s3] sm:$0xff] %v712_v35 }

// kernel: resnet_forward.24
= control target key start
LH: loop header
LB: loop body
LE: loop exit
PB: predicated region body
PF: predicated region fallthrough
CT: control target
= control target key end

     0   :  { %s15513_s1 = inlined_call_operand.vmem [shape: bf16[4608,512], index: 1, kind: input, shape index: {}]   ;;  %s15514_s0 = inlined_call_operand.vmem [shape: bf16[16,4608], index: 0, kind: input, shape index: {}]   ;;  %s15515_s2 = inlined_call_operand.vmem [shape: f32[1,512], index: 2, kind: input, shape index: {}]   ;;  %s15516_s3 = inlined_call_operand.vmem [shape: bf16[16,512], index: 3, kind: input, shape index: {}]   ;;  %s15517_s4 = inlined_call_operand.vmem [shape: bf16[16,512], index: 4, kind: output, shape index: {}]  }
   0x1   :  { %v10115_v0 = vld [vmem:[%s15513_s1 + $0x4] ss:$16 sps:$4 sm:$0xff]   ;;  %v10117_v1 = vld [vmem:[%s15513_s1 + $0xc] ss:$16 sps:$4 sm:$0xff]   ;;  %v10119_v2 = vld [vmem:[%s15513_s1] ss:$16 sps:$4 sm:$0xff]  }
   0x2   :  { %7167 = vmatprep.subr.bf16.mxu0 %v10115_v0  ;;  %v10120_v3 = vld [vmem:[%s15513_s1 + $0x8] ss:$16 sps:$4 sm:$0xff]   ;;  %7941 = vmatprep.subr.bf16.mxu1 %v10117_v1  ;;  %v10121_v4 = vld [vmem:[%s15513_s1 + $0x24] ss:$16 sps:$4 sm:$0xff]   ;;  %v10123_v5 = vld [vmem:[%s15513_s1 + $0x2c] ss:$16 sps:$4 sm:$0xff]  }
   0x3   :  { %7168 = vmatpush1.bf16.msra.mxu0 %v10119_v2  ;;  %7942 = vmatpush1.bf16.msra.mxu1 %v10120_v3  ;;  %v10125_v6 = vld [vmem:[%s15513_s1 + $0x20] ss:$16 sps:$4 sm:$0xff]   ;;  %v10126_v7 = vld [vmem:[%s15513_s1 + $0x28] ss:$16 sps:$4 sm:$0xff]   ;;  %v10127_v8 = vld [vmem:[%s15513_s1 + $0x44] ss:$16 sps:$4 sm:$0xff]  }
   0x4   :  { %7169 = vmatprep.subr.bf16.mxu0 %v10121_v4  ;;  %7943 = vmatprep.subr.bf16.mxu1 %v10123_v5  ;;  %v10129_v9 = vld [vmem:[%s15513_s1 + $0x4c] ss:$16 sps:$4 sm:$0xff]   ;;  %v10131_v10 = vld [vmem:[%s15513_s1 + $0x40] ss:$16 sps:$4 sm:$0xff]   ;;  %v10132_v11 = vld [vmem:[%s15513_s1 + $0x48] ss:$16 sps:$4 sm:$0xff]  }
   0x5   :  { %v10133_v12 = vld [vmem:[%s15513_s1 + $0x64] ss:$16 sps:$4 sm:$0xff]   ;;  %v10135_v13 = vld [vmem:[%s15513_s1 + $0x6c] ss:$16 sps:$4 sm:$0xff]   ;;  %v10137_v14 = vld [vmem:[%s15513_s1 + $0x60] ss:$16 sps:$4 sm:$0xff]  }
   0x6   :  { %v10138_v15 = vld [vmem:[%s15513_s1 + $0x68] ss:$16 sps:$4 sm:$0xff]   ;;  %v10139_v16 = vld [vmem:[%s15513_s1 + $0x84] ss:$16 sps:$4 sm:$0xff]   ;;  %v10141_v17 = vld [vmem:[%s15513_s1 + $0x8c] ss:$16 sps:$4 sm:$0xff]  }
   0x7   :  { %7170 = vmatpush1.bf16.msra.mxu0 %v10125_v6  ;;  %7944 = vmatpush1.bf16.msra.mxu1 %v10126_v7  ;;  %v10143_v18 = vld [vmem:[%s15513_s1 + $0x80] ss:$16 sps:$4 sm:$0xff]   ;;  %v10144_v19 = vld [vmem:[%s15513_s1 + $0x88] ss:$16 sps:$4 sm:$0xff]   ;;  %v10145_v20 = vld [vmem:[%s15513_s1 + $0xa4] ss:$16 sps:$4 sm:$0xff]  }
   0x8   :  { %7171 = vmatprep.subr.bf16.mxu0 %v10127_v8  ;;  %7945 = vmatprep.subr.bf16.mxu1 %v10129_v9  ;;  %v10147_v21 = vld [vmem:[%s15513_s1 + $0xac] ss:$16 sps:$4 sm:$0xff]   ;;  %v10149_v22 = vld [vmem:[%s15513_s1 + $0xa0] ss:$16 sps:$4 sm:$0xff]   ;;  %v10150_v23 = vld [vmem:[%s15513_s1 + $0xa8] ss:$16 sps:$4 sm:$0xff]  }
   0x9   :  { %v10151_v24 = vld [vmem:[%s15513_s1 + $0xc4] ss:$16 sps:$4 sm:$0xff]   ;;  %v10153_v25 = vld [vmem:[%s15513_s1 + $0xcc] ss:$16 sps:$4 sm:$0xff]   ;;  %v10155_v26 = vld [vmem:[%s15513_s1 + $0xc0] ss:$16 sps:$4 sm:$0xff]  }
   0xa   :  { %v10156_v27 = vld [vmem:[%s15513_s1 + $0xc8] ss:$16 sps:$4 sm:$0xff]   ;;  %v10157_v28 = vld [vmem:[%s15513_s1 + $0xe4] ss:$16 sps:$4 sm:$0xff]   ;;  %v10159_v29 = vld [vmem:[%s15513_s1 + $0xec] ss:$16 sps:$4 sm:$0xff]  }
   0xb   :  { %7172 = vmatpush1.bf16.msra.mxu0 %v10131_v10  ;;  %7946 = vmatpush1.bf16.msra.mxu1 %v10132_v11  ;;  %v10161_v30 = vld [vmem:[%s15513_s1 + $0xe0] ss:$16 sps:$4 sm:$0xff]   ;;  %v10162_v31 = vld [vmem:[%s15513_s1 + $0xe8] ss:$16 sps:$4 sm:$0xff]   ;;  %v10163_v32 = vld [vmem:[%s15513_s1 + $0x104] ss:$16 sps:$4 sm:$0xff]  }
   0xc   :  { %7173 = vmatprep.subr.bf16.mxu0 %v10133_v12  ;;  %7947 = vmatprep.subr.bf16.mxu1 %v10135_v13  ;;  %v10165_v33 = vld [vmem:[%s15513_s1 + $0x10c] ss:$16 sps:$4 sm:$0xff]   ;;  %v10167_v34 = vld [vmem:[%s15513_s1 + $0x100] ss:$16 sps:$4 sm:$0xff]   ;;  %v10168_v35 = vld [vmem:[%s15513_s1 + $0x108] ss:$16 sps:$4 sm:$0xff]  }
   0xd   :  { %v10169_v36 = vld [vmem:[%s15513_s1 + $0x124] ss:$16 sps:$4 sm:$0xff]   ;;  %v10171_v37 = vld [vmem:[%s15513_s1 + $0x12c] ss:$16 sps:$4 sm:$0xff]   ;;  %v10173_v38 = vld [vmem:[%s15513_s1 + $0x120] ss:$16 sps:$4 sm:$0xff]  }
   0xe   :  { %v10174_v39 = vld [vmem:[%s15513_s1 + $0x128] ss:$16 sps:$4 sm:$0xff]   ;;  %v10175_v40 = vld [vmem:[%s15513_s1 + $0x144] ss:$16 sps:$4 sm:$0xff]   ;;  %v10177_v41 = vld [vmem:[%s15513_s1 + $0x14c] ss:$16 sps:$4 sm:$0xff]  }
   0xf   :  { %7174 = vmatpush1.bf16.msra.mxu0 %v10137_v14  ;;  %7948 = vmatpush1.bf16.msra.mxu1 %v10138_v15  ;;  %v10179_v42 = vld [vmem:[%s15513_s1 + $0x140] ss:$16 sps:$4 sm:$0xff]   ;;  %v10180_v43 = vld [vmem:[%s15513_s1 + $0x148] ss:$16 sps:$4 sm:$0xff]   ;;  %v10181_v44 = vld [vmem:[%s15513_s1 + $0x164] ss:$16 sps:$4 sm:$0xff]  }
  0x10   :  { %7175 = vmatprep.subr.bf16.mxu0 %v10139_v16  ;;  %7949 = vmatprep.subr.bf16.mxu1 %v10141_v17  ;;  %v10183_v45 = vld [vmem:[%s15513_s1 + $0x16c] ss:$16 sps:$4 sm:$0xff]   ;;  %v10185_v46 = vld [vmem:[%s15513_s1 + $0x160] ss:$16 sps:$4 sm:$0xff]   ;;  %v10186_v47 = vld [vmem:[%s15513_s1 + $0x168] ss:$16 sps:$4 sm:$0xff]  }
  0x11   :  { %v10213_v48 = vld [vmem:[%s15514_s0 + $0x4] ss:$144 sps:$4 sm:$0xff]   ;;  %v10189_v50 = vld [vmem:[%s15513_s1 + $0x18c] ss:$16 sps:$4 sm:$0xff]   ;;  %v10191_v51 = vld [vmem:[%s15513_s1 + $0x180] ss:$16 sps:$4 sm:$0xff]  }
  0x12   :  { %v10187_v49 = vld [vmem:[%s15513_s1 + $0x184] ss:$16 sps:$4 sm:$0xff]   ;;  %7199 = vmatprep.mubr.bf16.mxu0 %v10213_v48  ;;  %7973 = vmatprep.mubr.bf16.mxu1 %v10213_v48  ;;  %v10192_v52 = vld [vmem:[%s15513_s1 + $0x188] ss:$16 sps:$4 sm:$0xff]   ;;  %v10195_v54 = vld [vmem:[%s15513_s1 + $0x1ac] ss:$16 sps:$4 sm:$0xff]  }
  0x13   :  { %7176 = vmatpush1.bf16.msra.mxu0 %v10143_v18  ;;  %7950 = vmatpush1.bf16.msra.mxu1 %v10144_v19  ;;  %v10193_v53 = vld [vmem:[%s15513_s1 + $0x1a4] ss:$16 sps:$4 sm:$0xff]   ;;  %v10197_v55 = vld [vmem:[%s15513_s1 + $0x1a0] ss:$16 sps:$4 sm:$0xff]   ;;  %v10198_v56 = vld [vmem:[%s15513_s1 + $0x1a8] ss:$16 sps:$4 sm:$0xff]  }
  0x14   :  { %7177 = vmatprep.subr.bf16.mxu0 %v10145_v20  ;;  %7951 = vmatprep.subr.bf16.mxu1 %v10147_v21  ;;  %v10199_v57 = vld [vmem:[%s15513_s1 + $0x1c4] ss:$16 sps:$4 sm:$0xff]   ;;  %v10201_v58 = vld [vmem:[%s15513_s1 + $0x1cc] ss:$16 sps:$4 sm:$0xff]   ;;  %v10203_v59 = vld [vmem:[%s15513_s1 + $0x1c0] ss:$16 sps:$4 sm:$0xff]  }
  0x15   :  { %v10204_v60 = vld [vmem:[%s15513_s1 + $0x1c8] ss:$16 sps:$4 sm:$0xff]   ;;  %v10205_v61 = vld [vmem:[%s15513_s1 + $0x1e4] ss:$16 sps:$4 sm:$0xff]   ;;  %v10207_v62 = vld [vmem:[%s15513_s1 + $0x1ec] ss:$16 sps:$4 sm:$0xff]  }
  0x16   :  { %v10209_v63 = vld [vmem:[%s15513_s1 + $0x1e0] ss:$16 sps:$4 sm:$0xff]   ;;  %v10210_v0 = vld [vmem:[%s15513_s1 + $0x1e8] ss:$16 sps:$4 sm:$0xff]   ;;  %v10216_v1 = vld [vmem:[%s15513_s1 + $0x204] ss:$16 sps:$4 sm:$0xff]  }
  0x17   :  { %7178 = vmatpush1.bf16.msra.mxu0 %v10149_v22  ;;  %7952 = vmatpush1.bf16.msra.mxu1 %v10150_v23  ;;  %v10219_v2 = vld [vmem:[%s15513_s1 + $0x20c] ss:$16 sps:$4 sm:$0xff]   ;;  %v10211_v3 = vld [vmem:[%s15514_s0] ss:$144 sps:$4 sm:$0xff]   ;;  %v10217_v5 = vld [vmem:[%s15513_s1 + $0x208] ss:$16 sps:$4 sm:$0xff]  }
  0x18   :  { %7179 = vmatprep.subr.bf16.mxu0 %v10151_v24  ;;  %7953 = vmatprep.subr.bf16.mxu1 %v10153_v25  ;;  %v10214_v4 = vld [vmem:[%s15513_s1 + $0x200] ss:$16 sps:$4 sm:$0xff]   ;;  %v10222_v6 = vld [vmem:[%s15513_s1 + $0x224] ss:$16 sps:$4 sm:$0xff]   ;;  %v10225_v7 = vld [vmem:[%s15513_s1 + $0x22c] ss:$16 sps:$4 sm:$0xff]  }
  0x19   :  { %v10220_v8 = vld [vmem:[%s15513_s1 + $0x220] ss:$16 sps:$4 sm:$0xff]   ;;  %v10223_v9 = vld [vmem:[%s15513_s1 + $0x228] ss:$16 sps:$4 sm:$0xff]   ;;  %v10228_v10 = vld [vmem:[%s15513_s1 + $0x244] ss:$16 sps:$4 sm:$0xff]  }
  0x1a   :  { %v10231_v11 = vld [vmem:[%s15513_s1 + $0x24c] ss:$16 sps:$4 sm:$0xff]   ;;  %v10226_v12 = vld [vmem:[%s15513_s1 + $0x240] ss:$16 sps:$4 sm:$0xff]   ;;  %v10229_v13 = vld [vmem:[%s15513_s1 + $0x248] ss:$16 sps:$4 sm:$0xff]  }
  0x1b   :  { %7180 = vmatpush1.bf16.msra.mxu0 %v10155_v26  ;;  %7954 = vmatpush1.bf16.msra.mxu1 %v10156_v27  ;;  %v10234_v14 = vld [vmem:[%s15513_s1 + $0x264] ss:$16 sps:$4 sm:$0xff]   ;;  %v10237_v15 = vld [vmem:[%s15513_s1 + $0x26c] ss:$16 sps:$4 sm:$0xff]   ;;  %v10232_v16 = vld [vmem:[%s15513_s1 + $0x260] ss:$16 sps:$4 sm:$0xff]  }
  0x1c   :  { %7181 = vmatprep.subr.bf16.mxu0 %v10157_v28  ;;  %7955 = vmatprep.subr.bf16.mxu1 %v10159_v29  ;;  %v10235_v17 = vld [vmem:[%s15513_s1 + $0x268] ss:$16 sps:$4 sm:$0xff]   ;;  %v10240_v18 = vld [vmem:[%s15513_s1 + $0x284] ss:$16 sps:$4 sm:$0xff]   ;;  %v10243_v19 = vld [vmem:[%s15513_s1 + $0x28c] ss:$16 sps:$4 sm:$0xff]  }
  0x1d   :  { %v10238_v20 = vld [vmem:[%s15513_s1 + $0x280] ss:$16 sps:$4 sm:$0xff]   ;;  %v10241_v21 = vld [vmem:[%s15513_s1 + $0x288] ss:$16 sps:$4 sm:$0xff]   ;;  %v10246_v22 = vld [vmem:[%s15513_s1 + $0x2a4] ss:$16 sps:$4 sm:$0xff]  }
  0x1e   :  { %v10249_v23 = vld [vmem:[%s15513_s1 + $0x2ac] ss:$16 sps:$4 sm:$0xff]   ;;  %v10244_v24 = vld [vmem:[%s15513_s1 + $0x2a0] ss:$16 sps:$4 sm:$0xff]   ;;  %v10247_v25 = vld [vmem:[%s15513_s1 + $0x2a8] ss:$16 sps:$4 sm:$0xff]  }
  0x1f   :  { %7182 = vmatpush1.bf16.msra.mxu0 %v10161_v30  ;;  %7956 = vmatpush1.bf16.msra.mxu1 %v10162_v31  ;;  %v10252_v26 = vld [vmem:[%s15513_s1 + $0x2c4] ss:$16 sps:$4 sm:$0xff]   ;;  %v10255_v27 = vld [vmem:[%s15513_s1 + $0x2cc] ss:$16 sps:$4 sm:$0xff]   ;;  %v10250_v28 = vld [vmem:[%s15513_s1 + $0x2c0] ss:$16 sps:$4 sm:$0xff]  }
  0x20   :  { %7183 = vmatprep.subr.bf16.mxu0 %v10163_v32  ;;  %7957 = vmatprep.subr.bf16.mxu1 %v10165_v33  ;;  %v10253_v29 = vld [vmem:[%s15513_s1 + $0x2c8] ss:$16 sps:$4 sm:$0xff]   ;;  %v10312_v30 = vld [vmem:[%s15514_s0 + $0xc] ss:$144 sps:$4 sm:$0xff]   ;;  %v10258_v31 = vld [vmem:[%s15513_s1 + $0x2e4] ss:$16 sps:$4 sm:$0xff]  }
  0x21   :  { %v10261_v32 = vld [vmem:[%s15513_s1 + $0x2ec] ss:$16 sps:$4 sm:$0xff]   ;;  %v10256_v33 = vld [vmem:[%s15513_s1 + $0x2e0] ss:$16 sps:$4 sm:$0xff]  }
  0x22   :  { %v10285_v48 = vld [vmem:[%s15513_s1 + $0x36c] ss:$16 sps:$4 sm:$0xff]  }
  0x23   :  { %7184 = vmatpush1.bf16.msra.mxu0 %v10167_v34  ;;  %7958 = vmatpush1.bf16.msra.mxu1 %v10168_v35  ;;  %v10259_v34 = vld [vmem:[%s15513_s1 + $0x2e8] ss:$16 sps:$4 sm:$0xff]   ;;  %v10264_v35 = vld [vmem:[%s15513_s1 + $0x304] ss:$16 sps:$4 sm:$0xff]  }
  0x24   :  { %7185 = vmatprep.subr.bf16.mxu0 %v10169_v36  ;;  %7959 = vmatprep.subr.bf16.mxu1 %v10171_v37  ;;  %v10267_v36 = vld [vmem:[%s15513_s1 + $0x30c] ss:$16 sps:$4 sm:$0xff]   ;;  %v10262_v37 = vld [vmem:[%s15513_s1 + $0x300] ss:$16 sps:$4 sm:$0xff]  }
  0x27   :  { %7186 = vmatpush1.bf16.msra.mxu0 %v10173_v38  ;;  %7960 = vmatpush1.bf16.msra.mxu1 %v10174_v39  ;;  %v10265_v38 = vld [vmem:[%s15513_s1 + $0x308] ss:$16 sps:$4 sm:$0xff]   ;;  %v10270_v39 = vld [vmem:[%s15513_s1 + $0x324] ss:$16 sps:$4 sm:$0xff]  }
  0x28   :  { %7187 = vmatprep.subr.bf16.mxu0 %v10175_v40  ;;  %7961 = vmatprep.subr.bf16.mxu1 %v10177_v41  ;;  %v10273_v40 = vld [vmem:[%s15513_s1 + $0x32c] ss:$16 sps:$4 sm:$0xff]   ;;  %v10268_v41 = vld [vmem:[%s15513_s1 + $0x320] ss:$16 sps:$4 sm:$0xff]  }
  0x2b   :  { %7188 = vmatpush1.bf16.msra.mxu0 %v10179_v42  ;;  %7962 = vmatpush1.bf16.msra.mxu1 %v10180_v43  ;;  %v10271_v42 = vld [vmem:[%s15513_s1 + $0x328] ss:$16 sps:$4 sm:$0xff]   ;;  %v10276_v43 = vld [vmem:[%s15513_s1 + $0x344] ss:$16 sps:$4 sm:$0xff]  }
  0x2c   :  { %7189 = vmatprep.subr.bf16.mxu0 %v10181_v44  ;;  %7963 = vmatprep.subr.bf16.mxu1 %v10183_v45  ;;  %v10279_v44 = vld [vmem:[%s15513_s1 + $0x34c] ss:$16 sps:$4 sm:$0xff]   ;;  %v10274_v45 = vld [vmem:[%s15513_s1 + $0x340] ss:$16 sps:$4 sm:$0xff]  }
  0x2f   :  { %7190 = vmatpush1.bf16.msra.mxu0 %v10185_v46  ;;  %7964 = vmatpush1.bf16.msra.mxu1 %v10186_v47  ;;  %v10277_v46 = vld [vmem:[%s15513_s1 + $0x348] ss:$16 sps:$4 sm:$0xff]   ;;  %v10282_v47 = vld [vmem:[%s15513_s1 + $0x364] ss:$16 sps:$4 sm:$0xff]  }
  0x30   :  { %7191 = vmatprep.subr.bf16.mxu0 %v10187_v49  ;;  %7965 = vmatprep.subr.bf16.mxu1 %v10189_v50  ;;  %v10280_v49 = vld [vmem:[%s15513_s1 + $0x360] ss:$16 sps:$4 sm:$0xff]   ;;  %v10283_v50 = vld [vmem:[%s15513_s1 + $0x368] ss:$16 sps:$4 sm:$0xff]  }
  0x33   :  { %7192 = vmatpush1.bf16.msra.mxu0 %v10191_v51  ;;  %7966 = vmatpush1.bf16.msra.mxu1 %v10192_v52  ;;  %v10288_v51 = vld [vmem:[%s15513_s1 + $0x384] ss:$16 sps:$4 sm:$0xff]   ;;  %v10291_v52 = vld [vmem:[%s15513_s1 + $0x38c] ss:$16 sps:$4 sm:$0xff]  }
  0x34   :  { %7193 = vmatprep.subr.bf16.mxu0 %v10193_v53  ;;  %7967 = vmatprep.subr.bf16.mxu1 %v10195_v54  ;;  %v10286_v53 = vld [vmem:[%s15513_s1 + $0x380] ss:$16 sps:$4 sm:$0xff]   ;;  %v10289_v54 = vld [vmem:[%s15513_s1 + $0x388] ss:$16 sps:$4 sm:$0xff]  }
  0x37   :  { %7194 = vmatpush1.bf16.msra.mxu0 %v10197_v55  ;;  %7968 = vmatpush1.bf16.msra.mxu1 %v10198_v56  ;;  %v10294_v55 = vld [vmem:[%s15513_s1 + $0x3a4] ss:$16 sps:$4 sm:$0xff]   ;;  %v10297_v56 = vld [vmem:[%s15513_s1 + $0x3ac] ss:$16 sps:$4 sm:$0xff]  }
  0x38   :  { %7195 = vmatprep.subr.bf16.mxu0 %v10199_v57  ;;  %7969 = vmatprep.subr.bf16.mxu1 %v10201_v58  ;;  %v10292_v57 = vld [vmem:[%s15513_s1 + $0x3a0] ss:$16 sps:$4 sm:$0xff]   ;;  %v10295_v58 = vld [vmem:[%s15513_s1 + $0x3a8] ss:$16 sps:$4 sm:$0xff]  }
  0x3b   :  { %7196 = vmatpush1.bf16.msra.mxu0 %v10203_v59  ;;  %7970 = vmatpush1.bf16.msra.mxu1 %v10204_v60  ;;  %v10300_v59 = vld [vmem:[%s15513_s1 + $0x3c4] ss:$16 sps:$4 sm:$0xff]   ;;  %v10303_v60 = vld [vmem:[%s15513_s1 + $0x3cc] ss:$16 sps:$4 sm:$0xff]  }
  0x3c   :  { %7197 = vmatprep.subr.bf16.mxu0 %v10205_v61  ;;  %7971 = vmatprep.subr.bf16.mxu1 %v10207_v62  ;;  %v10298_v61 = vld [vmem:[%s15513_s1 + $0x3c0] ss:$16 sps:$4 sm:$0xff]   ;;  %v10301_v62 = vld [vmem:[%s15513_s1 + $0x3c8] ss:$16 sps:$4 sm:$0xff]  }
  0x3f   :  { %7198 = vmatpush1.bf16.msra.mxu0 %v10209_v63  ;;  %7972 = vmatpush1.bf16.msra.mxu1 %v10210_v0  ;;  %v10306_v63 = vld [vmem:[%s15513_s1 + $0x3e4] ss:$16 sps:$4 sm:$0xff]   ;;  %v10309_v0 = vld [vmem:[%s15513_s1 + $0x3ec] ss:$16 sps:$4 sm:$0xff]  }
  0x40   :  { %7210 = vmatprep.subr.bf16.mxu0 %v10216_v1  ;;  %7984 = vmatprep.subr.bf16.mxu1 %v10219_v2  ;;  %v10304_v1 = vld [vmem:[%s15513_s1 + $0x3e0] ss:$16 sps:$4 sm:$0xff]   ;;  %v10307_v2 = vld [vmem:[%s15513_s1 + $0x3e8] ss:$16 sps:$4 sm:$0xff]  }
  0x42   :  { %7200 = vmatmul.mubr.bf16.vlgmr.msra.gmra.mrb[0].mxu0 %v10211_v3  ;;  %7974 = vmatmul.mubr.bf16.vlgmr.msra.gmra.mrb[0].mxu1 %v10211_v3  ;;  %v10315_v3 = vld [vmem:[%s15513_s1 + $0x404] ss:$16 sps:$4 sm:$0xff]  }
  0x43   :  { %7211 = vmatpush1.bf16.msra.mxu0 %v10214_v4  ;;  %7985 = vmatpush1.bf16.msra.mxu1 %v10217_v5  ;;  %v10318_v4 = vld [vmem:[%s15513_s1 + $0x40c] ss:$16 sps:$4 sm:$0xff]   ;;  %v10310_v5 = vld [vmem:[%s15514_s0 + $0x8] ss:$144 sps:$4 sm:$0xff]  }
  0x44   :  { %7212 = vmatprep.subr.bf16.mxu0 %v10222_v6  ;;  %7986 = vmatprep.subr.bf16.mxu1 %v10225_v7  ;;  %v10313_v6 = vld [vmem:[%s15513_s1 + $0x400] ss:$16 sps:$4 sm:$0xff]   ;;  %v10316_v7 = vld [vmem:[%s15513_s1 + $0x408] ss:$16 sps:$4 sm:$0xff]  }
  0x45   :  { %7242 = vmatprep.mubr.bf16.mxu0 %v10312_v30  ;;  %8016 = vmatprep.mubr.bf16.mxu1 %v10312_v30  ;;  %v10354_v30 = vld [vmem:[%s15513_s1 + $0x4cc] ss:$16 sps:$4 sm:$0xff]  }
  0x47   :  { %7213 = vmatpush1.bf16.msra.mxu0 %v10220_v8  ;;  %7987 = vmatpush1.bf16.msra.mxu1 %v10223_v9  ;;  %v10321_v8 = vld [vmem:[%s15513_s1 + $0x424] ss:$16 sps:$4 sm:$0xff]   ;;  %v10324_v9 = vld [vmem:[%s15513_s1 + $0x42c] ss:$16 sps:$4 sm:$0xff]  }
  0x48   :  { %7214 = vmatprep.subr.bf16.mxu0 %v10228_v10  ;;  %7988 = vmatprep.subr.bf16.mxu1 %v10231_v11  ;;  %v10319_v10 = vld [vmem:[%s15513_s1 + $0x420] ss:$16 sps:$4 sm:$0xff]   ;;  %v10322_v11 = vld [vmem:[%s15513_s1 + $0x428] ss:$16 sps:$4 sm:$0xff]  }
  0x4b   :  { %7215 = vmatpush1.bf16.msra.mxu0 %v10226_v12  ;;  %7989 = vmatpush1.bf16.msra.mxu1 %v10229_v13  ;;  %v10411_v12 = vld [vmem:[%s15514_s0 + $0x14] ss:$144 sps:$4 sm:$0xff]  }
  0x4c   :  { %7216 = vmatprep.subr.bf16.mxu0 %v10234_v14  ;;  %7990 = vmatprep.subr.bf16.mxu1 %v10237_v15  ;;  %v10327_v13 = vld [vmem:[%s15513_s1 + $0x444] ss:$16 sps:$4 sm:$0xff]   ;;  %v10330_v14 = vld [vmem:[%s15513_s1 + $0x44c] ss:$16 sps:$4 sm:$0xff]   ;;  %v10325_v15 = vld [vmem:[%s15513_s1 + $0x440] ss:$16 sps:$4 sm:$0xff]  }
  0x4f   :  { %7217 = vmatpush1.bf16.msra.mxu0 %v10232_v16  ;;  %7991 = vmatpush1.bf16.msra.mxu1 %v10235_v17  ;;  %v10328_v16 = vld [vmem:[%s15513_s1 + $0x448] ss:$16 sps:$4 sm:$0xff]   ;;  %v10333_v17 = vld [vmem:[%s15513_s1 + $0x464] ss:$16 sps:$4 sm:$0xff]  }
  0x50   :  { %7218 = vmatprep.subr.bf16.mxu0 %v10240_v18  ;;  %7992 = vmatprep.subr.bf16.mxu1 %v10243_v19  ;;  %v10336_v18 = vld [vmem:[%s15513_s1 + $0x46c] ss:$16 sps:$4 sm:$0xff]   ;;  %v10331_v19 = vld [vmem:[%s15513_s1 + $0x460] ss:$16 sps:$4 sm:$0xff]  }
  0x53   :  { %7219 = vmatpush1.bf16.msra.mxu0 %v10238_v20  ;;  %7993 = vmatpush1.bf16.msra.mxu1 %v10241_v21  ;;  %v10334_v20 = vld [vmem:[%s15513_s1 + $0x468] ss:$16 sps:$4 sm:$0xff]   ;;  %v10339_v21 = vld [vmem:[%s15513_s1 + $0x484] ss:$16 sps:$4 sm:$0xff]  }
  0x54   :  { %7220 = vmatprep.subr.bf16.mxu0 %v10246_v22  ;;  %7994 = vmatprep.subr.bf16.mxu1 %v10249_v23  ;;  %v10342_v22 = vld [vmem:[%s15513_s1 + $0x48c] ss:$16 sps:$4 sm:$0xff]   ;;  %v10337_v23 = vld [vmem:[%s15513_s1 + $0x480] ss:$16 sps:$4 sm:$0xff]  }
  0x57   :  { %7221 = vmatpush1.bf16.msra.mxu0 %v10244_v24  ;;  %7995 = vmatpush1.bf16.msra.mxu1 %v10247_v25  ;;  %v10340_v24 = vld [vmem:[%s15513_s1 + $0x488] ss:$16 sps:$4 sm:$0xff]   ;;  %v10345_v25 = vld [vmem:[%s15513_s1 + $0x4a4] ss:$16 sps:$4 sm:$0xff]  }
  0x58   :  { %7222 = vmatprep.subr.bf16.mxu0 %v10252_v26  ;;  %7996 = vmatprep.subr.bf16.mxu1 %v10255_v27  ;;  %v10348_v26 = vld [vmem:[%s15513_s1 + $0x4ac] ss:$16 sps:$4 sm:$0xff]   ;;  %v10343_v27 = vld [vmem:[%s15513_s1 + $0x4a0] ss:$16 sps:$4 sm:$0xff]  }
  0x5b   :  { %7223 = vmatpush1.bf16.msra.mxu0 %v10250_v28  ;;  %7997 = vmatpush1.bf16.msra.mxu1 %v10253_v29  ;;  %v10346_v28 = vld [vmem:[%s15513_s1 + $0x4a8] ss:$16 sps:$4 sm:$0xff]   ;;  %v10351_v29 = vld [vmem:[%s15513_s1 + $0x4c4] ss:$16 sps:$4 sm:$0xff]  }
  0x5c   :  { %7224 = vmatprep.subr.bf16.mxu0 %v10258_v31  ;;  %7998 = vmatprep.subr.bf16.mxu1 %v10261_v32  ;;  %v10349_v31 = vld [vmem:[%s15513_s1 + $0x4c0] ss:$16 sps:$4 sm:$0xff]   ;;  %v10352_v32 = vld [vmem:[%s15513_s1 + $0x4c8] ss:$16 sps:$4 sm:$0xff]  }
  0x5f   :  { %7225 = vmatpush1.bf16.msra.mxu0 %v10256_v33  ;;  %7999 = vmatpush1.bf16.msra.mxu1 %v10259_v34  ;;  %v10357_v33 = vld [vmem:[%s15513_s1 + $0x4e4] ss:$16 sps:$4 sm:$0xff]   ;;  %v10360_v34 = vld [vmem:[%s15513_s1 + $0x4ec] ss:$16 sps:$4 sm:$0xff]  }
  0x60   :  { %7226 = vmatprep.subr.bf16.mxu0 %v10264_v35  ;;  %8000 = vmatprep.subr.bf16.mxu1 %v10267_v36  ;;  %v10355_v35 = vld [vmem:[%s15513_s1 + $0x4e0] ss:$16 sps:$4 sm:$0xff]   ;;  %v10358_v36 = vld [vmem:[%s15513_s1 + $0x4e8] ss:$16 sps:$4 sm:$0xff]  }
  0x63   :  { %7227 = vmatpush1.bf16.msra.mxu0 %v10262_v37  ;;  %8001 = vmatpush1.bf16.msra.mxu1 %v10265_v38  ;;  %v10363_v37 = vld [vmem:[%s15513_s1 + $0x504] ss:$16 sps:$4 sm:$0xff]   ;;  %v10366_v38 = vld [vmem:[%s15513_s1 + $0x50c] ss:$16 sps:$4 sm:$0xff]  }
  0x64   :  { %7228 = vmatprep.subr.bf16.mxu0 %v10270_v39  ;;  %8002 = vmatprep.subr.bf16.mxu1 %v10273_v40  ;;  %v10361_v39 = vld [vmem:[%s15513_s1 + $0x500] ss:$16 sps:$4 sm:$0xff]   ;;  %v10364_v40 = vld [vmem:[%s15513_s1 + $0x508] ss:$16 sps:$4 sm:$0xff]  }
  0x67   :  { %7229 = vmatpush1.bf16.msra.mxu0 %v10268_v41  ;;  %8003 = vmatpush1.bf16.msra.mxu1 %v10271_v42  ;;  %v10369_v41 = vld [vmem:[%s15513_s1 + $0x524] ss:$16 sps:$4 sm:$0xff]   ;;  %v10372_v42 = vld [vmem:[%s15513_s1 + $0x52c] ss:$16 sps:$4 sm:$0xff]  }
  0x68   :  { %7230 = vmatprep.subr.bf16.mxu0 %v10276_v43  ;;  %8004 = vmatprep.subr.bf16.mxu1 %v10279_v44  ;;  %v10367_v43 = vld [vmem:[%s15513_s1 + $0x520] ss:$16 sps:$4 sm:$0xff]   ;;  %v10370_v44 = vld [vmem:[%s15513_s1 + $0x528] ss:$16 sps:$4 sm:$0xff]  }
  0x6b   :  { %7231 = vmatpush1.bf16.msra.mxu0 %v10274_v45  ;;  %8005 = vmatpush1.bf16.msra.mxu1 %v10277_v46  ;;  %v10375_v45 = vld [vmem:[%s15513_s1 + $0x544] ss:$16 sps:$4 sm:$0xff]   ;;  %v10378_v46 = vld [vmem:[%s15513_s1 + $0x54c] ss:$16 sps:$4 sm:$0xff]  }
  0x6c   :  { %7232 = vmatprep.subr.bf16.mxu0 %v10282_v47  ;;  %8006 = vmatprep.subr.bf16.mxu1 %v10285_v48  ;;  %v10373_v47 = vld [vmem:[%s15513_s1 + $0x540] ss:$16 sps:$4 sm:$0xff]   ;;  %v10376_v48 = vld [vmem:[%s15513_s1 + $0x548] ss:$16 sps:$4 sm:$0xff]  }
  0x6f   :  { %7233 = vmatpush1.bf16.msra.mxu0 %v10280_v49  ;;  %8007 = vmatpush1.bf16.msra.mxu1 %v10283_v50  ;;  %v10381_v49 = vld [vmem:[%s15513_s1 + $0x564] ss:$16 sps:$4 sm:$0xff]   ;;  %v10384_v50 = vld [vmem:[%s15513_s1 + $0x56c] ss:$16 sps:$4 sm:$0xff]  }
  0x70   :  { %7234 = vmatprep.subr.bf16.mxu0 %v10288_v51  ;;  %8008 = vmatprep.subr.bf16.mxu1 %v10291_v52  ;;  %v10379_v51 = vld [vmem:[%s15513_s1 + $0x560] ss:$16 sps:$4 sm:$0xff]   ;;  %v10382_v52 = vld [vmem:[%s15513_s1 + $0x568] ss:$16 sps:$4 sm:$0xff]  }
  0x73   :  { %7235 = vmatpush1.bf16.msra.mxu0 %v10286_v53  ;;  %8009 = vmatpush1.bf16.msra.mxu1 %v10289_v54  ;;  %v10387_v53 = vld [vmem:[%s15513_s1 + $0x584] ss:$16 sps:$4 sm:$0xff]   ;;  %v10390_v54 = vld [vmem:[%s15513_s1 + $0x58c] ss:$16 sps:$4 sm:$0xff]  }
  0x74   :  { %7236 = vmatprep.subr.bf16.mxu0 %v10294_v55  ;;  %8010 = vmatprep.subr.bf16.mxu1 %v10297_v56  ;;  %v10385_v55 = vld [vmem:[%s15513_s1 + $0x580] ss:$16 sps:$4 sm:$0xff]   ;;  %v10388_v56 = vld [vmem:[%s15513_s1 + $0x588] ss:$16 sps:$4 sm:$0xff]  }
  0x77   :  { %7237 = vmatpush1.bf16.msra.mxu0 %v10292_v57  ;;  %8011 = vmatpush1.bf16.msra.mxu1 %v10295_v58  ;;  %v10393_v57 = vld [vmem:[%s15513_s1 + $0x5a4] ss:$16 sps:$4 sm:$0xff]   ;;  %v10396_v58 = vld [vmem:[%s15513_s1 + $0x5ac] ss:$16 sps:$4 sm:$0xff]  }
  0x78   :  { %7238 = vmatprep.subr.bf16.mxu0 %v10300_v59  ;;  %8012 = vmatprep.subr.bf16.mxu1 %v10303_v60  ;;  %v10391_v59 = vld [vmem:[%s15513_s1 + $0x5a0] ss:$16 sps:$4 sm:$0xff]   ;;  %v10394_v60 = vld [vmem:[%s15513_s1 + $0x5a8] ss:$16 sps:$4 sm:$0xff]  }
  0x7b   :  { %7239 = vmatpush1.bf16.msra.mxu0 %v10298_v61  ;;  %8013 = vmatpush1.bf16.msra.mxu1 %v10301_v62  ;;  %v10399_v61 = vld [vmem:[%s15513_s1 + $0x5c4] ss:$16 sps:$4 sm:$0xff]   ;;  %v10402_v62 = vld [vmem:[%s15513_s1 + $0x5cc] ss:$16 sps:$4 sm:$0xff]  }
  0x7c   :  { %7240 = vmatprep.subr.bf16.mxu0 %v10306_v63  ;;  %8014 = vmatprep.subr.bf16.mxu1 %v10309_v0  ;;  %v10397_v63 = vld [vmem:[%s15513_s1 + $0x5c0] ss:$16 sps:$4 sm:$0xff]   ;;  %v10400_v0 = vld [vmem:[%s15513_s1 + $0x5c8] ss:$16 sps:$4 sm:$0xff]  }
  0x7f   :  { %7241 = vmatpush1.bf16.msra.mxu0 %v10304_v1  ;;  %8015 = vmatpush1.bf16.msra.mxu1 %v10307_v2  ;;  %v10405_v1 = vld [vmem:[%s15513_s1 + $0x5e4] ss:$16 sps:$4 sm:$0xff]   ;;  %v10408_v2 = vld [vmem:[%s15513_s1 + $0x5ec] ss:$16 sps:$4 sm:$0xff]  }
  0x80   :  { %7253 = vmatprep.subr.bf16.mxu0 %v10315_v3  ;;  %8027 = vmatprep.subr.bf16.mxu1 %v10318_v4  ;;  %v10403_v3 = vld [vmem:[%s15513_s1 + $0x5e0] ss:$16 sps:$4 sm:$0xff]   ;;  %v10406_v4 = vld [vmem:[%s15513_s1 + $0x5e8] ss:$16 sps:$4 sm:$0xff]  }
  0x82   :  { %7243 = vmatmul.mubr.bf16.vlgmr.msra.gmra.mrb[0].mxu0 %v10310_v5  ;;  %8017 = vmatmul.mubr.bf16.vlgmr.msra.gmra.mrb[0].mxu1 %v10310_v5  ;;  %v10414_v5 = vld [vmem:[%s15513_s1 + $0x604] ss:$16 sps:$4 sm:$0xff]  }
  0x83   :  { %7254 = vmatpush1.bf16.msra.mxu0 %v10313_v6  ;;  %8028 = vmatpush1.bf16.msra.mxu1 %v10316_v7  ;;  %v10417_v6 = vld [vmem:[%s15513_s1 + $0x60c] ss:$16 sps:$4 sm:$0xff]   ;;  %v10409_v7 = vld [vmem:[%s15514_s0 + $0x10] ss:$144 sps:$4 sm:$0xff]  }
  0x84   :  { %7255 = vmatprep.subr.bf16.mxu0 %v10321_v8  ;;  %8029 = vmatprep.subr.bf16.mxu1 %v10324_v9  ;;  %v10412_v8 = vld [vmem:[%s15513_s1 + $0x600] ss:$16 sps:$4 sm:$0xff]   ;;  %v10415_v9 = vld [vmem:[%s15513_s1 + $0x608] ss:$16 sps:$4 sm:$0xff]  }
  0x85   :  { %7285 = vmatprep.mubr.bf16.mxu0 %v10411_v12  ;;  %8059 = vmatprep.mubr.bf16.mxu1 %v10411_v12  ;;  %v10510_v12 = vld [vmem:[%s15514_s0 + $0x1c] ss:$144 sps:$4 sm:$0xff]  }
  0x87   :  { %7256 = vmatpush1.bf16.msra.mxu0 %v10319_v10  ;;  %8030 = vmatpush1.bf16.msra.mxu1 %v10322_v11  ;;  %v10420_v10 = vld [vmem:[%s15513_s1 + $0x624] ss:$16 sps:$4 sm:$0xff]   ;;  %v10423_v11 = vld [vmem:[%s15513_s1 + $0x62c] ss:$16 sps:$4 sm:$0xff]  }
  0x88   :  { %7257 = vmatprep.subr.bf16.mxu0 %v10327_v13  ;;  %8031 = vmatprep.subr.bf16.mxu1 %v10330_v14  ;;  %v10418_v13 = vld [vmem:[%s15513_s1 + $0x620] ss:$16 sps:$4 sm:$0xff]   ;;  %v10421_v14 = vld [vmem:[%s15513_s1 + $0x628] ss:$16 sps:$4 sm:$0xff]  }
  0x8b   :  { %7258 = vmatpush1.bf16.msra.mxu0 %v10325_v15  ;;  %8032 = vmatpush1.bf16.msra.mxu1 %v10328_v16  ;;  %v10426_v15 = vld [vmem:[%s15513_s1 + $0x644] ss:$16 sps:$4 sm:$0xff]   ;;  %v10429_v16 = vld [vmem:[%s15513_s1 + $0x64c] ss:$16 sps:$4 sm:$0xff]  }
  0x8c   :  { %7259 = vmatprep.subr.bf16.mxu0 %v10333_v17  ;;  %8033 = vmatprep.subr.bf16.mxu1 %v10336_v18  ;;  %v10424_v17 = vld [vmem:[%s15513_s1 + $0x640] ss:$16 sps:$4 sm:$0xff]   ;;  %v10427_v18 = vld [vmem:[%s15513_s1 + $0x648] ss:$16 sps:$4 sm:$0xff]  }
  0x8f   :  { %7260 = vmatpush1.bf16.msra.mxu0 %v10331_v19  ;;  %8034 = vmatpush1.bf16.msra.mxu1 %v10334_v20  ;;  %v10432_v19 = vld [vmem:[%s15513_s1 + $0x664] ss:$16 sps:$4 sm:$0xff]   ;;  %v10435_v20 = vld [vmem:[%s15513_s1 + $0x66c] ss:$16 sps:$4 sm:$0xff]  }
  0x90   :  { %7261 = vmatprep.subr.bf16.mxu0 %v10339_v21  ;;  %8035 = vmatprep.subr.bf16.mxu1 %v10342_v22  ;;  %v10430_v21 = vld [vmem:[%s15513_s1 + $0x660] ss:$16 sps:$4 sm:$0xff]   ;;  %v10433_v22 = vld [vmem:[%s15513_s1 + $0x668] ss:$16 sps:$4 sm:$0xff]  }
  0x93   :  { %7262 = vmatpush1.bf16.msra.mxu0 %v10337_v23  ;;  %8036 = vmatpush1.bf16.msra.mxu1 %v10340_v24  ;;  %v10438_v23 = vld [vmem:[%s15513_s1 + $0x684] ss:$16 sps:$4 sm:$0xff]   ;;  %v10441_v24 = vld [vmem:[%s15513_s1 + $0x68c] ss:$16 sps:$4 sm:$0xff]  }
  0x94   :  { %7263 = vmatprep.subr.bf16.mxu0 %v10345_v25  ;;  %8037 = vmatprep.subr.bf16.mxu1 %v10348_v26  ;;  %v10436_v25 = vld [vmem:[%s15513_s1 + $0x680] ss:$16 sps:$4 sm:$0xff]   ;;  %v10439_v26 = vld [vmem:[%s15513_s1 + $0x688] ss:$16 sps:$4 sm:$0xff]  }
  0x97   :  { %7264 = vmatpush1.bf16.msra.mxu0 %v10343_v27  ;;  %8038 = vmatpush1.bf16.msra.mxu1 %v10346_v28  ;;  %v10444_v27 = vld [vmem:[%s15513_s1 + $0x6a4] ss:$16 sps:$4 sm:$0xff]   ;;  %v10447_v28 = vld [vmem:[%s15513_s1 + $0x6ac] ss:$16 sps:$4 sm:$0xff]  }
  0x98   :  { %7265 = vmatprep.subr.bf16.mxu0 %v10351_v29  ;;  %8039 = vmatprep.subr.bf16.mxu1 %v10354_v30  ;;  %v10442_v29 = vld [vmem:[%s15513_s1 + $0x6a0] ss:$16 sps:$4 sm:$0xff]   ;;  %v10445_v30 = vld [vmem:[%s15513_s1 + $0x6a8] ss:$16 sps:$4 sm:$0xff]  }
  0x9b   :  { %7266 = vmatpush1.bf16.msra.mxu0 %v10349_v31  ;;  %8040 = vmatpush1.bf16.msra.mxu1 %v10352_v32  ;;  %v10450_v31 = vld [vmem:[%s15513_s1 + $0x6c4] ss:$16 sps:$4 sm:$0xff]   ;;  %v10453_v32 = vld [vmem:[%s15513_s1 + $0x6cc] ss:$16 sps:$4 sm:$0xff]  }
  0x9c   :  { %7267 = vmatprep.subr.bf16.mxu0 %v10357_v33  ;;  %8041 = vmatprep.subr.bf16.mxu1 %v10360_v34  ;;  %v10448_v33 = vld [vmem:[%s15513_s1 + $0x6c0] ss:$16 sps:$4 sm:$0xff]   ;;  %v10451_v34 = vld [vmem:[%s15513_s1 + $0x6c8] ss:$16 sps:$4 sm:$0xff]  }
  0x9f   :  { %7268 = vmatpush1.bf16.msra.mxu0 %v10355_v35  ;;  %8042 = vmatpush1.bf16.msra.mxu1 %v10358_v36  ;;  %v10456_v35 = vld [vmem:[%s15513_s1 + $0x6e4] ss:$16 sps:$4 sm:$0xff]   ;;  %v10459_v36 = vld [vmem:[%s15513_s1 + $0x6ec] ss:$16 sps:$4 sm:$0xff]  }
  0xa0   :  { %7269 = vmatprep.subr.bf16.mxu0 %v10363_v37  ;;  %8043 = vmatprep.subr.bf16.mxu1 %v10366_v38  ;;  %v10454_v37 = vld [vmem:[%s15513_s1 + $0x6e0] ss:$16 sps:$4 sm:$0xff]   ;;  %v10457_v38 = vld [vmem:[%s15513_s1 + $0x6e8] ss:$16 sps:$4 sm:$0xff]  }
  0xa3   :  { %7270 = vmatpush1.bf16.msra.mxu0 %v10361_v39  ;;  %8044 = vmatpush1.bf16.msra.mxu1 %v10364_v40  ;;  %v10462_v39 = vld [vmem:[%s15513_s1 + $0x704] ss:$16 sps:$4 sm:$0xff]   ;;  %v10465_v40 = vld [vmem:[%s15513_s1 + $0x70c] ss:$16 sps:$4 sm:$0xff]  }
  0xa4   :  { %7271 = vmatprep.subr.bf16.mxu0 %v10369_v41  ;;  %8045 = vmatprep.subr.bf16.mxu1 %v10372_v42  ;;  %v10460_v41 = vld [vmem:[%s15513_s1 + $0x700] ss:$16 sps:$4 sm:$0xff]   ;;  %v10463_v42 = vld [vmem:[%s15513_s1 + $0x708] ss:$16 sps:$4 sm:$0xff]  }
  0xa7   :  { %7272 = vmatpush1.bf16.msra.mxu0 %v10367_v43  ;;  %8046 = vmatpush1.bf16.msra.mxu1 %v10370_v44  ;;  %v10468_v43 = vld [vmem:[%s15513_s1 + $0x724] ss:$16 sps:$4 sm:$0xff]   ;;  %v10471_v44 = vld [vmem:[%s15513_s1 + $0x72c] ss:$16 sps:$4 sm:$0xff]  }
  0xa8   :  { %7273 = vmatprep.subr.bf16.mxu0 %v10375_v45  ;;  %8047 = vmatprep.subr.bf16.mxu1 %v10378_v46  ;;  %v10466_v45 = vld [vmem:[%s15513_s1 + $0x720] ss:$16 sps:$4 sm:$0xff]   ;;  %v10469_v46 = vld [vmem:[%s15513_s1 + $0x728] ss:$16 sps:$4 sm:$0xff]  }
  0xab   :  { %7274 = vmatpush1.bf16.msra.mxu0 %v10373_v47  ;;  %8048 = vmatpush1.bf16.msra.mxu1 %v10376_v48  ;;  %v10474_v47 = vld [vmem:[%s15513_s1 + $0x744] ss:$16 sps:$4 sm:$0xff]   ;;  %v10477_v48 = vld [vmem:[%s15513_s1 + $0x74c] ss:$16 sps:$4 sm:$0xff]  }
  0xac   :  { %7275 = vmatprep.subr.bf16.mxu0 %v10381_v49  ;;  %8049 = vmatprep.subr.bf16.mxu1 %v10384_v50  ;;  %v10472_v49 = vld [vmem:[%s15513_s1 + $0x740] ss:$16 sps:$4 sm:$0xff]   ;;  %v10475_v50 = vld [vmem:[%s15513_s1 + $0x748] ss:$16 sps:$4 sm:$0xff]  }
  0xaf   :  { %7276 = vmatpush1.bf16.msra.mxu0 %v10379_v51  ;;  %8050 = vmatpush1.bf16.msra.mxu1 %v10382_v52  ;;  %v10480_v51 = vld [vmem:[%s15513_s1 + $0x764] ss:$16 sps:$4 sm:$0xff]   ;;  %v10483_v52 = vld [vmem:[%s15513_s1 + $0x76c] ss:$16 sps:$4 sm:$0xff]  }
  0xb0   :  { %7277 = vmatprep.subr.bf16.mxu0 %v10387_v53  ;;  %8051 = vmatprep.subr.bf16.mxu1 %v10390_v54  ;;  %v10478_v53 = vld [vmem:[%s15513_s1 + $0x760] ss:$16 sps:$4 sm:$0xff]   ;;  %v10481_v54 = vld [vmem:[%s15513_s1 + $0x768] ss:$16 sps:$4 sm:$0xff]  }
  0xb3   :  { %7278 = vmatpush1.bf16.msra.mxu0 %v10385_v55  ;;  %8052 = vmatpush1.bf16.msra.mxu1 %v10388_v56  ;;  %v10486_v55 = vld [vmem:[%s15513_s1 + $0x784] ss:$16 sps:$4 sm:$0xff]   ;;  %v10489_v56 = vld [vmem:[%s15513_s1 + $0x78c] ss:$16 sps:$4 sm:$0xff]  }
  0xb4   :  { %7279 = vmatprep.subr.bf16.mxu0 %v10393_v57  ;;  %8053 = vmatprep.subr.bf16.mxu1 %v10396_v58  ;;  %v10484_v57 = vld [vmem:[%s15513_s1 + $0x780] ss:$16 sps:$4 sm:$0xff]   ;;  %v10487_v58 = vld [vmem:[%s15513_s1 + $0x788] ss:$16 sps:$4 sm:$0xff]  }
  0xb7   :  { %7280 = vmatpush1.bf16.msra.mxu0 %v10391_v59  ;;  %8054 = vmatpush1.bf16.msra.mxu1 %v10394_v60  ;;  %v10492_v59 = vld [vmem:[%s15513_s1 + $0x7a4] ss:$16 sps:$4 sm:$0xff]   ;;  %v10495_v60 = vld [vmem:[%s15513_s1 + $0x7ac] ss:$16 sps:$4 sm:$0xff]  }
  0xb8   :  { %7281 = vmatprep.subr.bf16.mxu0 %v10399_v61  ;;  %8055 = vmatprep.subr.bf16.mxu1 %v10402_v62  ;;  %v10490_v61 = vld [vmem:[%s15513_s1 + $0x7a0] ss:$16 sps:$4 sm:$0xff]   ;;  %v10493_v62 = vld [vmem:[%s15513_s1 + $0x7a8] ss:$16 sps:$4 sm:$0xff]  }
  0xbb   :  { %7282 = vmatpush1.bf16.msra.mxu0 %v10397_v63  ;;  %8056 = vmatpush1.bf16.msra.mxu1 %v10400_v0  ;;  %v10498_v63 = vld [vmem:[%s15513_s1 + $0x7c4] ss:$16 sps:$4 sm:$0xff]   ;;  %v10501_v0 = vld [vmem:[%s15513_s1 + $0x7cc] ss:$16 sps:$4 sm:$0xff]  }
  0xbc   :  { %7283 = vmatprep.subr.bf16.mxu0 %v10405_v1  ;;  %8057 = vmatprep.subr.bf16.mxu1 %v10408_v2  ;;  %v10496_v1 = vld [vmem:[%s15513_s1 + $0x7c0] ss:$16 sps:$4 sm:$0xff]   ;;  %v10499_v2 = vld [vmem:[%s15513_s1 + $0x7c8] ss:$16 sps:$4 sm:$0xff]  }
  0xbf   :  { %7284 = vmatpush1.bf16.msra.mxu0 %v10403_v3  ;;  %8058 = vmatpush1.bf16.msra.mxu1 %v10406_v4  ;;  %v10504_v3 = vld [vmem:[%s15513_s1 + $0x7e4] ss:$16 sps:$4 sm:$0xff]   ;;  %v10507_v4 = vld [vmem:[%s15513_s1 + $0x7ec] ss:$16 sps:$4 sm:$0xff]  }
  0xc0   :  { %7296 = vmatprep.subr.bf16.mxu0 %v10414_v5  ;;  %8070 = vmatprep.subr.bf16.mxu1 %v10417_v6  ;;  %v10502_v5 = vld [vmem:[%s15513_s1 + $0x7e0] ss:$16 sps:$4 sm:$0xff]   ;;  %v10505_v6 = vld [vmem:[%s15513_s1 + $0x7e8] ss:$16 sps:$4 sm:$0xff]  }
  0xc2   :  { %7286 = vmatmul.mubr.bf16.vlgmr.msra.gmra.mrb[0].mxu0 %v10409_v7  ;;  %8060 = vmatmul.mubr.bf16.vlgmr.msra.gmra.mrb[0].mxu1 %v10409_v7  ;;  %v10513_v7 = vld [vmem:[%s15513_s1 + $0x804] ss:$16 sps:$4 sm:$0xff]  }
  0xc3   :  { %7297 = vmatpush1.bf16.msra.mxu0 %v10412_v8  ;;  %8071 = vmatpush1.bf16.msra.mxu1 %v10415_v9  ;;  %v10516_v8 = vld [vmem:[%s15513_s1 + $0x80c] ss:$16 sps:$4 sm:$0xff]   ;;  %v10508_v9 = vld [vmem:[%s15514_s0 + $0x18] ss:$144 sps:$4 sm:$0xff]  }
  0xc4   :  { %7298 = vmatprep.subr.bf16.mxu0 %v10420_v10  ;;  %8072 = vmatprep.subr.bf16.mxu1 %v10423_v11  ;;  %v10511_v10 = vld [vmem:[%s15513_s1 + $0x800] ss:$16 sps:$4 sm:$0xff]   ;;  %v10514_v11 = vld [vmem:[%s15513_s1 + $0x808] ss:$16 sps:$4 sm:$0xff]  }
  0xc5   :  { %7328 = vmatprep.mubr.bf16.mxu0 %v10510_v12  ;;  %8102 = vmatprep.mubr.bf16.mxu1 %v10510_v12  ;;  %v10519_v12 = vld [vmem:[%s15513_s1 + $0x824] ss:$16 sps:$4 sm:$0xff]  }
  0xc7   :  { %7299 = vmatpush1.bf16.msra.mxu0 %v10418_v13  ;;  %8073 = vmatpush1.bf16.msra.mxu1 %v10421_v14  ;;  %v10522_v13 = vld [vmem:[%s15513_s1 + $0x82c] ss:$16 sps:$4 sm:$0xff]   ;;  %v10609_v14 = vld [vmem:[%s15514_s0 + $0x24] ss:$144 sps:$4 sm:$0xff]  }
  0xc8   :  { %7300 = vmatprep.subr.bf16.mxu0 %v10426_v15  ;;  %8074 = vmatprep.subr.bf16.mxu1 %v10429_v16  ;;  %v10517_v15 = vld [vmem:[%s15513_s1 + $0x820] ss:$16 sps:$4 sm:$0xff]   ;;  %v10520_v16 = vld [vmem:[%s15513_s1 + $0x828] ss:$16 sps:$4 sm:$0xff]  }
  0xcb   :  { %7301 = vmatpush1.bf16.msra.mxu0 %v10424_v17  ;;  %8075 = vmatpush1.bf16.msra.mxu1 %v10427_v18  ;;  %v10525_v17 = vld [vmem:[%s15513_s1 + $0x844] ss:$16 sps:$4 sm:$0xff]   ;;  %v10528_v18 = vld [vmem:[%s15513_s1 + $0x84c] ss:$16 sps:$4 sm:$0xff]  }
  0xcc   :  { %7302 = vmatprep.subr.bf16.mxu0 %v10432_v19  ;;  %8076 = vmatprep.subr.bf16.mxu1 %v10435_v20  ;;  %v10523_v19 = vld [vmem:[%s15513_s1 + $0x840] ss:$16 sps:$4 sm:$0xff]   ;;  %v10526_v20 = vld [vmem:[%s15513_s1 + $0x848] ss:$16 sps:$4 sm:$0xff]  }
  0xcf   :  { %7303 = vmatpush1.bf16.msra.mxu0 %v10430_v21  ;;  %8077 = vmatpush1.bf16.msra.mxu1 %v10433_v22  ;;  %v10531_v21 = vld [vmem:[%s15513_s1 + $0x864] ss:$16 sps:$4 sm:$0xff]   ;;  %v10534_v22 = vld [vmem:[%s15513_s1 + $0x86c] ss:$16 sps:$4 sm:$0xff]  }
  0xd0   :  { %7304 = vmatprep.subr.bf16.mxu0 %v10438_v23  ;;  %8078 = vmatprep.subr.bf16.mxu1 %v10441_v24  ;;  %v10529_v23 = vld [vmem:[%s15513_s1 + $0x860] ss:$16 sps:$4 sm:$0xff]   ;;  %v10532_v24 = vld [vmem:[%s15513_s1 + $0x868] ss:$16 sps:$4 sm:$0xff]  }
  0xd3   :  { %7305 = vmatpush1.bf16.msra.mxu0 %v10436_v25  ;;  %8079 = vmatpush1.bf16.msra.mxu1 %v10439_v26  ;;  %v10537_v25 = vld [vmem:[%s15513_s1 + $0x884] ss:$16 sps:$4 sm:$0xff]   ;;  %v10540_v26 = vld [vmem:[%s15513_s1 + $0x88c] ss:$16 sps:$4 sm:$0xff]  }
  0xd4   :  { %7306 = vmatprep.subr.bf16.mxu0 %v10444_v27  ;;  %8080 = vmatprep.subr.bf16.mxu1 %v10447_v28  ;;  %v10535_v27 = vld [vmem:[%s15513_s1 + $0x880] ss:$16 sps:$4 sm:$0xff]   ;;  %v10538_v28 = vld [vmem:[%s15513_s1 + $0x888] ss:$16 sps:$4 sm:$0xff]  }
  0xd7   :  { %7307 = vmatpush1.bf16.msra.mxu0 %v10442_v29  ;;  %8081 = vmatpush1.bf16.msra.mxu1 %v10445_v30  ;;  %v10543_v29 = vld [vmem:[%s15513_s1 + $0x8a4] ss:$16 sps:$4 sm:$0xff]   ;;  %v10546_v30 = vld [vmem:[%s15513_s1 + $0x8ac] ss:$16 sps:$4 sm:$0xff]  }
  0xd8   :  { %7308 = vmatprep.subr.bf16.mxu0 %v10450_v31  ;;  %8082 = vmatprep.subr.bf16.mxu1 %v10453_v32  ;;  %v10541_v31 = vld [vmem:[%s15513_s1 + $0x8a0] ss:$16 sps:$4 sm:$0xff]   ;;  %v10544_v32 = vld [vmem:[%s15513_s1 + $0x8a8] ss:$16 sps:$4 sm:$0xff]  }
  0xdb   :  { %7309 = vmatpush1.bf16.msra.mxu0 %v10448_v33  ;;  %8083 = vmatpush1.bf16.msra.mxu1 %v10451_v34  ;;  %v10549_v33 = vld [vmem:[%s15513_s1 + $0x8c4] ss:$16 sps:$4 sm:$0xff]   ;;  %v10552_v34 = vld [vmem:[%s15513_s1 + $0x8cc] ss:$16 sps:$4 sm:$0xff]  }
  0xdc   :  { %7310 = vmatprep.subr.bf16.mxu0 %v10456_v35  ;;  %8084 = vmatprep.subr.bf16.mxu1 %v10459_v36  ;;  %v10547_v35 = vld [vmem:[%s15513_s1 + $0x8c0] ss:$16 sps:$4 sm:$0xff]   ;;  %v10550_v36 = vld [vmem:[%s15513_s1 + $0x8c8] ss:$16 sps:$4 sm:$0xff]  }
  0xdf   :  { %7311 = vmatpush1.bf16.msra.mxu0 %v10454_v37  ;;  %8085 = vmatpush1.bf16.msra.mxu1 %v10457_v38  ;;  %v10555_v37 = vld [vmem:[%s15513_s1 + $0x8e4] ss:$16 sps:$4 sm:$0xff]   ;;  %v10558_v38 = vld [vmem:[%s15513_s1 + $0x8ec] ss:$16 sps:$4 sm:$0xff]  }
  0xe0   :  { %7312 = vmatprep.subr.bf16.mxu0 %v10462_v39  ;;  %8086 = vmatprep.subr.bf16.mxu1 %v10465_v40  ;;  %v10553_v39 = vld [vmem:[%s15513_s1 + $0x8e0] ss:$16 sps:$4 sm:$0xff]   ;;  %v10556_v40 = vld [vmem:[%s15513_s1 + $0x8e8] ss:$16 sps:$4 sm:$0xff]  }
  0xe3   :  { %7313 = vmatpush1.bf16.msra.mxu0 %v10460_v41  ;;  %8087 = vmatpush1.bf16.msra.mxu1 %v10463_v42  ;;  %v10561_v41 = vld [vmem:[%s15513_s1 + $0x904] ss:$16 sps:$4 sm:$0xff]   ;;  %v10564_v42 = vld [vmem:[%s15513_s1 + $0x90c] ss:$16 sps:$4 sm:$0xff]  }
  0xe4   :  { %7314 = vmatprep.subr.bf16.mxu0 %v10468_v43  ;;  %8088 = vmatprep.subr.bf16.mxu1 %v10471_v44  ;;  %v10559_v43 = vld [vmem:[%s15513_s1 + $0x900] ss:$16 sps:$4 sm:$0xff]   ;;  %v10562_v44 = vld [vmem:[%s15513_s1 + $0x908] ss:$16 sps:$4 sm:$0xff]  }
  0xe7   :  { %7315 = vmatpush1.bf16.msra.mxu0 %v10466_v45  ;;  %8089 = vmatpush1.bf16.msra.mxu1 %v10469_v46  ;;  %v10567_v45 = vld [vmem:[%s15513_s1 + $0x924] ss:$16 sps:$4 sm:$0xff]   ;;  %v10570_v46 = vld [vmem:[%s15513_s1 + $0x92c] ss:$16 sps:$4 sm:$0xff]  }
  0xe8   :  { %7316 = vmatprep.subr.bf16.mxu0 %v10474_v47  ;;  %8090 = vmatprep.subr.bf16.mxu1 %v10477_v48  ;;  %v10565_v47 = vld [vmem:[%s15513_s1 + $0x920] ss:$16 sps:$4 sm:$0xff]   ;;  %v10568_v48 = vld [vmem:[%s15513_s1 + $0x928] ss:$16 sps:$4 sm:$0xff]  }
  0xeb   :  { %7317 = vmatpush1.bf16.msra.mxu0 %v10472_v49  ;;  %8091 = vmatpush1.bf16.msra.mxu1 %v10475_v50  ;;  %v10573_v49 = vld [vmem:[%s15513_s1 + $0x944] ss:$16 sps:$4 sm:$0xff]   ;;  %v10576_v50 = vld [vmem:[%s15513_s1 + $0x94c] ss:$16 sps:$4 sm:$0xff]  }
  0xec   :  { %7318 = vmatprep.subr.bf16.mxu0 %v10480_v51  ;;  %8092 = vmatprep.subr.bf16.mxu1 %v10483_v52  ;;  %v10571_v51 = vld [vmem:[%s15513_s1 + $0x940] ss:$16 sps:$4 sm:$0xff]   ;;  %v10574_v52 = vld [vmem:[%s15513_s1 + $0x948] ss:$16 sps:$4 sm:$0xff]  }
  0xef   :  { %7319 = vmatpush1.bf16.msra.mxu0 %v10478_v53  ;;  %8093 = vmatpush1.bf16.msra.mxu1 %v10481_v54  ;;  %v10579_v53 = vld [vmem:[%s15513_s1 + $0x964] ss:$16 sps:$4 sm:$0xff]   ;;  %v10582_v54 = vld [vmem:[%s15513_s1 + $0x96c] ss:$16 sps:$4 sm:$0xff]  }
  0xf0   :  { %7320 = vmatprep.subr.bf16.mxu0 %v10486_v55  ;;  %8094 = vmatprep.subr.bf16.mxu1 %v10489_v56  ;;  %v10577_v55 = vld [vmem:[%s15513_s1 + $0x960] ss:$16 sps:$4 sm:$0xff]   ;;  %v10580_v56 = vld [vmem:[%s15513_s1 + $0x968] ss:$16 sps:$4 sm:$0xff]  }
  0xf3   :  { %7321 = vmatpush1.bf16.msra.mxu0 %v10484_v57  ;;  %8095 = vmatpush1.bf16.msra.mxu1 %v10487_v58  ;;  %v10585_v57 = vld [vmem:[%s15513_s1 + $0x984] ss:$16 sps:$4 sm:$0xff]   ;;  %v10588_v58 = vld [vmem:[%s15513_s1 + $0x98c] ss:$16 sps:$4 sm:$0xff]  }
  0xf4   :  { %7322 = vmatprep.subr.bf16.mxu0 %v10492_v59  ;;  %8096 = vmatprep.subr.bf16.mxu1 %v10495_v60  ;;  %v10583_v59 = vld [vmem:[%s15513_s1 + $0x980] ss:$16 sps:$4 sm:$0xff]   ;;  %v10586_v60 = vld [vmem:[%s15513_s1 + $0x988] ss:$16 sps:$4 sm:$0xff]  }
  0xf7   :  { %7323 = vmatpush1.bf16.msra.mxu0 %v10490_v61  ;;  %8097 = vmatpush1.bf16.msra.mxu1 %v10493_v62  ;;  %v10591_v61 = vld [vmem:[%s15513_s1 + $0x9a4] ss:$16 sps:$4 sm:$0xff]   ;;  %v10594_v62 = vld [vmem:[%s15513_s1 + $0x9ac] ss:$16 sps:$4 sm:$0xff]  }
  0xf8   :  { %7324 = vmatprep.subr.bf16.mxu0 %v10498_v63  ;;  %8098 = vmatprep.subr.bf16.mxu1 %v10501_v0  ;;  %v10589_v63 = vld [vmem:[%s15513_s1 + $0x9a0] ss:$16 sps:$4 sm:$0xff]   ;;  %v10592_v0 = vld [vmem:[%s15513_s1 + $0x9a8] ss:$16 sps:$4 sm:$0xff]  }
  0xfb   :  { %7325 = vmatpush1.bf16.msra.mxu0 %v10496_v1  ;;  %8099 = vmatpush1.bf16.msra.mxu1 %v10499_v2  ;;  %v10597_v1 = vld [vmem:[%s15513_s1 + $0x9c4] ss:$16 sps:$4 sm:$0xff]   ;;  %v10600_v2 = vld [vmem:[%s15513_s1 + $0x9cc] ss:$16 sps:$4 sm:$0xff]  }
  0xfc   :  { %7326 = vmatprep.subr.bf16.mxu0 %v10504_v3  ;;  %8100 = vmatprep.subr.bf16.mxu1 %v10507_v4  ;;  %v10595_v3 = vld [vmem:[%s15513_s1 + $0x9c0] ss:$16 sps:$4 sm:$0xff]   ;;  %v10598_v4 = vld [vmem:[%s15513_s1 + $0x9c8] ss:$16 sps:$4 sm:$0xff]  }
  0xff   :  { %7327 = vmatpush1.bf16.msra.mxu0 %v10502_v5  ;;  %8101 = vmatpush1.bf16.msra.mxu1 %v10505_v6  ;;  %v10603_v5 = vld [vmem:[%s15513_s1 + $0x9e4] ss:$16 sps:$4 sm:$0xff]   ;;  %v10606_v6 = vld [vmem:[%s15513_s1 + $0x9ec] ss:$16 sps:$4 sm:$0xff]  }
 0x100   :  { %7339 = vmatprep.subr.bf16.mxu0 %v10513_v7  ;;  %8113 = vmatprep.subr.bf16.mxu1 %v10516_v8  ;;  %v10601_v7 = vld [vmem:[%s15513_s1 + $0x9e0] ss:$16 sps:$4 sm:$0xff]   ;;  %v10604_v8 = vld [vmem:[%s15513_s1 + $0x9e8] ss:$16 sps:$4 sm:$0xff]  }
 0x102   :  { %7329 = vmatmul.mubr.bf16.vlgmr.msra.gmra.mrb[0].mxu0 %v10508_v9  ;;  %8103 = vmatmul.mubr.bf16.vlgmr.msra.gmra.mrb[0].mxu1 %v10508_v9  ;;  %v10607_v9 = vld [vmem:[%s15514_s0 + $0x20] ss:$144 sps:$4 sm:$0xff]  }
 0x103   :  { %7340 = vmatpush1.bf16.msra.mxu0 %v10511_v10  ;;  %8114 = vmatpush1.bf16.msra.mxu1 %v10514_v11  ;;  %v10612_v10 = vld [vmem:[%s15513_s1 + $0xa04] ss:$16 sps:$4 sm:$0xff]   ;;  %v10615_v11 = vld [vmem:[%s15513_s1 + $0xa0c] ss:$16 sps:$4 sm:$0xff]  }
 0x104   :  { %7341 = vmatprep.subr.bf16.mxu0 %v10519_v12  ;;  %8115 = vmatprep.subr.bf16.mxu1 %v10522_v13  ;;  %v10610_v12 = vld [vmem:[%s15513_s1 + $0xa00] ss:$16 sps:$4 sm:$0xff]   ;;  %v10613_v13 = vld [vmem:[%s15513_s1 + $0xa08] ss:$16 sps:$4 sm:$0xff]  }
 0x105   :  { %7371 = vmatprep.mubr.bf16.mxu0 %v10609_v14  ;;  %8145 = vmatprep.mubr.bf16.mxu1 %v10609_v14  ;;  %v10618_v14 = vld [vmem:[%s15513_s1 + $0xa24] ss:$16 sps:$4 sm:$0xff]  }
 0x107   :  { %7342 = vmatpush1.bf16.msra.mxu0 %v10517_v15  ;;  %8116 = vmatpush1.bf16.msra.mxu1 %v10520_v16  ;;  %v10621_v15 = vld [vmem:[%s15513_s1 + $0xa2c] ss:$16 sps:$4 sm:$0xff]  }
 0x108   :  { %7343 = vmatprep.subr.bf16.mxu0 %v10525_v17  ;;  %8117 = vmatprep.subr.bf16.mxu1 %v10528_v18  ;;  %v10708_v16 = vld [vmem:[%s15514_s0 + $0x2c] ss:$144 sps:$4 sm:$0xff]   ;;  %v10616_v17 = vld [vmem:[%s15513_s1 + $0xa20] ss:$16 sps:$4 sm:$0xff]   ;;  %v10619_v18 = vld [vmem:[%s15513_s1 + $0xa28] ss:$16 sps:$4 sm:$0xff]  }
 0x10b   :  { %7344 = vmatpush1.bf16.msra.mxu0 %v10523_v19  ;;  %8118 = vmatpush1.bf16.msra.mxu1 %v10526_v20  ;;  %v10624_v19 = vld [vmem:[%s15513_s1 + $0xa44] ss:$16 sps:$4 sm:$0xff]   ;;  %v10627_v20 = vld [vmem:[%s15513_s1 + $0xa4c] ss:$16 sps:$4 sm:$0xff]  }
 0x10c   :  { %7345 = vmatprep.subr.bf16.mxu0 %v10531_v21  ;;  %8119 = vmatprep.subr.bf16.mxu1 %v10534_v22  ;;  %v10622_v21 = vld [vmem:[%s15513_s1 + $0xa40] ss:$16 sps:$4 sm:$0xff]   ;;  %v10625_v22 = vld [vmem:[%s15513_s1 + $0xa48] ss:$16 sps:$4 sm:$0xff]  }
 0x10f   :  { %7346 = vmatpush1.bf16.msra.mxu0 %v10529_v23  ;;  %8120 = vmatpush1.bf16.msra.mxu1 %v10532_v24  ;;  %v10630_v23 = vld [vmem:[%s15513_s1 + $0xa64] ss:$16 sps:$4 sm:$0xff]   ;;  %v10633_v24 = vld [vmem:[%s15513_s1 + $0xa6c] ss:$16 sps:$4 sm:$0xff]  }
 0x110   :  { %7347 = vmatprep.subr.bf16.mxu0 %v10537_v25  ;;  %8121 = vmatprep.subr.bf16.mxu1 %v10540_v26  ;;  %v10628_v25 = vld [vmem:[%s15513_s1 + $0xa60] ss:$16 sps:$4 sm:$0xff]   ;;  %v10631_v26 = vld [vmem:[%s15513_s1 + $0xa68] ss:$16 sps:$4 sm:$0xff]  }
 0x113   :  { %7348 = vmatpush1.bf16.msra.mxu0 %v10535_v27  ;;  %8122 = vmatpush1.bf16.msra.mxu1 %v10538_v28  ;;  %v10636_v27 = vld [vmem:[%s15513_s1 + $0xa84] ss:$16 sps:$4 sm:$0xff]   ;;  %v10639_v28 = vld [vmem:[%s15513_s1 + $0xa8c] ss:$16 sps:$4 sm:$0xff]  }
 0x114   :  { %7349 = vmatprep.subr.bf16.mxu0 %v10543_v29  ;;  %8123 = vmatprep.subr.bf16.mxu1 %v10546_v30  ;;  %v10634_v29 = vld [vmem:[%s15513_s1 + $0xa80] ss:$16 sps:$4 sm:$0xff]   ;;  %v10637_v30 = vld [vmem:[%s15513_s1 + $0xa88] ss:$16 sps:$4 sm:$0xff]  }
 0x117   :  { %7350 = vmatpush1.bf16.msra.mxu0 %v10541_v31  ;;  %8124 = vmatpush1.bf16.msra.mxu1 %v10544_v32  ;;  %v10642_v31 = vld [vmem:[%s15513_s1 + $0xaa4] ss:$16 sps:$4 sm:$0xff]   ;;  %v10645_v32 = vld [vmem:[%s15513_s1 + $0xaac] ss:$16 sps:$4 sm:$0xff]  }
 0x118   :  { %7351 = vmatprep.subr.bf16.mxu0 %v10549_v33  ;;  %8125 = vmatprep.subr.bf16.mxu1 %v10552_v34  ;;  %v10640_v33 = vld [vmem:[%s15513_s1 + $0xaa0] ss:$16 sps:$4 sm:$0xff]   ;;  %v10643_v34 = vld [vmem:[%s15513_s1 + $0xaa8] ss:$16 sps:$4 sm:$0xff]  }
 0x11b   :  { %7352 = vmatpush1.bf16.msra.mxu0 %v10547_v35  ;;  %8126 = vmatpush1.bf16.msra.mxu1 %v10550_v36  ;;  %v10648_v35 = vld [vmem:[%s15513_s1 + $0xac4] ss:$16 sps:$4 sm:$0xff]   ;;  %v10651_v36 = vld [vmem:[%s15513_s1 + $0xacc] ss:$16 sps:$4 sm:$0xff]  }
 0x11c   :  { %7353 = vmatprep.subr.bf16.mxu0 %v10555_v37  ;;  %8127 = vmatprep.subr.bf16.mxu1 %v10558_v38  ;;  %v10646_v37 = vld [vmem:[%s15513_s1 + $0xac0] ss:$16 sps:$4 sm:$0xff]   ;;  %v10649_v38 = vld [vmem:[%s15513_s1 + $0xac8] ss:$16 sps:$4 sm:$0xff]  }
 0x11f   :  { %7354 = vmatpush1.bf16.msra.mxu0 %v10553_v39  ;;  %8128 = vmatpush1.bf16.msra.mxu1 %v10556_v40  ;;  %v10654_v39 = vld [vmem:[%s15513_s1 + $0xae4] ss:$16 sps:$4 sm:$0xff]   ;;  %v10657_v40 = vld [vmem:[%s15513_s1 + $0xaec] ss:$16 sps:$4 sm:$0xff]  }
 0x120   :  { %7355 = vmatprep.subr.bf16.mxu0 %v10561_v41  ;;  %8129 = vmatprep.subr.bf16.mxu1 %v10564_v42  ;;  %v10652_v41 = vld [vmem:[%s15513_s1 + $0xae0] ss:$16 sps:$4 sm:$0xff]   ;;  %v10655_v42 = vld [vmem:[%s15513_s1 + $0xae8] ss:$16 sps:$4 sm:$0xff]  }
 0x123   :  { %7356 = vmatpush1.bf16.msra.mxu0 %v10559_v43  ;;  %8130 = vmatpush1.bf16.msra.mxu1 %v10562_v44  ;;  %v10660_v43 = vld [vmem:[%s15513_s1 + $0xb04] ss:$16 sps:$4 sm:$0xff]   ;;  %v10663_v44 = vld [vmem:[%s15513_s1 + $0xb0c] ss:$16 sps:$4 sm:$0xff]  }
 0x124   :  { %7357 = vmatprep.subr.bf16.mxu0 %v10567_v45  ;;  %8131 = vmatprep.subr.bf16.mxu1 %v10570_v46  ;;  %v10658_v45 = vld [vmem:[%s15513_s1 + $0xb00] ss:$16 sps:$4 sm:$0xff]   ;;  %v10661_v46 = vld [vmem:[%s15513_s1 + $0xb08] ss:$16 sps:$4 sm:$0xff]  }
 0x127   :  { %7358 = vmatpush1.bf16.msra.mxu0 %v10565_v47  ;;  %8132 = vmatpush1.bf16.msra.mxu1 %v10568_v48  ;;  %v10666_v47 = vld [vmem:[%s15513_s1 + $0xb24] ss:$16 sps:$4 sm:$0xff]   ;;  %v10669_v48 = vld [vmem:[%s15513_s1 + $0xb2c] ss:$16 sps:$4 sm:$0xff]  }
 0x128   :  { %7359 = vmatprep.subr.bf16.mxu0 %v10573_v49  ;;  %8133 = vmatprep.subr.bf16.mxu1 %v10576_v50  ;;  %v10664_v49 = vld [vmem:[%s15513_s1 + $0xb20] ss:$16 sps:$4 sm:$0xff]   ;;  %v10667_v50 = vld [vmem:[%s15513_s1 + $0xb28] ss:$16 sps:$4 sm:$0xff]  }
 0x12b   :  { %7360 = vmatpush1.bf16.msra.mxu0 %v10571_v51  ;;  %8134 = vmatpush1.bf16.msra.mxu1 %v10574_v52  ;;  %v10672_v51 = vld [vmem:[%s15513_s1 + $0xb44] ss:$16 sps:$4 sm:$0xff]   ;;  %v10675_v52 = vld [vmem:[%s15513_s1 + $0xb4c] ss:$16 sps:$4 sm:$0xff]  }
 0x12c   :  { %7361 = vmatprep.subr.bf16.mxu0 %v10579_v53  ;;  %8135 = vmatprep.subr.bf16.mxu1 %v10582_v54  ;;  %v10670_v53 = vld [vmem:[%s15513_s1 + $0xb40] ss:$16 sps:$4 sm:$0xff]   ;;  %v10673_v54 = vld [vmem:[%s15513_s1 + $0xb48] ss:$16 sps:$4 sm:$0xff]  }
 0x12f   :  { %7362 = vmatpush1.bf16.msra.mxu0 %v10577_v55  ;;  %8136 = vmatpush1.bf16.msra.mxu1 %v10580_v56  ;;  %v10678_v55 = vld [vmem:[%s15513_s1 + $0xb64] ss:$16 sps:$4 sm:$0xff]   ;;  %v10681_v56 = vld [vmem:[%s15513_s1 + $0xb6c] ss:$16 sps:$4 sm:$0xff]  }
 0x130   :  { %7363 = vmatprep.subr.bf16.mxu0 %v10585_v57  ;;  %8137 = vmatprep.subr.bf16.mxu1 %v10588_v58  ;;  %v10676_v57 = vld [vmem:[%s15513_s1 + $0xb60] ss:$16 sps:$4 sm:$0xff]   ;;  %v10679_v58 = vld [vmem:[%s15513_s1 + $0xb68] ss:$16 sps:$4 sm:$0xff]  }
 0x133   :  { %7364 = vmatpush1.bf16.msra.mxu0 %v10583_v59  ;;  %8138 = vmatpush1.bf16.msra.mxu1 %v10586_v60  ;;  %v10684_v59 = vld [vmem:[%s15513_s1 + $0xb84] ss:$16 sps:$4 sm:$0xff]   ;;  %v10687_v60 = vld [vmem:[%s15513_s1 + $0xb8c] ss:$16 sps:$4 sm:$0xff]  }
 0x134   :  { %7365 = vmatprep.subr.bf16.mxu0 %v10591_v61  ;;  %8139 = vmatprep.subr.bf16.mxu1 %v10594_v62  ;;  %v10682_v61 = vld [vmem:[%s15513_s1 + $0xb80] ss:$16 sps:$4 sm:$0xff]   ;;  %v10685_v62 = vld [vmem:[%s15513_s1 + $0xb88] ss:$16 sps:$4 sm:$0xff]  }
 0x137   :  { %7366 = vmatpush1.bf16.msra.mxu0 %v10589_v63  ;;  %8140 = vmatpush1.bf16.msra.mxu1 %v10592_v0  ;;  %v10690_v63 = vld [vmem:[%s15513_s1 + $0xba4] ss:$16 sps:$4 sm:$0xff]   ;;  %v10693_v0 = vld [vmem:[%s15513_s1 + $0xbac] ss:$16 sps:$4 sm:$0xff]  }
 0x138   :  { %7367 = vmatprep.subr.bf16.mxu0 %v10597_v1  ;;  %8141 = vmatprep.subr.bf16.mxu1 %v10600_v2  ;;  %v10688_v1 = vld [vmem:[%s15513_s1 + $0xba0] ss:$16 sps:$4 sm:$0xff]   ;;  %v10691_v2 = vld [vmem:[%s15513_s1 + $0xba8] ss:$16 sps:$4 sm:$0xff]  }
 0x13b   :  { %7368 = vmatpush1.bf16.msra.mxu0 %v10595_v3  ;;  %8142 = vmatpush1.bf16.msra.mxu1 %v10598_v4  ;;  %v10696_v3 = vld [vmem:[%s15513_s1 + $0xbc4] ss:$16 sps:$4 sm:$0xff]   ;;  %v10699_v4 = vld [vmem:[%s15513_s1 + $0xbcc] ss:$16 sps:$4 sm:$0xff]  }
 0x13c   :  { %7369 = vmatprep.subr.bf16.mxu0 %v10603_v5  ;;  %8143 = vmatprep.subr.bf16.mxu1 %v10606_v6  ;;  %v10694_v5 = vld [vmem:[%s15513_s1 + $0xbc0] ss:$16 sps:$4 sm:$0xff]   ;;  %v10697_v6 = vld [vmem:[%s15513_s1 + $0xbc8] ss:$16 sps:$4 sm:$0xff]  }
 0x13f   :  { %7370 = vmatpush1.bf16.msra.mxu0 %v10601_v7  ;;  %8144 = vmatpush1.bf16.msra.mxu1 %v10604_v8  ;;  %v10702_v7 = vld [vmem:[%s15513_s1 + $0xbe4] ss:$16 sps:$4 sm:$0xff]   ;;  %v10705_v8 = vld [vmem:[%s15513_s1 + $0xbec] ss:$16 sps:$4 sm:$0xff]  }
 0x140   :  { %7382 = vmatprep.subr.bf16.mxu0 %v10612_v10  ;;  %8156 = vmatprep.subr.bf16.mxu1 %v10615_v11  ;;  %v10703_v10 = vld [vmem:[%s15513_s1 + $0xbe8] ss:$16 sps:$4 sm:$0xff]  }
 0x141   :  { %v10706_v11 = vld [vmem:[%s15514_s0 + $0x28] ss:$144 sps:$4 sm:$0xff]  }
 0x142   :  { %7372 = vmatmul.mubr.bf16.vlgmr.msra.gmra.mrb[0].mxu0 %v10607_v9  ;;  %8146 = vmatmul.mubr.bf16.vlgmr.msra.gmra.mrb[0].mxu1 %v10607_v9  ;;  %v10700_v9 = vld [vmem:[%s15513_s1 + $0xbe0] ss:$16 sps:$4 sm:$0xff]  }
 0x143   :  { %7383 = vmatpush1.bf16.msra.mxu0 %v10610_v12  ;;  %8157 = vmatpush1.bf16.msra.mxu1 %v10613_v13  ;;  %v10711_v12 = vld [vmem:[%s15513_s1 + $0xc04] ss:$16 sps:$4 sm:$0xff]   ;;  %v10714_v13 = vld [vmem:[%s15513_s1 + $0xc0c] ss:$16 sps:$4 sm:$0xff]  }
 0x144   :  { %7384 = vmatprep.subr.bf16.mxu0 %v10618_v14  ;;  %8158 = vmatprep.subr.bf16.mxu1 %v10621_v15  ;;  %v10709_v14 = vld [vmem:[%s15513_s1 + $0xc00] ss:$16 sps:$4 sm:$0xff]   ;;  %v10712_v15 = vld [vmem:[%s15513_s1 + $0xc08] ss:$16 sps:$4 sm:$0xff]  }
 0x145   :  { %7414 = vmatprep.mubr.bf16.mxu0 %v10708_v16  ;;  %8188 = vmatprep.mubr.bf16.mxu1 %v10708_v16  ;;  %v10717_v16 = vld [vmem:[%s15513_s1 + $0xc24] ss:$16 sps:$4 sm:$0xff]  }
 0x147   :  { %7385 = vmatpush1.bf16.msra.mxu0 %v10616_v17  ;;  %8159 = vmatpush1.bf16.msra.mxu1 %v10619_v18  ;;  %v10720_v17 = vld [vmem:[%s15513_s1 + $0xc2c] ss:$16 sps:$4 sm:$0xff]   ;;  %v10807_v18 = vld [vmem:[%s15514_s0 + $0x34] ss:$144 sps:$4 sm:$0xff]  }
 0x148   :  { %7386 = vmatprep.subr.bf16.mxu0 %v10624_v19  ;;  %8160 = vmatprep.subr.bf16.mxu1 %v10627_v20  ;;  %v10715_v19 = vld [vmem:[%s15513_s1 + $0xc20] ss:$16 sps:$4 sm:$0xff]   ;;  %v10718_v20 = vld [vmem:[%s15513_s1 + $0xc28] ss:$16 sps:$4 sm:$0xff]  }
 0x14b   :  { %7387 = vmatpush1.bf16.msra.mxu0 %v10622_v21  ;;  %8161 = vmatpush1.bf16.msra.mxu1 %v10625_v22  ;;  %v10723_v21 = vld [vmem:[%s15513_s1 + $0xc44] ss:$16 sps:$4 sm:$0xff]   ;;  %v10726_v22 = vld [vmem:[%s15513_s1 + $0xc4c] ss:$16 sps:$4 sm:$0xff]  }
 0x14c   :  { %7388 = vmatprep.subr.bf16.mxu0 %v10630_v23  ;;  %8162 = vmatprep.subr.bf16.mxu1 %v10633_v24  ;;  %v10721_v23 = vld [vmem:[%s15513_s1 + $0xc40] ss:$16 sps:$4 sm:$0xff]   ;;  %v10724_v24 = vld [vmem:[%s15513_s1 + $0xc48] ss:$16 sps:$4 sm:$0xff]  }
 0x14f   :  { %7389 = vmatpush1.bf16.msra.mxu0 %v10628_v25  ;;  %8163 = vmatpush1.bf16.msra.mxu1 %v10631_v26  ;;  %v10729_v25 = vld [vmem:[%s15513_s1 + $0xc64] ss:$16 sps:$4 sm:$0xff]   ;;  %v10732_v26 = vld [vmem:[%s15513_s1 + $0xc6c] ss:$16 sps:$4 sm:$0xff]  }
 0x150   :  { %7390 = vmatprep.subr.bf16.mxu0 %v10636_v27  ;;  %8164 = vmatprep.subr.bf16.mxu1 %v10639_v28  ;;  %v10727_v27 = vld [vmem:[%s15513_s1 + $0xc60] ss:$16 sps:$4 sm:$0xff]   ;;  %v10730_v28 = vld [vmem:[%s15513_s1 + $0xc68] ss:$16 sps:$4 sm:$0xff]  }
 0x153   :  { %7391 = vmatpush1.bf16.msra.mxu0 %v10634_v29  ;;  %8165 = vmatpush1.bf16.msra.mxu1 %v10637_v30  ;;  %v10735_v29 = vld [vmem:[%s15513_s1 + $0xc84] ss:$16 sps:$4 sm:$0xff]   ;;  %v10738_v30 = vld [vmem:[%s15513_s1 + $0xc8c] ss:$16 sps:$4 sm:$0xff]  }
 0x154   :  { %7392 = vmatprep.subr.bf16.mxu0 %v10642_v31  ;;  %8166 = vmatprep.subr.bf16.mxu1 %v10645_v32  ;;  %v10733_v31 = vld [vmem:[%s15513_s1 + $0xc80] ss:$16 sps:$4 sm:$0xff]   ;;  %v10736_v32 = vld [vmem:[%s15513_s1 + $0xc88] ss:$16 sps:$4 sm:$0xff]  }
 0x157   :  { %7393 = vmatpush1.bf16.msra.mxu0 %v10640_v33  ;;  %8167 = vmatpush1.bf16.msra.mxu1 %v10643_v34  ;;  %v10741_v33 = vld [vmem:[%s15513_s1 + $0xca4] ss:$16 sps:$4 sm:$0xff]   ;;  %v10744_v34 = vld [vmem:[%s15513_s1 + $0xcac] ss:$16 sps:$4 sm:$0xff]  }
 0x158   :  { %7394 = vmatprep.subr.bf16.mxu0 %v10648_v35  ;;  %8168 = vmatprep.subr.bf16.mxu1 %v10651_v36  ;;  %v10739_v35 = vld [vmem:[%s15513_s1 + $0xca0] ss:$16 sps:$4 sm:$0xff]   ;;  %v10742_v36 = vld [vmem:[%s15513_s1 + $0xca8] ss:$16 sps:$4 sm:$0xff]  }
 0x15b   :  { %7395 = vmatpush1.bf16.msra.mxu0 %v10646_v37  ;;  %8169 = vmatpush1.bf16.msra.mxu1 %v10649_v38  ;;  %v10747_v37 = vld [vmem:[%s15513_s1 + $0xcc4] ss:$16 sps:$4 sm:$0xff]   ;;  %v10750_v38 = vld [vmem:[%s15513_s1 + $0xccc] ss:$16 sps:$4 sm:$0xff]  }
 0x15c   :  { %7396 = vmatprep.subr.bf16.mxu0 %v10654_v39  ;;  %8170 = vmatprep.subr.bf16.mxu1 %v10657_v40  ;;  %v10745_v39 = vld [vmem:[%s15513_s1 + $0xcc0] ss:$16 sps:$4 sm:$0xff]   ;;  %v10748_v40 = vld [vmem:[%s15513_s1 + $0xcc8] ss:$16 sps:$4 sm:$0xff]  }
 0x15f   :  { %7397 = vmatpush1.bf16.msra.mxu0 %v10652_v41  ;;  %8171 = vmatpush1.bf16.msra.mxu1 %v10655_v42  ;;  %v10753_v41 = vld [vmem:[%s15513_s1 + $0xce4] ss:$16 sps:$4 sm:$0xff]   ;;  %v10756_v42 = vld [vmem:[%s15513_s1 + $0xcec] ss:$16 sps:$4 sm:$0xff]  }
 0x160   :  { %7398 = vmatprep.subr.bf16.mxu0 %v10660_v43  ;;  %8172 = vmatprep.subr.bf16.mxu1 %v10663_v44  ;;  %v10751_v43 = vld [vmem:[%s15513_s1 + $0xce0] ss:$16 sps:$4 sm:$0xff]   ;;  %v10754_v44 = vld [vmem:[%s15513_s1 + $0xce8] ss:$16 sps:$4 sm:$0xff]  }
 0x163   :  { %7399 = vmatpush1.bf16.msra.mxu0 %v10658_v45  ;;  %8173 = vmatpush1.bf16.msra.mxu1 %v10661_v46  ;;  %v10759_v45 = vld [vmem:[%s15513_s1 + $0xd04] ss:$16 sps:$4 sm:$0xff]   ;;  %v10762_v46 = vld [vmem:[%s15513_s1 + $0xd0c] ss:$16 sps:$4 sm:$0xff]  }
 0x164   :  { %7400 = vmatprep.subr.bf16.mxu0 %v10666_v47  ;;  %8174 = vmatprep.subr.bf16.mxu1 %v10669_v48  ;;  %v10757_v47 = vld [vmem:[%s15513_s1 + $0xd00] ss:$16 sps:$4 sm:$0xff]   ;;  %v10760_v48 = vld [vmem:[%s15513_s1 + $0xd08] ss:$16 sps:$4 sm:$0xff]  }
 0x167   :  { %7401 = vmatpush1.bf16.msra.mxu0 %v10664_v49  ;;  %8175 = vmatpush1.bf16.msra.mxu1 %v10667_v50  ;;  %v10765_v49 = vld [vmem:[%s15513_s1 + $0xd24] ss:$16 sps:$4 sm:$0xff]   ;;  %v10768_v50 = vld [vmem:[%s15513_s1 + $0xd2c] ss:$16 sps:$4 sm:$0xff]  }
 0x168   :  { %7402 = vmatprep.subr.bf16.mxu0 %v10672_v51  ;;  %8176 = vmatprep.subr.bf16.mxu1 %v10675_v52  ;;  %v10763_v51 = vld [vmem:[%s15513_s1 + $0xd20] ss:$16 sps:$4 sm:$0xff]   ;;  %v10766_v52 = vld [vmem:[%s15513_s1 + $0xd28] ss:$16 sps:$4 sm:$0xff]  }
 0x16b   :  { %7403 = vmatpush1.bf16.msra.mxu0 %v10670_v53  ;;  %8177 = vmatpush1.bf16.msra.mxu1 %v10673_v54  ;;  %v10771_v53 = vld [vmem:[%s15513_s1 + $0xd44] ss:$16 sps:$4 sm:$0xff]   ;;  %v10774_v54 = vld [vmem:[%s15513_s1 + $0xd4c] ss:$16 sps:$4 sm:$0xff]  }
 0x16c   :  { %7404 = vmatprep.subr.bf16.mxu0 %v10678_v55  ;;  %8178 = vmatprep.subr.bf16.mxu1 %v10681_v56  ;;  %v10769_v55 = vld [vmem:[%s15513_s1 + $0xd40] ss:$16 sps:$4 sm:$0xff]   ;;  %v10772_v56 = vld [vmem:[%s15513_s1 + $0xd48] ss:$16 sps:$4 sm:$0xff]  }
 0x16f   :  { %7405 = vmatpush1.bf16.msra.mxu0 %v10676_v57  ;;  %8179 = vmatpush1.bf16.msra.mxu1 %v10679_v58  ;;  %v10777_v57 = vld [vmem:[%s15513_s1 + $0xd64] ss:$16 sps:$4 sm:$0xff]   ;;  %v10780_v58 = vld [vmem:[%s15513_s1 + $0xd6c] ss:$16 sps:$4 sm:$0xff]  }
 0x170   :  { %7406 = vmatprep.subr.bf16.mxu0 %v10684_v59  ;;  %8180 = vmatprep.subr.bf16.mxu1 %v10687_v60  ;;  %v10775_v59 = vld [vmem:[%s15513_s1 + $0xd60] ss:$16 sps:$4 sm:$0xff]   ;;  %v10778_v60 = vld [vmem:[%s15513_s1 + $0xd68] ss:$16 sps:$4 sm:$0xff]  }
 0x173   :  { %7407 = vmatpush1.bf16.msra.mxu0 %v10682_v61  ;;  %8181 = vmatpush1.bf16.msra.mxu1 %v10685_v62  ;;  %v10783_v61 = vld [vmem:[%s15513_s1 + $0xd84] ss:$16 sps:$4 sm:$0xff]   ;;  %v10786_v62 = vld [vmem:[%s15513_s1 + $0xd8c] ss:$16 sps:$4 sm:$0xff]  }
 0x174   :  { %7408 = vmatprep.subr.bf16.mxu0 %v10690_v63  ;;  %8182 = vmatprep.subr.bf16.mxu1 %v10693_v0  ;;  %v10781_v63 = vld [vmem:[%s15513_s1 + $0xd80] ss:$16 sps:$4 sm:$0xff]   ;;  %v10784_v0 = vld [vmem:[%s15513_s1 + $0xd88] ss:$16 sps:$4 sm:$0xff]  }
 0x177   :  { %7409 = vmatpush1.bf16.msra.mxu0 %v10688_v1  ;;  %8183 = vmatpush1.bf16.msra.mxu1 %v10691_v2  ;;  %v10789_v1 = vld [vmem:[%s15513_s1 + $0xda4] ss:$16 sps:$4 sm:$0xff]   ;;  %v10792_v2 = vld [vmem:[%s15513_s1 + $0xdac] ss:$16 sps:$4 sm:$0xff]  }
 0x178   :  { %7410 = vmatprep.subr.bf16.mxu0 %v10696_v3  ;;  %8184 = vmatprep.subr.bf16.mxu1 %v10699_v4  ;;  %v10787_v3 = vld [vmem:[%s15513_s1 + $0xda0] ss:$16 sps:$4 sm:$0xff]   ;;  %v10790_v4 = vld [vmem:[%s15513_s1 + $0xda8] ss:$16 sps:$4 sm:$0xff]  }
 0x17b   :  { %7411 = vmatpush1.bf16.msra.mxu0 %v10694_v5  ;;  %8185 = vmatpush1.bf16.msra.mxu1 %v10697_v6  ;;  %v10795_v5 = vld [vmem:[%s15513_s1 + $0xdc4] ss:$16 sps:$4 sm:$0xff]   ;;  %v10798_v6 = vld [vmem:[%s15513_s1 + $0xdcc] ss:$16 sps:$4 sm:$0xff]  }
 0x17c   :  { %7412 = vmatprep.subr.bf16.mxu0 %v10702_v7  ;;  %8186 = vmatprep.subr.bf16.mxu1 %v10705_v8  ;;  %v10793_v7 = vld [vmem:[%s15513_s1 + $0xdc0] ss:$16 sps:$4 sm:$0xff]   ;;  %v10796_v8 = vld [vmem:[%s15513_s1 + $0xdc8] ss:$16 sps:$4 sm:$0xff]  }
 0x17f   :  { %7413 = vmatpush1.bf16.msra.mxu0 %v10700_v9  ;;  %8187 = vmatpush1.bf16.msra.mxu1 %v10703_v10  ;;  %v10801_v9 = vld [vmem:[%s15513_s1 + $0xde4] ss:$16 sps:$4 sm:$0xff]   ;;  %v10804_v10 = vld [vmem:[%s15513_s1 + $0xdec] ss:$16 sps:$4 sm:$0xff]  }
 0x180   :  { %7425 = vmatprep.subr.bf16.mxu0 %v10711_v12  ;;  %8199 = vmatprep.subr.bf16.mxu1 %v10714_v13  ;;  %v10802_v12 = vld [vmem:[%s15513_s1 + $0xde8] ss:$16 sps:$4 sm:$0xff]   ;;  %v10805_v13 = vld [vmem:[%s15514_s0 + $0x30] ss:$144 sps:$4 sm:$0xff]  }
 0x182   :  { %7415 = vmatmul.mubr.bf16.vlgmr.msra.gmra.mrb[0].mxu0 %v10706_v11  ;;  %8189 = vmatmul.mubr.bf16.vlgmr.msra.gmra.mrb[0].mxu1 %v10706_v11  ;;  %v10799_v11 = vld [vmem:[%s15513_s1 + $0xde0] ss:$16 sps:$4 sm:$0xff]  }
 0x183   :  { %7426 = vmatpush1.bf16.msra.mxu0 %v10709_v14  ;;  %8200 = vmatpush1.bf16.msra.mxu1 %v10712_v15  ;;  %v10810_v14 = vld [vmem:[%s15513_s1 + $0xe04] ss:$16 sps:$4 sm:$0xff]   ;;  %v10813_v15 = vld [vmem:[%s15513_s1 + $0xe0c] ss:$16 sps:$4 sm:$0xff]  }
 0x184   :  { %7427 = vmatprep.subr.bf16.mxu0 %v10717_v16  ;;  %8201 = vmatprep.subr.bf16.mxu1 %v10720_v17  ;;  %v10808_v16 = vld [vmem:[%s15513_s1 + $0xe00] ss:$16 sps:$4 sm:$0xff]   ;;  %v10811_v17 = vld [vmem:[%s15513_s1 + $0xe08] ss:$16 sps:$4 sm:$0xff]  }
 0x185   :  { %7457 = vmatprep.mubr.bf16.mxu0 %v10807_v18  ;;  %8231 = vmatprep.mubr.bf16.mxu1 %v10807_v18  ;;  %v10816_v18 = vld [vmem:[%s15513_s1 + $0xe24] ss:$16 sps:$4 sm:$0xff]  }
 0x187   :  { %7428 = vmatpush1.bf16.msra.mxu0 %v10715_v19  ;;  %8202 = vmatpush1.bf16.msra.mxu1 %v10718_v20  ;;  %v10819_v19 = vld [vmem:[%s15513_s1 + $0xe2c] ss:$16 sps:$4 sm:$0xff]  }
 0x188   :  { %7429 = vmatprep.subr.bf16.mxu0 %v10723_v21  ;;  %8203 = vmatprep.subr.bf16.mxu1 %v10726_v22  ;;  %v10906_v20 = vld [vmem:[%s15514_s0 + $0x3c] ss:$144 sps:$4 sm:$0xff]   ;;  %v10814_v21 = vld [vmem:[%s15513_s1 + $0xe20] ss:$16 sps:$4 sm:$0xff]   ;;  %v10817_v22 = vld [vmem:[%s15513_s1 + $0xe28] ss:$16 sps:$4 sm:$0xff]  }
 0x18b   :  { %7430 = vmatpush1.bf16.msra.mxu0 %v10721_v23  ;;  %8204 = vmatpush1.bf16.msra.mxu1 %v10724_v24  ;;  %v10822_v23 = vld [vmem:[%s15513_s1 + $0xe44] ss:$16 sps:$4 sm:$0xff]   ;;  %v10825_v24 = vld [vmem:[%s15513_s1 + $0xe4c] ss:$16 sps:$4 sm:$0xff]  }
 0x18c   :  { %7431 = vmatprep.subr.bf16.mxu0 %v10729_v25  ;;  %8205 = vmatprep.subr.bf16.mxu1 %v10732_v26  ;;  %v10820_v25 = vld [vmem:[%s15513_s1 + $0xe40] ss:$16 sps:$4 sm:$0xff]   ;;  %v10823_v26 = vld [vmem:[%s15513_s1 + $0xe48] ss:$16 sps:$4 sm:$0xff]  }
 0x18f   :  { %7432 = vmatpush1.bf16.msra.mxu0 %v10727_v27  ;;  %8206 = vmatpush1.bf16.msra.mxu1 %v10730_v28  ;;  %v10828_v27 = vld [vmem:[%s15513_s1 + $0xe64] ss:$16 sps:$4 sm:$0xff]   ;;  %v10831_v28 = vld [vmem:[%s15513_s1 + $0xe6c] ss:$16 sps:$4 sm:$0xff]  }
 0x190   :  { %7433 = vmatprep.subr.bf16.mxu0 %v10735_v29  ;;  %8207 = vmatprep.subr.bf16.mxu1 %v10738_v30  ;;  %v10826_v29 = vld [vmem:[%s15513_s1 + $0xe60] ss:$16 sps:$4 sm:$0xff]   ;;  %v10829_v30 = vld [vmem:[%s15513_s1 + $0xe68] ss:$16 sps:$4 sm:$0xff]  }
 0x193   :  { %7434 = vmatpush1.bf16.msra.mxu0 %v10733_v31  ;;  %8208 = vmatpush1.bf16.msra.mxu1 %v10736_v32  ;;  %v10834_v31 = vld [vmem:[%s15513_s1 + $0xe84] ss:$16 sps:$4 sm:$0xff]   ;;  %v10837_v32 = vld [vmem:[%s15513_s1 + $0xe8c] ss:$16 sps:$4 sm:$0xff]  }
 0x194   :  { %7435 = vmatprep.subr.bf16.mxu0 %v10741_v33  ;;  %8209 = vmatprep.subr.bf16.mxu1 %v10744_v34  ;;  %v10832_v33 = vld [vmem:[%s15513_s1 + $0xe80] ss:$16 sps:$4 sm:$0xff]   ;;  %v10835_v34 = vld [vmem:[%s15513_s1 + $0xe88] ss:$16 sps:$4 sm:$0xff]  }
 0x197   :  { %7436 = vmatpush1.bf16.msra.mxu0 %v10739_v35  ;;  %8210 = vmatpush1.bf16.msra.mxu1 %v10742_v36  ;;  %v10840_v35 = vld [vmem:[%s15513_s1 + $0xea4] ss:$16 sps:$4 sm:$0xff]   ;;  %v10843_v36 = vld [vmem:[%s15513_s1 + $0xeac] ss:$16 sps:$4 sm:$0xff]  }
 0x198   :  { %7437 = vmatprep.subr.bf16.mxu0 %v10747_v37  ;;  %8211 = vmatprep.subr.bf16.mxu1 %v10750_v38  ;;  %v10838_v37 = vld [vmem:[%s15513_s1 + $0xea0] ss:$16 sps:$4 sm:$0xff]   ;;  %v10841_v38 = vld [vmem:[%s15513_s1 + $0xea8] ss:$16 sps:$4 sm:$0xff]  }
 0x19b   :  { %7438 = vmatpush1.bf16.msra.mxu0 %v10745_v39  ;;  %8212 = vmatpush1.bf16.msra.mxu1 %v10748_v40  ;;  %v10846_v39 = vld [vmem:[%s15513_s1 + $0xec4] ss:$16 sps:$4 sm:$0xff]   ;;  %v10849_v40 = vld [vmem:[%s15513_s1 + $0xecc] ss:$16 sps:$4 sm:$0xff]  }
 0x19c   :  { %7439 = vmatprep.subr.bf16.mxu0 %v10753_v41  ;;  %8213 = vmatprep.subr.bf16.mxu1 %v10756_v42  ;;  %v10844_v41 = vld [vmem:[%s15513_s1 + $0xec0] ss:$16 sps:$4 sm:$0xff]   ;;  %v10847_v42 = vld [vmem:[%s15513_s1 + $0xec8] ss:$16 sps:$4 sm:$0xff]  }
 0x19f   :  { %7440 = vmatpush1.bf16.msra.mxu0 %v10751_v43  ;;  %8214 = vmatpush1.bf16.msra.mxu1 %v10754_v44  ;;  %v10852_v43 = vld [vmem:[%s15513_s1 + $0xee4] ss:$16 sps:$4 sm:$0xff]   ;;  %v10855_v44 = vld [vmem:[%s15513_s1 + $0xeec] ss:$16 sps:$4 sm:$0xff]  }
 0x1a0   :  { %7441 = vmatprep.subr.bf16.mxu0 %v10759_v45  ;;  %8215 = vmatprep.subr.bf16.mxu1 %v10762_v46  ;;  %v10850_v45 = vld [vmem:[%s15513_s1 + $0xee0] ss:$16 sps:$4 sm:$0xff]   ;;  %v10853_v46 = vld [vmem:[%s15513_s1 + $0xee8] ss:$16 sps:$4 sm:$0xff]  }
 0x1a3   :  { %7442 = vmatpush1.bf16.msra.mxu0 %v10757_v47  ;;  %8216 = vmatpush1.bf16.msra.mxu1 %v10760_v48  ;;  %v10858_v47 = vld [vmem:[%s15513_s1 + $0xf04] ss:$16 sps:$4 sm:$0xff]   ;;  %v10861_v48 = vld [vmem:[%s15513_s1 + $0xf0c] ss:$16 sps:$4 sm:$0xff]  }
 0x1a4   :  { %7443 = vmatprep.subr.bf16.mxu0 %v10765_v49  ;;  %8217 = vmatprep.subr.bf16.mxu1 %v10768_v50  ;;  %v10856_v49 = vld [vmem:[%s15513_s1 + $0xf00] ss:$16 sps:$4 sm:$0xff]   ;;  %v10859_v50 = vld [vmem:[%s15513_s1 + $0xf08] ss:$16 sps:$4 sm:$0xff]  }
 0x1a7   :  { %7444 = vmatpush1.bf16.msra.mxu0 %v10763_v51  ;;  %8218 = vmatpush1.bf16.msra.mxu1 %v10766_v52  ;;  %v10864_v51 = vld [vmem:[%s15513_s1 + $0xf24] ss:$16 sps:$4 sm:$0xff]   ;;  %v10867_v52 = vld [vmem:[%s15513_s1 + $0xf2c] ss:$16 sps:$4 sm:$0xff]  }
 0x1a8   :  { %7445 = vmatprep.subr.bf16.mxu0 %v10771_v53  ;;  %8219 = vmatprep.subr.bf16.mxu1 %v10774_v54  ;;  %v10862_v53 = vld [vmem:[%s15513_s1 + $0xf20] ss:$16 sps:$4 sm:$0xff]   ;;  %v10865_v54 = vld [vmem:[%s15513_s1 + $0xf28] ss:$16 sps:$4 sm:$0xff]  }
 0x1ab   :  { %7446 = vmatpush1.bf16.msra.mxu0 %v10769_v55  ;;  %8220 = vmatpush1.bf16.msra.mxu1 %v10772_v56  ;;  %v10870_v55 = vld [vmem:[%s15513_s1 + $0xf44] ss:$16 sps:$4 sm:$0xff]   ;;  %v10873_v56 = vld [vmem:[%s15513_s1 + $0xf4c] ss:$16 sps:$4 sm:$0xff]  }
 0x1ac   :  { %7447 = vmatprep.subr.bf16.mxu0 %v10777_v57  ;;  %8221 = vmatprep.subr.bf16.mxu1 %v10780_v58  ;;  %v10868_v57 = vld [vmem:[%s15513_s1 + $0xf40] ss:$16 sps:$4 sm:$0xff]   ;;  %v10871_v58 = vld [vmem:[%s15513_s1 + $0xf48] ss:$16 sps:$4 sm:$0xff]  }
 0x1af   :  { %7448 = vmatpush1.bf16.msra.mxu0 %v10775_v59  ;;  %8222 = vmatpush1.bf16.msra.mxu1 %v10778_v60  ;;  %v10876_v59 = vld [vmem:[%s15513_s1 + $0xf64] ss:$16 sps:$4 sm:$0xff]   ;;  %v10879_v60 = vld [vmem:[%s15513_s1 + $0xf6c] ss:$16 sps:$4 sm:$0xff]  }
 0x1b0   :  { %7449 = vmatprep.subr.bf16.mxu0 %v10783_v61  ;;  %8223 = vmatprep.subr.bf16.mxu1 %v10786_v62  ;;  %v10874_v61 = vld [vmem:[%s15513_s1 + $0xf60] ss:$16 sps:$4 sm:$0xff]   ;;  %v10877_v62 = vld [vmem:[%s15513_s1 + $0xf68] ss:$16 sps:$4 sm:$0xff]  }
 0x1b3   :  { %7450 = vmatpush1.bf16.msra.mxu0 %v10781_v63  ;;  %8224 = vmatpush1.bf16.msra.mxu1 %v10784_v0  ;;  %v10882_v63 = vld [vmem:[%s15513_s1 + $0xf84] ss:$16 sps:$4 sm:$0xff]   ;;  %v10885_v0 = vld [vmem:[%s15513_s1 + $0xf8c] ss:$16 sps:$4 sm:$0xff]  }
 0x1b4   :  { %7451 = vmatprep.subr.bf16.mxu0 %v10789_v1  ;;  %8225 = vmatprep.subr.bf16.mxu1 %v10792_v2  ;;  %v10880_v1 = vld [vmem:[%s15513_s1 + $0xf80] ss:$16 sps:$4 sm:$0xff]   ;;  %v10883_v2 = vld [vmem:[%s15513_s1 + $0xf88] ss:$16 sps:$4 sm:$0xff]  }
 0x1b7   :  { %7452 = vmatpush1.bf16.msra.mxu0 %v10787_v3  ;;  %8226 = vmatpush1.bf16.msra.mxu1 %v10790_v4  ;;  %v10888_v3 = vld [vmem:[%s15513_s1 + $0xfa4] ss:$16 sps:$4 sm:$0xff]   ;;  %v10891_v4 = vld [vmem:[%s15513_s1 + $0xfac] ss:$16 sps:$4 sm:$0xff]  }
 0x1b8   :  { %7453 = vmatprep.subr.bf16.mxu0 %v10795_v5  ;;  %8227 = vmatprep.subr.bf16.mxu1 %v10798_v6  ;;  %v10886_v5 = vld [vmem:[%s15513_s1 + $0xfa0] ss:$16 sps:$4 sm:$0xff]   ;;  %v10889_v6 = vld [vmem:[%s15513_s1 + $0xfa8] ss:$16 sps:$4 sm:$0xff]  }
 0x1bb   :  { %7454 = vmatpush1.bf16.msra.mxu0 %v10793_v7  ;;  %8228 = vmatpush1.bf16.msra.mxu1 %v10796_v8  ;;  %v10894_v7 = vld [vmem:[%s15513_s1 + $0xfc4] ss:$16 sps:$4 sm:$0xff]   ;;  %v10897_v8 = vld [vmem:[%s15513_s1 + $0xfcc] ss:$16 sps:$4 sm:$0xff]  }
 0x1bc   :  { %7455 = vmatprep.subr.bf16.mxu0 %v10801_v9  ;;  %8229 = vmatprep.subr.bf16.mxu1 %v10804_v10  ;;  %v10892_v9 = vld [vmem:[%s15513_s1 + $0xfc0] ss:$16 sps:$4 sm:$0xff]   ;;  %v10895_v10 = vld [vmem:[%s15513_s1 + $0xfc8] ss:$16 sps:$4 sm:$0xff]  }
 0x1bf   :  { %7456 = vmatpush1.bf16.msra.mxu0 %v10799_v11  ;;  %8230 = vmatpush1.bf16.msra.mxu1 %v10802_v12  ;;  %v10900_v11 = vld [vmem:[%s15513_s1 + $0xfe4] ss:$16 sps:$4 sm:$0xff]   ;;  %v10903_v12 = vld [vmem:[%s15513_s1 + $0xfec] ss:$16 sps:$4 sm:$0xff]  }
 0x1c0   :  { %7468 = vmatprep.subr.bf16.mxu0 %v10810_v14  ;;  %8242 = vmatprep.subr.bf16.mxu1 %v10813_v15  ;;  %v10901_v14 = vld [vmem:[%s15513_s1 + $0xfe8] ss:$16 sps:$4 sm:$0xff]  }
 0x1c1   :  { %v10904_v15 = vld [vmem:[%s15514_s0 + $0x38] ss:$144 sps:$4 sm:$0xff]  }
 0x1c2   :  { %7458 = vmatmul.mubr.bf16.vlgmr.msra.gmra.mrb[0].mxu0 %v10805_v13  ;;  %8232 = vmatmul.mubr.bf16.vlgmr.msra.gmra.mrb[0].mxu1 %v10805_v13  ;;  %v10898_v13 = vld [vmem:[%s15513_s1 + $0xfe0] ss:$16 sps:$4 sm:$0xff]  }
 0x1c3   :  { %7469 = vmatpush1.bf16.msra.mxu0 %v10808_v16  ;;  %8243 = vmatpush1.bf16.msra.mxu1 %v10811_v17  ;;  %v10909_v16 = vld [vmem:[%s15513_s1 + $0x1004] ss:$16 sps:$4 sm:$0xff]   ;;  %v10912_v17 = vld [vmem:[%s15513_s1 + $0x100c] ss:$16 sps:$4 sm:$0xff]  }
 0x1c4   :  { %7470 = vmatprep.subr.bf16.mxu0 %v10816_v18  ;;  %8244 = vmatprep.subr.bf16.mxu1 %v10819_v19  ;;  %v10907_v18 = vld [vmem:[%s15513_s1 + $0x1000] ss:$16 sps:$4 sm:$0xff]   ;;  %v10910_v19 = vld [vmem:[%s15513_s1 + $0x1008] ss:$16 sps:$4 sm:$0xff]  }
 0x1c5   :  { %7500 = vmatprep.mubr.bf16.mxu0 %v10906_v20  ;;  %8274 = vmatprep.mubr.bf16.mxu1 %v10906_v20  ;;  %v10915_v20 = vld [vmem:[%s15513_s1 + $0x1024] ss:$16 sps:$4 sm:$0xff]  }
 0x1c7   :  { %7471 = vmatpush1.bf16.msra.mxu0 %v10814_v21  ;;  %8245 = vmatpush1.bf16.msra.mxu1 %v10817_v22  ;;  %v10918_v21 = vld [vmem:[%s15513_s1 + $0x102c] ss:$16 sps:$4 sm:$0xff]   ;;  %v11005_v22 = vld [vmem:[%s15514_s0 + $0x44] ss:$144 sps:$4 sm:$0xff]  }
 0x1c8   :  { %7472 = vmatprep.subr.bf16.mxu0 %v10822_v23  ;;  %8246 = vmatprep.subr.bf16.mxu1 %v10825_v24  ;;  %v10913_v23 = vld [vmem:[%s15513_s1 + $0x1020] ss:$16 sps:$4 sm:$0xff]   ;;  %v10916_v24 = vld [vmem:[%s15513_s1 + $0x1028] ss:$16 sps:$4 sm:$0xff]  }
 0x1cb   :  { %7473 = vmatpush1.bf16.msra.mxu0 %v10820_v25  ;;  %8247 = vmatpush1.bf16.msra.mxu1 %v10823_v26  ;;  %v10921_v25 = vld [vmem:[%s15513_s1 + $0x1044] ss:$16 sps:$4 sm:$0xff]   ;;  %v10924_v26 = vld [vmem:[%s15513_s1 + $0x104c] ss:$16 sps:$4 sm:$0xff]  }
 0x1cc   :  { %7474 = vmatprep.subr.bf16.mxu0 %v10828_v27  ;;  %8248 = vmatprep.subr.bf16.mxu1 %v10831_v28  ;;  %v10919_v27 = vld [vmem:[%s15513_s1 + $0x1040] ss:$16 sps:$4 sm:$0xff]   ;;  %v10922_v28 = vld [vmem:[%s15513_s1 + $0x1048] ss:$16 sps:$4 sm:$0xff]  }
 0x1cf   :  { %7475 = vmatpush1.bf16.msra.mxu0 %v10826_v29  ;;  %8249 = vmatpush1.bf16.msra.mxu1 %v10829_v30  ;;  %v10927_v29 = vld [vmem:[%s15513_s1 + $0x1064] ss:$16 sps:$4 sm:$0xff]   ;;  %v10930_v30 = vld [vmem:[%s15513_s1 + $0x106c] ss:$16 sps:$4 sm:$0xff]  }
 0x1d0   :  { %7476 = vmatprep.subr.bf16.mxu0 %v10834_v31  ;;  %8250 = vmatprep.subr.bf16.mxu1 %v10837_v32  ;;  %v10925_v31 = vld [vmem:[%s15513_s1 + $0x1060] ss:$16 sps:$4 sm:$0xff]   ;;  %v10928_v32 = vld [vmem:[%s15513_s1 + $0x1068] ss:$16 sps:$4 sm:$0xff]  }
 0x1d3   :  { %7477 = vmatpush1.bf16.msra.mxu0 %v10832_v33  ;;  %8251 = vmatpush1.bf16.msra.mxu1 %v10835_v34  ;;  %v10933_v33 = vld [vmem:[%s15513_s1 + $0x1084] ss:$16 sps:$4 sm:$0xff]   ;;  %v10936_v34 = vld [vmem:[%s15513_s1 + $0x108c] ss:$16 sps:$4 sm:$0xff]  }
 0x1d4   :  { %7478 = vmatprep.subr.bf16.mxu0 %v10840_v35  ;;  %8252 = vmatprep.subr.bf16.mxu1 %v10843_v36  ;;  %v10931_v35 = vld [vmem:[%s15513_s1 + $0x1080] ss:$16 sps:$4 sm:$0xff]   ;;  %v10934_v36 = vld [vmem:[%s15513_s1 + $0x1088] ss:$16 sps:$4 sm:$0xff]  }
 0x1d7   :  { %7479 = vmatpush1.bf16.msra.mxu0 %v10838_v37  ;;  %8253 = vmatpush1.bf16.msra.mxu1 %v10841_v38  ;;  %v10939_v37 = vld [vmem:[%s15513_s1 + $0x10a4] ss:$16 sps:$4 sm:$0xff]   ;;  %v10942_v38 = vld [vmem:[%s15513_s1 + $0x10ac] ss:$16 sps:$4 sm:$0xff]  }
 0x1d8   :  { %7480 = vmatprep.subr.bf16.mxu0 %v10846_v39  ;;  %8254 = vmatprep.subr.bf16.mxu1 %v10849_v40  ;;  %v10937_v39 = vld [vmem:[%s15513_s1 + $0x10a0] ss:$16 sps:$4 sm:$0xff]   ;;  %v10940_v40 = vld [vmem:[%s15513_s1 + $0x10a8] ss:$16 sps:$4 sm:$0xff]  }
 0x1db   :  { %7481 = vmatpush1.bf16.msra.mxu0 %v10844_v41  ;;  %8255 = vmatpush1.bf16.msra.mxu1 %v10847_v42  ;;  %v10945_v41 = vld [vmem:[%s15513_s1 + $0x10c4] ss:$16 sps:$4 sm:$0xff]   ;;  %v10948_v42 = vld [vmem:[%s15513_s1 + $0x10cc] ss:$16 sps:$4 sm:$0xff]  }
 0x1dc   :  { %7482 = vmatprep.subr.bf16.mxu0 %v10852_v43  ;;  %8256 = vmatprep.subr.bf16.mxu1 %v10855_v44  ;;  %v10943_v43 = vld [vmem:[%s15513_s1 + $0x10c0] ss:$16 sps:$4 sm:$0xff]   ;;  %v10946_v44 = vld [vmem:[%s15513_s1 + $0x10c8] ss:$16 sps:$4 sm:$0xff]  }
 0x1df   :  { %7483 = vmatpush1.bf16.msra.mxu0 %v10850_v45  ;;  %8257 = vmatpush1.bf16.msra.mxu1 %v10853_v46  ;;  %v10951_v45 = vld [vmem:[%s15513_s1 + $0x10e4] ss:$16 sps:$4 sm:$0xff]   ;;  %v10954_v46 = vld [vmem:[%s15513_s1 + $0x10ec] ss:$16 sps:$4 sm:$0xff]  }
 0x1e0   :  { %7484 = vmatprep.subr.bf16.mxu0 %v10858_v47  ;;  %8258 = vmatprep.subr.bf16.mxu1 %v10861_v48  ;;  %v10949_v47 = vld [vmem:[%s15513_s1 + $0x10e0] ss:$16 sps:$4 sm:$0xff]   ;;  %v10952_v48 = vld [vmem:[%s15513_s1 + $0x10e8] ss:$16 sps:$4 sm:$0xff]  }
 0x1e3   :  { %7485 = vmatpush1.bf16.msra.mxu0 %v10856_v49  ;;  %8259 = vmatpush1.bf16.msra.mxu1 %v10859_v50  ;;  %v10957_v49 = vld [vmem:[%s15513_s1 + $0x1104] ss:$16 sps:$4 sm:$0xff]   ;;  %v10960_v50 = vld [vmem:[%s15513_s1 + $0x110c] ss:$16 sps:$4 sm:$0xff]  }
 0x1e4   :  { %7486 = vmatprep.subr.bf16.mxu0 %v10864_v51  ;;  %8260 = vmatprep.subr.bf16.mxu1 %v10867_v52  ;;  %v10955_v51 = vld [vmem:[%s15513_s1 + $0x1100] ss:$16 sps:$4 sm:$0xff]   ;;  %v10958_v52 = vld [vmem:[%s15513_s1 + $0x1108] ss:$16 sps:$4 sm:$0xff]  }
 0x1e7   :  { %7487 = vmatpush1.bf16.msra.mxu0 %v10862_v53  ;;  %8261 = vmatpush1.bf16.msra.mxu1 %v10865_v54  ;;  %v10963_v53 = vld [vmem:[%s15513_s1 + $0x1124] ss:$16 sps:$4 sm:$0xff]   ;;  %v10966_v54 = vld [vmem:[%s15513_s1 + $0x112c] ss:$16 sps:$4 sm:$0xff]  }
 0x1e8   :  { %7488 = vmatprep.subr.bf16.mxu0 %v10870_v55  ;;  %8262 = vmatprep.subr.bf16.mxu1 %v10873_v56  ;;  %v10961_v55 = vld [vmem:[%s15513_s1 + $0x1120] ss:$16 sps:$4 sm:$0xff]   ;;  %v10964_v56 = vld [vmem:[%s15513_s1 + $0x1128] ss:$16 sps:$4 sm:$0xff]  }
 0x1eb   :  { %7489 = vmatpush1.bf16.msra.mxu0 %v10868_v57  ;;  %8263 = vmatpush1.bf16.msra.mxu1 %v10871_v58  ;;  %v10969_v57 = vld [vmem:[%s15513_s1 + $0x1144] ss:$16 sps:$4 sm:$0xff]   ;;  %v10972_v58 = vld [vmem:[%s15513_s1 + $0x114c] ss:$16 sps:$4 sm:$0xff]  }
 0x1ec   :  { %7490 = vmatprep.subr.bf16.mxu0 %v10876_v59  ;;  %8264 = vmatprep.subr.bf16.mxu1 %v10879_v60  ;;  %v10967_v59 = vld [vmem:[%s15513_s1 + $0x1140] ss:$16 sps:$4 sm:$0xff]   ;;  %v10970_v60 = vld [vmem:[%s15513_s1 + $0x1148] ss:$16 sps:$4 sm:$0xff]  }
 0x1ef   :  { %7491 = vmatpush1.bf16.msra.mxu0 %v10874_v61  ;;  %8265 = vmatpush1.bf16.msra.mxu1 %v10877_v62  ;;  %v10975_v61 = vld [vmem:[%s15513_s1 + $0x1164] ss:$16 sps:$4 sm:$0xff]   ;;  %v10978_v62 = vld [vmem:[%s15513_s1 + $0x116c] ss:$16 sps:$4 sm:$0xff]  }
 0x1f0   :  { %7492 = vmatprep.subr.bf16.mxu0 %v10882_v63  ;;  %8266 = vmatprep.subr.bf16.mxu1 %v10885_v0  ;;  %v10973_v63 = vld [vmem:[%s15513_s1 + $0x1160] ss:$16 sps:$4 sm:$0xff]   ;;  %v10976_v0 = vld [vmem:[%s15513_s1 + $0x1168] ss:$16 sps:$4 sm:$0xff]  }
 0x1f3   :  { %7493 = vmatpush1.bf16.msra.mxu0 %v10880_v1  ;;  %8267 = vmatpush1.bf16.msra.mxu1 %v10883_v2  ;;  %v10981_v1 = vld [vmem:[%s15513_s1 + $0x1184] ss:$16 sps:$4 sm:$0xff]   ;;  %v10984_v2 = vld [vmem:[%s15513_s1 + $0x118c] ss:$16 sps:$4 sm:$0xff]  }
 0x1f4   :  { %7494 = vmatprep.subr.bf16.mxu0 %v10888_v3  ;;  %8268 = vmatprep.subr.bf16.mxu1 %v10891_v4  ;;  %v10979_v3 = vld [vmem:[%s15513_s1 + $0x1180] ss:$16 sps:$4 sm:$0xff]   ;;  %v10982_v4 = vld [vmem:[%s15513_s1 + $0x1188] ss:$16 sps:$4 sm:$0xff]  }
 0x1f7   :  { %7495 = vmatpush1.bf16.msra.mxu0 %v10886_v5  ;;  %8269 = vmatpush1.bf16.msra.mxu1 %v10889_v6  ;;  %v10987_v5 = vld [vmem:[%s15513_s1 + $0x11a4] ss:$16 sps:$4 sm:$0xff]   ;;  %v10990_v6 = vld [vmem:[%s15513_s1 + $0x11ac] ss:$16 sps:$4 sm:$0xff]  }
 0x1f8   :  { %7496 = vmatprep.subr.bf16.mxu0 %v10894_v7  ;;  %8270 = vmatprep.subr.bf16.mxu1 %v10897_v8  ;;  %v10985_v7 = vld [vmem:[%s15513_s1 + $0x11a0] ss:$16 sps:$4 sm:$0xff]   ;;  %v10988_v8 = vld [vmem:[%s15513_s1 + $0x11a8] ss:$16 sps:$4 sm:$0xff]  }
 0x1fb   :  { %7497 = vmatpush1.bf16.msra.mxu0 %v10892_v9  ;;  %8271 = vmatpush1.bf16.msra.mxu1 %v10895_v10  ;;  %v10993_v9 = vld [vmem:[%s15513_s1 + $0x11c4] ss:$16 sps:$4 sm:$0xff]   ;;  %v10996_v10 = vld [vmem:[%s15513_s1 + $0x11cc] ss:$16 sps:$4 sm:$0xff]  }
 0x1fc   :  { %7498 = vmatprep.subr.bf16.mxu0 %v10900_v11  ;;  %8272 = vmatprep.subr.bf16.mxu1 %v10903_v12  ;;  %v10991_v11 = vld [vmem:[%s15513_s1 + $0x11c0] ss:$16 sps:$4 sm:$0xff]   ;;  %v10994_v12 = vld [vmem:[%s15513_s1 + $0x11c8] ss:$16 sps:$4 sm:$0xff]  }
 0x1ff   :  { %7499 = vmatpush1.bf16.msra.mxu0 %v10898_v13  ;;  %8273 = vmatpush1.bf16.msra.mxu1 %v10901_v14  ;;  %v10999_v13 = vld [vmem:[%s15513_s1 + $0x11e4] ss:$16 sps:$4 sm:$0xff]   ;;  %v11002_v14 = vld [vmem:[%s15513_s1 + $0x11ec] ss:$16 sps:$4 sm:$0xff]  }
 0x200   :  { %7511 = vmatprep.subr.bf16.mxu0 %v10909_v16  ;;  %8285 = vmatprep.subr.bf16.mxu1 %v10912_v17  ;;  %v11000_v16 = vld [vmem:[%s15513_s1 + $0x11e8] ss:$16 sps:$4 sm:$0xff]   ;;  %v11003_v17 = vld [vmem:[%s15514_s0 + $0x40] ss:$144 sps:$4 sm:$0xff]  }
 0x202   :  { %7501 = vmatmul.mubr.bf16.vlgmr.msra.gmra.mrb[0].mxu0 %v10904_v15  ;;  %8275 = vmatmul.mubr.bf16.vlgmr.msra.gmra.mrb[0].mxu1 %v10904_v15  ;;  %v10997_v15 = vld [vmem:[%s15513_s1 + $0x11e0] ss:$16 sps:$4 sm:$0xff]  }
 0x203   :  { %7512 = vmatpush1.bf16.msra.mxu0 %v10907_v18  ;;  %8286 = vmatpush1.bf16.msra.mxu1 %v10910_v19  ;;  %v11008_v18 = vld [vmem:[%s15513_s1 + $0x1204] ss:$16 sps:$4 sm:$0xff]   ;;  %v11011_v19 = vld [vmem:[%s15513_s1 + $0x120c] ss:$16 sps:$4 sm:$0xff]  }
 0x204   :  { %7513 = vmatprep.subr.bf16.mxu0 %v10915_v20  ;;  %8287 = vmatprep.subr.bf16.mxu1 %v10918_v21  ;;  %v11006_v20 = vld [vmem:[%s15513_s1 + $0x1200] ss:$16 sps:$4 sm:$0xff]   ;;  %v11009_v21 = vld [vmem:[%s15513_s1 + $0x1208] ss:$16 sps:$4 sm:$0xff]  }
 0x205   :  { %7543 = vmatprep.mubr.bf16.mxu0 %v11005_v22  ;;  %8317 = vmatprep.mubr.bf16.mxu1 %v11005_v22  ;;  %v11014_v22 = vld [vmem:[%s15513_s1 + $0x1224] ss:$16 sps:$4 sm:$0xff]  }
 0x207   :  { %7514 = vmatpush1.bf16.msra.mxu0 %v10913_v23  ;;  %8288 = vmatpush1.bf16.msra.mxu1 %v10916_v24  ;;  %v11017_v23 = vld [vmem:[%s15513_s1 + $0x122c] ss:$16 sps:$4 sm:$0xff]  }
 0x208   :  { %7515 = vmatprep.subr.bf16.mxu0 %v10921_v25  ;;  %8289 = vmatprep.subr.bf16.mxu1 %v10924_v26  ;;  %v11104_v24 = vld [vmem:[%s15514_s0 + $0x4c] ss:$144 sps:$4 sm:$0xff]   ;;  %v11012_v25 = vld [vmem:[%s15513_s1 + $0x1220] ss:$16 sps:$4 sm:$0xff]   ;;  %v11015_v26 = vld [vmem:[%s15513_s1 + $0x1228] ss:$16 sps:$4 sm:$0xff]  }
 0x20b   :  { %7516 = vmatpush1.bf16.msra.mxu0 %v10919_v27  ;;  %8290 = vmatpush1.bf16.msra.mxu1 %v10922_v28  ;;  %v11020_v27 = vld [vmem:[%s15513_s1 + $0x1244] ss:$16 sps:$4 sm:$0xff]   ;;  %v11023_v28 = vld [vmem:[%s15513_s1 + $0x124c] ss:$16 sps:$4 sm:$0xff]  }
 0x20c   :  { %7517 = vmatprep.subr.bf16.mxu0 %v10927_v29  ;;  %8291 = vmatprep.subr.bf16.mxu1 %v10930_v30  ;;  %v11018_v29 = vld [vmem:[%s15513_s1 + $0x1240] ss:$16 sps:$4 sm:$0xff]   ;;  %v11021_v30 = vld [vmem:[%s15513_s1 + $0x1248] ss:$16 sps:$4 sm:$0xff]  }
 0x20f   :  { %7518 = vmatpush1.bf16.msra.mxu0 %v10925_v31  ;;  %8292 = vmatpush1.bf16.msra.mxu1 %v10928_v32  ;;  %v11026_v31 = vld [vmem:[%s15513_s1 + $0x1264] ss:$16 sps:$4 sm:$0xff]   ;;  %v11029_v32 = vld [vmem:[%s15513_s1 + $0x126c] ss:$16 sps:$4 sm:$0xff]  }
 0x210   :  { %7519 = vmatprep.subr.bf16.mxu0 %v10933_v33  ;;  %8293 = vmatprep.subr.bf16.mxu1 %v10936_v34  ;;  %v11024_v33 = vld [vmem:[%s15513_s1 + $0x1260] ss:$16 sps:$4 sm:$0xff]   ;;  %v11027_v34 = vld [vmem:[%s15513_s1 + $0x1268] ss:$16 sps:$4 sm:$0xff]  }
 0x213   :  { %7520 = vmatpush1.bf16.msra.mxu0 %v10931_v35  ;;  %8294 = vmatpush1.bf16.msra.mxu1 %v10934_v36  ;;  %v11032_v35 = vld [vmem:[%s15513_s1 + $0x1284] ss:$16 sps:$4 sm:$0xff]   ;;  %v11035_v36 = vld [vmem:[%s15513_s1 + $0x128c] ss:$16 sps:$4 sm:$0xff]  }
 0x214   :  { %7521 = vmatprep.subr.bf16.mxu0 %v10939_v37  ;;  %8295 = vmatprep.subr.bf16.mxu1 %v10942_v38  ;;  %v11030_v37 = vld [vmem:[%s15513_s1 + $0x1280] ss:$16 sps:$4 sm:$0xff]   ;;  %v11033_v38 = vld [vmem:[%s15513_s1 + $0x1288] ss:$16 sps:$4 sm:$0xff]  }
 0x217   :  { %7522 = vmatpush1.bf16.msra.mxu0 %v10937_v39  ;;  %8296 = vmatpush1.bf16.msra.mxu1 %v10940_v40  ;;  %v11038_v39 = vld [vmem:[%s15513_s1 + $0x12a4] ss:$16 sps:$4 sm:$0xff]   ;;  %v11041_v40 = vld [vmem:[%s15513_s1 + $0x12ac] ss:$16 sps:$4 sm:$0xff]  }
 0x218   :  { %7523 = vmatprep.subr.bf16.mxu0 %v10945_v41  ;;  %8297 = vmatprep.subr.bf16.mxu1 %v10948_v42  ;;  %v11036_v41 = vld [vmem:[%s15513_s1 + $0x12a0] ss:$16 sps:$4 sm:$0xff]   ;;  %v11039_v42 = vld [vmem:[%s15513_s1 + $0x12a8] ss:$16 sps:$4 sm:$0xff]  }
 0x21b   :  { %7524 = vmatpush1.bf16.msra.mxu0 %v10943_v43  ;;  %8298 = vmatpush1.bf16.msra.mxu1 %v10946_v44  ;;  %v11044_v43 = vld [vmem:[%s15513_s1 + $0x12c4] ss:$16 sps:$4 sm:$0xff]   ;;  %v11047_v44 = vld [vmem:[%s15513_s1 + $0x12cc] ss:$16 sps:$4 sm:$0xff]  }
 0x21c   :  { %7525 = vmatprep.subr.bf16.mxu0 %v10951_v45  ;;  %8299 = vmatprep.subr.bf16.mxu1 %v10954_v46  ;;  %v11042_v45 = vld [vmem:[%s15513_s1 + $0x12c0] ss:$16 sps:$4 sm:$0xff]   ;;  %v11045_v46 = vld [vmem:[%s15513_s1 + $0x12c8] ss:$16 sps:$4 sm:$0xff]  }
 0x21f   :  { %7526 = vmatpush1.bf16.msra.mxu0 %v10949_v47  ;;  %8300 = vmatpush1.bf16.msra.mxu1 %v10952_v48  ;;  %v11050_v47 = vld [vmem:[%s15513_s1 + $0x12e4] ss:$16 sps:$4 sm:$0xff]   ;;  %v11053_v48 = vld [vmem:[%s15513_s1 + $0x12ec] ss:$16 sps:$4 sm:$0xff]  }
 0x220   :  { %7527 = vmatprep.subr.bf16.mxu0 %v10957_v49  ;;  %8301 = vmatprep.subr.bf16.mxu1 %v10960_v50  ;;  %v11048_v49 = vld [vmem:[%s15513_s1 + $0x12e0] ss:$16 sps:$4 sm:$0xff]   ;;  %v11051_v50 = vld [vmem:[%s15513_s1 + $0x12e8] ss:$16 sps:$4 sm:$0xff]  }
 0x223   :  { %7528 = vmatpush1.bf16.msra.mxu0 %v10955_v51  ;;  %8302 = vmatpush1.bf16.msra.mxu1 %v10958_v52  ;;  %v11056_v51 = vld [vmem:[%s15513_s1 + $0x1304] ss:$16 sps:$4 sm:$0xff]   ;;  %v11059_v52 = vld [vmem:[%s15513_s1 + $0x130c] ss:$16 sps:$4 sm:$0xff]  }
 0x224   :  { %7529 = vmatprep.subr.bf16.mxu0 %v10963_v53  ;;  %8303 = vmatprep.subr.bf16.mxu1 %v10966_v54  ;;  %v11054_v53 = vld [vmem:[%s15513_s1 + $0x1300] ss:$16 sps:$4 sm:$0xff]   ;;  %v11057_v54 = vld [vmem:[%s15513_s1 + $0x1308] ss:$16 sps:$4 sm:$0xff]  }
 0x227   :  { %7530 = vmatpush1.bf16.msra.mxu0 %v10961_v55  ;;  %8304 = vmatpush1.bf16.msra.mxu1 %v10964_v56  ;;  %v11062_v55 = vld [vmem:[%s15513_s1 + $0x1324] ss:$16 sps:$4 sm:$0xff]   ;;  %v11065_v56 = vld [vmem:[%s15513_s1 + $0x132c] ss:$16 sps:$4 sm:$0xff]  }
 0x228   :  { %7531 = vmatprep.subr.bf16.mxu0 %v10969_v57  ;;  %8305 = vmatprep.subr.bf16.mxu1 %v10972_v58  ;;  %v11060_v57 = vld [vmem:[%s15513_s1 + $0x1320] ss:$16 sps:$4 sm:$0xff]   ;;  %v11063_v58 = vld [vmem:[%s15513_s1 + $0x1328] ss:$16 sps:$4 sm:$0xff]  }
 0x22b   :  { %7532 = vmatpush1.bf16.msra.mxu0 %v10967_v59  ;;  %8306 = vmatpush1.bf16.msra.mxu1 %v10970_v60  ;;  %v11068_v59 = vld [vmem:[%s15513_s1 + $0x1344] ss:$16 sps:$4 sm:$0xff]   ;;  %v11071_v60 = vld [vmem:[%s15513_s1 + $0x134c] ss:$16 sps:$4 sm:$0xff]  }
 0x22c   :  { %7533 = vmatprep.subr.bf16.mxu0 %v10975_v61  ;;  %8307 = vmatprep.subr.bf16.mxu1 %v10978_v62  ;;  %v11066_v61 = vld [vmem:[%s15513_s1 + $0x1340] ss:$16 sps:$4 sm:$0xff]   ;;  %v11069_v62 = vld [vmem:[%s15513_s1 + $0x1348] ss:$16 sps:$4 sm:$0xff]  }
 0x22f   :  { %7534 = vmatpush1.bf16.msra.mxu0 %v10973_v63  ;;  %8308 = vmatpush1.bf16.msra.mxu1 %v10976_v0  ;;  %v11074_v63 = vld [vmem:[%s15513_s1 + $0x1364] ss:$16 sps:$4 sm:$0xff]   ;;  %v11077_v0 = vld [vmem:[%s15513_s1 + $0x136c] ss:$16 sps:$4 sm:$0xff]  }
 0x230   :  { %7535 = vmatprep.subr.bf16.mxu0 %v10981_v1  ;;  %8309 = vmatprep.subr.bf16.mxu1 %v10984_v2  ;;  %v11072_v1 = vld [vmem:[%s15513_s1 + $0x1360] ss:$16 sps:$4 sm:$0xff]   ;;  %v11075_v2 = vld [vmem:[%s15513_s1 + $0x1368] ss:$16 sps:$4 sm:$0xff]  }
 0x233   :  { %7536 = vmatpush1.bf16.msra.mxu0 %v10979_v3  ;;  %8310 = vmatpush1.bf16.msra.mxu1 %v10982_v4  ;;  %v11080_v3 = vld [vmem:[%s15513_s1 + $0x1384] ss:$16 sps:$4 sm:$0xff]   ;;  %v11083_v4 = vld [vmem:[%s15513_s1 + $0x138c] ss:$16 sps:$4 sm:$0xff]  }
 0x234   :  { %7537 = vmatprep.subr.bf16.mxu0 %v10987_v5  ;;  %8311 = vmatprep.subr.bf16.mxu1 %v10990_v6  ;;  %v11078_v5 = vld [vmem:[%s15513_s1 + $0x1380] ss:$16 sps:$4 sm:$0xff]   ;;  %v11081_v6 = vld [vmem:[%s15513_s1 + $0x1388] ss:$16 sps:$4 sm:$0xff]  }
 0x237   :  { %7538 = vmatpush1.bf16.msra.mxu0 %v10985_v7  ;;  %8312 = vmatpush1.bf16.msra.mxu1 %v10988_v8  ;;  %v11086_v7 = vld [vmem:[%s15513_s1 + $0x13a4] ss:$16 sps:$4 sm:$0xff]   ;;  %v11089_v8 = vld [vmem:[%s15513_s1 + $0x13ac] ss:$16 sps:$4 sm:$0xff]  }
 0x238   :  { %7539 = vmatprep.subr.bf16.mxu0 %v10993_v9  ;;  %8313 = vmatprep.subr.bf16.mxu1 %v10996_v10  ;;  %v11084_v9 = vld [vmem:[%s15513_s1 + $0x13a0] ss:$16 sps:$4 sm:$0xff]   ;;  %v11087_v10 = vld [vmem:[%s15513_s1 + $0x13a8] ss:$16 sps:$4 sm:$0xff]  }
 0x23b   :  { %7540 = vmatpush1.bf16.msra.mxu0 %v10991_v11  ;;  %8314 = vmatpush1.bf16.msra.mxu1 %v10994_v12  ;;  %v11092_v11 = vld [vmem:[%s15513_s1 + $0x13c4] ss:$16 sps:$4 sm:$0xff]   ;;  %v11095_v12 = vld [vmem:[%s15513_s1 + $0x13cc] ss:$16 sps:$4 sm:$0xff]  }
 0x23c   :  { %7541 = vmatprep.subr.bf16.mxu0 %v10999_v13  ;;  %8315 = vmatprep.subr.bf16.mxu1 %v11002_v14  ;;  %v11090_v13 = vld [vmem:[%s15513_s1 + $0x13c0] ss:$16 sps:$4 sm:$0xff]   ;;  %v11093_v14 = vld [vmem:[%s15513_s1 + $0x13c8] ss:$16 sps:$4 sm:$0xff]  }
 0x23f   :  { %7542 = vmatpush1.bf16.msra.mxu0 %v10997_v15  ;;  %8316 = vmatpush1.bf16.msra.mxu1 %v11000_v16  ;;  %v11098_v15 = vld [vmem:[%s15513_s1 + $0x13e4] ss:$16 sps:$4 sm:$0xff]   ;;  %v11101_v16 = vld [vmem:[%s15513_s1 + $0x13ec] ss:$16 sps:$4 sm:$0xff]  }
 0x240   :  { %7554 = vmatprep.subr.bf16.mxu0 %v11008_v18  ;;  %8328 = vmatprep.subr.bf16.mxu1 %v11011_v19  ;;  %v11099_v18 = vld [vmem:[%s15513_s1 + $0x13e8] ss:$16 sps:$4 sm:$0xff]  }
 0x241   :  { %v11102_v19 = vld [vmem:[%s15514_s0 + $0x48] ss:$144 sps:$4 sm:$0xff]  }
 0x242   :  { %7544 = vmatmul.mubr.bf16.vlgmr.msra.gmra.mrb[0].mxu0 %v11003_v17  ;;  %8318 = vmatmul.mubr.bf16.vlgmr.msra.gmra.mrb[0].mxu1 %v11003_v17  ;;  %v11096_v17 = vld [vmem:[%s15513_s1 + $0x13e0] ss:$16 sps:$4 sm:$0xff]  }
 0x243   :  { %7555 = vmatpush1.bf16.msra.mxu0 %v11006_v20  ;;  %8329 = vmatpush1.bf16.msra.mxu1 %v11009_v21  ;;  %v11107_v20 = vld [vmem:[%s15513_s1 + $0x1404] ss:$16 sps:$4 sm:$0xff]   ;;  %v11110_v21 = vld [vmem:[%s15513_s1 + $0x140c] ss:$16 sps:$4 sm:$0xff]  }
 0x244   :  { %7556 = vmatprep.subr.bf16.mxu0 %v11014_v22  ;;  %8330 = vmatprep.subr.bf16.mxu1 %v11017_v23  ;;  %v11105_v22 = vld [vmem:[%s15513_s1 + $0x1400] ss:$16 sps:$4 sm:$0xff]   ;;  %v11108_v23 = vld [vmem:[%s15513_s1 + $0x1408] ss:$16 sps:$4 sm:$0xff]  }
 0x245   :  { %7586 = vmatprep.mubr.bf16.mxu0 %v11104_v24  ;;  %8360 = vmatprep.mubr.bf16.mxu1 %v11104_v24  ;;  %v11113_v24 = vld [vmem:[%s15513_s1 + $0x1424] ss:$16 sps:$4 sm:$0xff]  }
 0x247   :  { %7557 = vmatpush1.bf16.msra.mxu0 %v11012_v25  ;;  %8331 = vmatpush1.bf16.msra.mxu1 %v11015_v26  ;;  %v11116_v25 = vld [vmem:[%s15513_s1 + $0x142c] ss:$16 sps:$4 sm:$0xff]   ;;  %v11203_v26 = vld [vmem:[%s15514_s0 + $0x54] ss:$144 sps:$4 sm:$0xff]  }
 0x248   :  { %7558 = vmatprep.subr.bf16.mxu0 %v11020_v27  ;;  %8332 = vmatprep.subr.bf16.mxu1 %v11023_v28  ;;  %v11111_v27 = vld [vmem:[%s15513_s1 + $0x1420] ss:$16 sps:$4 sm:$0xff]   ;;  %v11114_v28 = vld [vmem:[%s15513_s1 + $0x1428] ss:$16 sps:$4 sm:$0xff]  }
 0x24b   :  { %7559 = vmatpush1.bf16.msra.mxu0 %v11018_v29  ;;  %8333 = vmatpush1.bf16.msra.mxu1 %v11021_v30  ;;  %v11119_v29 = vld [vmem:[%s15513_s1 + $0x1444] ss:$16 sps:$4 sm:$0xff]   ;;  %v11122_v30 = vld [vmem:[%s15513_s1 + $0x144c] ss:$16 sps:$4 sm:$0xff]  }
 0x24c   :  { %7560 = vmatprep.subr.bf16.mxu0 %v11026_v31  ;;  %8334 = vmatprep.subr.bf16.mxu1 %v11029_v32  ;;  %v11117_v31 = vld [vmem:[%s15513_s1 + $0x1440] ss:$16 sps:$4 sm:$0xff]   ;;  %v11120_v32 = vld [vmem:[%s15513_s1 + $0x1448] ss:$16 sps:$4 sm:$0xff]  }
 0x24f   :  { %7561 = vmatpush1.bf16.msra.mxu0 %v11024_v33  ;;  %8335 = vmatpush1.bf16.msra.mxu1 %v11027_v34  ;;  %v11125_v33 = vld [vmem:[%s15513_s1 + $0x1464] ss:$16 sps:$4 sm:$0xff]   ;;  %v11128_v34 = vld [vmem:[%s15513_s1 + $0x146c] ss:$16 sps:$4 sm:$0xff]  }
 0x250   :  { %7562 = vmatprep.subr.bf16.mxu0 %v11032_v35  ;;  %8336 = vmatprep.subr.bf16.mxu1 %v11035_v36  ;;  %v11123_v35 = vld [vmem:[%s15513_s1 + $0x1460] ss:$16 sps:$4 sm:$0xff]   ;;  %v11126_v36 = vld [vmem:[%s15513_s1 + $0x1468] ss:$16 sps:$4 sm:$0xff]  }
 0x253   :  { %7563 = vmatpush1.bf16.msra.mxu0 %v11030_v37  ;;  %8337 = vmatpush1.bf16.msra.mxu1 %v11033_v38  ;;  %v11131_v37 = vld [vmem:[%s15513_s1 + $0x1484] ss:$16 sps:$4 sm:$0xff]   ;;  %v11134_v38 = vld [vmem:[%s15513_s1 + $0x148c] ss:$16 sps:$4 sm:$0xff]  }
 0x254   :  { %7564 = vmatprep.subr.bf16.mxu0 %v11038_v39  ;;  %8338 = vmatprep.subr.bf16.mxu1 %v11041_v40  ;;  %v11129_v39 = vld [vmem:[%s15513_s1 + $0x1480] ss:$16 sps:$4 sm:$0xff]   ;;  %v11132_v40 = vld [vmem:[%s15513_s1 + $0x1488] ss:$16 sps:$4 sm:$0xff]  }
 0x257   :  { %7565 = vmatpush1.bf16.msra.mxu0 %v11036_v41  ;;  %8339 = vmatpush1.bf16.msra.mxu1 %v11039_v42  ;;  %v11137_v41 = vld [vmem:[%s15513_s1 + $0x14a4] ss:$16 sps:$4 sm:$0xff]   ;;  %v11140_v42 = vld [vmem:[%s15513_s1 + $0x14ac] ss:$16 sps:$4 sm:$0xff]  }
 0x258   :  { %7566 = vmatprep.subr.bf16.mxu0 %v11044_v43  ;;  %8340 = vmatprep.subr.bf16.mxu1 %v11047_v44  ;;  %v11135_v43 = vld [vmem:[%s15513_s1 + $0x14a0] ss:$16 sps:$4 sm:$0xff]   ;;  %v11138_v44 = vld [vmem:[%s15513_s1 + $0x14a8] ss:$16 sps:$4 sm:$0xff]  }
 0x25b   :  { %7567 = vmatpush1.bf16.msra.mxu0 %v11042_v45  ;;  %8341 = vmatpush1.bf16.msra.mxu1 %v11045_v46  ;;  %v11143_v45 = vld [vmem:[%s15513_s1 + $0x14c4] ss:$16 sps:$4 sm:$0xff]   ;;  %v11146_v46 = vld [vmem:[%s15513_s1 + $0x14cc] ss:$16 sps:$4 sm:$0xff]  }
 0x25c   :  { %7568 = vmatprep.subr.bf16.mxu0 %v11050_v47  ;;  %8342 = vmatprep.subr.bf16.mxu1 %v11053_v48  ;;  %v11141_v47 = vld [vmem:[%s15513_s1 + $0x14c0] ss:$16 sps:$4 sm:$0xff]   ;;  %v11144_v48 = vld [vmem:[%s15513_s1 + $0x14c8] ss:$16 sps:$4 sm:$0xff]  }
 0x25f   :  { %7569 = vmatpush1.bf16.msra.mxu0 %v11048_v49  ;;  %8343 = vmatpush1.bf16.msra.mxu1 %v11051_v50  ;;  %v11149_v49 = vld [vmem:[%s15513_s1 + $0x14e4] ss:$16 sps:$4 sm:$0xff]   ;;  %v11152_v50 = vld [vmem:[%s15513_s1 + $0x14ec] ss:$16 sps:$4 sm:$0xff]  }
 0x260   :  { %7570 = vmatprep.subr.bf16.mxu0 %v11056_v51  ;;  %8344 = vmatprep.subr.bf16.mxu1 %v11059_v52  ;;  %v11147_v51 = vld [vmem:[%s15513_s1 + $0x14e0] ss:$16 sps:$4 sm:$0xff]   ;;  %v11150_v52 = vld [vmem:[%s15513_s1 + $0x14e8] ss:$16 sps:$4 sm:$0xff]  }
 0x263   :  { %7571 = vmatpush1.bf16.msra.mxu0 %v11054_v53  ;;  %8345 = vmatpush1.bf16.msra.mxu1 %v11057_v54  ;;  %v11155_v53 = vld [vmem:[%s15513_s1 + $0x1504] ss:$16 sps:$4 sm:$0xff]   ;;  %v11158_v54 = vld [vmem:[%s15513_s1 + $0x150c] ss:$16 sps:$4 sm:$0xff]  }
 0x264   :  { %7572 = vmatprep.subr.bf16.mxu0 %v11062_v55  ;;  %8346 = vmatprep.subr.bf16.mxu1 %v11065_v56  ;;  %v11153_v55 = vld [vmem:[%s15513_s1 + $0x1500] ss:$16 sps:$4 sm:$0xff]   ;;  %v11156_v56 = vld [vmem:[%s15513_s1 + $0x1508] ss:$16 sps:$4 sm:$0xff]  }
 0x267   :  { %7573 = vmatpush1.bf16.msra.mxu0 %v11060_v57  ;;  %8347 = vmatpush1.bf16.msra.mxu1 %v11063_v58  ;;  %v11161_v57 = vld [vmem:[%s15513_s1 + $0x1524] ss:$16 sps:$4 sm:$0xff]   ;;  %v11164_v58 = vld [vmem:[%s15513_s1 + $0x152c] ss:$16 sps:$4 sm:$0xff]  }
 0x268   :  { %7574 = vmatprep.subr.bf16.mxu0 %v11068_v59  ;;  %8348 = vmatprep.subr.bf16.mxu1 %v11071_v60  ;;  %v11159_v59 = vld [vmem:[%s15513_s1 + $0x1520] ss:$16 sps:$4 sm:$0xff]   ;;  %v11162_v60 = vld [vmem:[%s15513_s1 + $0x1528] ss:$16 sps:$4 sm:$0xff]  }
 0x26b   :  { %7575 = vmatpush1.bf16.msra.mxu0 %v11066_v61  ;;  %8349 = vmatpush1.bf16.msra.mxu1 %v11069_v62  ;;  %v11167_v61 = vld [vmem:[%s15513_s1 + $0x1544] ss:$16 sps:$4 sm:$0xff]   ;;  %v11170_v62 = vld [vmem:[%s15513_s1 + $0x154c] ss:$16 sps:$4 sm:$0xff]  }
 0x26c   :  { %7576 = vmatprep.subr.bf16.mxu0 %v11074_v63  ;;  %8350 = vmatprep.subr.bf16.mxu1 %v11077_v0  ;;  %v11165_v63 = vld [vmem:[%s15513_s1 + $0x1540] ss:$16 sps:$4 sm:$0xff]   ;;  %v11168_v0 = vld [vmem:[%s15513_s1 + $0x1548] ss:$16 sps:$4 sm:$0xff]  }
 0x26f   :  { %7577 = vmatpush1.bf16.msra.mxu0 %v11072_v1  ;;  %8351 = vmatpush1.bf16.msra.mxu1 %v11075_v2  ;;  %v11173_v1 = vld [vmem:[%s15513_s1 + $0x1564] ss:$16 sps:$4 sm:$0xff]   ;;  %v11176_v2 = vld [vmem:[%s15513_s1 + $0x156c] ss:$16 sps:$4 sm:$0xff]  }
 0x270   :  { %7578 = vmatprep.subr.bf16.mxu0 %v11080_v3  ;;  %8352 = vmatprep.subr.bf16.mxu1 %v11083_v4  ;;  %v11171_v3 = vld [vmem:[%s15513_s1 + $0x1560] ss:$16 sps:$4 sm:$0xff]   ;;  %v11174_v4 = vld [vmem:[%s15513_s1 + $0x1568] ss:$16 sps:$4 sm:$0xff]  }
 0x273   :  { %7579 = vmatpush1.bf16.msra.mxu0 %v11078_v5  ;;  %8353 = vmatpush1.bf16.msra.mxu1 %v11081_v6  ;;  %v11179_v5 = vld [vmem:[%s15513_s1 + $0x1584] ss:$16 sps:$4 sm:$0xff]   ;;  %v11182_v6 = vld [vmem:[%s15513_s1 + $0x158c] ss:$16 sps:$4 sm:$0xff]  }
 0x274   :  { %7580 = vmatprep.subr.bf16.mxu0 %v11086_v7  ;;  %8354 = vmatprep.subr.bf16.mxu1 %v11089_v8  ;;  %v11177_v7 = vld [vmem:[%s15513_s1 + $0x1580] ss:$16 sps:$4 sm:$0xff]   ;;  %v11180_v8 = vld [vmem:[%s15513_s1 + $0x1588] ss:$16 sps:$4 sm:$0xff]  }
 0x277   :  { %7581 = vmatpush1.bf16.msra.mxu0 %v11084_v9  ;;  %8355 = vmatpush1.bf16.msra.mxu1 %v11087_v10  ;;  %v11185_v9 = vld [vmem:[%s15513_s1 + $0x15a4] ss:$16 sps:$4 sm:$0xff]   ;;  %v11188_v10 = vld [vmem:[%s15513_s1 + $0x15ac] ss:$16 sps:$4 sm:$0xff]  }
 0x278   :  { %7582 = vmatprep.subr.bf16.mxu0 %v11092_v11  ;;  %8356 = vmatprep.subr.bf16.mxu1 %v11095_v12  ;;  %v11183_v11 = vld [vmem:[%s15513_s1 + $0x15a0] ss:$16 sps:$4 sm:$0xff]   ;;  %v11186_v12 = vld [vmem:[%s15513_s1 + $0x15a8] ss:$16 sps:$4 sm:$0xff]  }
 0x27b   :  { %7583 = vmatpush1.bf16.msra.mxu0 %v11090_v13  ;;  %8357 = vmatpush1.bf16.msra.mxu1 %v11093_v14  ;;  %v11191_v13 = vld [vmem:[%s15513_s1 + $0x15c4] ss:$16 sps:$4 sm:$0xff]   ;;  %v11194_v14 = vld [vmem:[%s15513_s1 + $0x15cc] ss:$16 sps:$4 sm:$0xff]  }
 0x27c   :  { %7584 = vmatprep.subr.bf16.mxu0 %v11098_v15  ;;  %8358 = vmatprep.subr.bf16.mxu1 %v11101_v16  ;;  %v11189_v15 = vld [vmem:[%s15513_s1 + $0x15c0] ss:$16 sps:$4 sm:$0xff]   ;;  %v11192_v16 = vld [vmem:[%s15513_s1 + $0x15c8] ss:$16 sps:$4 sm:$0xff]  }
 0x27f   :  { %7585 = vmatpush1.bf16.msra.mxu0 %v11096_v17  ;;  %8359 = vmatpush1.bf16.msra.mxu1 %v11099_v18  ;;  %v11197_v17 = vld [vmem:[%s15513_s1 + $0x15e4] ss:$16 sps:$4 sm:$0xff]   ;;  %v11200_v18 = vld [vmem:[%s15513_s1 + $0x15ec] ss:$16 sps:$4 sm:$0xff]  }
 0x280   :  { %7597 = vmatprep.subr.bf16.mxu0 %v11107_v20  ;;  %8371 = vmatprep.subr.bf16.mxu1 %v11110_v21  ;;  %v11198_v20 = vld [vmem:[%s15513_s1 + $0x15e8] ss:$16 sps:$4 sm:$0xff]   ;;  %v11206_v21 = vld [vmem:[%s15513_s1 + $0x1604] ss:$16 sps:$4 sm:$0xff]  }
 0x282   :  { %7587 = vmatmul.mubr.bf16.vlgmr.msra.gmra.mrb[0].mxu0 %v11102_v19  ;;  %8361 = vmatmul.mubr.bf16.vlgmr.msra.gmra.mrb[0].mxu1 %v11102_v19  ;;  %v11195_v19 = vld [vmem:[%s15513_s1 + $0x15e0] ss:$16 sps:$4 sm:$0xff]  }
 0x283   :  { %7598 = vmatpush1.bf16.msra.mxu0 %v11105_v22  ;;  %8372 = vmatpush1.bf16.msra.mxu1 %v11108_v23  ;;  %v11209_v22 = vld [vmem:[%s15513_s1 + $0x160c] ss:$16 sps:$4 sm:$0xff]   ;;  %v11201_v23 = vld [vmem:[%s15514_s0 + $0x50] ss:$144 sps:$4 sm:$0xff]  }
 0x284   :  { %7599 = vmatprep.subr.bf16.mxu0 %v11113_v24  ;;  %8373 = vmatprep.subr.bf16.mxu1 %v11116_v25  ;;  %v11204_v24 = vld [vmem:[%s15513_s1 + $0x1600] ss:$16 sps:$4 sm:$0xff]   ;;  %v11207_v25 = vld [vmem:[%s15513_s1 + $0x1608] ss:$16 sps:$4 sm:$0xff]  }
 0x285   :  { %7629 = vmatprep.mubr.bf16.mxu0 %v11203_v26  ;;  %8403 = vmatprep.mubr.bf16.mxu1 %v11203_v26  ;;  %v11212_v26 = vld [vmem:[%s15513_s1 + $0x1624] ss:$16 sps:$4 sm:$0xff]  }
 0x287   :  { %7600 = vmatpush1.bf16.msra.mxu0 %v11111_v27  ;;  %8374 = vmatpush1.bf16.msra.mxu1 %v11114_v28  ;;  %v11215_v27 = vld [vmem:[%s15513_s1 + $0x162c] ss:$16 sps:$4 sm:$0xff]  }
 0x288   :  { %7601 = vmatprep.subr.bf16.mxu0 %v11119_v29  ;;  %8375 = vmatprep.subr.bf16.mxu1 %v11122_v30  ;;  %v11302_v28 = vld [vmem:[%s15514_s0 + $0x5c] ss:$144 sps:$4 sm:$0xff]   ;;  %v11210_v29 = vld [vmem:[%s15513_s1 + $0x1620] ss:$16 sps:$4 sm:$0xff]   ;;  %v11213_v30 = vld [vmem:[%s15513_s1 + $0x1628] ss:$16 sps:$4 sm:$0xff]  }
 0x28b   :  { %7602 = vmatpush1.bf16.msra.mxu0 %v11117_v31  ;;  %8376 = vmatpush1.bf16.msra.mxu1 %v11120_v32  ;;  %v11218_v31 = vld [vmem:[%s15513_s1 + $0x1644] ss:$16 sps:$4 sm:$0xff]   ;;  %v11221_v32 = vld [vmem:[%s15513_s1 + $0x164c] ss:$16 sps:$4 sm:$0xff]  }
 0x28c   :  { %7603 = vmatprep.subr.bf16.mxu0 %v11125_v33  ;;  %8377 = vmatprep.subr.bf16.mxu1 %v11128_v34  ;;  %v11216_v33 = vld [vmem:[%s15513_s1 + $0x1640] ss:$16 sps:$4 sm:$0xff]   ;;  %v11219_v34 = vld [vmem:[%s15513_s1 + $0x1648] ss:$16 sps:$4 sm:$0xff]  }
 0x28f   :  { %7604 = vmatpush1.bf16.msra.mxu0 %v11123_v35  ;;  %8378 = vmatpush1.bf16.msra.mxu1 %v11126_v36  ;;  %v11224_v35 = vld [vmem:[%s15513_s1 + $0x1664] ss:$16 sps:$4 sm:$0xff]   ;;  %v11227_v36 = vld [vmem:[%s15513_s1 + $0x166c] ss:$16 sps:$4 sm:$0xff]  }
 0x290   :  { %7605 = vmatprep.subr.bf16.mxu0 %v11131_v37  ;;  %8379 = vmatprep.subr.bf16.mxu1 %v11134_v38  ;;  %v11222_v37 = vld [vmem:[%s15513_s1 + $0x1660] ss:$16 sps:$4 sm:$0xff]   ;;  %v11225_v38 = vld [vmem:[%s15513_s1 + $0x1668] ss:$16 sps:$4 sm:$0xff]  }
 0x293   :  { %7606 = vmatpush1.bf16.msra.mxu0 %v11129_v39  ;;  %8380 = vmatpush1.bf16.msra.mxu1 %v11132_v40  ;;  %v11230_v39 = vld [vmem:[%s15513_s1 + $0x1684] ss:$16 sps:$4 sm:$0xff]   ;;  %v11233_v40 = vld [vmem:[%s15513_s1 + $0x168c] ss:$16 sps:$4 sm:$0xff]  }
 0x294   :  { %7607 = vmatprep.subr.bf16.mxu0 %v11137_v41  ;;  %8381 = vmatprep.subr.bf16.mxu1 %v11140_v42  ;;  %v11228_v41 = vld [vmem:[%s15513_s1 + $0x1680] ss:$16 sps:$4 sm:$0xff]   ;;  %v11231_v42 = vld [vmem:[%s15513_s1 + $0x1688] ss:$16 sps:$4 sm:$0xff]  }
 0x297   :  { %7608 = vmatpush1.bf16.msra.mxu0 %v11135_v43  ;;  %8382 = vmatpush1.bf16.msra.mxu1 %v11138_v44  ;;  %v11236_v43 = vld [vmem:[%s15513_s1 + $0x16a4] ss:$16 sps:$4 sm:$0xff]   ;;  %v11239_v44 = vld [vmem:[%s15513_s1 + $0x16ac] ss:$16 sps:$4 sm:$0xff]  }
 0x298   :  { %7609 = vmatprep.subr.bf16.mxu0 %v11143_v45  ;;  %8383 = vmatprep.subr.bf16.mxu1 %v11146_v46  ;;  %v11234_v45 = vld [vmem:[%s15513_s1 + $0x16a0] ss:$16 sps:$4 sm:$0xff]   ;;  %v11237_v46 = vld [vmem:[%s15513_s1 + $0x16a8] ss:$16 sps:$4 sm:$0xff]  }
 0x29b   :  { %7610 = vmatpush1.bf16.msra.mxu0 %v11141_v47  ;;  %8384 = vmatpush1.bf16.msra.mxu1 %v11144_v48  ;;  %v11242_v47 = vld [vmem:[%s15513_s1 + $0x16c4] ss:$16 sps:$4 sm:$0xff]   ;;  %v11245_v48 = vld [vmem:[%s15513_s1 + $0x16cc] ss:$16 sps:$4 sm:$0xff]  }
 0x29c   :  { %7611 = vmatprep.subr.bf16.mxu0 %v11149_v49  ;;  %8385 = vmatprep.subr.bf16.mxu1 %v11152_v50  ;;  %v11240_v49 = vld [vmem:[%s15513_s1 + $0x16c0] ss:$16 sps:$4 sm:$0xff]   ;;  %v11243_v50 = vld [vmem:[%s15513_s1 + $0x16c8] ss:$16 sps:$4 sm:$0xff]  }
 0x29f   :  { %7612 = vmatpush1.bf16.msra.mxu0 %v11147_v51  ;;  %8386 = vmatpush1.bf16.msra.mxu1 %v11150_v52  ;;  %v11248_v51 = vld [vmem:[%s15513_s1 + $0x16e4] ss:$16 sps:$4 sm:$0xff]   ;;  %v11251_v52 = vld [vmem:[%s15513_s1 + $0x16ec] ss:$16 sps:$4 sm:$0xff]  }
 0x2a0   :  { %7613 = vmatprep.subr.bf16.mxu0 %v11155_v53  ;;  %8387 = vmatprep.subr.bf16.mxu1 %v11158_v54  ;;  %v11246_v53 = vld [vmem:[%s15513_s1 + $0x16e0] ss:$16 sps:$4 sm:$0xff]   ;;  %v11249_v54 = vld [vmem:[%s15513_s1 + $0x16e8] ss:$16 sps:$4 sm:$0xff]  }
 0x2a3   :  { %7614 = vmatpush1.bf16.msra.mxu0 %v11153_v55  ;;  %8388 = vmatpush1.bf16.msra.mxu1 %v11156_v56  ;;  %v11254_v55 = vld [vmem:[%s15513_s1 + $0x1704] ss:$16 sps:$4 sm:$0xff]   ;;  %v11257_v56 = vld [vmem:[%s15513_s1 + $0x170c] ss:$16 sps:$4 sm:$0xff]  }
 0x2a4   :  { %7615 = vmatprep.subr.bf16.mxu0 %v11161_v57  ;;  %8389 = vmatprep.subr.bf16.mxu1 %v11164_v58  ;;  %v11252_v57 = vld [vmem:[%s15513_s1 + $0x1700] ss:$16 sps:$4 sm:$0xff]   ;;  %v11255_v58 = vld [vmem:[%s15513_s1 + $0x1708] ss:$16 sps:$4 sm:$0xff]  }
 0x2a7   :  { %7616 = vmatpush1.bf16.msra.mxu0 %v11159_v59  ;;  %8390 = vmatpush1.bf16.msra.mxu1 %v11162_v60  ;;  %v11260_v59 = vld [vmem:[%s15513_s1 + $0x1724] ss:$16 sps:$4 sm:$0xff]   ;;  %v11263_v60 = vld [vmem:[%s15513_s1 + $0x172c] ss:$16 sps:$4 sm:$0xff]  }
 0x2a8   :  { %7617 = vmatprep.subr.bf16.mxu0 %v11167_v61  ;;  %8391 = vmatprep.subr.bf16.mxu1 %v11170_v62  ;;  %v11258_v61 = vld [vmem:[%s15513_s1 + $0x1720] ss:$16 sps:$4 sm:$0xff]   ;;  %v11261_v62 = vld [vmem:[%s15513_s1 + $0x1728] ss:$16 sps:$4 sm:$0xff]  }
 0x2ab   :  { %7618 = vmatpush1.bf16.msra.mxu0 %v11165_v63  ;;  %8392 = vmatpush1.bf16.msra.mxu1 %v11168_v0  ;;  %v11266_v63 = vld [vmem:[%s15513_s1 + $0x1744] ss:$16 sps:$4 sm:$0xff]   ;;  %v11269_v0 = vld [vmem:[%s15513_s1 + $0x174c] ss:$16 sps:$4 sm:$0xff]  }
 0x2ac   :  { %7619 = vmatprep.subr.bf16.mxu0 %v11173_v1  ;;  %8393 = vmatprep.subr.bf16.mxu1 %v11176_v2  ;;  %v11264_v1 = vld [vmem:[%s15513_s1 + $0x1740] ss:$16 sps:$4 sm:$0xff]   ;;  %v11267_v2 = vld [vmem:[%s15513_s1 + $0x1748] ss:$16 sps:$4 sm:$0xff]  }
 0x2af   :  { %7620 = vmatpush1.bf16.msra.mxu0 %v11171_v3  ;;  %8394 = vmatpush1.bf16.msra.mxu1 %v11174_v4  ;;  %v11272_v3 = vld [vmem:[%s15513_s1 + $0x1764] ss:$16 sps:$4 sm:$0xff]   ;;  %v11275_v4 = vld [vmem:[%s15513_s1 + $0x176c] ss:$16 sps:$4 sm:$0xff]  }
 0x2b0   :  { %7621 = vmatprep.subr.bf16.mxu0 %v11179_v5  ;;  %8395 = vmatprep.subr.bf16.mxu1 %v11182_v6  ;;  %v11270_v5 = vld [vmem:[%s15513_s1 + $0x1760] ss:$16 sps:$4 sm:$0xff]   ;;  %v11273_v6 = vld [vmem:[%s15513_s1 + $0x1768] ss:$16 sps:$4 sm:$0xff]  }
 0x2b3   :  { %7622 = vmatpush1.bf16.msra.mxu0 %v11177_v7  ;;  %8396 = vmatpush1.bf16.msra.mxu1 %v11180_v8  ;;  %v11278_v7 = vld [vmem:[%s15513_s1 + $0x1784] ss:$16 sps:$4 sm:$0xff]   ;;  %v11281_v8 = vld [vmem:[%s15513_s1 + $0x178c] ss:$16 sps:$4 sm:$0xff]  }
 0x2b4   :  { %7623 = vmatprep.subr.bf16.mxu0 %v11185_v9  ;;  %8397 = vmatprep.subr.bf16.mxu1 %v11188_v10  ;;  %v11276_v9 = vld [vmem:[%s15513_s1 + $0x1780] ss:$16 sps:$4 sm:$0xff]   ;;  %v11279_v10 = vld [vmem:[%s15513_s1 + $0x1788] ss:$16 sps:$4 sm:$0xff]  }
 0x2b7   :  { %7624 = vmatpush1.bf16.msra.mxu0 %v11183_v11  ;;  %8398 = vmatpush1.bf16.msra.mxu1 %v11186_v12  ;;  %v11284_v11 = vld [vmem:[%s15513_s1 + $0x17a4] ss:$16 sps:$4 sm:$0xff]   ;;  %v11287_v12 = vld [vmem:[%s15513_s1 + $0x17ac] ss:$16 sps:$4 sm:$0xff]  }
 0x2b8   :  { %7625 = vmatprep.subr.bf16.mxu0 %v11191_v13  ;;  %8399 = vmatprep.subr.bf16.mxu1 %v11194_v14  ;;  %v11282_v13 = vld [vmem:[%s15513_s1 + $0x17a0] ss:$16 sps:$4 sm:$0xff]   ;;  %v11285_v14 = vld [vmem:[%s15513_s1 + $0x17a8] ss:$16 sps:$4 sm:$0xff]  }
 0x2bb   :  { %7626 = vmatpush1.bf16.msra.mxu0 %v11189_v15  ;;  %8400 = vmatpush1.bf16.msra.mxu1 %v11192_v16  ;;  %v11290_v15 = vld [vmem:[%s15513_s1 + $0x17c4] ss:$16 sps:$4 sm:$0xff]   ;;  %v11293_v16 = vld [vmem:[%s15513_s1 + $0x17cc] ss:$16 sps:$4 sm:$0xff]  }
 0x2bc   :  { %7627 = vmatprep.subr.bf16.mxu0 %v11197_v17  ;;  %8401 = vmatprep.subr.bf16.mxu1 %v11200_v18  ;;  %v11288_v17 = vld [vmem:[%s15513_s1 + $0x17c0] ss:$16 sps:$4 sm:$0xff]   ;;  %v11291_v18 = vld [vmem:[%s15513_s1 + $0x17c8] ss:$16 sps:$4 sm:$0xff]  }
 0x2bf   :  { %7628 = vmatpush1.bf16.msra.mxu0 %v11195_v19  ;;  %8402 = vmatpush1.bf16.msra.mxu1 %v11198_v20  ;;  %v11296_v19 = vld [vmem:[%s15513_s1 + $0x17e4] ss:$16 sps:$4 sm:$0xff]   ;;  %v11299_v20 = vld [vmem:[%s15513_s1 + $0x17ec] ss:$16 sps:$4 sm:$0xff]  }
 0x2c0   :  { %7640 = vmatprep.subr.bf16.mxu0 %v11206_v21  ;;  %8414 = vmatprep.subr.bf16.mxu1 %v11209_v22  ;;  %v11294_v21 = vld [vmem:[%s15513_s1 + $0x17e0] ss:$16 sps:$4 sm:$0xff]   ;;  %v11297_v22 = vld [vmem:[%s15513_s1 + $0x17e8] ss:$16 sps:$4 sm:$0xff]  }
 0x2c2   :  { %7630 = vmatmul.mubr.bf16.vlgmr.msra.gmra.mrb[0].mxu0 %v11201_v23  ;;  %8404 = vmatmul.mubr.bf16.vlgmr.msra.gmra.mrb[0].mxu1 %v11201_v23  ;;  %v11305_v23 = vld [vmem:[%s15513_s1 + $0x1804] ss:$16 sps:$4 sm:$0xff]  }
 0x2c3   :  { %7641 = vmatpush1.bf16.msra.mxu0 %v11204_v24  ;;  %8415 = vmatpush1.bf16.msra.mxu1 %v11207_v25  ;;  %v11308_v24 = vld [vmem:[%s15513_s1 + $0x180c] ss:$16 sps:$4 sm:$0xff]   ;;  %v11300_v25 = vld [vmem:[%s15514_s0 + $0x58] ss:$144 sps:$4 sm:$0xff]  }
 0x2c4   :  { %7642 = vmatprep.subr.bf16.mxu0 %v11212_v26  ;;  %8416 = vmatprep.subr.bf16.mxu1 %v11215_v27  ;;  %v11303_v26 = vld [vmem:[%s15513_s1 + $0x1800] ss:$16 sps:$4 sm:$0xff]   ;;  %v11306_v27 = vld [vmem:[%s15513_s1 + $0x1808] ss:$16 sps:$4 sm:$0xff]  }
 0x2c5   :  { %7672 = vmatprep.mubr.bf16.mxu0 %v11302_v28  ;;  %8446 = vmatprep.mubr.bf16.mxu1 %v11302_v28  ;;  %v11311_v28 = vld [vmem:[%s15513_s1 + $0x1824] ss:$16 sps:$4 sm:$0xff]  }
 0x2c7   :  { %7643 = vmatpush1.bf16.msra.mxu0 %v11210_v29  ;;  %8417 = vmatpush1.bf16.msra.mxu1 %v11213_v30  ;;  %v11314_v29 = vld [vmem:[%s15513_s1 + $0x182c] ss:$16 sps:$4 sm:$0xff]   ;;  %v11401_v30 = vld [vmem:[%s15514_s0 + $0x64] ss:$144 sps:$4 sm:$0xff]  }
 0x2c8   :  { %7644 = vmatprep.subr.bf16.mxu0 %v11218_v31  ;;  %8418 = vmatprep.subr.bf16.mxu1 %v11221_v32  ;;  %v11309_v31 = vld [vmem:[%s15513_s1 + $0x1820] ss:$16 sps:$4 sm:$0xff]   ;;  %v11312_v32 = vld [vmem:[%s15513_s1 + $0x1828] ss:$16 sps:$4 sm:$0xff]  }
 0x2cb   :  { %7645 = vmatpush1.bf16.msra.mxu0 %v11216_v33  ;;  %8419 = vmatpush1.bf16.msra.mxu1 %v11219_v34  ;;  %v11317_v33 = vld [vmem:[%s15513_s1 + $0x1844] ss:$16 sps:$4 sm:$0xff]   ;;  %v11320_v34 = vld [vmem:[%s15513_s1 + $0x184c] ss:$16 sps:$4 sm:$0xff]  }
 0x2cc   :  { %7646 = vmatprep.subr.bf16.mxu0 %v11224_v35  ;;  %8420 = vmatprep.subr.bf16.mxu1 %v11227_v36  ;;  %v11315_v35 = vld [vmem:[%s15513_s1 + $0x1840] ss:$16 sps:$4 sm:$0xff]   ;;  %v11318_v36 = vld [vmem:[%s15513_s1 + $0x1848] ss:$16 sps:$4 sm:$0xff]  }
 0x2cf   :  { %7647 = vmatpush1.bf16.msra.mxu0 %v11222_v37  ;;  %8421 = vmatpush1.bf16.msra.mxu1 %v11225_v38  ;;  %v11323_v37 = vld [vmem:[%s15513_s1 + $0x1864] ss:$16 sps:$4 sm:$0xff]   ;;  %v11326_v38 = vld [vmem:[%s15513_s1 + $0x186c] ss:$16 sps:$4 sm:$0xff]  }
 0x2d0   :  { %7648 = vmatprep.subr.bf16.mxu0 %v11230_v39  ;;  %8422 = vmatprep.subr.bf16.mxu1 %v11233_v40  ;;  %v11321_v39 = vld [vmem:[%s15513_s1 + $0x1860] ss:$16 sps:$4 sm:$0xff]   ;;  %v11324_v40 = vld [vmem:[%s15513_s1 + $0x1868] ss:$16 sps:$4 sm:$0xff]  }
 0x2d3   :  { %7649 = vmatpush1.bf16.msra.mxu0 %v11228_v41  ;;  %8423 = vmatpush1.bf16.msra.mxu1 %v11231_v42  ;;  %v11329_v41 = vld [vmem:[%s15513_s1 + $0x1884] ss:$16 sps:$4 sm:$0xff]   ;;  %v11332_v42 = vld [vmem:[%s15513_s1 + $0x188c] ss:$16 sps:$4 sm:$0xff]  }
 0x2d4   :  { %7650 = vmatprep.subr.bf16.mxu0 %v11236_v43  ;;  %8424 = vmatprep.subr.bf16.mxu1 %v11239_v44  ;;  %v11327_v43 = vld [vmem:[%s15513_s1 + $0x1880] ss:$16 sps:$4 sm:$0xff]   ;;  %v11330_v44 = vld [vmem:[%s15513_s1 + $0x1888] ss:$16 sps:$4 sm:$0xff]  }
 0x2d7   :  { %7651 = vmatpush1.bf16.msra.mxu0 %v11234_v45  ;;  %8425 = vmatpush1.bf16.msra.mxu1 %v11237_v46  ;;  %v11335_v45 = vld [vmem:[%s15513_s1 + $0x18a4] ss:$16 sps:$4 sm:$0xff]   ;;  %v11338_v46 = vld [vmem:[%s15513_s1 + $0x18ac] ss:$16 sps:$4 sm:$0xff]  }
 0x2d8   :  { %7652 = vmatprep.subr.bf16.mxu0 %v11242_v47  ;;  %8426 = vmatprep.subr.bf16.mxu1 %v11245_v48  ;;  %v11333_v47 = vld [vmem:[%s15513_s1 + $0x18a0] ss:$16 sps:$4 sm:$0xff]   ;;  %v11336_v48 = vld [vmem:[%s15513_s1 + $0x18a8] ss:$16 sps:$4 sm:$0xff]  }
 0x2db   :  { %7653 = vmatpush1.bf16.msra.mxu0 %v11240_v49  ;;  %8427 = vmatpush1.bf16.msra.mxu1 %v11243_v50  ;;  %v11341_v49 = vld [vmem:[%s15513_s1 + $0x18c4] ss:$16 sps:$4 sm:$0xff]   ;;  %v11344_v50 = vld [vmem:[%s15513_s1 + $0x18cc] ss:$16 sps:$4 sm:$0xff]  }
 0x2dc   :  { %7654 = vmatprep.subr.bf16.mxu0 %v11248_v51  ;;  %8428 = vmatprep.subr.bf16.mxu1 %v11251_v52  ;;  %v11339_v51 = vld [vmem:[%s15513_s1 + $0x18c0] ss:$16 sps:$4 sm:$0xff]   ;;  %v11342_v52 = vld [vmem:[%s15513_s1 + $0x18c8] ss:$16 sps:$4 sm:$0xff]  }
 0x2df   :  { %7655 = vmatpush1.bf16.msra.mxu0 %v11246_v53  ;;  %8429 = vmatpush1.bf16.msra.mxu1 %v11249_v54  ;;  %v11347_v53 = vld [vmem:[%s15513_s1 + $0x18e4] ss:$16 sps:$4 sm:$0xff]   ;;  %v11350_v54 = vld [vmem:[%s15513_s1 + $0x18ec] ss:$16 sps:$4 sm:$0xff]  }
 0x2e0   :  { %7656 = vmatprep.subr.bf16.mxu0 %v11254_v55  ;;  %8430 = vmatprep.subr.bf16.mxu1 %v11257_v56  ;;  %v11345_v55 = vld [vmem:[%s15513_s1 + $0x18e0] ss:$16 sps:$4 sm:$0xff]   ;;  %v11348_v56 = vld [vmem:[%s15513_s1 + $0x18e8] ss:$16 sps:$4 sm:$0xff]  }
 0x2e3   :  { %7657 = vmatpush1.bf16.msra.mxu0 %v11252_v57  ;;  %8431 = vmatpush1.bf16.msra.mxu1 %v11255_v58  ;;  %v11353_v57 = vld [vmem:[%s15513_s1 + $0x1904] ss:$16 sps:$4 sm:$0xff]   ;;  %v11356_v58 = vld [vmem:[%s15513_s1 + $0x190c] ss:$16 sps:$4 sm:$0xff]  }
 0x2e4   :  { %7658 = vmatprep.subr.bf16.mxu0 %v11260_v59  ;;  %8432 = vmatprep.subr.bf16.mxu1 %v11263_v60  ;;  %v11351_v59 = vld [vmem:[%s15513_s1 + $0x1900] ss:$16 sps:$4 sm:$0xff]   ;;  %v11354_v60 = vld [vmem:[%s15513_s1 + $0x1908] ss:$16 sps:$4 sm:$0xff]  }
 0x2e7   :  { %7659 = vmatpush1.bf16.msra.mxu0 %v11258_v61  ;;  %8433 = vmatpush1.bf16.msra.mxu1 %v11261_v62  ;;  %v11359_v61 = vld [vmem:[%s15513_s1 + $0x1924] ss:$16 sps:$4 sm:$0xff]   ;;  %v11362_v62 = vld [vmem:[%s15513_s1 + $0x192c] ss:$16 sps:$4 sm:$0xff]  }
 0x2e8   :  { %7660 = vmatprep.subr.bf16.mxu0 %v11266_v63  ;;  %8434 = vmatprep.subr.bf16.mxu1 %v11269_v0  ;;  %v11357_v63 = vld [vmem:[%s15513_s1 + $0x1920] ss:$16 sps:$4 sm:$0xff]   ;;  %v11360_v0 = vld [vmem:[%s15513_s1 + $0x1928] ss:$16 sps:$4 sm:$0xff]  }
 0x2eb   :  { %7661 = vmatpush1.bf16.msra.mxu0 %v11264_v1  ;;  %8435 = vmatpush1.bf16.msra.mxu1 %v11267_v2  ;;  %v11365_v1 = vld [vmem:[%s15513_s1 + $0x1944] ss:$16 sps:$4 sm:$0xff]   ;;  %v11368_v2 = vld [vmem:[%s15513_s1 + $0x194c] ss:$16 sps:$4 sm:$0xff]  }
 0x2ec   :  { %7662 = vmatprep.subr.bf16.mxu0 %v11272_v3  ;;  %8436 = vmatprep.subr.bf16.mxu1 %v11275_v4  ;;  %v11363_v3 = vld [vmem:[%s15513_s1 + $0x1940] ss:$16 sps:$4 sm:$0xff]   ;;  %v11366_v4 = vld [vmem:[%s15513_s1 + $0x1948] ss:$16 sps:$4 sm:$0xff]  }
 0x2ef   :  { %7663 = vmatpush1.bf16.msra.mxu0 %v11270_v5  ;;  %8437 = vmatpush1.bf16.msra.mxu1 %v11273_v6  ;;  %v11371_v5 = vld [vmem:[%s15513_s1 + $0x1964] ss:$16 sps:$4 sm:$0xff]   ;;  %v11374_v6 = vld [vmem:[%s15513_s1 + $0x196c] ss:$16 sps:$4 sm:$0xff]  }
 0x2f0   :  { %7664 = vmatprep.subr.bf16.mxu0 %v11278_v7  ;;  %8438 = vmatprep.subr.bf16.mxu1 %v11281_v8  ;;  %v11369_v7 = vld [vmem:[%s15513_s1 + $0x1960] ss:$16 sps:$4 sm:$0xff]   ;;  %v11372_v8 = vld [vmem:[%s15513_s1 + $0x1968] ss:$16 sps:$4 sm:$0xff]  }
 0x2f3   :  { %7665 = vmatpush1.bf16.msra.mxu0 %v11276_v9  ;;  %8439 = vmatpush1.bf16.msra.mxu1 %v11279_v10  ;;  %v11377_v9 = vld [vmem:[%s15513_s1 + $0x1984] ss:$16 sps:$4 sm:$0xff]   ;;  %v11380_v10 = vld [vmem:[%s15513_s1 + $0x198c] ss:$16 sps:$4 sm:$0xff]  }
 0x2f4   :  { %7666 = vmatprep.subr.bf16.mxu0 %v11284_v11  ;;  %8440 = vmatprep.subr.bf16.mxu1 %v11287_v12  ;;  %v11375_v11 = vld [vmem:[%s15513_s1 + $0x1980] ss:$16 sps:$4 sm:$0xff]   ;;  %v11378_v12 = vld [vmem:[%s15513_s1 + $0x1988] ss:$16 sps:$4 sm:$0xff]  }
 0x2f7   :  { %7667 = vmatpush1.bf16.msra.mxu0 %v11282_v13  ;;  %8441 = vmatpush1.bf16.msra.mxu1 %v11285_v14  ;;  %v11383_v13 = vld [vmem:[%s15513_s1 + $0x19a4] ss:$16 sps:$4 sm:$0xff]   ;;  %v11386_v14 = vld [vmem:[%s15513_s1 + $0x19ac] ss:$16 sps:$4 sm:$0xff]  }
 0x2f8   :  { %7668 = vmatprep.subr.bf16.mxu0 %v11290_v15  ;;  %8442 = vmatprep.subr.bf16.mxu1 %v11293_v16  ;;  %v11381_v15 = vld [vmem:[%s15513_s1 + $0x19a0] ss:$16 sps:$4 sm:$0xff]   ;;  %v11384_v16 = vld [vmem:[%s15513_s1 + $0x19a8] ss:$16 sps:$4 sm:$0xff]  }
 0x2fb   :  { %7669 = vmatpush1.bf16.msra.mxu0 %v11288_v17  ;;  %8443 = vmatpush1.bf16.msra.mxu1 %v11291_v18  ;;  %v11389_v17 = vld [vmem:[%s15513_s1 + $0x19c4] ss:$16 sps:$4 sm:$0xff]   ;;  %v11392_v18 = vld [vmem:[%s15513_s1 + $0x19cc] ss:$16 sps:$4 sm:$0xff]  }
 0x2fc   :  { %7670 = vmatprep.subr.bf16.mxu0 %v11296_v19  ;;  %8444 = vmatprep.subr.bf16.mxu1 %v11299_v20  ;;  %v11387_v19 = vld [vmem:[%s15513_s1 + $0x19c0] ss:$16 sps:$4 sm:$0xff]   ;;  %v11390_v20 = vld [vmem:[%s15513_s1 + $0x19c8] ss:$16 sps:$4 sm:$0xff]  }
 0x2ff   :  { %7671 = vmatpush1.bf16.msra.mxu0 %v11294_v21  ;;  %8445 = vmatpush1.bf16.msra.mxu1 %v11297_v22  ;;  %v11395_v21 = vld [vmem:[%s15513_s1 + $0x19e4] ss:$16 sps:$4 sm:$0xff]   ;;  %v11398_v22 = vld [vmem:[%s15513_s1 + $0x19ec] ss:$16 sps:$4 sm:$0xff]  }
 0x300   :  { %7683 = vmatprep.subr.bf16.mxu0 %v11305_v23  ;;  %8457 = vmatprep.subr.bf16.mxu1 %v11308_v24  ;;  %v11393_v23 = vld [vmem:[%s15513_s1 + $0x19e0] ss:$16 sps:$4 sm:$0xff]   ;;  %v11396_v24 = vld [vmem:[%s15513_s1 + $0x19e8] ss:$16 sps:$4 sm:$0xff]  }
 0x302   :  { %7673 = vmatmul.mubr.bf16.vlgmr.msra.gmra.mrb[0].mxu0 %v11300_v25  ;;  %8447 = vmatmul.mubr.bf16.vlgmr.msra.gmra.mrb[0].mxu1 %v11300_v25  ;;  %v11404_v25 = vld [vmem:[%s15513_s1 + $0x1a04] ss:$16 sps:$4 sm:$0xff]  }
 0x303   :  { %7684 = vmatpush1.bf16.msra.mxu0 %v11303_v26  ;;  %8458 = vmatpush1.bf16.msra.mxu1 %v11306_v27  ;;  %v11407_v26 = vld [vmem:[%s15513_s1 + $0x1a0c] ss:$16 sps:$4 sm:$0xff]   ;;  %v11399_v27 = vld [vmem:[%s15514_s0 + $0x60] ss:$144 sps:$4 sm:$0xff]  }
 0x304   :  { %7685 = vmatprep.subr.bf16.mxu0 %v11311_v28  ;;  %8459 = vmatprep.subr.bf16.mxu1 %v11314_v29  ;;  %v11402_v28 = vld [vmem:[%s15513_s1 + $0x1a00] ss:$16 sps:$4 sm:$0xff]   ;;  %v11405_v29 = vld [vmem:[%s15513_s1 + $0x1a08] ss:$16 sps:$4 sm:$0xff]  }
 0x305   :  { %7715 = vmatprep.mubr.bf16.mxu0 %v11401_v30  ;;  %8489 = vmatprep.mubr.bf16.mxu1 %v11401_v30  ;;  %v11410_v30 = vld [vmem:[%s15513_s1 + $0x1a24] ss:$16 sps:$4 sm:$0xff]  }
 0x307   :  { %7686 = vmatpush1.bf16.msra.mxu0 %v11309_v31  ;;  %8460 = vmatpush1.bf16.msra.mxu1 %v11312_v32  ;;  %v11413_v31 = vld [vmem:[%s15513_s1 + $0x1a2c] ss:$16 sps:$4 sm:$0xff]  }
 0x308   :  { %7687 = vmatprep.subr.bf16.mxu0 %v11317_v33  ;;  %8461 = vmatprep.subr.bf16.mxu1 %v11320_v34  ;;  %v11500_v32 = vld [vmem:[%s15514_s0 + $0x6c] ss:$144 sps:$4 sm:$0xff]   ;;  %v11408_v33 = vld [vmem:[%s15513_s1 + $0x1a20] ss:$16 sps:$4 sm:$0xff]   ;;  %v11411_v34 = vld [vmem:[%s15513_s1 + $0x1a28] ss:$16 sps:$4 sm:$0xff]  }
 0x30b   :  { %7688 = vmatpush1.bf16.msra.mxu0 %v11315_v35  ;;  %8462 = vmatpush1.bf16.msra.mxu1 %v11318_v36  ;;  %v11416_v35 = vld [vmem:[%s15513_s1 + $0x1a44] ss:$16 sps:$4 sm:$0xff]   ;;  %v11419_v36 = vld [vmem:[%s15513_s1 + $0x1a4c] ss:$16 sps:$4 sm:$0xff]  }
 0x30c   :  { %7689 = vmatprep.subr.bf16.mxu0 %v11323_v37  ;;  %8463 = vmatprep.subr.bf16.mxu1 %v11326_v38  ;;  %v11414_v37 = vld [vmem:[%s15513_s1 + $0x1a40] ss:$16 sps:$4 sm:$0xff]   ;;  %v11417_v38 = vld [vmem:[%s15513_s1 + $0x1a48] ss:$16 sps:$4 sm:$0xff]  }
 0x30f   :  { %7690 = vmatpush1.bf16.msra.mxu0 %v11321_v39  ;;  %8464 = vmatpush1.bf16.msra.mxu1 %v11324_v40  ;;  %v11422_v39 = vld [vmem:[%s15513_s1 + $0x1a64] ss:$16 sps:$4 sm:$0xff]   ;;  %v11425_v40 = vld [vmem:[%s15513_s1 + $0x1a6c] ss:$16 sps:$4 sm:$0xff]  }
 0x310   :  { %7691 = vmatprep.subr.bf16.mxu0 %v11329_v41  ;;  %8465 = vmatprep.subr.bf16.mxu1 %v11332_v42  ;;  %v11420_v41 = vld [vmem:[%s15513_s1 + $0x1a60] ss:$16 sps:$4 sm:$0xff]   ;;  %v11423_v42 = vld [vmem:[%s15513_s1 + $0x1a68] ss:$16 sps:$4 sm:$0xff]  }
 0x313   :  { %7692 = vmatpush1.bf16.msra.mxu0 %v11327_v43  ;;  %8466 = vmatpush1.bf16.msra.mxu1 %v11330_v44  ;;  %v11428_v43 = vld [vmem:[%s15513_s1 + $0x1a84] ss:$16 sps:$4 sm:$0xff]   ;;  %v11431_v44 = vld [vmem:[%s15513_s1 + $0x1a8c] ss:$16 sps:$4 sm:$0xff]  }
 0x314   :  { %7693 = vmatprep.subr.bf16.mxu0 %v11335_v45  ;;  %8467 = vmatprep.subr.bf16.mxu1 %v11338_v46  ;;  %v11426_v45 = vld [vmem:[%s15513_s1 + $0x1a80] ss:$16 sps:$4 sm:$0xff]   ;;  %v11429_v46 = vld [vmem:[%s15513_s1 + $0x1a88] ss:$16 sps:$4 sm:$0xff]  }
 0x317   :  { %7694 = vmatpush1.bf16.msra.mxu0 %v11333_v47  ;;  %8468 = vmatpush1.bf16.msra.mxu1 %v11336_v48  ;;  %v11434_v47 = vld [vmem:[%s15513_s1 + $0x1aa4] ss:$16 sps:$4 sm:$0xff]   ;;  %v11437_v48 = vld [vmem:[%s15513_s1 + $0x1aac] ss:$16 sps:$4 sm:$0xff]  }
 0x318   :  { %7695 = vmatprep.subr.bf16.mxu0 %v11341_v49  ;;  %8469 = vmatprep.subr.bf16.mxu1 %v11344_v50  ;;  %v11432_v49 = vld [vmem:[%s15513_s1 + $0x1aa0] ss:$16 sps:$4 sm:$0xff]   ;;  %v11435_v50 = vld [vmem:[%s15513_s1 + $0x1aa8] ss:$16 sps:$4 sm:$0xff]  }
 0x31b   :  { %7696 = vmatpush1.bf16.msra.mxu0 %v11339_v51  ;;  %8470 = vmatpush1.bf16.msra.mxu1 %v11342_v52  ;;  %v11440_v51 = vld [vmem:[%s15513_s1 + $0x1ac4] ss:$16 sps:$4 sm:$0xff]   ;;  %v11443_v52 = vld [vmem:[%s15513_s1 + $0x1acc] ss:$16 sps:$4 sm:$0xff]  }
 0x31c   :  { %7697 = vmatprep.subr.bf16.mxu0 %v11347_v53  ;;  %8471 = vmatprep.subr.bf16.mxu1 %v11350_v54  ;;  %v11438_v53 = vld [vmem:[%s15513_s1 + $0x1ac0] ss:$16 sps:$4 sm:$0xff]   ;;  %v11441_v54 = vld [vmem:[%s15513_s1 + $0x1ac8] ss:$16 sps:$4 sm:$0xff]  }
 0x31f   :  { %7698 = vmatpush1.bf16.msra.mxu0 %v11345_v55  ;;  %8472 = vmatpush1.bf16.msra.mxu1 %v11348_v56  ;;  %v11446_v55 = vld [vmem:[%s15513_s1 + $0x1ae4] ss:$16 sps:$4 sm:$0xff]   ;;  %v11449_v56 = vld [vmem:[%s15513_s1 + $0x1aec] ss:$16 sps:$4 sm:$0xff]  }
 0x320   :  { %7699 = vmatprep.subr.bf16.mxu0 %v11353_v57  ;;  %8473 = vmatprep.subr.bf16.mxu1 %v11356_v58  ;;  %v11444_v57 = vld [vmem:[%s15513_s1 + $0x1ae0] ss:$16 sps:$4 sm:$0xff]   ;;  %v11447_v58 = vld [vmem:[%s15513_s1 + $0x1ae8] ss:$16 sps:$4 sm:$0xff]  }
 0x323   :  { %7700 = vmatpush1.bf16.msra.mxu0 %v11351_v59  ;;  %8474 = vmatpush1.bf16.msra.mxu1 %v11354_v60  ;;  %v11452_v59 = vld [vmem:[%s15513_s1 + $0x1b04] ss:$16 sps:$4 sm:$0xff]   ;;  %v11455_v60 = vld [vmem:[%s15513_s1 + $0x1b0c] ss:$16 sps:$4 sm:$0xff]  }
 0x324   :  { %7701 = vmatprep.subr.bf16.mxu0 %v11359_v61  ;;  %8475 = vmatprep.subr.bf16.mxu1 %v11362_v62  ;;  %v11450_v61 = vld [vmem:[%s15513_s1 + $0x1b00] ss:$16 sps:$4 sm:$0xff]   ;;  %v11453_v62 = vld [vmem:[%s15513_s1 + $0x1b08] ss:$16 sps:$4 sm:$0xff]  }
 0x327   :  { %7702 = vmatpush1.bf16.msra.mxu0 %v11357_v63  ;;  %8476 = vmatpush1.bf16.msra.mxu1 %v11360_v0  ;;  %v11458_v63 = vld [vmem:[%s15513_s1 + $0x1b24] ss:$16 sps:$4 sm:$0xff]   ;;  %v11461_v0 = vld [vmem:[%s15513_s1 + $0x1b2c] ss:$16 sps:$4 sm:$0xff]  }
 0x328   :  { %7703 = vmatprep.subr.bf16.mxu0 %v11365_v1  ;;  %8477 = vmatprep.subr.bf16.mxu1 %v11368_v2  ;;  %v11456_v1 = vld [vmem:[%s15513_s1 + $0x1b20] ss:$16 sps:$4 sm:$0xff]   ;;  %v11459_v2 = vld [vmem:[%s15513_s1 + $0x1b28] ss:$16 sps:$4 sm:$0xff]  }
 0x32b   :  { %7704 = vmatpush1.bf16.msra.mxu0 %v11363_v3  ;;  %8478 = vmatpush1.bf16.msra.mxu1 %v11366_v4  ;;  %v11464_v3 = vld [vmem:[%s15513_s1 + $0x1b44] ss:$16 sps:$4 sm:$0xff]   ;;  %v11467_v4 = vld [vmem:[%s15513_s1 + $0x1b4c] ss:$16 sps:$4 sm:$0xff]  }
 0x32c   :  { %7705 = vmatprep.subr.bf16.mxu0 %v11371_v5  ;;  %8479 = vmatprep.subr.bf16.mxu1 %v11374_v6  ;;  %v11462_v5 = vld [vmem:[%s15513_s1 + $0x1b40] ss:$16 sps:$4 sm:$0xff]   ;;  %v11465_v6 = vld [vmem:[%s15513_s1 + $0x1b48] ss:$16 sps:$4 sm:$0xff]  }
 0x32f   :  { %7706 = vmatpush1.bf16.msra.mxu0 %v11369_v7  ;;  %8480 = vmatpush1.bf16.msra.mxu1 %v11372_v8  ;;  %v11470_v7 = vld [vmem:[%s15513_s1 + $0x1b64] ss:$16 sps:$4 sm:$0xff]   ;;  %v11473_v8 = vld [vmem:[%s15513_s1 + $0x1b6c] ss:$16 sps:$4 sm:$0xff]  }
 0x330   :  { %7707 = vmatprep.subr.bf16.mxu0 %v11377_v9  ;;  %8481 = vmatprep.subr.bf16.mxu1 %v11380_v10  ;;  %v11468_v9 = vld [vmem:[%s15513_s1 + $0x1b60] ss:$16 sps:$4 sm:$0xff]   ;;  %v11471_v10 = vld [vmem:[%s15513_s1 + $0x1b68] ss:$16 sps:$4 sm:$0xff]  }
 0x333   :  { %7708 = vmatpush1.bf16.msra.mxu0 %v11375_v11  ;;  %8482 = vmatpush1.bf16.msra.mxu1 %v11378_v12  ;;  %v11476_v11 = vld [vmem:[%s15513_s1 + $0x1b84] ss:$16 sps:$4 sm:$0xff]   ;;  %v11479_v12 = vld [vmem:[%s15513_s1 + $0x1b8c] ss:$16 sps:$4 sm:$0xff]  }
 0x334   :  { %7709 = vmatprep.subr.bf16.mxu0 %v11383_v13  ;;  %8483 = vmatprep.subr.bf16.mxu1 %v11386_v14  ;;  %v11474_v13 = vld [vmem:[%s15513_s1 + $0x1b80] ss:$16 sps:$4 sm:$0xff]   ;;  %v11477_v14 = vld [vmem:[%s15513_s1 + $0x1b88] ss:$16 sps:$4 sm:$0xff]  }
 0x337   :  { %7710 = vmatpush1.bf16.msra.mxu0 %v11381_v15  ;;  %8484 = vmatpush1.bf16.msra.mxu1 %v11384_v16  ;;  %v11482_v15 = vld [vmem:[%s15513_s1 + $0x1ba4] ss:$16 sps:$4 sm:$0xff]   ;;  %v11485_v16 = vld [vmem:[%s15513_s1 + $0x1bac] ss:$16 sps:$4 sm:$0xff]  }
 0x338   :  { %7711 = vmatprep.subr.bf16.mxu0 %v11389_v17  ;;  %8485 = vmatprep.subr.bf16.mxu1 %v11392_v18  ;;  %v11480_v17 = vld [vmem:[%s15513_s1 + $0x1ba0] ss:$16 sps:$4 sm:$0xff]   ;;  %v11483_v18 = vld [vmem:[%s15513_s1 + $0x1ba8] ss:$16 sps:$4 sm:$0xff]  }
 0x33b   :  { %7712 = vmatpush1.bf16.msra.mxu0 %v11387_v19  ;;  %8486 = vmatpush1.bf16.msra.mxu1 %v11390_v20  ;;  %v11488_v19 = vld [vmem:[%s15513_s1 + $0x1bc4] ss:$16 sps:$4 sm:$0xff]   ;;  %v11491_v20 = vld [vmem:[%s15513_s1 + $0x1bcc] ss:$16 sps:$4 sm:$0xff]  }
 0x33c   :  { %7713 = vmatprep.subr.bf16.mxu0 %v11395_v21  ;;  %8487 = vmatprep.subr.bf16.mxu1 %v11398_v22  ;;  %v11486_v21 = vld [vmem:[%s15513_s1 + $0x1bc0] ss:$16 sps:$4 sm:$0xff]   ;;  %v11489_v22 = vld [vmem:[%s15513_s1 + $0x1bc8] ss:$16 sps:$4 sm:$0xff]  }
 0x33f   :  { %7714 = vmatpush1.bf16.msra.mxu0 %v11393_v23  ;;  %8488 = vmatpush1.bf16.msra.mxu1 %v11396_v24  ;;  %v11494_v23 = vld [vmem:[%s15513_s1 + $0x1be4] ss:$16 sps:$4 sm:$0xff]   ;;  %v11497_v24 = vld [vmem:[%s15513_s1 + $0x1bec] ss:$16 sps:$4 sm:$0xff]  }
 0x340   :  { %7726 = vmatprep.subr.bf16.mxu0 %v11404_v25  ;;  %8500 = vmatprep.subr.bf16.mxu1 %v11407_v26  ;;  %v11492_v25 = vld [vmem:[%s15513_s1 + $0x1be0] ss:$16 sps:$4 sm:$0xff]   ;;  %v11495_v26 = vld [vmem:[%s15513_s1 + $0x1be8] ss:$16 sps:$4 sm:$0xff]  }
 0x342   :  { %7716 = vmatmul.mubr.bf16.vlgmr.msra.gmra.mrb[0].mxu0 %v11399_v27  ;;  %8490 = vmatmul.mubr.bf16.vlgmr.msra.gmra.mrb[0].mxu1 %v11399_v27  ;;  %v11503_v27 = vld [vmem:[%s15513_s1 + $0x1c04] ss:$16 sps:$4 sm:$0xff]  }
 0x343   :  { %7727 = vmatpush1.bf16.msra.mxu0 %v11402_v28  ;;  %8501 = vmatpush1.bf16.msra.mxu1 %v11405_v29  ;;  %v11506_v28 = vld [vmem:[%s15513_s1 + $0x1c0c] ss:$16 sps:$4 sm:$0xff]   ;;  %v11498_v29 = vld [vmem:[%s15514_s0 + $0x68] ss:$144 sps:$4 sm:$0xff]  }
 0x344   :  { %7728 = vmatprep.subr.bf16.mxu0 %v11410_v30  ;;  %8502 = vmatprep.subr.bf16.mxu1 %v11413_v31  ;;  %v11501_v30 = vld [vmem:[%s15513_s1 + $0x1c00] ss:$16 sps:$4 sm:$0xff]   ;;  %v11504_v31 = vld [vmem:[%s15513_s1 + $0x1c08] ss:$16 sps:$4 sm:$0xff]  }
 0x345   :  { %7758 = vmatprep.mubr.bf16.mxu0 %v11500_v32  ;;  %8532 = vmatprep.mubr.bf16.mxu1 %v11500_v32  ;;  %v11509_v32 = vld [vmem:[%s15513_s1 + $0x1c24] ss:$16 sps:$4 sm:$0xff]  }
 0x347   :  { %7729 = vmatpush1.bf16.msra.mxu0 %v11408_v33  ;;  %8503 = vmatpush1.bf16.msra.mxu1 %v11411_v34  ;;  %v11512_v33 = vld [vmem:[%s15513_s1 + $0x1c2c] ss:$16 sps:$4 sm:$0xff]   ;;  %v11599_v34 = vld [vmem:[%s15514_s0 + $0x74] ss:$144 sps:$4 sm:$0xff]  }
 0x348   :  { %7730 = vmatprep.subr.bf16.mxu0 %v11416_v35  ;;  %8504 = vmatprep.subr.bf16.mxu1 %v11419_v36  ;;  %v11507_v35 = vld [vmem:[%s15513_s1 + $0x1c20] ss:$16 sps:$4 sm:$0xff]   ;;  %v11510_v36 = vld [vmem:[%s15513_s1 + $0x1c28] ss:$16 sps:$4 sm:$0xff]  }
 0x34b   :  { %7731 = vmatpush1.bf16.msra.mxu0 %v11414_v37  ;;  %8505 = vmatpush1.bf16.msra.mxu1 %v11417_v38  ;;  %v11515_v37 = vld [vmem:[%s15513_s1 + $0x1c44] ss:$16 sps:$4 sm:$0xff]   ;;  %v11518_v38 = vld [vmem:[%s15513_s1 + $0x1c4c] ss:$16 sps:$4 sm:$0xff]  }
 0x34c   :  { %7732 = vmatprep.subr.bf16.mxu0 %v11422_v39  ;;  %8506 = vmatprep.subr.bf16.mxu1 %v11425_v40  ;;  %v11513_v39 = vld [vmem:[%s15513_s1 + $0x1c40] ss:$16 sps:$4 sm:$0xff]   ;;  %v11516_v40 = vld [vmem:[%s15513_s1 + $0x1c48] ss:$16 sps:$4 sm:$0xff]  }
 0x34f   :  { %7733 = vmatpush1.bf16.msra.mxu0 %v11420_v41  ;;  %8507 = vmatpush1.bf16.msra.mxu1 %v11423_v42  ;;  %v11521_v41 = vld [vmem:[%s15513_s1 + $0x1c64] ss:$16 sps:$4 sm:$0xff]   ;;  %v11524_v42 = vld [vmem:[%s15513_s1 + $0x1c6c] ss:$16 sps:$4 sm:$0xff]  }
 0x350   :  { %7734 = vmatprep.subr.bf16.mxu0 %v11428_v43  ;;  %8508 = vmatprep.subr.bf16.mxu1 %v11431_v44  ;;  %v11519_v43 = vld [vmem:[%s15513_s1 + $0x1c60] ss:$16 sps:$4 sm:$0xff]   ;;  %v11522_v44 = vld [vmem:[%s15513_s1 + $0x1c68] ss:$16 sps:$4 sm:$0xff]  }
 0x353   :  { %7735 = vmatpush1.bf16.msra.mxu0 %v11426_v45  ;;  %8509 = vmatpush1.bf16.msra.mxu1 %v11429_v46  ;;  %v11527_v45 = vld [vmem:[%s15513_s1 + $0x1c84] ss:$16 sps:$4 sm:$0xff]   ;;  %v11530_v46 = vld [vmem:[%s15513_s1 + $0x1c8c] ss:$16 sps:$4 sm:$0xff]  }
 0x354   :  { %7736 = vmatprep.subr.bf16.mxu0 %v11434_v47  ;;  %8510 = vmatprep.subr.bf16.mxu1 %v11437_v48  ;;  %v11525_v47 = vld [vmem:[%s15513_s1 + $0x1c80] ss:$16 sps:$4 sm:$0xff]   ;;  %v11528_v48 = vld [vmem:[%s15513_s1 + $0x1c88] ss:$16 sps:$4 sm:$0xff]  }
 0x357   :  { %7737 = vmatpush1.bf16.msra.mxu0 %v11432_v49  ;;  %8511 = vmatpush1.bf16.msra.mxu1 %v11435_v50  ;;  %v11533_v49 = vld [vmem:[%s15513_s1 + $0x1ca4] ss:$16 sps:$4 sm:$0xff]   ;;  %v11536_v50 = vld [vmem:[%s15513_s1 + $0x1cac] ss:$16 sps:$4 sm:$0xff]  }
 0x358   :  { %7738 = vmatprep.subr.bf16.mxu0 %v11440_v51  ;;  %8512 = vmatprep.subr.bf16.mxu1 %v11443_v52  ;;  %v11531_v51 = vld [vmem:[%s15513_s1 + $0x1ca0] ss:$16 sps:$4 sm:$0xff]   ;;  %v11534_v52 = vld [vmem:[%s15513_s1 + $0x1ca8] ss:$16 sps:$4 sm:$0xff]  }
 0x35b   :  { %7739 = vmatpush1.bf16.msra.mxu0 %v11438_v53  ;;  %8513 = vmatpush1.bf16.msra.mxu1 %v11441_v54  ;;  %v11539_v53 = vld [vmem:[%s15513_s1 + $0x1cc4] ss:$16 sps:$4 sm:$0xff]   ;;  %v11542_v54 = vld [vmem:[%s15513_s1 + $0x1ccc] ss:$16 sps:$4 sm:$0xff]  }
 0x35c   :  { %7740 = vmatprep.subr.bf16.mxu0 %v11446_v55  ;;  %8514 = vmatprep.subr.bf16.mxu1 %v11449_v56  ;;  %v11537_v55 = vld [vmem:[%s15513_s1 + $0x1cc0] ss:$16 sps:$4 sm:$0xff]   ;;  %v11540_v56 = vld [vmem:[%s15513_s1 + $0x1cc8] ss:$16 sps:$4 sm:$0xff]  }
 0x35f   :  { %7741 = vmatpush1.bf16.msra.mxu0 %v11444_v57  ;;  %8515 = vmatpush1.bf16.msra.mxu1 %v11447_v58  ;;  %v11545_v57 = vld [vmem:[%s15513_s1 + $0x1ce4] ss:$16 sps:$4 sm:$0xff]   ;;  %v11548_v58 = vld [vmem:[%s15513_s1 + $0x1cec] ss:$16 sps:$4 sm:$0xff]  }
 0x360   :  { %7742 = vmatprep.subr.bf16.mxu0 %v11452_v59  ;;  %8516 = vmatprep.subr.bf16.mxu1 %v11455_v60  ;;  %v11543_v59 = vld [vmem:[%s15513_s1 + $0x1ce0] ss:$16 sps:$4 sm:$0xff]   ;;  %v11546_v60 = vld [vmem:[%s15513_s1 + $0x1ce8] ss:$16 sps:$4 sm:$0xff]  }
 0x363   :  { %7743 = vmatpush1.bf16.msra.mxu0 %v11450_v61  ;;  %8517 = vmatpush1.bf16.msra.mxu1 %v11453_v62  ;;  %v11551_v61 = vld [vmem:[%s15513_s1 + $0x1d04] ss:$16 sps:$4 sm:$0xff]   ;;  %v11554_v62 = vld [vmem:[%s15513_s1 + $0x1d0c] ss:$16 sps:$4 sm:$0xff]  }
 0x364   :  { %7744 = vmatprep.subr.bf16.mxu0 %v11458_v63  ;;  %8518 = vmatprep.subr.bf16.mxu1 %v11461_v0  ;;  %v11549_v63 = vld [vmem:[%s15513_s1 + $0x1d00] ss:$16 sps:$4 sm:$0xff]   ;;  %v11552_v0 = vld [vmem:[%s15513_s1 + $0x1d08] ss:$16 sps:$4 sm:$0xff]  }
 0x367   :  { %7745 = vmatpush1.bf16.msra.mxu0 %v11456_v1  ;;  %8519 = vmatpush1.bf16.msra.mxu1 %v11459_v2  ;;  %v11557_v1 = vld [vmem:[%s15513_s1 + $0x1d24] ss:$16 sps:$4 sm:$0xff]   ;;  %v11560_v2 = vld [vmem:[%s15513_s1 + $0x1d2c] ss:$16 sps:$4 sm:$0xff]  }
 0x368   :  { %7746 = vmatprep.subr.bf16.mxu0 %v11464_v3  ;;  %8520 = vmatprep.subr.bf16.mxu1 %v11467_v4  ;;  %v11555_v3 = vld [vmem:[%s15513_s1 + $0x1d20] ss:$16 sps:$4 sm:$0xff]   ;;  %v11558_v4 = vld [vmem:[%s15513_s1 + $0x1d28] ss:$16 sps:$4 sm:$0xff]  }
 0x36b   :  { %7747 = vmatpush1.bf16.msra.mxu0 %v11462_v5  ;;  %8521 = vmatpush1.bf16.msra.mxu1 %v11465_v6  ;;  %v11563_v5 = vld [vmem:[%s15513_s1 + $0x1d44] ss:$16 sps:$4 sm:$0xff]   ;;  %v11566_v6 = vld [vmem:[%s15513_s1 + $0x1d4c] ss:$16 sps:$4 sm:$0xff]  }
 0x36c   :  { %7748 = vmatprep.subr.bf16.mxu0 %v11470_v7  ;;  %8522 = vmatprep.subr.bf16.mxu1 %v11473_v8  ;;  %v11561_v7 = vld [vmem:[%s15513_s1 + $0x1d40] ss:$16 sps:$4 sm:$0xff]   ;;  %v11564_v8 = vld [vmem:[%s15513_s1 + $0x1d48] ss:$16 sps:$4 sm:$0xff]  }
 0x36f   :  { %7749 = vmatpush1.bf16.msra.mxu0 %v11468_v9  ;;  %8523 = vmatpush1.bf16.msra.mxu1 %v11471_v10  ;;  %v11569_v9 = vld [vmem:[%s15513_s1 + $0x1d64] ss:$16 sps:$4 sm:$0xff]   ;;  %v11572_v10 = vld [vmem:[%s15513_s1 + $0x1d6c] ss:$16 sps:$4 sm:$0xff]  }
 0x370   :  { %7750 = vmatprep.subr.bf16.mxu0 %v11476_v11  ;;  %8524 = vmatprep.subr.bf16.mxu1 %v11479_v12  ;;  %v11567_v11 = vld [vmem:[%s15513_s1 + $0x1d60] ss:$16 sps:$4 sm:$0xff]   ;;  %v11570_v12 = vld [vmem:[%s15513_s1 + $0x1d68] ss:$16 sps:$4 sm:$0xff]  }
 0x373   :  { %7751 = vmatpush1.bf16.msra.mxu0 %v11474_v13  ;;  %8525 = vmatpush1.bf16.msra.mxu1 %v11477_v14  ;;  %v11575_v13 = vld [vmem:[%s15513_s1 + $0x1d84] ss:$16 sps:$4 sm:$0xff]   ;;  %v11578_v14 = vld [vmem:[%s15513_s1 + $0x1d8c] ss:$16 sps:$4 sm:$0xff]  }
 0x374   :  { %7752 = vmatprep.subr.bf16.mxu0 %v11482_v15  ;;  %8526 = vmatprep.subr.bf16.mxu1 %v11485_v16  ;;  %v11573_v15 = vld [vmem:[%s15513_s1 + $0x1d80] ss:$16 sps:$4 sm:$0xff]   ;;  %v11576_v16 = vld [vmem:[%s15513_s1 + $0x1d88] ss:$16 sps:$4 sm:$0xff]  }
 0x377   :  { %7753 = vmatpush1.bf16.msra.mxu0 %v11480_v17  ;;  %8527 = vmatpush1.bf16.msra.mxu1 %v11483_v18  ;;  %v11581_v17 = vld [vmem:[%s15513_s1 + $0x1da4] ss:$16 sps:$4 sm:$0xff]   ;;  %v11584_v18 = vld [vmem:[%s15513_s1 + $0x1dac] ss:$16 sps:$4 sm:$0xff]  }
 0x378   :  { %7754 = vmatprep.subr.bf16.mxu0 %v11488_v19  ;;  %8528 = vmatprep.subr.bf16.mxu1 %v11491_v20  ;;  %v11579_v19 = vld [vmem:[%s15513_s1 + $0x1da0] ss:$16 sps:$4 sm:$0xff]   ;;  %v11582_v20 = vld [vmem:[%s15513_s1 + $0x1da8] ss:$16 sps:$4 sm:$0xff]  }
 0x37b   :  { %7755 = vmatpush1.bf16.msra.mxu0 %v11486_v21  ;;  %8529 = vmatpush1.bf16.msra.mxu1 %v11489_v22  ;;  %v11587_v21 = vld [vmem:[%s15513_s1 + $0x1dc4] ss:$16 sps:$4 sm:$0xff]   ;;  %v11590_v22 = vld [vmem:[%s15513_s1 + $0x1dcc] ss:$16 sps:$4 sm:$0xff]  }
 0x37c   :  { %7756 = vmatprep.subr.bf16.mxu0 %v11494_v23  ;;  %8530 = vmatprep.subr.bf16.mxu1 %v11497_v24  ;;  %v11585_v23 = vld [vmem:[%s15513_s1 + $0x1dc0] ss:$16 sps:$4 sm:$0xff]   ;;  %v11588_v24 = vld [vmem:[%s15513_s1 + $0x1dc8] ss:$16 sps:$4 sm:$0xff]  }
 0x37f   :  { %7757 = vmatpush1.bf16.msra.mxu0 %v11492_v25  ;;  %8531 = vmatpush1.bf16.msra.mxu1 %v11495_v26  ;;  %v11593_v25 = vld [vmem:[%s15513_s1 + $0x1de4] ss:$16 sps:$4 sm:$0xff]   ;;  %v11596_v26 = vld [vmem:[%s15513_s1 + $0x1dec] ss:$16 sps:$4 sm:$0xff]  }
 0x380   :  { %7769 = vmatprep.subr.bf16.mxu0 %v11503_v27  ;;  %8543 = vmatprep.subr.bf16.mxu1 %v11506_v28  ;;  %v11591_v27 = vld [vmem:[%s15513_s1 + $0x1de0] ss:$16 sps:$4 sm:$0xff]   ;;  %v11594_v28 = vld [vmem:[%s15513_s1 + $0x1de8] ss:$16 sps:$4 sm:$0xff]  }
 0x382   :  { %7759 = vmatmul.mubr.bf16.vlgmr.msra.gmra.mrb[0].mxu0 %v11498_v29  ;;  %8533 = vmatmul.mubr.bf16.vlgmr.msra.gmra.mrb[0].mxu1 %v11498_v29  ;;  %v11602_v29 = vld [vmem:[%s15513_s1 + $0x1e04] ss:$16 sps:$4 sm:$0xff]  }
 0x383   :  { %7770 = vmatpush1.bf16.msra.mxu0 %v11501_v30  ;;  %8544 = vmatpush1.bf16.msra.mxu1 %v11504_v31  ;;  %v11605_v30 = vld [vmem:[%s15513_s1 + $0x1e0c] ss:$16 sps:$4 sm:$0xff]   ;;  %v11597_v31 = vld [vmem:[%s15514_s0 + $0x70] ss:$144 sps:$4 sm:$0xff]  }
 0x384   :  { %7771 = vmatprep.subr.bf16.mxu0 %v11509_v32  ;;  %8545 = vmatprep.subr.bf16.mxu1 %v11512_v33  ;;  %v11600_v32 = vld [vmem:[%s15513_s1 + $0x1e00] ss:$16 sps:$4 sm:$0xff]   ;;  %v11603_v33 = vld [vmem:[%s15513_s1 + $0x1e08] ss:$16 sps:$4 sm:$0xff]  }
 0x385   :  { %7801 = vmatprep.mubr.bf16.mxu0 %v11599_v34  ;;  %8575 = vmatprep.mubr.bf16.mxu1 %v11599_v34  ;;  %v11608_v34 = vld [vmem:[%s15513_s1 + $0x1e24] ss:$16 sps:$4 sm:$0xff]  }
 0x387   :  { %7772 = vmatpush1.bf16.msra.mxu0 %v11507_v35  ;;  %8546 = vmatpush1.bf16.msra.mxu1 %v11510_v36  ;;  %v11611_v35 = vld [vmem:[%s15513_s1 + $0x1e2c] ss:$16 sps:$4 sm:$0xff]  }
 0x388   :  { %7773 = vmatprep.subr.bf16.mxu0 %v11515_v37  ;;  %8547 = vmatprep.subr.bf16.mxu1 %v11518_v38  ;;  %v11698_v36 = vld [vmem:[%s15514_s0 + $0x7c] ss:$144 sps:$4 sm:$0xff]   ;;  %v11606_v37 = vld [vmem:[%s15513_s1 + $0x1e20] ss:$16 sps:$4 sm:$0xff]   ;;  %v11609_v38 = vld [vmem:[%s15513_s1 + $0x1e28] ss:$16 sps:$4 sm:$0xff]  }
 0x38b   :  { %7774 = vmatpush1.bf16.msra.mxu0 %v11513_v39  ;;  %8548 = vmatpush1.bf16.msra.mxu1 %v11516_v40  ;;  %v11614_v39 = vld [vmem:[%s15513_s1 + $0x1e44] ss:$16 sps:$4 sm:$0xff]   ;;  %v11617_v40 = vld [vmem:[%s15513_s1 + $0x1e4c] ss:$16 sps:$4 sm:$0xff]  }
 0x38c   :  { %7775 = vmatprep.subr.bf16.mxu0 %v11521_v41  ;;  %8549 = vmatprep.subr.bf16.mxu1 %v11524_v42  ;;  %v11612_v41 = vld [vmem:[%s15513_s1 + $0x1e40] ss:$16 sps:$4 sm:$0xff]   ;;  %v11615_v42 = vld [vmem:[%s15513_s1 + $0x1e48] ss:$16 sps:$4 sm:$0xff]  }
 0x38f   :  { %7776 = vmatpush1.bf16.msra.mxu0 %v11519_v43  ;;  %8550 = vmatpush1.bf16.msra.mxu1 %v11522_v44  ;;  %v11620_v43 = vld [vmem:[%s15513_s1 + $0x1e64] ss:$16 sps:$4 sm:$0xff]   ;;  %v11623_v44 = vld [vmem:[%s15513_s1 + $0x1e6c] ss:$16 sps:$4 sm:$0xff]  }
 0x390   :  { %7777 = vmatprep.subr.bf16.mxu0 %v11527_v45  ;;  %8551 = vmatprep.subr.bf16.mxu1 %v11530_v46  ;;  %v11618_v45 = vld [vmem:[%s15513_s1 + $0x1e60] ss:$16 sps:$4 sm:$0xff]   ;;  %v11621_v46 = vld [vmem:[%s15513_s1 + $0x1e68] ss:$16 sps:$4 sm:$0xff]  }
 0x393   :  { %7778 = vmatpush1.bf16.msra.mxu0 %v11525_v47  ;;  %8552 = vmatpush1.bf16.msra.mxu1 %v11528_v48  ;;  %v11626_v47 = vld [vmem:[%s15513_s1 + $0x1e84] ss:$16 sps:$4 sm:$0xff]   ;;  %v11629_v48 = vld [vmem:[%s15513_s1 + $0x1e8c] ss:$16 sps:$4 sm:$0xff]  }
 0x394   :  { %7779 = vmatprep.subr.bf16.mxu0 %v11533_v49  ;;  %8553 = vmatprep.subr.bf16.mxu1 %v11536_v50  ;;  %v11624_v49 = vld [vmem:[%s15513_s1 + $0x1e80] ss:$16 sps:$4 sm:$0xff]   ;;  %v11627_v50 = vld [vmem:[%s15513_s1 + $0x1e88] ss:$16 sps:$4 sm:$0xff]  }
 0x397   :  { %7780 = vmatpush1.bf16.msra.mxu0 %v11531_v51  ;;  %8554 = vmatpush1.bf16.msra.mxu1 %v11534_v52  ;;  %v11632_v51 = vld [vmem:[%s15513_s1 + $0x1ea4] ss:$16 sps:$4 sm:$0xff]   ;;  %v11635_v52 = vld [vmem:[%s15513_s1 + $0x1eac] ss:$16 sps:$4 sm:$0xff]  }
 0x398   :  { %7781 = vmatprep.subr.bf16.mxu0 %v11539_v53  ;;  %8555 = vmatprep.subr.bf16.mxu1 %v11542_v54  ;;  %v11630_v53 = vld [vmem:[%s15513_s1 + $0x1ea0] ss:$16 sps:$4 sm:$0xff]   ;;  %v11633_v54 = vld [vmem:[%s15513_s1 + $0x1ea8] ss:$16 sps:$4 sm:$0xff]  }
 0x39b   :  { %7782 = vmatpush1.bf16.msra.mxu0 %v11537_v55  ;;  %8556 = vmatpush1.bf16.msra.mxu1 %v11540_v56  ;;  %v11638_v55 = vld [vmem:[%s15513_s1 + $0x1ec4] ss:$16 sps:$4 sm:$0xff]   ;;  %v11641_v56 = vld [vmem:[%s15513_s1 + $0x1ecc] ss:$16 sps:$4 sm:$0xff]  }
 0x39c   :  { %7783 = vmatprep.subr.bf16.mxu0 %v11545_v57  ;;  %8557 = vmatprep.subr.bf16.mxu1 %v11548_v58  ;;  %v11636_v57 = vld [vmem:[%s15513_s1 + $0x1ec0] ss:$16 sps:$4 sm:$0xff]   ;;  %v11639_v58 = vld [vmem:[%s15513_s1 + $0x1ec8] ss:$16 sps:$4 sm:$0xff]  }
 0x39f   :  { %7784 = vmatpush1.bf16.msra.mxu0 %v11543_v59  ;;  %8558 = vmatpush1.bf16.msra.mxu1 %v11546_v60  ;;  %v11644_v59 = vld [vmem:[%s15513_s1 + $0x1ee4] ss:$16 sps:$4 sm:$0xff]   ;;  %v11647_v60 = vld [vmem:[%s15513_s1 + $0x1eec] ss:$16 sps:$4 sm:$0xff]  }
 0x3a0   :  { %7785 = vmatprep.subr.bf16.mxu0 %v11551_v61  ;;  %8559 = vmatprep.subr.bf16.mxu1 %v11554_v62  ;;  %v11642_v61 = vld [vmem:[%s15513_s1 + $0x1ee0] ss:$16 sps:$4 sm:$0xff]   ;;  %v11645_v62 = vld [vmem:[%s15513_s1 + $0x1ee8] ss:$16 sps:$4 sm:$0xff]  }
 0x3a3   :  { %7786 = vmatpush1.bf16.msra.mxu0 %v11549_v63  ;;  %8560 = vmatpush1.bf16.msra.mxu1 %v11552_v0  ;;  %v11650_v63 = vld [vmem:[%s15513_s1 + $0x1f04] ss:$16 sps:$4 sm:$0xff]   ;;  %v11653_v0 = vld [vmem:[%s15513_s1 + $0x1f0c] ss:$16 sps:$4 sm:$0xff]  }
 0x3a4   :  { %7787 = vmatprep.subr.bf16.mxu0 %v11557_v1  ;;  %8561 = vmatprep.subr.bf16.mxu1 %v11560_v2  ;;  %v11648_v1 = vld [vmem:[%s15513_s1 + $0x1f00] ss:$16 sps:$4 sm:$0xff]   ;;  %v11651_v2 = vld [vmem:[%s15513_s1 + $0x1f08] ss:$16 sps:$4 sm:$0xff]  }
 0x3a7   :  { %7788 = vmatpush1.bf16.msra.mxu0 %v11555_v3  ;;  %8562 = vmatpush1.bf16.msra.mxu1 %v11558_v4  ;;  %v11656_v3 = vld [vmem:[%s15513_s1 + $0x1f24] ss:$16 sps:$4 sm:$0xff]   ;;  %v11659_v4 = vld [vmem:[%s15513_s1 + $0x1f2c] ss:$16 sps:$4 sm:$0xff]  }
 0x3a8   :  { %7789 = vmatprep.subr.bf16.mxu0 %v11563_v5  ;;  %8563 = vmatprep.subr.bf16.mxu1 %v11566_v6  ;;  %v11654_v5 = vld [vmem:[%s15513_s1 + $0x1f20] ss:$16 sps:$4 sm:$0xff]   ;;  %v11657_v6 = vld [vmem:[%s15513_s1 + $0x1f28] ss:$16 sps:$4 sm:$0xff]  }
 0x3ab   :  { %7790 = vmatpush1.bf16.msra.mxu0 %v11561_v7  ;;  %8564 = vmatpush1.bf16.msra.mxu1 %v11564_v8  ;;  %v11662_v7 = vld [vmem:[%s15513_s1 + $0x1f44] ss:$16 sps:$4 sm:$0xff]   ;;  %v11665_v8 = vld [vmem:[%s15513_s1 + $0x1f4c] ss:$16 sps:$4 sm:$0xff]  }
 0x3ac   :  { %7791 = vmatprep.subr.bf16.mxu0 %v11569_v9  ;;  %8565 = vmatprep.subr.bf16.mxu1 %v11572_v10  ;;  %v11660_v9 = vld [vmem:[%s15513_s1 + $0x1f40] ss:$16 sps:$4 sm:$0xff]   ;;  %v11663_v10 = vld [vmem:[%s15513_s1 + $0x1f48] ss:$16 sps:$4 sm:$0xff]  }
 0x3af   :  { %7792 = vmatpush1.bf16.msra.mxu0 %v11567_v11  ;;  %8566 = vmatpush1.bf16.msra.mxu1 %v11570_v12  ;;  %v11668_v11 = vld [vmem:[%s15513_s1 + $0x1f64] ss:$16 sps:$4 sm:$0xff]   ;;  %v11671_v12 = vld [vmem:[%s15513_s1 + $0x1f6c] ss:$16 sps:$4 sm:$0xff]  }
 0x3b0   :  { %7793 = vmatprep.subr.bf16.mxu0 %v11575_v13  ;;  %8567 = vmatprep.subr.bf16.mxu1 %v11578_v14  ;;  %v11666_v13 = vld [vmem:[%s15513_s1 + $0x1f60] ss:$16 sps:$4 sm:$0xff]   ;;  %v11669_v14 = vld [vmem:[%s15513_s1 + $0x1f68] ss:$16 sps:$4 sm:$0xff]  }
 0x3b3   :  { %7794 = vmatpush1.bf16.msra.mxu0 %v11573_v15  ;;  %8568 = vmatpush1.bf16.msra.mxu1 %v11576_v16  ;;  %v11674_v15 = vld [vmem:[%s15513_s1 + $0x1f84] ss:$16 sps:$4 sm:$0xff]   ;;  %v11677_v16 = vld [vmem:[%s15513_s1 + $0x1f8c] ss:$16 sps:$4 sm:$0xff]  }
 0x3b4   :  { %7795 = vmatprep.subr.bf16.mxu0 %v11581_v17  ;;  %8569 = vmatprep.subr.bf16.mxu1 %v11584_v18  ;;  %v11672_v17 = vld [vmem:[%s15513_s1 + $0x1f80] ss:$16 sps:$4 sm:$0xff]   ;;  %v11675_v18 = vld [vmem:[%s15513_s1 + $0x1f88] ss:$16 sps:$4 sm:$0xff]  }
 0x3b7   :  { %7796 = vmatpush1.bf16.msra.mxu0 %v11579_v19  ;;  %8570 = vmatpush1.bf16.msra.mxu1 %v11582_v20  ;;  %v11680_v19 = vld [vmem:[%s15513_s1 + $0x1fa4] ss:$16 sps:$4 sm:$0xff]   ;;  %v11683_v20 = vld [vmem:[%s15513_s1 + $0x1fac] ss:$16 sps:$4 sm:$0xff]  }
 0x3b8   :  { %7797 = vmatprep.subr.bf16.mxu0 %v11587_v21  ;;  %8571 = vmatprep.subr.bf16.mxu1 %v11590_v22  ;;  %v11678_v21 = vld [vmem:[%s15513_s1 + $0x1fa0] ss:$16 sps:$4 sm:$0xff]   ;;  %v11681_v22 = vld [vmem:[%s15513_s1 + $0x1fa8] ss:$16 sps:$4 sm:$0xff]  }
 0x3bb   :  { %7798 = vmatpush1.bf16.msra.mxu0 %v11585_v23  ;;  %8572 = vmatpush1.bf16.msra.mxu1 %v11588_v24  ;;  %v11686_v23 = vld [vmem:[%s15513_s1 + $0x1fc4] ss:$16 sps:$4 sm:$0xff]   ;;  %v11689_v24 = vld [vmem:[%s15513_s1 + $0x1fcc] ss:$16 sps:$4 sm:$0xff]  }
 0x3bc   :  { %7799 = vmatprep.subr.bf16.mxu0 %v11593_v25  ;;  %8573 = vmatprep.subr.bf16.mxu1 %v11596_v26  ;;  %v11684_v25 = vld [vmem:[%s15513_s1 + $0x1fc0] ss:$16 sps:$4 sm:$0xff]   ;;  %v11687_v26 = vld [vmem:[%s15513_s1 + $0x1fc8] ss:$16 sps:$4 sm:$0xff]  }
 0x3bf   :  { %7800 = vmatpush1.bf16.msra.mxu0 %v11591_v27  ;;  %8574 = vmatpush1.bf16.msra.mxu1 %v11594_v28  ;;  %v11692_v27 = vld [vmem:[%s15513_s1 + $0x1fe4] ss:$16 sps:$4 sm:$0xff]   ;;  %v11695_v28 = vld [vmem:[%s15513_s1 + $0x1fec] ss:$16 sps:$4 sm:$0xff]  }
 0x3c0   :  { %7812 = vmatprep.subr.bf16.mxu0 %v11602_v29  ;;  %8586 = vmatprep.subr.bf16.mxu1 %v11605_v30  ;;  %v11690_v29 = vld [vmem:[%s15513_s1 + $0x1fe0] ss:$16 sps:$4 sm:$0xff]   ;;  %v11693_v30 = vld [vmem:[%s15513_s1 + $0x1fe8] ss:$16 sps:$4 sm:$0xff]  }
 0x3c2   :  { %7802 = vmatmul.mubr.bf16.vlgmr.msra.gmra.mrb[0].mxu0 %v11597_v31  ;;  %8576 = vmatmul.mubr.bf16.vlgmr.msra.gmra.mrb[0].mxu1 %v11597_v31  ;;  %v11701_v31 = vld [vmem:[%s15513_s1 + $0x2004] ss:$16 sps:$4 sm:$0xff]  }
 0x3c3   :  { %7813 = vmatpush1.bf16.msra.mxu0 %v11600_v32  ;;  %8587 = vmatpush1.bf16.msra.mxu1 %v11603_v33  ;;  %v11704_v32 = vld [vmem:[%s15513_s1 + $0x200c] ss:$16 sps:$4 sm:$0xff]   ;;  %v11696_v33 = vld [vmem:[%s15514_s0 + $0x78] ss:$144 sps:$4 sm:$0xff]  }
 0x3c4   :  { %7814 = vmatprep.subr.bf16.mxu0 %v11608_v34  ;;  %8588 = vmatprep.subr.bf16.mxu1 %v11611_v35  ;;  %v11699_v34 = vld [vmem:[%s15513_s1 + $0x2000] ss:$16 sps:$4 sm:$0xff]   ;;  %v11702_v35 = vld [vmem:[%s15513_s1 + $0x2008] ss:$16 sps:$4 sm:$0xff]  }
 0x3c5   :  { %7844 = vmatprep.mubr.bf16.mxu0 %v11698_v36  ;;  %8618 = vmatprep.mubr.bf16.mxu1 %v11698_v36  ;;  %v11707_v36 = vld [vmem:[%s15513_s1 + $0x2024] ss:$16 sps:$4 sm:$0xff]  }
 0x3c7   :  { %7815 = vmatpush1.bf16.msra.mxu0 %v11606_v37  ;;  %8589 = vmatpush1.bf16.msra.mxu1 %v11609_v38  ;;  %v11710_v37 = vld [vmem:[%s15513_s1 + $0x202c] ss:$16 sps:$4 sm:$0xff]   ;;  %v11797_v38 = vld [vmem:[%s15514_s0 + $0x84] ss:$144 sps:$4 sm:$0xff]  }
 0x3c8   :  { %7816 = vmatprep.subr.bf16.mxu0 %v11614_v39  ;;  %8590 = vmatprep.subr.bf16.mxu1 %v11617_v40  ;;  %v11705_v39 = vld [vmem:[%s15513_s1 + $0x2020] ss:$16 sps:$4 sm:$0xff]   ;;  %v11708_v40 = vld [vmem:[%s15513_s1 + $0x2028] ss:$16 sps:$4 sm:$0xff]  }
 0x3cb   :  { %7817 = vmatpush1.bf16.msra.mxu0 %v11612_v41  ;;  %8591 = vmatpush1.bf16.msra.mxu1 %v11615_v42  ;;  %v11713_v41 = vld [vmem:[%s15513_s1 + $0x2044] ss:$16 sps:$4 sm:$0xff]   ;;  %v11716_v42 = vld [vmem:[%s15513_s1 + $0x204c] ss:$16 sps:$4 sm:$0xff]  }
 0x3cc   :  { %7818 = vmatprep.subr.bf16.mxu0 %v11620_v43  ;;  %8592 = vmatprep.subr.bf16.mxu1 %v11623_v44  ;;  %v11711_v43 = vld [vmem:[%s15513_s1 + $0x2040] ss:$16 sps:$4 sm:$0xff]   ;;  %v11714_v44 = vld [vmem:[%s15513_s1 + $0x2048] ss:$16 sps:$4 sm:$0xff]  }
 0x3cf   :  { %7819 = vmatpush1.bf16.msra.mxu0 %v11618_v45  ;;  %8593 = vmatpush1.bf16.msra.mxu1 %v11621_v46  ;;  %v11719_v45 = vld [vmem:[%s15513_s1 + $0x2064] ss:$16 sps:$4 sm:$0xff]   ;;  %v11722_v46 = vld [vmem:[%s15513_s1 + $0x206c] ss:$16 sps:$4 sm:$0xff]  }
 0x3d0   :  { %7820 = vmatprep.subr.bf16.mxu0 %v11626_v47  ;;  %8594 = vmatprep.subr.bf16.mxu1 %v11629_v48  ;;  %v11717_v47 = vld [vmem:[%s15513_s1 + $0x2060] ss:$16 sps:$4 sm:$0xff]   ;;  %v11720_v48 = vld [vmem:[%s15513_s1 + $0x2068] ss:$16 sps:$4 sm:$0xff]  }
 0x3d3   :  { %7821 = vmatpush1.bf16.msra.mxu0 %v11624_v49  ;;  %8595 = vmatpush1.bf16.msra.mxu1 %v11627_v50  ;;  %v11725_v49 = vld [vmem:[%s15513_s1 + $0x2084] ss:$16 sps:$4 sm:$0xff]   ;;  %v11728_v50 = vld [vmem:[%s15513_s1 + $0x208c] ss:$16 sps:$4 sm:$0xff]  }
 0x3d4   :  { %7822 = vmatprep.subr.bf16.mxu0 %v11632_v51  ;;  %8596 = vmatprep.subr.bf16.mxu1 %v11635_v52  ;;  %v11723_v51 = vld [vmem:[%s15513_s1 + $0x2080] ss:$16 sps:$4 sm:$0xff]   ;;  %v11726_v52 = vld [vmem:[%s15513_s1 + $0x2088] ss:$16 sps:$4 sm:$0xff]  }
 0x3d7   :  { %7823 = vmatpush1.bf16.msra.mxu0 %v11630_v53  ;;  %8597 = vmatpush1.bf16.msra.mxu1 %v11633_v54  ;;  %v11731_v53 = vld [vmem:[%s15513_s1 + $0x20a4] ss:$16 sps:$4 sm:$0xff]   ;;  %v11734_v54 = vld [vmem:[%s15513_s1 + $0x20ac] ss:$16 sps:$4 sm:$0xff]  }
 0x3d8   :  { %7824 = vmatprep.subr.bf16.mxu0 %v11638_v55  ;;  %8598 = vmatprep.subr.bf16.mxu1 %v11641_v56  ;;  %v11729_v55 = vld [vmem:[%s15513_s1 + $0x20a0] ss:$16 sps:$4 sm:$0xff]   ;;  %v11732_v56 = vld [vmem:[%s15513_s1 + $0x20a8] ss:$16 sps:$4 sm:$0xff]  }
 0x3db   :  { %7825 = vmatpush1.bf16.msra.mxu0 %v11636_v57  ;;  %8599 = vmatpush1.bf16.msra.mxu1 %v11639_v58  ;;  %v11737_v57 = vld [vmem:[%s15513_s1 + $0x20c4] ss:$16 sps:$4 sm:$0xff]   ;;  %v11740_v58 = vld [vmem:[%s15513_s1 + $0x20cc] ss:$16 sps:$4 sm:$0xff]  }
 0x3dc   :  { %7826 = vmatprep.subr.bf16.mxu0 %v11644_v59  ;;  %8600 = vmatprep.subr.bf16.mxu1 %v11647_v60  ;;  %v11735_v59 = vld [vmem:[%s15513_s1 + $0x20c0] ss:$16 sps:$4 sm:$0xff]   ;;  %v11738_v60 = vld [vmem:[%s15513_s1 + $0x20c8] ss:$16 sps:$4 sm:$0xff]  }
 0x3df   :  { %7827 = vmatpush1.bf16.msra.mxu0 %v11642_v61  ;;  %8601 = vmatpush1.bf16.msra.mxu1 %v11645_v62  ;;  %v11743_v61 = vld [vmem:[%s15513_s1 + $0x20e4] ss:$16 sps:$4 sm:$0xff]   ;;  %v11746_v62 = vld [vmem:[%s15513_s1 + $0x20ec] ss:$16 sps:$4 sm:$0xff]  }
 0x3e0   :  { %7828 = vmatprep.subr.bf16.mxu0 %v11650_v63  ;;  %8602 = vmatprep.subr.bf16.mxu1 %v11653_v0  ;;  %v11741_v63 = vld [vmem:[%s15513_s1 + $0x20e0] ss:$16 sps:$4 sm:$0xff]   ;;  %v11744_v0 = vld [vmem:[%s15513_s1 + $0x20e8] ss:$16 sps:$4 sm:$0xff]  }
 0x3e3   :  { %7829 = vmatpush1.bf16.msra.mxu0 %v11648_v1  ;;  %8603 = vmatpush1.bf16.msra.mxu1 %v11651_v2  ;;  %v11749_v1 = vld [vmem:[%s15513_s1 + $0x2104] ss:$16 sps:$4 sm:$0xff]   ;;  %v11752_v2 = vld [vmem:[%s15513_s1 + $0x210c] ss:$16 sps:$4 sm:$0xff]  }
 0x3e4   :  { %7830 = vmatprep.subr.bf16.mxu0 %v11656_v3  ;;  %8604 = vmatprep.subr.bf16.mxu1 %v11659_v4  ;;  %v11747_v3 = vld [vmem:[%s15513_s1 + $0x2100] ss:$16 sps:$4 sm:$0xff]   ;;  %v11750_v4 = vld [vmem:[%s15513_s1 + $0x2108] ss:$16 sps:$4 sm:$0xff]  }
 0x3e7   :  { %7831 = vmatpush1.bf16.msra.mxu0 %v11654_v5  ;;  %8605 = vmatpush1.bf16.msra.mxu1 %v11657_v6  ;;  %v11755_v5 = vld [vmem:[%s15513_s1 + $0x2124] ss:$16 sps:$4 sm:$0xff]   ;;  %v11758_v6 = vld [vmem:[%s15513_s1 + $0x212c] ss:$16 sps:$4 sm:$0xff]  }
 0x3e8   :  { %7832 = vmatprep.subr.bf16.mxu0 %v11662_v7  ;;  %8606 = vmatprep.subr.bf16.mxu1 %v11665_v8  ;;  %v11753_v7 = vld [vmem:[%s15513_s1 + $0x2120] ss:$16 sps:$4 sm:$0xff]   ;;  %v11756_v8 = vld [vmem:[%s15513_s1 + $0x2128] ss:$16 sps:$4 sm:$0xff]  }
 0x3eb   :  { %7833 = vmatpush1.bf16.msra.mxu0 %v11660_v9  ;;  %8607 = vmatpush1.bf16.msra.mxu1 %v11663_v10  ;;  %v11761_v9 = vld [vmem:[%s15513_s1 + $0x2144] ss:$16 sps:$4 sm:$0xff]   ;;  %v11764_v10 = vld [vmem:[%s15513_s1 + $0x214c] ss:$16 sps:$4 sm:$0xff]  }
 0x3ec   :  { %7834 = vmatprep.subr.bf16.mxu0 %v11668_v11  ;;  %8608 = vmatprep.subr.bf16.mxu1 %v11671_v12  ;;  %v11759_v11 = vld [vmem:[%s15513_s1 + $0x2140] ss:$16 sps:$4 sm:$0xff]   ;;  %v11762_v12 = vld [vmem:[%s15513_s1 + $0x2148] ss:$16 sps:$4 sm:$0xff]  }
 0x3ef   :  { %7835 = vmatpush1.bf16.msra.mxu0 %v11666_v13  ;;  %8609 = vmatpush1.bf16.msra.mxu1 %v11669_v14  ;;  %v11767_v13 = vld [vmem:[%s15513_s1 + $0x2164] ss:$16 sps:$4 sm:$0xff]   ;;  %v11770_v14 = vld [vmem:[%s15513_s1 + $0x216c] ss:$16 sps:$4 sm:$0xff]  }
 0x3f0   :  { %7836 = vmatprep.subr.bf16.mxu0 %v11674_v15  ;;  %8610 = vmatprep.subr.bf16.mxu1 %v11677_v16  ;;  %v11765_v15 = vld [vmem:[%s15513_s1 + $0x2160] ss:$16 sps:$4 sm:$0xff]   ;;  %v11768_v16 = vld [vmem:[%s15513_s1 + $0x2168] ss:$16 sps:$4 sm:$0xff]  }
 0x3f3   :  { %7837 = vmatpush1.bf16.msra.mxu0 %v11672_v17  ;;  %8611 = vmatpush1.bf16.msra.mxu1 %v11675_v18  ;;  %v11773_v17 = vld [vmem:[%s15513_s1 + $0x2184] ss:$16 sps:$4 sm:$0xff]   ;;  %v11776_v18 = vld [vmem:[%s15513_s1 + $0x218c] ss:$16 sps:$4 sm:$0xff]  }
 0x3f4   :  { %7838 = vmatprep.subr.bf16.mxu0 %v11680_v19  ;;  %8612 = vmatprep.subr.bf16.mxu1 %v11683_v20  ;;  %v11771_v19 = vld [vmem:[%s15513_s1 + $0x2180] ss:$16 sps:$4 sm:$0xff]   ;;  %v11774_v20 = vld [vmem:[%s15513_s1 + $0x2188] ss:$16 sps:$4 sm:$0xff]  }
 0x3f7   :  { %7839 = vmatpush1.bf16.msra.mxu0 %v11678_v21  ;;  %8613 = vmatpush1.bf16.msra.mxu1 %v11681_v22  ;;  %v11779_v21 = vld [vmem:[%s15513_s1 + $0x21a4] ss:$16 sps:$4 sm:$0xff]   ;;  %v11782_v22 = vld [vmem:[%s15513_s1 + $0x21ac] ss:$16 sps:$4 sm:$0xff]  }
 0x3f8   :  { %7840 = vmatprep.subr.bf16.mxu0 %v11686_v23  ;;  %8614 = vmatprep.subr.bf16.mxu1 %v11689_v24  ;;  %v11777_v23 = vld [vmem:[%s15513_s1 + $0x21a0] ss:$16 sps:$4 sm:$0xff]   ;;  %v11780_v24 = vld [vmem:[%s15513_s1 + $0x21a8] ss:$16 sps:$4 sm:$0xff]  }
 0x3fb   :  { %7841 = vmatpush1.bf16.msra.mxu0 %v11684_v25  ;;  %8615 = vmatpush1.bf16.msra.mxu1 %v11687_v26  ;;  %v11785_v25 = vld [vmem:[%s15513_s1 + $0x21c4] ss:$16 sps:$4 sm:$0xff]   ;;  %v11788_v26 = vld [vmem:[%s15513_s1 + $0x21cc] ss:$16 sps:$4 sm:$0xff]  }
 0x3fc   :  { %7842 = vmatprep.subr.bf16.mxu0 %v11692_v27  ;;  %8616 = vmatprep.subr.bf16.mxu1 %v11695_v28  ;;  %v11783_v27 = vld [vmem:[%s15513_s1 + $0x21c0] ss:$16 sps:$4 sm:$0xff]   ;;  %v11786_v28 = vld [vmem:[%s15513_s1 + $0x21c8] ss:$16 sps:$4 sm:$0xff]  }
 0x3ff   :  { %7843 = vmatpush1.bf16.msra.mxu0 %v11690_v29  ;;  %8617 = vmatpush1.bf16.msra.mxu1 %v11693_v30  ;;  %v11791_v29 = vld [vmem:[%s15513_s1 + $0x21e4] ss:$16 sps:$4 sm:$0xff]   ;;  %v11794_v30 = vld [vmem:[%s15513_s1 + $0x21ec] ss:$16 sps:$4 sm:$0xff]  }
 0x400   :  { %7855 = vmatprep.subr.bf16.mxu0 %v11701_v31  ;;  %8629 = vmatprep.subr.bf16.mxu1 %v11704_v32  ;;  %v11789_v31 = vld [vmem:[%s15513_s1 + $0x21e0] ss:$16 sps:$4 sm:$0xff]   ;;  %v11792_v32 = vld [vmem:[%s15513_s1 + $0x21e8] ss:$16 sps:$4 sm:$0xff]  }
 0x402   :  { %7845 = vmatmul.mubr.bf16.vlgmr.msra.gmra.mrb[0].mxu0 %v11696_v33  ;;  %8619 = vmatmul.mubr.bf16.vlgmr.msra.gmra.mrb[0].mxu1 %v11696_v33  ;;  %v11800_v33 = vld [vmem:[%s15513_s1 + $0x2204] ss:$16 sps:$4 sm:$0xff]  }
 0x403   :  { %7856 = vmatpush1.bf16.msra.mxu0 %v11699_v34  ;;  %8630 = vmatpush1.bf16.msra.mxu1 %v11702_v35  ;;  %v11803_v34 = vld [vmem:[%s15513_s1 + $0x220c] ss:$16 sps:$4 sm:$0xff]   ;;  %v11795_v35 = vld [vmem:[%s15514_s0 + $0x80] ss:$144 sps:$4 sm:$0xff]  }
 0x404   :  { %7857 = vmatprep.subr.bf16.mxu0 %v11707_v36  ;;  %8631 = vmatprep.subr.bf16.mxu1 %v11710_v37  ;;  %v11798_v36 = vld [vmem:[%s15513_s1 + $0x2200] ss:$16 sps:$4 sm:$0xff]   ;;  %v11801_v37 = vld [vmem:[%s15513_s1 + $0x2208] ss:$16 sps:$4 sm:$0xff]  }
 0x405   :  { %7887 = vmatprep.mubr.bf16.mxu0 %v11797_v38  ;;  %8661 = vmatprep.mubr.bf16.mxu1 %v11797_v38  ;;  %v11806_v38 = vld [vmem:[%s15513_s1 + $0x2224] ss:$16 sps:$4 sm:$0xff]  }
 0x407   :  { %7858 = vmatpush1.bf16.msra.mxu0 %v11705_v39  ;;  %8632 = vmatpush1.bf16.msra.mxu1 %v11708_v40  ;;  %v11809_v39 = vld [vmem:[%s15513_s1 + $0x222c] ss:$16 sps:$4 sm:$0xff]  }
 0x408   :  { %7859 = vmatprep.subr.bf16.mxu0 %v11713_v41  ;;  %8633 = vmatprep.subr.bf16.mxu1 %v11716_v42  ;;  %v11896_v40 = vld [vmem:[%s15514_s0 + $0x8c] ss:$144 sps:$4 sm:$0xff]   ;;  %v11804_v41 = vld [vmem:[%s15513_s1 + $0x2220] ss:$16 sps:$4 sm:$0xff]   ;;  %v11807_v42 = vld [vmem:[%s15513_s1 + $0x2228] ss:$16 sps:$4 sm:$0xff]  }
 0x40b   :  { %7860 = vmatpush1.bf16.msra.mxu0 %v11711_v43  ;;  %8634 = vmatpush1.bf16.msra.mxu1 %v11714_v44  ;;  %v11812_v43 = vld [vmem:[%s15513_s1 + $0x2244] ss:$16 sps:$4 sm:$0xff]   ;;  %v11815_v44 = vld [vmem:[%s15513_s1 + $0x224c] ss:$16 sps:$4 sm:$0xff]  }
 0x40c   :  { %7861 = vmatprep.subr.bf16.mxu0 %v11719_v45  ;;  %8635 = vmatprep.subr.bf16.mxu1 %v11722_v46  ;;  %v11810_v45 = vld [vmem:[%s15513_s1 + $0x2240] ss:$16 sps:$4 sm:$0xff]   ;;  %v11813_v46 = vld [vmem:[%s15513_s1 + $0x2248] ss:$16 sps:$4 sm:$0xff]  }
 0x40f   :  { %7862 = vmatpush1.bf16.msra.mxu0 %v11717_v47  ;;  %8636 = vmatpush1.bf16.msra.mxu1 %v11720_v48  ;;  %v11818_v47 = vld [vmem:[%s15513_s1 + $0x2264] ss:$16 sps:$4 sm:$0xff]   ;;  %v11821_v48 = vld [vmem:[%s15513_s1 + $0x226c] ss:$16 sps:$4 sm:$0xff]  }
 0x410   :  { %7863 = vmatprep.subr.bf16.mxu0 %v11725_v49  ;;  %8637 = vmatprep.subr.bf16.mxu1 %v11728_v50  ;;  %v11816_v49 = vld [vmem:[%s15513_s1 + $0x2260] ss:$16 sps:$4 sm:$0xff]   ;;  %v11819_v50 = vld [vmem:[%s15513_s1 + $0x2268] ss:$16 sps:$4 sm:$0xff]  }
 0x413   :  { %7864 = vmatpush1.bf16.msra.mxu0 %v11723_v51  ;;  %8638 = vmatpush1.bf16.msra.mxu1 %v11726_v52  ;;  %v11824_v51 = vld [vmem:[%s15513_s1 + $0x2284] ss:$16 sps:$4 sm:$0xff]   ;;  %v11827_v52 = vld [vmem:[%s15513_s1 + $0x228c] ss:$16 sps:$4 sm:$0xff]  }
 0x414   :  { %7865 = vmatprep.subr.bf16.mxu0 %v11731_v53  ;;  %8639 = vmatprep.subr.bf16.mxu1 %v11734_v54  ;;  %v11822_v53 = vld [vmem:[%s15513_s1 + $0x2280] ss:$16 sps:$4 sm:$0xff]   ;;  %v11825_v54 = vld [vmem:[%s15513_s1 + $0x2288] ss:$16 sps:$4 sm:$0xff]  }
 0x417   :  { %7866 = vmatpush1.bf16.msra.mxu0 %v11729_v55  ;;  %8640 = vmatpush1.bf16.msra.mxu1 %v11732_v56  ;;  %v11830_v55 = vld [vmem:[%s15513_s1 + $0x22a4] ss:$16 sps:$4 sm:$0xff]   ;;  %v11833_v56 = vld [vmem:[%s15513_s1 + $0x22ac] ss:$16 sps:$4 sm:$0xff]  }
 0x418   :  { %7867 = vmatprep.subr.bf16.mxu0 %v11737_v57  ;;  %8641 = vmatprep.subr.bf16.mxu1 %v11740_v58  ;;  %v11828_v57 = vld [vmem:[%s15513_s1 + $0x22a0] ss:$16 sps:$4 sm:$0xff]   ;;  %v11831_v58 = vld [vmem:[%s15513_s1 + $0x22a8] ss:$16 sps:$4 sm:$0xff]  }
 0x41b   :  { %7868 = vmatpush1.bf16.msra.mxu0 %v11735_v59  ;;  %8642 = vmatpush1.bf16.msra.mxu1 %v11738_v60  ;;  %v11836_v59 = vld [vmem:[%s15513_s1 + $0x22c4] ss:$16 sps:$4 sm:$0xff]   ;;  %v11839_v60 = vld [vmem:[%s15513_s1 + $0x22cc] ss:$16 sps:$4 sm:$0xff]  }
 0x41c   :  { %7869 = vmatprep.subr.bf16.mxu0 %v11743_v61  ;;  %8643 = vmatprep.subr.bf16.mxu1 %v11746_v62  ;;  %v11834_v61 = vld [vmem:[%s15513_s1 + $0x22c0] ss:$16 sps:$4 sm:$0xff]   ;;  %v11837_v62 = vld [vmem:[%s15513_s1 + $0x22c8] ss:$16 sps:$4 sm:$0xff]  }
 0x41f   :  { %7870 = vmatpush1.bf16.msra.mxu0 %v11741_v63  ;;  %8644 = vmatpush1.bf16.msra.mxu1 %v11744_v0  ;;  %v11842_v63 = vld [vmem:[%s15513_s1 + $0x22e4] ss:$16 sps:$4 sm:$0xff]   ;;  %v11845_v0 = vld [vmem:[%s15513_s1 + $0x22ec] ss:$16 sps:$4 sm:$0xff]  }
 0x420   :  { %7871 = vmatprep.subr.bf16.mxu0 %v11749_v1  ;;  %8645 = vmatprep.subr.bf16.mxu1 %v11752_v2  ;;  %v11840_v1 = vld [vmem:[%s15513_s1 + $0x22e0] ss:$16 sps:$4 sm:$0xff]   ;;  %v11843_v2 = vld [vmem:[%s15513_s1 + $0x22e8] ss:$16 sps:$4 sm:$0xff]  }
 0x423   :  { %7872 = vmatpush1.bf16.msra.mxu0 %v11747_v3  ;;  %8646 = vmatpush1.bf16.msra.mxu1 %v11750_v4  ;;  %v11848_v3 = vld [vmem:[%s15513_s1 + $0x2304] ss:$16 sps:$4 sm:$0xff]   ;;  %v11851_v4 = vld [vmem:[%s15513_s1 + $0x230c] ss:$16 sps:$4 sm:$0xff]  }
 0x424   :  { %7873 = vmatprep.subr.bf16.mxu0 %v11755_v5  ;;  %8647 = vmatprep.subr.bf16.mxu1 %v11758_v6  ;;  %v11846_v5 = vld [vmem:[%s15513_s1 + $0x2300] ss:$16 sps:$4 sm:$0xff]   ;;  %v11849_v6 = vld [vmem:[%s15513_s1 + $0x2308] ss:$16 sps:$4 sm:$0xff]  }
 0x427   :  { %7874 = vmatpush1.bf16.msra.mxu0 %v11753_v7  ;;  %8648 = vmatpush1.bf16.msra.mxu1 %v11756_v8  ;;  %v11854_v7 = vld [vmem:[%s15513_s1 + $0x2324] ss:$16 sps:$4 sm:$0xff]   ;;  %v11857_v8 = vld [vmem:[%s15513_s1 + $0x232c] ss:$16 sps:$4 sm:$0xff]  }
 0x428   :  { %7875 = vmatprep.subr.bf16.mxu0 %v11761_v9  ;;  %8649 = vmatprep.subr.bf16.mxu1 %v11764_v10  ;;  %v11852_v9 = vld [vmem:[%s15513_s1 + $0x2320] ss:$16 sps:$4 sm:$0xff]   ;;  %v11855_v10 = vld [vmem:[%s15513_s1 + $0x2328] ss:$16 sps:$4 sm:$0xff]  }
 0x42b   :  { %7876 = vmatpush1.bf16.msra.mxu0 %v11759_v11  ;;  %8650 = vmatpush1.bf16.msra.mxu1 %v11762_v12  ;;  %v11860_v11 = vld [vmem:[%s15513_s1 + $0x2344] ss:$16 sps:$4 sm:$0xff]   ;;  %v11863_v12 = vld [vmem:[%s15513_s1 + $0x234c] ss:$16 sps:$4 sm:$0xff]  }
 0x42c   :  { %7877 = vmatprep.subr.bf16.mxu0 %v11767_v13  ;;  %8651 = vmatprep.subr.bf16.mxu1 %v11770_v14  ;;  %v11858_v13 = vld [vmem:[%s15513_s1 + $0x2340] ss:$16 sps:$4 sm:$0xff]   ;;  %v11861_v14 = vld [vmem:[%s15513_s1 + $0x2348] ss:$16 sps:$4 sm:$0xff]  }
 0x42f   :  { %7878 = vmatpush1.bf16.msra.mxu0 %v11765_v15  ;;  %8652 = vmatpush1.bf16.msra.mxu1 %v11768_v16  ;;  %v11866_v15 = vld [vmem:[%s15513_s1 + $0x2364] ss:$16 sps:$4 sm:$0xff]   ;;  %v11869_v16 = vld [vmem:[%s15513_s1 + $0x236c] ss:$16 sps:$4 sm:$0xff]  }
 0x430   :  { %7879 = vmatprep.subr.bf16.mxu0 %v11773_v17  ;;  %8653 = vmatprep.subr.bf16.mxu1 %v11776_v18  ;;  %v11864_v17 = vld [vmem:[%s15513_s1 + $0x2360] ss:$16 sps:$4 sm:$0xff]   ;;  %v11867_v18 = vld [vmem:[%s15513_s1 + $0x2368] ss:$16 sps:$4 sm:$0xff]  }
 0x433   :  { %7880 = vmatpush1.bf16.msra.mxu0 %v11771_v19  ;;  %8654 = vmatpush1.bf16.msra.mxu1 %v11774_v20  ;;  %v11872_v19 = vld [vmem:[%s15513_s1 + $0x2384] ss:$16 sps:$4 sm:$0xff]   ;;  %v11875_v20 = vld [vmem:[%s15513_s1 + $0x238c] ss:$16 sps:$4 sm:$0xff]  }
 0x434   :  { %7881 = vmatprep.subr.bf16.mxu0 %v11779_v21  ;;  %8655 = vmatprep.subr.bf16.mxu1 %v11782_v22  ;;  %v11870_v21 = vld [vmem:[%s15513_s1 + $0x2380] ss:$16 sps:$4 sm:$0xff]   ;;  %v11873_v22 = vld [vmem:[%s15513_s1 + $0x2388] ss:$16 sps:$4 sm:$0xff]  }
 0x437   :  { %7882 = vmatpush1.bf16.msra.mxu0 %v11777_v23  ;;  %8656 = vmatpush1.bf16.msra.mxu1 %v11780_v24  ;;  %v11878_v23 = vld [vmem:[%s15513_s1 + $0x23a4] ss:$16 sps:$4 sm:$0xff]   ;;  %v11881_v24 = vld [vmem:[%s15513_s1 + $0x23ac] ss:$16 sps:$4 sm:$0xff]  }
 0x438   :  { %7883 = vmatprep.subr.bf16.mxu0 %v11785_v25  ;;  %8657 = vmatprep.subr.bf16.mxu1 %v11788_v26  ;;  %v11876_v25 = vld [vmem:[%s15513_s1 + $0x23a0] ss:$16 sps:$4 sm:$0xff]   ;;  %v11879_v26 = vld [vmem:[%s15513_s1 + $0x23a8] ss:$16 sps:$4 sm:$0xff]  }
 0x43b   :  { %7884 = vmatpush1.bf16.msra.mxu0 %v11783_v27  ;;  %8658 = vmatpush1.bf16.msra.mxu1 %v11786_v28  ;;  %v11884_v27 = vld [vmem:[%s15513_s1 + $0x23c4] ss:$16 sps:$4 sm:$0xff]   ;;  %v11887_v28 = vld [vmem:[%s15513_s1 + $0x23cc] ss:$16 sps:$4 sm:$0xff]  }
 0x43c   :  { %7885 = vmatprep.subr.bf16.mxu0 %v11791_v29  ;;  %8659 = vmatprep.subr.bf16.mxu1 %v11794_v30  ;;  %v11882_v29 = vld [vmem:[%s15513_s1 + $0x23c0] ss:$16 sps:$4 sm:$0xff]   ;;  %v11885_v30 = vld [vmem:[%s15513_s1 + $0x23c8] ss:$16 sps:$4 sm:$0xff]  }
 0x43f   :  { %7886 = vmatpush1.bf16.msra.mxu0 %v11789_v31  ;;  %8660 = vmatpush1.bf16.msra.mxu1 %v11792_v32  ;;  %v11890_v31 = vld [vmem:[%s15513_s1 + $0x23e4] ss:$16 sps:$4 sm:$0xff]   ;;  %v11893_v32 = vld [vmem:[%s15513_s1 + $0x23ec] ss:$16 sps:$4 sm:$0xff]  }
 0x440   :  { %7898 = vmatprep.subr.bf16.mxu0 %v11800_v33  ;;  %8672 = vmatprep.subr.bf16.mxu1 %v11803_v34  ;;  %v11888_v33 = vld [vmem:[%s15513_s1 + $0x23e0] ss:$16 sps:$4 sm:$0xff]   ;;  %v11891_v34 = vld [vmem:[%s15513_s1 + $0x23e8] ss:$16 sps:$4 sm:$0xff]  }
 0x442   :  { %7888 = vmatmul.mubr.bf16.vlgmr.msra.gmra.mrb[0].mxu0 %v11795_v35  ;;  %8662 = vmatmul.mubr.bf16.vlgmr.msra.gmra.mrb[0].mxu1 %v11795_v35  ;;  %v11894_v35 = vld [vmem:[%s15514_s0 + $0x88] ss:$144 sps:$4 sm:$0xff]  }
 0x443   :  { %7899 = vmatpush1.bf16.msra.mxu0 %v11798_v36  ;;  %8673 = vmatpush1.bf16.msra.mxu1 %v11801_v37  ;;  %v1207_v36 = vlaneseq }
 0x444   :  { %7900 = vmatprep.subr.bf16.mxu0 %v11806_v38  ;;  %8674 = vmatprep.subr.bf16.mxu1 %v11809_v39 }
 0x445   :  { %7930 = vmatprep.mubr.bf16.mxu0 %v11896_v40  ;;  %8704 = vmatprep.mubr.bf16.mxu1 %v11896_v40  ;;  %v1208_v37 = vshrl.u32 %v1207_v36, 7  ;;  %v1205_v40 = vld [vmem:[%s15515_s2] sm:$0xf] }
 0x447   :  { %7901 = vmatpush1.bf16.msra.mxu0 %v11804_v41  ;;  %8675 = vmatpush1.bf16.msra.mxu1 %v11807_v42  ;;  %v1209_v38 = vsub.s32 0, %v1208_v37  ;;  %v1217_v39 = vsub.s32 2, %v1208_v37  ;;  %v1213_v41 = vsub.s32 1, %v1208_v37  ;;  %v1221_v42 = vsub.s32 3, %v1208_v37 }
 0x448   :  { %7902 = vmatprep.subr.bf16.mxu0 %v11812_v43  ;;  %8676 = vmatprep.subr.bf16.mxu1 %v11815_v44  ;;  %v8715_v43 = vld [vmem:[%s15516_s3] sm:$0xff]  ;;  %v8716_v44 = vld [vmem:[%s15516_s3 + $0x8] sm:$0xff] }
 0x44b   :  { %7903 = vmatpush1.bf16.msra.mxu0 %v11810_v45  ;;  %8677 = vmatpush1.bf16.msra.mxu1 %v11813_v46  ;;  %v1210_v45 = vrot.slane %v1205_v40, %v1209_v38  ;;  %v1218_v46 = vrot.slane %v1205_v40, %v1217_v39 }
 0x44c   :  { %7904 = vmatprep.subr.bf16.mxu0 %v11818_v47  ;;  %8678 = vmatprep.subr.bf16.mxu1 %v11821_v48  ;;  %v1214_v47 = vrot.slane %v1205_v40, %v1213_v41  ;;  %v1222_v48 = vrot.slane %v1205_v40, %v1221_v42 }
 0x44f   :  { %7905 = vmatpush1.bf16.msra.mxu0 %v11816_v49  ;;  %8679 = vmatpush1.bf16.msra.mxu1 %v11819_v50  ;;  %v8717_v49 = vld [vmem:[%s15516_s3 + $0x10] sm:$0xff]  ;;  %v8718_v50 = vld [vmem:[%s15516_s3 + $0x18] sm:$0xff] }
 0x450   :  { %7906 = vmatprep.subr.bf16.mxu0 %v11824_v51  ;;  %8680 = vmatprep.subr.bf16.mxu1 %v11827_v52  ;;  %v8719_v51 = vunpack.c.l.bf16 %v8715_v43  ;;  %v8721_v52 = vunpack.c.l.bf16 %v8716_v44 }
 0x453   :  { %7907 = vmatpush1.bf16.msra.mxu0 %v11822_v53  ;;  %8681 = vmatpush1.bf16.msra.mxu1 %v11825_v54 }
 0x454   :  { %7908 = vmatprep.subr.bf16.mxu0 %v11830_v55  ;;  %8682 = vmatprep.subr.bf16.mxu1 %v11833_v56  ;;  %v8720_v55 = vunpack.c.h.bf16 %v8715_v43  ;;  %v8722_v56 = vunpack.c.h.bf16 %v8716_v44 }
 0x457   :  { %7909 = vmatpush1.bf16.msra.mxu0 %v11828_v57  ;;  %8683 = vmatpush1.bf16.msra.mxu1 %v11831_v58 }
 0x458   :  { %7910 = vmatprep.subr.bf16.mxu0 %v11836_v59  ;;  %8684 = vmatprep.subr.bf16.mxu1 %v11839_v60 }
 0x45b   :  { %7911 = vmatpush1.bf16.msra.mxu0 %v11834_v61  ;;  %8685 = vmatpush1.bf16.msra.mxu1 %v11837_v62  ;;  %v8723_v61 = vunpack.c.l.bf16 %v8717_v49  ;;  %v8725_v62 = vunpack.c.l.bf16 %v8718_v50 }
 0x45c   :  { %7912 = vmatprep.subr.bf16.mxu0 %v11842_v63  ;;  %8686 = vmatprep.subr.bf16.mxu1 %v11845_v0 }
 0x45f   :  { %7913 = vmatpush1.bf16.msra.mxu0 %v11840_v1  ;;  %8687 = vmatpush1.bf16.msra.mxu1 %v11843_v2 }
 0x460   :  { %7914 = vmatprep.subr.bf16.mxu0 %v11848_v3  ;;  %8688 = vmatprep.subr.bf16.mxu1 %v11851_v4  ;;  %v8724_v3 = vunpack.c.h.bf16 %v8717_v49  ;;  %v8726_v4 = vunpack.c.h.bf16 %v8718_v50 }
 0x463   :  { %7915 = vmatpush1.bf16.msra.mxu0 %v11846_v5  ;;  %8689 = vmatpush1.bf16.msra.mxu1 %v11849_v6 }
 0x464   :  { %7916 = vmatprep.subr.bf16.mxu0 %v11854_v7  ;;  %8690 = vmatprep.subr.bf16.mxu1 %v11857_v8 }
 0x467   :  { %7917 = vmatpush1.bf16.msra.mxu0 %v11852_v9  ;;  %8691 = vmatpush1.bf16.msra.mxu1 %v11855_v10 }
 0x468   :  { %7918 = vmatprep.subr.bf16.mxu0 %v11860_v11  ;;  %8692 = vmatprep.subr.bf16.mxu1 %v11863_v12 }
 0x46b   :  { %7919 = vmatpush1.bf16.msra.mxu0 %v11858_v13  ;;  %8693 = vmatpush1.bf16.msra.mxu1 %v11861_v14 }
 0x46c   :  { %7920 = vmatprep.subr.bf16.mxu0 %v11866_v15  ;;  %8694 = vmatprep.subr.bf16.mxu1 %v11869_v16 }
 0x46f   :  { %7921 = vmatpush1.bf16.msra.mxu0 %v11864_v17  ;;  %8695 = vmatpush1.bf16.msra.mxu1 %v11867_v18 }
 0x470   :  { %7922 = vmatprep.subr.bf16.mxu0 %v11872_v19  ;;  %8696 = vmatprep.subr.bf16.mxu1 %v11875_v20 }
 0x473   :  { %7923 = vmatpush1.bf16.msra.mxu0 %v11870_v21  ;;  %8697 = vmatpush1.bf16.msra.mxu1 %v11873_v22 }
 0x474   :  { %7924 = vmatprep.subr.bf16.mxu0 %v11878_v23  ;;  %8698 = vmatprep.subr.bf16.mxu1 %v11881_v24 }
 0x477   :  { %7925 = vmatpush1.bf16.msra.mxu0 %v11876_v25  ;;  %8699 = vmatpush1.bf16.msra.mxu1 %v11879_v26 }
 0x478   :  { %7926 = vmatprep.subr.bf16.mxu0 %v11884_v27  ;;  %8700 = vmatprep.subr.bf16.mxu1 %v11887_v28 }
 0x47b   :  { %7927 = vmatpush1.bf16.msra.mxu0 %v11882_v29  ;;  %8701 = vmatpush1.bf16.msra.mxu1 %v11885_v30 }
 0x47c   :  { %7928 = vmatprep.subr.bf16.mxu0 %v11890_v31  ;;  %8702 = vmatprep.subr.bf16.mxu1 %v11893_v32 }
 0x47f   :  { %7929 = vmatpush1.bf16.msra.mxu0 %v11888_v33  ;;  %8703 = vmatpush1.bf16.msra.mxu1 %v11891_v34 }
 0x482   :  { %7931 = vmatmul.mubr.bf16.vlgmr.msra.gmra.mrb[0].mxu0 %v11894_v35  ;;  %8705 = vmatmul.mubr.bf16.vlgmr.msra.gmra.mrb[0].mxu1 %v11894_v35 }
 0x555   :  { %v7932_v53 = vpop.f32.mrb[0].mxu0  ;;  %v8706_v54 = vpop.f32.mrb[0].mxu1 }
 0x556   :  { %v9971_v57 = vadd.f32 %v7932_v53, %v1210_v45  ;;  %v9975_v58 = vadd.f32 %v8706_v54, %v1218_v46  ;;  %v7934_v59 = vpop.f32.mrb[1].mxu0  ;;  %v8708_v60 = vpop.f32.mrb[1].mxu1 }
 0x557   :  { %v9972_v63 = vadd.f32 %v7934_v59, %v1214_v47  ;;  %v9976_v0 = vadd.f32 %v8708_v60, %v1222_v48  ;;  %v7936_v1 = vpop.f32.mrb[2].mxu0  ;;  %v8710_v2 = vpop.f32.mrb[2].mxu1 }
 0x558   :  { %v8727_v5 = vadd.f32 %v9971_v57, %v8719_v51  ;;  %v8729_v6 = vadd.f32 %v9975_v58, %v8721_v52  ;;  %v9973_v7 = vadd.f32 %v7936_v1, %v1210_v45  ;;  %v9977_v8 = vadd.f32 %v8710_v2, %v1218_v46  ;;  %v7938_v9 = vpop.f32.mrb[3].mxu0  ;;  %v8712_v10 = vpop.f32.mrb[3].mxu1 }
 0x559   :  { %v8728_v11 = vadd.f32 %v9972_v63, %v8720_v55  ;;  %v8730_v12 = vadd.f32 %v9976_v0, %v8722_v56  ;;  %v9974_v13 = vadd.f32 %v7938_v9, %v1214_v47  ;;  %v9978_v14 = vadd.f32 %v8712_v10, %v1222_v48 }
 0x55a   :  { %v8735_v15 = vmax.f32 %v8727_v5, 0.0  ;;  %v8737_v16 = vmax.f32 %v8729_v6, 0.0  ;;  %v8731_v17 = vadd.f32 %v9973_v7, %v8723_v61  ;;  %v8733_v18 = vadd.f32 %v9977_v8, %v8725_v62 }
 0x55b   :  { %v8736_v19 = vmax.f32 %v8728_v11, 0.0  ;;  %v8738_v20 = vmax.f32 %v8730_v12, 0.0  ;;  %v8732_v21 = vadd.f32 %v9974_v13, %v8724_v3  ;;  %v8734_v22 = vadd.f32 %v9978_v14, %v8726_v4 }
 0x55c   :  { %v8739_v23 = vmax.f32 %v8731_v17, 0.0  ;;  %v8741_v24 = vmax.f32 %v8733_v18, 0.0 }
 0x55d   :  { %v9967_v25 = vpack.c.bf16 %v8736_v19, %v8735_v15  ;;  %v9968_v26 = vpack.c.bf16 %v8738_v20, %v8737_v16  ;;  %v8740_v27 = vmax.f32 %v8732_v21, 0.0  ;;  %v8742_v28 = vmax.f32 %v8734_v22, 0.0 }
 0x55f   :  { %8767 = vst [vmem:[%s15517_s4] sm:$0xff] %v9967_v25  ;;  %8768 = vst [vmem:[%s15517_s4 + $0x8] sm:$0xff] %v9968_v26  ;;  %v9969_v29 = vpack.c.bf16 %v8740_v27, %v8739_v23  ;;  %v9970_v30 = vpack.c.bf16 %v8742_v28, %v8741_v24 }
 0x561   :  { %8769 = vst [vmem:[%s15517_s4 + $0x10] sm:$0xff] %v9969_v29  ;;  %8770 = vst [vmem:[%s15517_s4 + $0x18] sm:$0xff] %v9970_v30 }

</bundles_post_ra>
